<compile_context>
chip_gen: v7x
topology: tpu7x:2x2x1
jax: 0.10.0
libtpu: 0.0.40
codegen_flags: <defaults>
</compile_context>

<pallas_src>
import math

import numpy as np
import jax
import jax.numpy as jnp
from jax.experimental import pallas as pl
from jax.experimental.pallas import tpu as pltpu

# ----------------------------- configuration -------------------------------
B, T = 2, 16
CP = 8                          # hparams['phoneme_in_channels']
CE = 8                          # hparams['emotional_prosodic_in_channels']
CIN = CP + CE                   # 16
UNITS = 128                     # conv-bank units (GRU input size)
BANK_WIDTHS = (2, 3)
NB = len(BANK_WIDTHS)
MAXK = max(BANK_WIDTHS)         # 3
CBANK = 2 * NB * UNITS          # 512 : [ph_k2 | ph_k3 | emo_k2 | emo_k3]
MAX_POOL_W = 2
DURATION_HIGHWAY_LAYERS = 2
HEADS = ("spec", "energy", "cap", "lf0")
HID = 32                        # all four GRU hidden sizes
HCAT = len(HEADS) * HID         # 128 : 4 heads concatenated on the lane axis
DGW = 3 * HCAT                  # 384 : per-direction gate width [r | z | n]
GW = 2 * DGW                    # 768 : [fwd gates | bwd gates]
SPEC_UNITS, LF0_UNITS, CAP_UNITS, ENERGY_UNITS, UV_UNITS = 24, 1, 1, 1, 1
N_AC = SPEC_UNITS + LF0_UNITS + CAP_UNITS + ENERGY_UNITS   # 27
BN_EPS = 1e-5
RR = B * T                      # 32 fused rows, time-major: row = t*B + b


# ------------------------------ fused kernel --------------------------------
def _emphasis_kernel(x_ref, wbank_ref, bbank_ref, wproj_ref, bnss_ref,
                     whwlin_ref, bhwlin_ref, whw_ref, bhw_ref,
                     wgx_ref, bgx_ref, whh_ref, bhh_ref, wout_ref, bout_ref,
                     o_ref,
                     xpad, gx_scr, hseq_scr):
    """Whole-model forward; batch folded into the sublane (M) axis."""
    f32, bf16 = jnp.float32, jnp.bfloat16

    def shift_rows(v, n, period):
        # result[r] = v[r + n] within each `period`-row block, zeros elsewhere.
        # (time shift by n//B frames in the time-major layout; XLU roll + mask)
        nrows = v.shape[0]
        rolled = pltpu.roll(v, shift=(-n) % nrows, axis=0)
        pos = jax.lax.broadcasted_iota(jnp.int32, v.shape, 0) % period
        valid = (pos < period - n) if n >= 0 else (pos >= -n)
        return jnp.where(valid, rolled, 0.0)

    # -------- conv banks (k=2,3; ph+emo fused on lanes), right pad, ReLU -----
    # TODO(synk): causal right-pad by (k-1) assumed for the repo's Conv1d helper.
    xpad[0:RR, :] = x_ref[...]
    xpad[RR:RR + 8, :] = jnp.zeros((8, CIN), f32)
    acc = jnp.zeros((RR, CBANK), f32)
    for tap in range(MAXK):                        # static unroll over taps
        xt = xpad[tap * B:tap * B + RR, :].astype(bf16)
        acc += jnp.dot(xt, wbank_ref[tap], preferred_element_type=f32)
    bank = jnp.maximum(acc + bbank_ref[...], 0.0)                 # (RR, 512)

    # -------- MaxPool1d(kernel=2, stride=1), right zero-pad (bank >= 0) ------
    mp = jnp.maximum(bank, shift_rows(bank, B, RR))               # (RR, 512)

    # -------- conv projection (k=3, pad=1); ph & emo share weights -----------
    # Stack the two 256-wide stream halves on the M axis -> dense (256,128) RHS.
    mp_m = jnp.concatenate([mp[:, :NB * UNITS], mp[:, NB * UNITS:]],
                           axis=0)                                # (2*RR, 256)
    accp = jnp.dot(shift_rows(mp_m, -B, RR).astype(bf16), wproj_ref[0],
                   preferred_element_type=f32)                    # tap t-1
    accp += jnp.dot(mp_m.astype(bf16), wproj_ref[1],
                    preferred_element_type=f32)                   # tap t
    accp += jnp.dot(shift_rows(mp_m, B, RR).astype(bf16), wproj_ref[2],
                    preferred_element_type=f32)                   # tap t+1
    # folded conv-bias + eval-mode BatchNorm (scale/shift) + ReLU
    pr = jnp.maximum(accp * bnss_ref[0:1, :] + bnss_ref[1:2, :], 0.0)

    # -------- highway input [ph_proj | emo_proj] + highway linear (256->128) -
    hw_in = jnp.concatenate([pr[0:RR, :], pr[RR:2 * RR, :]], axis=1)  # (RR,256)
    xh = jnp.dot(hw_in.astype(bf16), whwlin_ref[...],
                 preferred_element_type=f32) + bhwlin_ref[...]        # (RR,128)

    # -------- highway layers (same module applied twice, as in the reference)
    for _ in range(DURATION_HIGHWAY_LAYERS):
        ht = jnp.dot(xh.astype(bf16), whw_ref[...],
                     preferred_element_type=f32) + bhw_ref[...]
        h_part = jnp.maximum(ht[:, :UNITS], 0.0)
        t_part = jax.nn.sigmoid(ht[:, UNITS:])
        xh = h_part * t_part + xh * (1.0 - t_part)                    # (RR,128)

    # -------- GRU input gates: 4 heads x 2 dirs x 3 gates in ONE matmul ------
    gx_scr[...] = jnp.dot(xh.astype(bf16), wgx_ref[...],
                          preferred_element_type=f32) + bgx_ref[...]  # (RR,768)

    # -------- fused bidirectional 4-head GRU recurrence (M = B per step) -----
    # Gate layout: cols [fwd r|z|n (384) | bwd r|z|n (384)], 128 = heads x 32.
    h_f = jnp.zeros((B, HCAT), f32)
    h_b = jnp.zeros((B, HCAT), f32)
    for s in range(T):                                    # static unroll, T=16
        gi_f = gx_scr[s * B:(s + 1) * B, 0:DGW]           # fwd reads time s
        gi_b = gx_scr[(T - 1 - s) * B:(T - s) * B, DGW:2 * DGW]   # bwd: T-1-s
        gh_f = jnp.dot(h_f.astype(bf16), whh_ref[0],
                       preferred_element_type=f32) + bhh_ref[0:1, :]
        gh_b = jnp.dot(h_b.astype(bf16), whh_ref[1],
                       preferred_element_type=f32) + bhh_ref[1:2, :]
        r_f = jax.nn.sigmoid(gi_f[:, 0:HCAT] + gh_f[:, 0:HCAT])
        z_f = jax.nn.sigmoid(gi_f[:, HCAT:2 * HCAT] + gh_f[:, HCAT:2 * HCAT])
        n_f = jnp.tanh(gi_f[:, 2 * HCAT:] + r_f * gh_f[:, 2 * HCAT:])
        h_f = (1.0 - z_f) * n_f + z_f * h_f
        r_b = jax.nn.sigmoid(gi_b[:, 0:HCAT] + gh_b[:, 0:HCAT])
        z_b = jax.nn.sigmoid(gi_b[:, HCAT:2 * HCAT] + gh_b[:, HCAT:2 * HCAT])
        n_b = jnp.tanh(gi_b[:, 2 * HCAT:] + r_b * gh_b[:, 2 * HCAT:])
        h_b = (1.0 - z_b) * n_b + z_b * h_b
        hseq_scr[s * B:(s + 1) * B, 0:HCAT] = h_f                 # fwd @ t=s
        hseq_scr[(T - 1 - s) * B:(T - s) * B, HCAT:2 * HCAT] = h_b  # bwd @ T-1-s

    # -------- fused output projections (spec|lf0|cap|energy|uv), lane-dense --
    feat = jnp.concatenate([hseq_scr[...], xh], axis=1).astype(bf16)  # (RR,384)
    o_ref[...] = (jnp.dot(feat, wout_ref[...], preferred_element_type=f32)
                  + bout_ref[...])                                    # (RR,128)


# ------------------------------ wrapper --------------------------------------
def forward(x, pk):
    assert x.shape == (B, T, CIN)
    # time-major fold of batch into sublanes: row = t*B + b  (layout plumbing)
    x_tm = jnp.transpose(x, (1, 0, 2)).reshape(RR, CIN)
    out = pl.pallas_call(
        _emphasis_kernel,
        out_shape=jax.ShapeDtypeStruct((RR, 128), jnp.float32),
        grid=(1,),
        in_specs=[
            pl.BlockSpec((RR, CIN), lambda i: (0, 0)),
            pl.BlockSpec((MAXK, CIN, CBANK), lambda i: (0, 0, 0)),
            pl.BlockSpec((1, CBANK), lambda i: (0, 0)),
            pl.BlockSpec((MAXK, NB * UNITS, UNITS), lambda i: (0, 0, 0)),
            pl.BlockSpec((2, UNITS), lambda i: (0, 0)),
            pl.BlockSpec((2 * UNITS, UNITS), lambda i: (0, 0)),
            pl.BlockSpec((1, UNITS), lambda i: (0, 0)),
            pl.BlockSpec((UNITS, 2 * UNITS), lambda i: (0, 0)),
            pl.BlockSpec((1, 2 * UNITS), lambda i: (0, 0)),
            pl.BlockSpec((UNITS, GW), lambda i: (0, 0)),
            pl.BlockSpec((1, GW), lambda i: (0, 0)),
            pl.BlockSpec((2, HCAT, DGW), lambda i: (0, 0, 0)),
            pl.BlockSpec((2, DGW), lambda i: (0, 0)),
            pl.BlockSpec((2 * HCAT + UNITS, 128), lambda i: (0, 0)),
            pl.BlockSpec((1, 128), lambda i: (0, 0)),
        ],
        out_specs=pl.BlockSpec((RR, 128), lambda i: (0, 0)),
        scratch_shapes=[
            pltpu.VMEM((RR + 8, CIN), jnp.float32),       # tiny padded conv input
            pltpu.VMEM((RR, GW), jnp.float32),            # GRU input gates
            pltpu.VMEM((RR, 2 * HCAT), jnp.float32),      # GRU hidden sequence
        ],
        compiler_params=pltpu.CompilerParams(
            dimension_semantics=("arbitrary",)),
    )(x_tm, pk["w_bank"], pk["b_bank"], pk["w_proj"], pk["bnss"],
      pk["w_hwlin"], pk["b_hwlin"], pk["w_hw"], pk["b_hw"],
      pk["w_gx"], pk["b_gx"], pk["w_hh"], pk["b_hh"],
      pk["w_out"], pk["b_out"])
    out = out.reshape(T, B, 128).transpose(1, 0, 2)       # back to (B, T, 128)
    acoustic = out[:, :, :N_AC]
    uv = out[:, :, N_AC:N_AC + UV_UNITS]
    return acoustic, uv


# --------------------- PyTorch-shaped parameter init -------------------------
def init_torch_params(key):
    """Per-module params with PyTorch layout (Linear (out,in), Conv1d (out,in,k))."""
    keys = iter(jax.random.split(key, 96))

    def u(shape, fan_in):
        bound = 1.0 / math.sqrt(fan_in)
        return np.asarray(
            jax.random.uniform(next(keys), shape, jnp.float32, -bound, bound))

    p = {}
    p["ph_bank"] = [{"w": u((UNITS, CP, k), CP * k), "b": u((UNITS,), CP * k)}
                    for k in BANK_WIDTHS]
    p["emo_bank"] = [{"w": u((UNITS, CE, k), CE * k), "b": u((UNITS,), CE * k)}
                     for k in BANK_WIDTHS]
    cin = UNITS * NB
    p["proj"] = {"w": u((UNITS, cin, 3), cin * 3), "b": u((UNITS,), cin * 3)}
    p["bn"] = {"gamma": np.ones(UNITS, np.float32),
               "beta": np.zeros(UNITS, np.float32),
               "rm": np.zeros(UNITS, np.float32),
               "rv": np.ones(UNITS, np.float32)}
    p["hw_lin"] = {"w": u((128, 2 * UNITS), 2 * UNITS), "b": u((128,), 2 * UNITS)}
    p["hw"] = {"wh": u((128, 128), 128), "bh": u((128,), 128),
               "wt": u((128, 128), 128),
               "bt": np.full((128,), -1.0, np.float32)}

    def gru_head(hid):
        return {d: {"wih": u((3 * hid, UNITS), hid), "whh": u((3 * hid, hid), hid),
                    "bih": u((3 * hid,), hid), "bhh": u((3 * hid,), hid)}
                for d in ("fwd", "bwd")}

    p["gru"] = {h: gru_head(HID) for h in HEADS}
    p["spec_lin"] = {"w": u((SPEC_UNITS, 2 * HID), 2 * HID),
                     "b": u((SPEC_UNITS,), 2 * HID)}
    p["energy_lin"] = {"w": u((ENERGY_UNITS, 2 * HID), 2 * HID),
                       "b": u((ENERGY_UNITS,), 2 * HID)}
    p["cap_lin"] = {"w": u((CAP_UNITS, 2 * HID), 2 * HID),
                    "b": u((CAP_UNITS,), 2 * HID)}
    p["lf0_lin"] = {"w": u((LF0_UNITS, 2 * HID), 2 * HID),
                    "b": u((LF0_UNITS,), 2 * HID)}
    p["uv_lin"] = {"w": u((UV_UNITS, UNITS), UNITS), "b": u((UV_UNITS,), UNITS)}
    return p


# ---------------- pack per-module params into fused kernel weights -----------
def pack_params(p):
    # conv banks: both streams + both widths in one (16, 512) weight per tap.
    w_bank = np.zeros((MAXK, CIN, CBANK), np.float32)
    b_bank = np.zeros((1, CBANK), np.float32)
    for bi, k in enumerate(BANK_WIDTHS):
        for tap in range(k):
            w_bank[tap, :CP, bi * UNITS:(bi + 1) * UNITS] = \
                p["ph_bank"][bi]["w"][:, :, tap].T
            w_bank[tap, CP:, (NB + bi) * UNITS:(NB + bi + 1) * UNITS] = \
                p["emo_bank"][bi]["w"][:, :, tap].T
        b_bank[0, bi * UNITS:(bi + 1) * UNITS] = p["ph_bank"][bi]["b"]
        b_bank[0, (NB + bi) * UNITS:(NB + bi + 1) * UNITS] = p["emo_bank"][bi]["b"]

    # dense (deduplicated) conv projection: one (256,128) weight per tap.
    cin = NB * UNITS
    w_proj = np.zeros((MAXK, cin, UNITS), np.float32)
    for tap in range(3):
        w_proj[tap] = p["proj"]["w"][:, :, tap].T                 # (256, 128)
    scale = p["bn"]["gamma"] / np.sqrt(p["bn"]["rv"] + BN_EPS)
    shift = p["bn"]["beta"] - p["bn"]["rm"] * scale + scale * p["proj"]["b"]
    bnss = np.stack([scale, shift]).astype(np.float32)            # (2, 128)

    # highway linear + shared highway layer ([W_H | W_T] side by side).
    w_hwlin = p["hw_lin"]["w"].T.astype(np.float32)               # (256, 128)
    b_hwlin = p["hw_lin"]["b"][None].astype(np.float32)
    w_hw = np.concatenate([p["hw"]["wh"].T, p["hw"]["wt"].T], axis=1)
    b_hw = np.concatenate([p["hw"]["bh"], p["hw"]["bt"]])[None].astype(np.float32)

    # fused GRU: gx cols [fwd r|z|n | bwd r|z|n] (128 each, heads x 32 within);
    # recurrent weights are dense per-direction (2, 128, 384).
    w_gx = np.zeros((UNITS, GW), np.float32)
    b_gx = np.zeros((1, GW), np.float32)
    w_hh = np.zeros((2, HCAT, DGW), np.float32)
    b_hh = np.zeros((2, DGW), np.float32)
    for d, dname in enumerate(("fwd", "bwd")):
        for hk, hname in enumerate(HEADS):
            g = p["gru"][hname][dname]
            for gi in range(3):                                   # PyTorch r,z,n
                col = gi * HCAT + hk * HID
                w_gx[:, d * DGW + col:d * DGW + col + HID] = \
                    g["wih"][gi * HID:(gi + 1) * HID, :].T
                b_gx[0, d * DGW + col:d * DGW + col + HID] = \
                    g["bih"][gi * HID:(gi + 1) * HID]
                b_hh[d, col:col + HID] = g["bhh"][gi * HID:(gi + 1) * HID]
                w_hh[d, hk * HID:(hk + 1) * HID, col:col + HID] = \
                    g["whh"][gi * HID:(gi + 1) * HID, :].T

    # fused output projections -> cols [spec(24) | lf0 | cap | energy | uv | 0s].
    w_out = np.zeros((2 * HCAT + UNITS, 128), np.float32)
    b_out = np.zeros((1, 128), np.float32)
    col_of = {"spec": 0, "lf0": SPEC_UNITS, "cap": SPEC_UNITS + LF0_UNITS,
              "energy": SPEC_UNITS + LF0_UNITS + CAP_UNITS}
    width_of = {"spec": SPEC_UNITS, "lf0": LF0_UNITS,
                "cap": CAP_UNITS, "energy": ENERGY_UNITS}
    for hk, hname in enumerate(HEADS):
        lw, lb = p[hname + "_lin"]["w"], p[hname + "_lin"]["b"]
        c0, cw = col_of[hname], width_of[hname]
        w_out[hk * HID:(hk + 1) * HID, c0:c0 + cw] = lw[:, :HID].T          # fwd
        w_out[HCAT + hk * HID:HCAT + (hk + 1) * HID, c0:c0 + cw] = lw[:, HID:].T
        b_out[0, c0:c0 + cw] = lb
    w_out[2 * HCAT:, N_AC:N_AC + 1] = p["uv_lin"]["w"].T
    b_out[0, N_AC:N_AC + 1] = p["uv_lin"]["b"]

    packed = dict(w_bank=w_bank, b_bank=b_bank, w_proj=w_proj, bnss=bnss,
                  w_hwlin=w_hwlin, b_hwlin=b_hwlin, w_hw=w_hw, b_hw=b_hw,
                  w_gx=w_gx, b_gx=b_gx, w_hh=w_hh, b_hh=b_hh,
                  w_out=w_out, b_out=b_out)
    weight_keys = {"w_bank", "w_proj", "w_hwlin", "w_hw", "w_gx", "w_hh", "w_out"}
    return {k: (jnp.asarray(v, jnp.bfloat16) if k in weight_keys
                else jnp.asarray(v, jnp.float32))
            for k, v in packed.items()}


# ----------------------------------- main ------------------------------------
if __name__ == "__main__":
    key = jax.random.PRNGKey(0)
    pkey, xkey = jax.random.split(key)
    params = init_torch_params(pkey)
    packed = pack_params(params)
    x = jax.random.normal(xkey, (B, T, CIN), jnp.float32)

    acoustic_out, uv_out = jax.jit(forward)(x, packed)
    jax.block_until_ready((acoustic_out, uv_out))

    assert acoustic_out.shape == (B, T, N_AC)
    assert uv_out.shape == (B, T, UV_UNITS)
    assert bool(jnp.all(jnp.isfinite(acoustic_out)))
    assert bool(jnp.all(jnp.isfinite(uv_out)))
    print("KERNEL_OK")
</pallas_src>

<mosaic_0001>
module attributes {stable_mosaic.version = 11 : i64} {
  func.func @_emphasis_kernel(%arg0: i32, %arg1: memref<32x16xf32, #tpu.memory_space<vmem>>, %arg2: memref<3x16x512xbf16, #tpu.memory_space<vmem>>, %arg3: memref<1x512xf32, #tpu.memory_space<vmem>>, %arg4: memref<3x256x128xbf16, #tpu.memory_space<vmem>>, %arg5: memref<2x128xf32, #tpu.memory_space<vmem>>, %arg6: memref<256x128xbf16, #tpu.memory_space<vmem>>, %arg7: memref<1x128xf32, #tpu.memory_space<vmem>>, %arg8: memref<128x256xbf16, #tpu.memory_space<vmem>>, %arg9: memref<1x256xf32, #tpu.memory_space<vmem>>, %arg10: memref<128x768xbf16, #tpu.memory_space<vmem>>, %arg11: memref<1x768xf32, #tpu.memory_space<vmem>>, %arg12: memref<2x128x384xbf16, #tpu.memory_space<vmem>>, %arg13: memref<2x384xf32, #tpu.memory_space<vmem>>, %arg14: memref<384x128xbf16, #tpu.memory_space<vmem>>, %arg15: memref<1x128xf32, #tpu.memory_space<vmem>>, %arg16: memref<32x128xf32, #tpu.memory_space<vmem>>, %arg17: memref<40x16xf32, #tpu.memory_space<vmem>>, %arg18: memref<32x768xf32, #tpu.memory_space<vmem>>, %arg19: memref<32x256xf32, #tpu.memory_space<vmem>>) attributes {dimension_semantics = [#tpu.dimension_semantics<arbitrary>], iteration_bounds = array<i64: 1>, scalar_prefetch = 0 : i64, scratch_operands = 3 : i64, tpu.core_type = #tpu.core_type<tc>, window_params = [{pipeline_mode = #tpu.pipeline_mode<synchronous>, transform_indices = @transform_0, window_bounds = array<i64: 32, 16>}, {pipeline_mode = #tpu.pipeline_mode<synchronous>, transform_indices = @transform_1, window_bounds = array<i64: 3, 16, 512>}, {pipeline_mode = #tpu.pipeline_mode<synchronous>, transform_indices = @transform_2, window_bounds = array<i64: 1, 512>}, {pipeline_mode = #tpu.pipeline_mode<synchronous>, transform_indices = @transform_3, window_bounds = array<i64: 3, 256, 128>}, {pipeline_mode = #tpu.pipeline_mode<synchronous>, transform_indices = @transform_4, window_bounds = array<i64: 2, 128>}, {pipeline_mode = #tpu.pipeline_mode<synchronous>, transform_indices = @transform_5, window_bounds = array<i64: 256, 128>}, {pipeline_mode = #tpu.pipeline_mode<synchronous>, transform_indices = @transform_6, window_bounds = array<i64: 1, 128>}, {pipeline_mode = #tpu.pipeline_mode<synchronous>, transform_indices = @transform_7, window_bounds = array<i64: 128, 256>}, {pipeline_mode = #tpu.pipeline_mode<synchronous>, transform_indices = @transform_8, window_bounds = array<i64: 1, 256>}, {pipeline_mode = #tpu.pipeline_mode<synchronous>, transform_indices = @transform_9, window_bounds = array<i64: 128, 768>}, {pipeline_mode = #tpu.pipeline_mode<synchronous>, transform_indices = @transform_10, window_bounds = array<i64: 1, 768>}, {pipeline_mode = #tpu.pipeline_mode<synchronous>, transform_indices = @transform_11, window_bounds = array<i64: 2, 128, 384>}, {pipeline_mode = #tpu.pipeline_mode<synchronous>, transform_indices = @transform_12, window_bounds = array<i64: 2, 384>}, {pipeline_mode = #tpu.pipeline_mode<synchronous>, transform_indices = @transform_13, window_bounds = array<i64: 384, 128>}, {pipeline_mode = #tpu.pipeline_mode<synchronous>, transform_indices = @transform_14, window_bounds = array<i64: 1, 128>}, {pipeline_mode = #tpu.pipeline_mode<synchronous>, transform_indices = @transform_15, window_bounds = array<i64: 32, 128>}]} {
    %c0 = arith.constant 0 : index
    %c0_0 = arith.constant 0 : index
    %0 = vector.load %arg1[%c0, %c0_0] : memref<32x16xf32, #tpu.memory_space<vmem>>, vector<32x16xf32>
    %c0_1 = arith.constant 0 : index
    %c0_2 = arith.constant 0 : index
    %1 = vector.load %arg17[%c0_1, %c0_2] : memref<40x16xf32, #tpu.memory_space<vmem>>, vector<32x16xf32>
    tpu.vector_store %arg17[%c0_1, %c0_2], %0 {strides = array<i32>} : memref<40x16xf32, #tpu.memory_space<vmem>>, vector<32x16xf32>,
    %cst = arith.constant 0.000000e+00 : f32
    %2 = vector.broadcast %cst : f32 to vector<8x16xf32>
    %c32 = arith.constant 32 : index
    %c0_3 = arith.constant 0 : index
    %3 = vector.load %arg17[%c32, %c0_3] : memref<40x16xf32, #tpu.memory_space<vmem>>, vector<8x16xf32>
    tpu.vector_store %arg17[%c32, %c0_3], %2 {strides = array<i32>} : memref<40x16xf32, #tpu.memory_space<vmem>>, vector<8x16xf32>,
    %cst_4 = arith.constant 0.000000e+00 : f32
    %4 = vector.broadcast %cst_4 : f32 to vector<32x512xf32>
    %c0_5 = arith.constant 0 : index
    %c0_6 = arith.constant 0 : index
    %5 = vector.load %arg17[%c0_5, %c0_6] : memref<40x16xf32, #tpu.memory_space<vmem>>, vector<32x16xf32>
    %6 = arith.truncf %5 : vector<32x16xf32> to vector<32x16xbf16>
    %c0_7 = arith.constant 0 : index
    %c0_8 = arith.constant 0 : index
    %c0_9 = arith.constant 0 : index
    %7 = vector.load %arg2[%c0_7, %c0_8, %c0_9] : memref<3x16x512xbf16, #tpu.memory_space<vmem>>, vector<1x16x512xbf16>
    %8 = vector.shape_cast %7 : vector<1x16x512xbf16> to vector<16x512xbf16>
    %cst_10 = arith.constant dense<0.000000e+00> : vector<32x512xf32>
    %9 = tpu.matmul %6, %8, %cst_10 {dimension_numbers = #tpu.dot_dimension_numbers<[1], [0], [0], [1], [0, 0, 1, 1], [], []>} : vector<32x16xbf16>, vector<16x512xbf16>, vector<32x512xf32> -> vector<32x512xf32>
    %10 = arith.addf %4, %9 : vector<32x512xf32>
    %c2 = arith.constant 2 : index
    %c0_11 = arith.constant 0 : index
    %11 = vector.load %arg17[%c2, %c0_11] : memref<40x16xf32, #tpu.memory_space<vmem>>, vector<32x16xf32>
    %12 = arith.truncf %11 : vector<32x16xf32> to vector<32x16xbf16>
    %c1 = arith.constant 1 : index
    %c0_12 = arith.constant 0 : index
    %c0_13 = arith.constant 0 : index
    %13 = vector.load %arg2[%c1, %c0_12, %c0_13] : memref<3x16x512xbf16, #tpu.memory_space<vmem>>, vector<1x16x512xbf16>
    %14 = vector.shape_cast %13 : vector<1x16x512xbf16> to vector<16x512xbf16>
    %cst_14 = arith.constant dense<0.000000e+00> : vector<32x512xf32>
    %15 = tpu.matmul %12, %14, %cst_14 {dimension_numbers = #tpu.dot_dimension_numbers<[1], [0], [0], [1], [0, 0, 1, 1], [], []>} : vector<32x16xbf16>, vector<16x512xbf16>, vector<32x512xf32> -> vector<32x512xf32>
    %16 = arith.addf %10, %15 : vector<32x512xf32>
    %c4 = arith.constant 4 : index
    %c0_15 = arith.constant 0 : index
    %17 = vector.load %arg17[%c4, %c0_15] : memref<40x16xf32, #tpu.memory_space<vmem>>, vector<32x16xf32>
    %18 = arith.truncf %17 : vector<32x16xf32> to vector<32x16xbf16>
    %c2_16 = arith.constant 2 : index
    %c0_17 = arith.constant 0 : index
    %c0_18 = arith.constant 0 : index
    %19 = vector.load %arg2[%c2_16, %c0_17, %c0_18] : memref<3x16x512xbf16, #tpu.memory_space<vmem>>, vector<1x16x512xbf16>
    %20 = vector.shape_cast %19 : vector<1x16x512xbf16> to vector<16x512xbf16>
    %cst_19 = arith.constant dense<0.000000e+00> : vector<32x512xf32>
    %21 = tpu.matmul %18, %20, %cst_19 {dimension_numbers = #tpu.dot_dimension_numbers<[1], [0], [0], [1], [0, 0, 1, 1], [], []>} : vector<32x16xbf16>, vector<16x512xbf16>, vector<32x512xf32> -> vector<32x512xf32>
    %22 = arith.addf %16, %21 : vector<32x512xf32>
    %c0_20 = arith.constant 0 : index
    %c0_21 = arith.constant 0 : index
    %23 = vector.load %arg3[%c0_20, %c0_21] : memref<1x512xf32, #tpu.memory_space<vmem>>, vector<1x512xf32>
    %24 = vector.broadcast %23 : vector<1x512xf32> to vector<32x512xf32>
    %25 = arith.addf %22, %24 : vector<32x512xf32>
    %cst_22 = arith.constant 0.000000e+00 : f32
    %26 = vector.broadcast %cst_22 : f32 to vector<32x512xf32>
    %27 = arith.maximumf %25, %26 : vector<32x512xf32>
    %c30_i32 = arith.constant 30 : i32
    %28 = tpu.dynamic_rotate %27 by %c30_i32 dim 0 : vector<32x512xf32>, i32 -> vector<32x512xf32>
    %29 = tpu.iota {dimensions = array<i32: 0>} : vector<32x512xi32>
    %c32_i32 = arith.constant 32 : i32
    %c0_i32 = arith.constant 0 : i32
    %30 = arith.cmpi eq, %c32_i32, %c0_i32 : i32
    %c1_i32 = arith.constant 1 : i32
    %31 = arith.select %30, %c1_i32, %c32_i32 : i32
    %32 = vector.broadcast %31 : i32 to vector<32x512xi32>
    %33 = arith.remsi %29, %32 : vector<32x512xi32>
    %c0_i32_23 = arith.constant 0 : i32
    %34 = vector.broadcast %c0_i32_23 : i32 to vector<32x512xi32>
    %35 = arith.cmpi ne, %33, %34 : vector<32x512xi32>
    %c0_i32_24 = arith.constant 0 : i32
    %36 = vector.broadcast %c0_i32_24 : i32 to vector<32x512xi32>
    %37 = arith.cmpi slt, %33, %36 : vector<32x512xi32>
    %c0_i32_25 = arith.constant 0 : i32
    %38 = arith.cmpi slt, %31, %c0_i32_25 : i32
    %39 = vector.broadcast %38 : i1 to vector<32x512xi1>
    %40 = vector.broadcast %39 : vector<32x512xi1> to vector<32x512xi1>
    %41 = arith.xori %37, %40 : vector<32x512xi1>
    %42 = arith.andi %41, %35 : vector<32x512xi1>
    %43 = vector.broadcast %31 : i32 to vector<32x512xi32>
    %44 = arith.addi %33, %43 : vector<32x512xi32>
    %45 = arith.select %42, %44, %33 : vector<32x512xi1>, vector<32x512xi32>
    %c30_i32_26 = arith.constant 30 : i32
    %46 = vector.broadcast %c30_i32_26 : i32 to vector<32x512xi32>
    %47 = arith.cmpi slt, %45, %46 : vector<32x512xi32>
    %cst_27 = arith.constant 0.000000e+00 : f32
    %48 = vector.broadcast %cst_27 : f32 to vector<32x512xf32>
    %49 = arith.select %47, %28, %48 : vector<32x512xi1>, vector<32x512xf32>
    %50 = arith.maximumf %27, %49 : vector<32x512xf32>
    %51 = vector.extract_strided_slice %50 {offsets = [0, 0], sizes = [32, 256], strides = [1, 1]} : vector<32x512xf32> to vector<32x256xf32>
    %52 = vector.extract_strided_slice %50 {offsets = [0, 256], sizes = [32, 256], strides = [1, 1]} : vector<32x512xf32> to vector<32x256xf32>
    %53 = tpu.concatenate %51, %52 in 0 : vector<32x256xf32>, vector<32x256xf32> -> vector<64x256xf32>
    %c2_i32 = arith.constant 2 : i32
    %54 = tpu.dynamic_rotate %53 by %c2_i32 dim 0 : vector<64x256xf32>, i32 -> vector<64x256xf32>
    %55 = tpu.iota {dimensions = array<i32: 0>} : vector<64x256xi32>
    %c32_i32_28 = arith.constant 32 : i32
    %c0_i32_29 = arith.constant 0 : i32
    %56 = arith.cmpi eq, %c32_i32_28, %c0_i32_29 : i32
    %c1_i32_30 = arith.constant 1 : i32
    %57 = arith.select %56, %c1_i32_30, %c32_i32_28 : i32
    %58 = vector.broadcast %57 : i32 to vector<64x256xi32>
    %59 = arith.remsi %55, %58 : vector<64x256xi32>
    %c0_i32_31 = arith.constant 0 : i32
    %60 = vector.broadcast %c0_i32_31 : i32 to vector<64x256xi32>
    %61 = arith.cmpi ne, %59, %60 : vector<64x256xi32>
    %c0_i32_32 = arith.constant 0 : i32
    %62 = vector.broadcast %c0_i32_32 : i32 to vector<64x256xi32>
    %63 = arith.cmpi slt, %59, %62 : vector<64x256xi32>
    %c0_i32_33 = arith.constant 0 : i32
    %64 = arith.cmpi slt, %57, %c0_i32_33 : i32
    %65 = vector.broadcast %64 : i1 to vector<64x256xi1>
    %66 = vector.broadcast %65 : vector<64x256xi1> to vector<64x256xi1>
    %67 = arith.xori %63, %66 : vector<64x256xi1>
    %68 = arith.andi %67, %61 : vector<64x256xi1>
    %69 = vector.broadcast %57 : i32 to vector<64x256xi32>
    %70 = arith.addi %59, %69 : vector<64x256xi32>
    %71 = arith.select %68, %70, %59 : vector<64x256xi1>, vector<64x256xi32>
    %c2_i32_34 = arith.constant 2 : i32
    %72 = vector.broadcast %c2_i32_34 : i32 to vector<64x256xi32>
    %73 = arith.cmpi sge, %71, %72 : vector<64x256xi32>
    %cst_35 = arith.constant 0.000000e+00 : f32
    %74 = vector.broadcast %cst_35 : f32 to vector<64x256xf32>
    %75 = arith.select %73, %54, %74 : vector<64x256xi1>, vector<64x256xf32>
    %76 = arith.truncf %75 : vector<64x256xf32> to vector<64x256xbf16>
    %c0_36 = arith.constant 0 : index
    %c0_37 = arith.constant 0 : index
    %c0_38 = arith.constant 0 : index
    %77 = vector.load %arg4[%c0_36, %c0_37, %c0_38] : memref<3x256x128xbf16, #tpu.memory_space<vmem>>, vector<1x256x128xbf16>
    %78 = vector.shape_cast %77 : vector<1x256x128xbf16> to vector<256x128xbf16>
    %cst_39 = arith.constant dense<0.000000e+00> : vector<64x128xf32>
    %79 = tpu.matmul %76, %78, %cst_39 {dimension_numbers = #tpu.dot_dimension_numbers<[1], [0], [0], [1], [0, 0, 1, 1], [], []>} : vector<64x256xbf16>, vector<256x128xbf16>, vector<64x128xf32> -> vector<64x128xf32>
    %80 = arith.truncf %53 : vector<64x256xf32> to vector<64x256xbf16>
    %c1_40 = arith.constant 1 : index
    %c0_41 = arith.constant 0 : index
    %c0_42 = arith.constant 0 : index
    %81 = vector.load %arg4[%c1_40, %c0_41, %c0_42] : memref<3x256x128xbf16, #tpu.memory_space<vmem>>, vector<1x256x128xbf16>
    %82 = vector.shape_cast %81 : vector<1x256x128xbf16> to vector<256x128xbf16>
    %cst_43 = arith.constant dense<0.000000e+00> : vector<64x128xf32>
    %83 = tpu.matmul %80, %82, %cst_43 {dimension_numbers = #tpu.dot_dimension_numbers<[1], [0], [0], [1], [0, 0, 1, 1], [], []>} : vector<64x256xbf16>, vector<256x128xbf16>, vector<64x128xf32> -> vector<64x128xf32>
    %84 = arith.addf %79, %83 : vector<64x128xf32>
    %c62_i32 = arith.constant 62 : i32
    %85 = tpu.dynamic_rotate %53 by %c62_i32 dim 0 : vector<64x256xf32>, i32 -> vector<64x256xf32>
    %86 = tpu.iota {dimensions = array<i32: 0>} : vector<64x256xi32>
    %c32_i32_44 = arith.constant 32 : i32
    %c0_i32_45 = arith.constant 0 : i32
    %87 = arith.cmpi eq, %c32_i32_44, %c0_i32_45 : i32
    %c1_i32_46 = arith.constant 1 : i32
    %88 = arith.select %87, %c1_i32_46, %c32_i32_44 : i32
    %89 = vector.broadcast %88 : i32 to vector<64x256xi32>
    %90 = arith.remsi %86, %89 : vector<64x256xi32>
    %c0_i32_47 = arith.constant 0 : i32
    %91 = vector.broadcast %c0_i32_47 : i32 to vector<64x256xi32>
    %92 = arith.cmpi ne, %90, %91 : vector<64x256xi32>
    %c0_i32_48 = arith.constant 0 : i32
    %93 = vector.broadcast %c0_i32_48 : i32 to vector<64x256xi32>
    %94 = arith.cmpi slt, %90, %93 : vector<64x256xi32>
    %c0_i32_49 = arith.constant 0 : i32
    %95 = arith.cmpi slt, %88, %c0_i32_49 : i32
    %96 = vector.broadcast %95 : i1 to vector<64x256xi1>
    %97 = vector.broadcast %96 : vector<64x256xi1> to vector<64x256xi1>
    %98 = arith.xori %94, %97 : vector<64x256xi1>
    %99 = arith.andi %98, %92 : vector<64x256xi1>
    %100 = vector.broadcast %88 : i32 to vector<64x256xi32>
    %101 = arith.addi %90, %100 : vector<64x256xi32>
    %102 = arith.select %99, %101, %90 : vector<64x256xi1>, vector<64x256xi32>
    %c30_i32_50 = arith.constant 30 : i32
    %103 = vector.broadcast %c30_i32_50 : i32 to vector<64x256xi32>
    %104 = arith.cmpi slt, %102, %103 : vector<64x256xi32>
    %cst_51 = arith.constant 0.000000e+00 : f32
    %105 = vector.broadcast %cst_51 : f32 to vector<64x256xf32>
    %106 = arith.select %104, %85, %105 : vector<64x256xi1>, vector<64x256xf32>
    %107 = arith.truncf %106 : vector<64x256xf32> to vector<64x256xbf16>
    %c2_52 = arith.constant 2 : index
    %c0_53 = arith.constant 0 : index
    %c0_54 = arith.constant 0 : index
    %108 = vector.load %arg4[%c2_52, %c0_53, %c0_54] : memref<3x256x128xbf16, #tpu.memory_space<vmem>>, vector<1x256x128xbf16>
    %109 = vector.shape_cast %108 : vector<1x256x128xbf16> to vector<256x128xbf16>
    %cst_55 = arith.constant dense<0.000000e+00> : vector<64x128xf32>
    %110 = tpu.matmul %107, %109, %cst_55 {dimension_numbers = #tpu.dot_dimension_numbers<[1], [0], [0], [1], [0, 0, 1, 1], [], []>} : vector<64x256xbf16>, vector<256x128xbf16>, vector<64x128xf32> -> vector<64x128xf32>
    %111 = arith.addf %84, %110 : vector<64x128xf32>
    %c0_56 = arith.constant 0 : index
    %c0_57 = arith.constant 0 : index
    %112 = vector.load %arg5[%c0_56, %c0_57] : memref<2x128xf32, #tpu.memory_space<vmem>>, vector<1x128xf32>
    %113 = vector.broadcast %112 : vector<1x128xf32> to vector<64x128xf32>
    %114 = arith.mulf %111, %113 : vector<64x128xf32>
    %c1_58 = arith.constant 1 : index
    %c0_59 = arith.constant 0 : index
    %115 = vector.load %arg5[%c1_58, %c0_59] : memref<2x128xf32, #tpu.memory_space<vmem>>, vector<1x128xf32>
    %116 = vector.broadcast %115 : vector<1x128xf32> to vector<64x128xf32>
    %117 = arith.addf %114, %116 : vector<64x128xf32>
    %cst_60 = arith.constant 0.000000e+00 : f32
    %118 = vector.broadcast %cst_60 : f32 to vector<64x128xf32>
    %119 = arith.maximumf %117, %118 : vector<64x128xf32>
    %120 = vector.extract_strided_slice %119 {offsets = [0, 0], sizes = [32, 128], strides = [1, 1]} : vector<64x128xf32> to vector<32x128xf32>
    %121 = vector.extract_strided_slice %119 {offsets = [32, 0], sizes = [32, 128], strides = [1, 1]} : vector<64x128xf32> to vector<32x128xf32>
    %122 = tpu.concatenate %120, %121 in 1 : vector<32x128xf32>, vector<32x128xf32> -> vector<32x256xf32>
    %123 = arith.truncf %122 : vector<32x256xf32> to vector<32x256xbf16>
    %c0_61 = arith.constant 0 : index
    %c0_62 = arith.constant 0 : index
    %124 = vector.load %arg6[%c0_61, %c0_62] : memref<256x128xbf16, #tpu.memory_space<vmem>>, vector<256x128xbf16>
    %cst_63 = arith.constant dense<0.000000e+00> : vector<32x128xf32>
    %125 = tpu.matmul %123, %124, %cst_63 {dimension_numbers = #tpu.dot_dimension_numbers<[1], [0], [0], [1], [0, 0, 1, 1], [], []>} : vector<32x256xbf16>, vector<256x128xbf16>, vector<32x128xf32> -> vector<32x128xf32>
    %c0_64 = arith.constant 0 : index
    %c0_65 = arith.constant 0 : index
    %126 = vector.load %arg7[%c0_64, %c0_65] : memref<1x128xf32, #tpu.memory_space<vmem>>, vector<1x128xf32>
    %127 = vector.broadcast %126 : vector<1x128xf32> to vector<32x128xf32>
    %128 = arith.addf %125, %127 : vector<32x128xf32>
    %129 = arith.truncf %128 : vector<32x128xf32> to vector<32x128xbf16>
    %c0_66 = arith.constant 0 : index
    %c0_67 = arith.constant 0 : index
    %130 = vector.load %arg8[%c0_66, %c0_67] : memref<128x256xbf16, #tpu.memory_space<vmem>>, vector<128x256xbf16>
    %cst_68 = arith.constant dense<0.000000e+00> : vector<32x256xf32>
    %131 = tpu.matmul %129, %130, %cst_68 {dimension_numbers = #tpu.dot_dimension_numbers<[1], [0], [0], [1], [0, 0, 1, 1], [], []>} : vector<32x128xbf16>, vector<128x256xbf16>, vector<32x256xf32> -> vector<32x256xf32>
    %c0_69 = arith.constant 0 : index
    %c0_70 = arith.constant 0 : index
    %132 = vector.load %arg9[%c0_69, %c0_70] : memref<1x256xf32, #tpu.memory_space<vmem>>, vector<1x256xf32>
    %133 = vector.broadcast %132 : vector<1x256xf32> to vector<32x256xf32>
    %134 = arith.addf %131, %133 : vector<32x256xf32>
    %135 = vector.extract_strided_slice %134 {offsets = [0, 0], sizes = [32, 128], strides = [1, 1]} : vector<32x256xf32> to vector<32x128xf32>
    %cst_71 = arith.constant 0.000000e+00 : f32
    %136 = vector.broadcast %cst_71 : f32 to vector<32x128xf32>
    %137 = arith.maximumf %135, %136 : vector<32x128xf32>
    %138 = vector.extract_strided_slice %134 {offsets = [0, 128], sizes = [32, 128], strides = [1, 1]} : vector<32x256xf32> to vector<32x128xf32>
    %139 = arith.negf %138 : vector<32x128xf32>
    %140 = math.exp %139 : vector<32x128xf32>
    %cst_72 = arith.constant 1.000000e+00 : f32
    %141 = vector.broadcast %cst_72 : f32 to vector<32x128xf32>
    %142 = arith.addf %141, %140 : vector<32x128xf32>
    %143 = arith.divf %141, %142 : vector<32x128xf32>
    %144 = arith.mulf %137, %143 : vector<32x128xf32>
    %cst_73 = arith.constant 1.000000e+00 : f32
    %145 = vector.broadcast %cst_73 : f32 to vector<32x128xf32>
    %146 = arith.subf %145, %143 : vector<32x128xf32>
    %147 = arith.mulf %128, %146 : vector<32x128xf32>
    %148 = arith.addf %144, %147 : vector<32x128xf32>
    %149 = arith.truncf %148 : vector<32x128xf32> to vector<32x128xbf16>
    %c0_74 = arith.constant 0 : index
    %c0_75 = arith.constant 0 : index
    %150 = vector.load %arg8[%c0_74, %c0_75] : memref<128x256xbf16, #tpu.memory_space<vmem>>, vector<128x256xbf16>
    %cst_76 = arith.constant dense<0.000000e+00> : vector<32x256xf32>
    %151 = tpu.matmul %149, %150, %cst_76 {dimension_numbers = #tpu.dot_dimension_numbers<[1], [0], [0], [1], [0, 0, 1, 1], [], []>} : vector<32x128xbf16>, vector<128x256xbf16>, vector<32x256xf32> -> vector<32x256xf32>
    %c0_77 = arith.constant 0 : index
    %c0_78 = arith.constant 0 : index
    %152 = vector.load %arg9[%c0_77, %c0_78] : memref<1x256xf32, #tpu.memory_space<vmem>>, vector<1x256xf32>
    %153 = vector.broadcast %152 : vector<1x256xf32> to vector<32x256xf32>
    %154 = arith.addf %151, %153 : vector<32x256xf32>
    %155 = vector.extract_strided_slice %154 {offsets = [0, 0], sizes = [32, 128], strides = [1, 1]} : vector<32x256xf32> to vector<32x128xf32>
    %cst_79 = arith.constant 0.000000e+00 : f32
    %156 = vector.broadcast %cst_79 : f32 to vector<32x128xf32>
    %157 = arith.maximumf %155, %156 : vector<32x128xf32>
    %158 = vector.extract_strided_slice %154 {offsets = [0, 128], sizes = [32, 128], strides = [1, 1]} : vector<32x256xf32> to vector<32x128xf32>
    %159 = arith.negf %158 : vector<32x128xf32>
    %160 = math.exp %159 : vector<32x128xf32>
    %cst_80 = arith.constant 1.000000e+00 : f32
    %161 = vector.broadcast %cst_80 : f32 to vector<32x128xf32>
    %162 = arith.addf %161, %160 : vector<32x128xf32>
    %163 = arith.divf %161, %162 : vector<32x128xf32>
    %164 = arith.mulf %157, %163 : vector<32x128xf32>
    %cst_81 = arith.constant 1.000000e+00 : f32
    %165 = vector.broadcast %cst_81 : f32 to vector<32x128xf32>
    %166 = arith.subf %165, %163 : vector<32x128xf32>
    %167 = arith.mulf %148, %166 : vector<32x128xf32>
    %168 = arith.addf %164, %167 : vector<32x128xf32>
    %169 = arith.truncf %168 : vector<32x128xf32> to vector<32x128xbf16>
    %c0_82 = arith.constant 0 : index
    %c0_83 = arith.constant 0 : index
    %170 = vector.load %arg10[%c0_82, %c0_83] : memref<128x768xbf16, #tpu.memory_space<vmem>>, vector<128x768xbf16>
    %cst_84 = arith.constant dense<0.000000e+00> : vector<32x768xf32>
    %171 = tpu.matmul %169, %170, %cst_84 {dimension_numbers = #tpu.dot_dimension_numbers<[1], [0], [0], [1], [0, 0, 1, 1], [], []>} : vector<32x128xbf16>, vector<128x768xbf16>, vector<32x768xf32> -> vector<32x768xf32>
    %c0_85 = arith.constant 0 : index
    %c0_86 = arith.constant 0 : index
    %172 = vector.load %arg11[%c0_85, %c0_86] : memref<1x768xf32, #tpu.memory_space<vmem>>, vector<1x768xf32>
    %173 = vector.broadcast %172 : vector<1x768xf32> to vector<32x768xf32>
    %174 = arith.addf %171, %173 : vector<32x768xf32>
    %c0_87 = arith.constant 0 : index
    %c0_88 = arith.constant 0 : index
    %175 = vector.load %arg18[%c0_87, %c0_88] : memref<32x768xf32, #tpu.memory_space<vmem>>, vector<32x768xf32>
    tpu.vector_store %arg18[%c0_87, %c0_88], %174 {strides = array<i32>} : memref<32x768xf32, #tpu.memory_space<vmem>>, vector<32x768xf32>,
    %cst_89 = arith.constant 0.000000e+00 : f32
    %176 = vector.broadcast %cst_89 : f32 to vector<2x128xf32>
    %cst_90 = arith.constant 0.000000e+00 : f32
    %177 = vector.broadcast %cst_90 : f32 to vector<2x128xf32>
    %c0_91 = arith.constant 0 : index
    %c0_92 = arith.constant 0 : index
    %178 = vector.load %arg18[%c0_91, %c0_92] : memref<32x768xf32, #tpu.memory_space<vmem>>, vector<2x384xf32>
    %c30 = arith.constant 30 : index
    %c384 = arith.constant 384 : index
    %179 = vector.load %arg18[%c30, %c384] : memref<32x768xf32, #tpu.memory_space<vmem>>, vector<2x384xf32>
    %180 = arith.truncf %176 : vector<2x128xf32> to vector<2x128xbf16>
    %c0_93 = arith.constant 0 : index
    %c0_94 = arith.constant 0 : index
    %c0_95 = arith.constant 0 : index
    %181 = vector.load %arg12[%c0_93, %c0_94, %c0_95] : memref<2x128x384xbf16, #tpu.memory_space<vmem>>, vector<1x128x384xbf16>
    %182 = vector.shape_cast %181 : vector<1x128x384xbf16> to vector<128x384xbf16>
    %cst_96 = arith.constant dense<0.000000e+00> : vector<2x384xf32>
    %183 = tpu.matmul %180, %182, %cst_96 {dimension_numbers = #tpu.dot_dimension_numbers<[1], [0], [0], [1], [0, 0, 1, 1], [], []>} : vector<2x128xbf16>, vector<128x384xbf16>, vector<2x384xf32> -> vector<2x384xf32>
    %c0_97 = arith.constant 0 : index
    %c0_98 = arith.constant 0 : index
    %184 = vector.load %arg13[%c0_97, %c0_98] : memref<2x384xf32, #tpu.memory_space<vmem>>, vector<1x384xf32>
    %185 = vector.broadcast %184 : vector<1x384xf32> to vector<2x384xf32>
    %186 = arith.addf %183, %185 : vector<2x384xf32>
    %187 = arith.truncf %177 : vector<2x128xf32> to vector<2x128xbf16>
    %c1_99 = arith.constant 1 : index
    %c0_100 = arith.constant 0 : index
    %c0_101 = arith.constant 0 : index
    %188 = vector.load %arg12[%c1_99, %c0_100, %c0_101] : memref<2x128x384xbf16, #tpu.memory_space<vmem>>, vector<1x128x384xbf16>
    %189 = vector.shape_cast %188 : vector<1x128x384xbf16> to vector<128x384xbf16>
    %cst_102 = arith.constant dense<0.000000e+00> : vector<2x384xf32>
    %190 = tpu.matmul %187, %189, %cst_102 {dimension_numbers = #tpu.dot_dimension_numbers<[1], [0], [0], [1], [0, 0, 1, 1], [], []>} : vector<2x128xbf16>, vector<128x384xbf16>, vector<2x384xf32> -> vector<2x384xf32>
    %c1_103 = arith.constant 1 : index
    %c0_104 = arith.constant 0 : index
    %191 = vector.load %arg13[%c1_103, %c0_104] : memref<2x384xf32, #tpu.memory_space<vmem>>, vector<1x384xf32>
    %192 = vector.broadcast %191 : vector<1x384xf32> to vector<2x384xf32>
    %193 = arith.addf %190, %192 : vector<2x384xf32>
    %194 = vector.extract_strided_slice %178 {offsets = [0, 0], sizes = [2, 128], strides = [1, 1]} : vector<2x384xf32> to vector<2x128xf32>
    %195 = vector.extract_strided_slice %186 {offsets = [0, 0], sizes = [2, 128], strides = [1, 1]} : vector<2x384xf32> to vector<2x128xf32>
    %196 = arith.addf %194, %195 : vector<2x128xf32>
    %197 = arith.negf %196 : vector<2x128xf32>
    %198 = math.exp %197 : vector<2x128xf32>
    %cst_105 = arith.constant 1.000000e+00 : f32
    %199 = vector.broadcast %cst_105 : f32 to vector<2x128xf32>
    %200 = arith.addf %199, %198 : vector<2x128xf32>
    %201 = arith.divf %199, %200 : vector<2x128xf32>
    %202 = vector.extract_strided_slice %178 {offsets = [0, 128], sizes = [2, 128], strides = [1, 1]} : vector<2x384xf32> to vector<2x128xf32>
    %203 = vector.extract_strided_slice %186 {offsets = [0, 128], sizes = [2, 128], strides = [1, 1]} : vector<2x384xf32> to vector<2x128xf32>
    %204 = arith.addf %202, %203 : vector<2x128xf32>
    %205 = arith.negf %204 : vector<2x128xf32>
    %206 = math.exp %205 : vector<2x128xf32>
    %cst_106 = arith.constant 1.000000e+00 : f32
    %207 = vector.broadcast %cst_106 : f32 to vector<2x128xf32>
    %208 = arith.addf %207, %206 : vector<2x128xf32>
    %209 = arith.divf %207, %208 : vector<2x128xf32>
    %210 = vector.extract_strided_slice %178 {offsets = [0, 256], sizes = [2, 128], strides = [1, 1]} : vector<2x384xf32> to vector<2x128xf32>
    %211 = vector.extract_strided_slice %186 {offsets = [0, 256], sizes = [2, 128], strides = [1, 1]} : vector<2x384xf32> to vector<2x128xf32>
    %212 = arith.mulf %201, %211 : vector<2x128xf32>
    %213 = arith.addf %210, %212 : vector<2x128xf32>
    %214 = math.tanh %213 : vector<2x128xf32>
    %cst_107 = arith.constant 1.000000e+00 : f32
    %215 = vector.broadcast %cst_107 : f32 to vector<2x128xf32>
    %216 = arith.subf %215, %209 : vector<2x128xf32>
    %217 = arith.mulf %216, %214 : vector<2x128xf32>
    %218 = arith.mulf %209, %176 : vector<2x128xf32>
    %219 = arith.addf %217, %218 : vector<2x128xf32>
    %220 = vector.extract_strided_slice %179 {offsets = [0, 0], sizes = [2, 128], strides = [1, 1]} : vector<2x384xf32> to vector<2x128xf32>
    %221 = vector.extract_strided_slice %193 {offsets = [0, 0], sizes = [2, 128], strides = [1, 1]} : vector<2x384xf32> to vector<2x128xf32>
    %222 = arith.addf %220, %221 : vector<2x128xf32>
    %223 = arith.negf %222 : vector<2x128xf32>
    %224 = math.exp %223 : vector<2x128xf32>
    %cst_108 = arith.constant 1.000000e+00 : f32
    %225 = vector.broadcast %cst_108 : f32 to vector<2x128xf32>
    %226 = arith.addf %225, %224 : vector<2x128xf32>
    %227 = arith.divf %225, %226 : vector<2x128xf32>
    %228 = vector.extract_strided_slice %179 {offsets = [0, 128], sizes = [2, 128], strides = [1, 1]} : vector<2x384xf32> to vector<2x128xf32>
    %229 = vector.extract_strided_slice %193 {offsets = [0, 128], sizes = [2, 128], strides = [1, 1]} : vector<2x384xf32> to vector<2x128xf32>
    %230 = arith.addf %228, %229 : vector<2x128xf32>
    %231 = arith.negf %230 : vector<2x128xf32>
    %232 = math.exp %231 : vector<2x128xf32>
    %cst_109 = arith.constant 1.000000e+00 : f32
    %233 = vector.broadcast %cst_109 : f32 to vector<2x128xf32>
    %234 = arith.addf %233, %232 : vector<2x128xf32>
    %235 = arith.divf %233, %234 : vector<2x128xf32>
    %236 = vector.extract_strided_slice %179 {offsets = [0, 256], sizes = [2, 128], strides = [1, 1]} : vector<2x384xf32> to vector<2x128xf32>
    %237 = vector.extract_strided_slice %193 {offsets = [0, 256], sizes = [2, 128], strides = [1, 1]} : vector<2x384xf32> to vector<2x128xf32>
    %238 = arith.mulf %227, %237 : vector<2x128xf32>
    %239 = arith.addf %236, %238 : vector<2x128xf32>
    %240 = math.tanh %239 : vector<2x128xf32>
    %cst_110 = arith.constant 1.000000e+00 : f32
    %241 = vector.broadcast %cst_110 : f32 to vector<2x128xf32>
    %242 = arith.subf %241, %235 : vector<2x128xf32>
    %243 = arith.mulf %242, %240 : vector<2x128xf32>
    %244 = arith.mulf %235, %177 : vector<2x128xf32>
    %245 = arith.addf %243, %244 : vector<2x128xf32>
    %c0_111 = arith.constant 0 : index
    %c0_112 = arith.constant 0 : index
    %246 = vector.load %arg19[%c0_111, %c0_112] : memref<32x256xf32, #tpu.memory_space<vmem>>, vector<2x128xf32>
    tpu.vector_store %arg19[%c0_111, %c0_112], %219 {strides = array<i32>} : memref<32x256xf32, #tpu.memory_space<vmem>>, vector<2x128xf32>,
    %c30_113 = arith.constant 30 : index
    %c128 = arith.constant 128 : index
    %247 = vector.load %arg19[%c30_113, %c128] : memref<32x256xf32, #tpu.memory_space<vmem>>, vector<2x128xf32>
    tpu.vector_store %arg19[%c30_113, %c128], %245 {strides = array<i32>} : memref<32x256xf32, #tpu.memory_space<vmem>>, vector<2x128xf32>,
    %c2_114 = arith.constant 2 : index
    %c0_115 = arith.constant 0 : index
    %248 = vector.load %arg18[%c2_114, %c0_115] : memref<32x768xf32, #tpu.memory_space<vmem>>, vector<2x384xf32>
    %c28 = arith.constant 28 : index
    %c384_116 = arith.constant 384 : index
    %249 = vector.load %arg18[%c28, %c384_116] : memref<32x768xf32, #tpu.memory_space<vmem>>, vector<2x384xf32>
    %250 = arith.truncf %219 : vector<2x128xf32> to vector<2x128xbf16>
    %c0_117 = arith.constant 0 : index
    %c0_118 = arith.constant 0 : index
    %c0_119 = arith.constant 0 : index
    %251 = vector.load %arg12[%c0_117, %c0_118, %c0_119] : memref<2x128x384xbf16, #tpu.memory_space<vmem>>, vector<1x128x384xbf16>
    %252 = vector.shape_cast %251 : vector<1x128x384xbf16> to vector<128x384xbf16>
    %cst_120 = arith.constant dense<0.000000e+00> : vector<2x384xf32>
    %253 = tpu.matmul %250, %252, %cst_120 {dimension_numbers = #tpu.dot_dimension_numbers<[1], [0], [0], [1], [0, 0, 1, 1], [], []>} : vector<2x128xbf16>, vector<128x384xbf16>, vector<2x384xf32> -> vector<2x384xf32>
    %c0_121 = arith.constant 0 : index
    %c0_122 = arith.constant 0 : index
    %254 = vector.load %arg13[%c0_121, %c0_122] : memref<2x384xf32, #tpu.memory_space<vmem>>, vector<1x384xf32>
    %255 = vector.broadcast %254 : vector<1x384xf32> to vector<2x384xf32>
    %256 = arith.addf %253, %255 : vector<2x384xf32>
    %257 = arith.truncf %245 : vector<2x128xf32> to vector<2x128xbf16>
    %c1_123 = arith.constant 1 : index
    %c0_124 = arith.constant 0 : index
    %c0_125 = arith.constant 0 : index
    %258 = vector.load %arg12[%c1_123, %c0_124, %c0_125] : memref<2x128x384xbf16, #tpu.memory_space<vmem>>, vector<1x128x384xbf16>
    %259 = vector.shape_cast %258 : vector<1x128x384xbf16> to vector<128x384xbf16>
    %cst_126 = arith.constant dense<0.000000e+00> : vector<2x384xf32>
    %260 = tpu.matmul %257, %259, %cst_126 {dimension_numbers = #tpu.dot_dimension_numbers<[1], [0], [0], [1], [0, 0, 1, 1], [], []>} : vector<2x128xbf16>, vector<128x384xbf16>, vector<2x384xf32> -> vector<2x384xf32>
    %c1_127 = arith.constant 1 : index
    %c0_128 = arith.constant 0 : index
    %261 = vector.load %arg13[%c1_127, %c0_128] : memref<2x384xf32, #tpu.memory_space<vmem>>, vector<1x384xf32>
    %262 = vector.broadcast %261 : vector<1x384xf32> to vector<2x384xf32>
    %263 = arith.addf %260, %262 : vector<2x384xf32>
    %264 = vector.extract_strided_slice %248 {offsets = [0, 0], sizes = [2, 128], strides = [1, 1]} : vector<2x384xf32> to vector<2x128xf32>
    %265 = vector.extract_strided_slice %256 {offsets = [0, 0], sizes = [2, 128], strides = [1, 1]} : vector<2x384xf32> to vector<2x128xf32>
    %266 = arith.addf %264, %265 : vector<2x128xf32>
    %267 = arith.negf %266 : vector<2x128xf32>
    %268 = math.exp %267 : vector<2x128xf32>
    %cst_129 = arith.constant 1.000000e+00 : f32
    %269 = vector.broadcast %cst_129 : f32 to vector<2x128xf32>
    %270 = arith.addf %269, %268 : vector<2x128xf32>
    %271 = arith.divf %269, %270 : vector<2x128xf32>
    %272 = vector.extract_strided_slice %248 {offsets = [0, 128], sizes = [2, 128], strides = [1, 1]} : vector<2x384xf32> to vector<2x128xf32>
    %273 = vector.extract_strided_slice %256 {offsets = [0, 128], sizes = [2, 128], strides = [1, 1]} : vector<2x384xf32> to vector<2x128xf32>
    %274 = arith.addf %272, %273 : vector<2x128xf32>
    %275 = arith.negf %274 : vector<2x128xf32>
    %276 = math.exp %275 : vector<2x128xf32>
    %cst_130 = arith.constant 1.000000e+00 : f32
    %277 = vector.broadcast %cst_130 : f32 to vector<2x128xf32>
    %278 = arith.addf %277, %276 : vector<2x128xf32>
    %279 = arith.divf %277, %278 : vector<2x128xf32>
    %280 = vector.extract_strided_slice %248 {offsets = [0, 256], sizes = [2, 128], strides = [1, 1]} : vector<2x384xf32> to vector<2x128xf32>
    %281 = vector.extract_strided_slice %256 {offsets = [0, 256], sizes = [2, 128], strides = [1, 1]} : vector<2x384xf32> to vector<2x128xf32>
    %282 = arith.mulf %271, %281 : vector<2x128xf32>
    %283 = arith.addf %280, %282 : vector<2x128xf32>
    %284 = math.tanh %283 : vector<2x128xf32>
    %cst_131 = arith.constant 1.000000e+00 : f32
    %285 = vector.broadcast %cst_131 : f32 to vector<2x128xf32>
    %286 = arith.subf %285, %279 : vector<2x128xf32>
    %287 = arith.mulf %286, %284 : vector<2x128xf32>
    %288 = arith.mulf %279, %219 : vector<2x128xf32>
    %289 = arith.addf %287, %288 : vector<2x128xf32>
    %290 = vector.extract_strided_slice %249 {offsets = [0, 0], sizes = [2, 128], strides = [1, 1]} : vector<2x384xf32> to vector<2x128xf32>
    %291 = vector.extract_strided_slice %263 {offsets = [0, 0], sizes = [2, 128], strides = [1, 1]} : vector<2x384xf32> to vector<2x128xf32>
    %292 = arith.addf %290, %291 : vector<2x128xf32>
    %293 = arith.negf %292 : vector<2x128xf32>
    %294 = math.exp %293 : vector<2x128xf32>
    %cst_132 = arith.constant 1.000000e+00 : f32
    %295 = vector.broadcast %cst_132 : f32 to vector<2x128xf32>
    %296 = arith.addf %295, %294 : vector<2x128xf32>
    %297 = arith.divf %295, %296 : vector<2x128xf32>
    %298 = vector.extract_strided_slice %249 {offsets = [0, 128], sizes = [2, 128], strides = [1, 1]} : vector<2x384xf32> to vector<2x128xf32>
    %299 = vector.extract_strided_slice %263 {offsets = [0, 128], sizes = [2, 128], strides = [1, 1]} : vector<2x384xf32> to vector<2x128xf32>
    %300 = arith.addf %298, %299 : vector<2x128xf32>
    %301 = arith.negf %300 : vector<2x128xf32>
    %302 = math.exp %301 : vector<2x128xf32>
    %cst_133 = arith.constant 1.000000e+00 : f32
    %303 = vector.broadcast %cst_133 : f32 to vector<2x128xf32>
    %304 = arith.addf %303, %302 : vector<2x128xf32>
    %305 = arith.divf %303, %304 : vector<2x128xf32>
    %306 = vector.extract_strided_slice %249 {offsets = [0, 256], sizes = [2, 128], strides = [1, 1]} : vector<2x384xf32> to vector<2x128xf32>
    %307 = vector.extract_strided_slice %263 {offsets = [0, 256], sizes = [2, 128], strides = [1, 1]} : vector<2x384xf32> to vector<2x128xf32>
    %308 = arith.mulf %297, %307 : vector<2x128xf32>
    %309 = arith.addf %306, %308 : vector<2x128xf32>
    %310 = math.tanh %309 : vector<2x128xf32>
    %cst_134 = arith.constant 1.000000e+00 : f32
    %311 = vector.broadcast %cst_134 : f32 to vector<2x128xf32>
    %312 = arith.subf %311, %305 : vector<2x128xf32>
    %313 = arith.mulf %312, %310 : vector<2x128xf32>
    %314 = arith.mulf %305, %245 : vector<2x128xf32>
    %315 = arith.addf %313, %314 : vector<2x128xf32>
    %c2_135 = arith.constant 2 : index
    %c0_136 = arith.constant 0 : index
    %316 = vector.load %arg19[%c2_135, %c0_136] : memref<32x256xf32, #tpu.memory_space<vmem>>, vector<2x128xf32>
    tpu.vector_store %arg19[%c2_135, %c0_136], %289 {strides = array<i32>} : memref<32x256xf32, #tpu.memory_space<vmem>>, vector<2x128xf32>,
    %c28_137 = arith.constant 28 : index
    %c128_138 = arith.constant 128 : index
    %317 = vector.load %arg19[%c28_137, %c128_138] : memref<32x256xf32, #tpu.memory_space<vmem>>, vector<2x128xf32>
    tpu.vector_store %arg19[%c28_137, %c128_138], %315 {strides = array<i32>} : memref<32x256xf32, #tpu.memory_space<vmem>>, vector<2x128xf32>,
    %c4_139 = arith.constant 4 : index
    %c0_140 = arith.constant 0 : index
    %318 = vector.load %arg18[%c4_139, %c0_140] : memref<32x768xf32, #tpu.memory_space<vmem>>, vector<2x384xf32>
    %c26 = arith.constant 26 : index
    %c384_141 = arith.constant 384 : index
    %319 = vector.load %arg18[%c26, %c384_141] : memref<32x768xf32, #tpu.memory_space<vmem>>, vector<2x384xf32>
    %320 = arith.truncf %289 : vector<2x128xf32> to vector<2x128xbf16>
    %c0_142 = arith.constant 0 : index
    %c0_143 = arith.constant 0 : index
    %c0_144 = arith.constant 0 : index
    %321 = vector.load %arg12[%c0_142, %c0_143, %c0_144] : memref<2x128x384xbf16, #tpu.memory_space<vmem>>, vector<1x128x384xbf16>
    %322 = vector.shape_cast %321 : vector<1x128x384xbf16> to vector<128x384xbf16>
    %cst_145 = arith.constant dense<0.000000e+00> : vector<2x384xf32>
    %323 = tpu.matmul %320, %322, %cst_145 {dimension_numbers = #tpu.dot_dimension_numbers<[1], [0], [0], [1], [0, 0, 1, 1], [], []>} : vector<2x128xbf16>, vector<128x384xbf16>, vector<2x384xf32> -> vector<2x384xf32>
    %c0_146 = arith.constant 0 : index
    %c0_147 = arith.constant 0 : index
    %324 = vector.load %arg13[%c0_146, %c0_147] : memref<2x384xf32, #tpu.memory_space<vmem>>, vector<1x384xf32>
    %325 = vector.broadcast %324 : vector<1x384xf32> to vector<2x384xf32>
    %326 = arith.addf %323, %325 : vector<2x384xf32>
    %327 = arith.truncf %315 : vector<2x128xf32> to vector<2x128xbf16>
    %c1_148 = arith.constant 1 : index
    %c0_149 = arith.constant 0 : index
    %c0_150 = arith.constant 0 : index
    %328 = vector.load %arg12[%c1_148, %c0_149, %c0_150] : memref<2x128x384xbf16, #tpu.memory_space<vmem>>, vector<1x128x384xbf16>
    %329 = vector.shape_cast %328 : vector<1x128x384xbf16> to vector<128x384xbf16>
    %cst_151 = arith.constant dense<0.000000e+00> : vector<2x384xf32>
    %330 = tpu.matmul %327, %329, %cst_151 {dimension_numbers = #tpu.dot_dimension_numbers<[1], [0], [0], [1], [0, 0, 1, 1], [], []>} : vector<2x128xbf16>, vector<128x384xbf16>, vector<2x384xf32> -> vector<2x384xf32>
    %c1_152 = arith.constant 1 : index
    %c0_153 = arith.constant 0 : index
    %331 = vector.load %arg13[%c1_152, %c0_153] : memref<2x384xf32, #tpu.memory_space<vmem>>, vector<1x384xf32>
    %332 = vector.broadcast %331 : vector<1x384xf32> to vector<2x384xf32>
    %333 = arith.addf %330, %332 : vector<2x384xf32>
    %334 = vector.extract_strided_slice %318 {offsets = [0, 0], sizes = [2, 128], strides = [1, 1]} : vector<2x384xf32> to vector<2x128xf32>
    %335 = vector.extract_strided_slice %326 {offsets = [0, 0], sizes = [2, 128], strides = [1, 1]} : vector<2x384xf32> to vector<2x128xf32>
    %336 = arith.addf %334, %335 : vector<2x128xf32>
    %337 = arith.negf %336 : vector<2x128xf32>
    %338 = math.exp %337 : vector<2x128xf32>
    %cst_154 = arith.constant 1.000000e+00 : f32
    %339 = vector.broadcast %cst_154 : f32 to vector<2x128xf32>
    %340 = arith.addf %339, %338 : vector<2x128xf32>
    %341 = arith.divf %339, %340 : vector<2x128xf32>
    %342 = vector.extract_strided_slice %318 {offsets = [0, 128], sizes = [2, 128], strides = [1, 1]} : vector<2x384xf32> to vector<2x128xf32>
    %343 = vector.extract_strided_slice %326 {offsets = [0, 128], sizes = [2, 128], strides = [1, 1]} : vector<2x384xf32> to vector<2x128xf32>
    %344 = arith.addf %342, %343 : vector<2x128xf32>
    %345 = arith.negf %344 : vector<2x128xf32>
    %346 = math.exp %345 : vector<2x128xf32>
    %cst_155 = arith.constant 1.000000e+00 : f32
    %347 = vector.broadcast %cst_155 : f32 to vector<2x128xf32>
    %348 = arith.addf %347, %346 : vector<2x128xf32>
    %349 = arith.divf %347, %348 : vector<2x128xf32>
    %350 = vector.extract_strided_slice %318 {offsets = [0, 256], sizes = [2, 128], strides = [1, 1]} : vector<2x384xf32> to vector<2x128xf32>
    %351 = vector.extract_strided_slice %326 {offsets = [0, 256], sizes = [2, 128], strides = [1, 1]} : vector<2x384xf32> to vector<2x128xf32>
    %352 = arith.mulf %341, %351 : vector<2x128xf32>
    %353 = arith.addf %350, %352 : vector<2x128xf32>
    %354 = math.tanh %353 : vector<2x128xf32>
    %cst_156 = arith.constant 1.000000e+00 : f32
    %355 = vector.broadcast %cst_156 : f32 to vector<2x128xf32>
    %356 = arith.subf %355, %349 : vector<2x128xf32>
    %357 = arith.mulf %356, %354 : vector<2x128xf32>
    %358 = arith.mulf %349, %289 : vector<2x128xf32>
    %359 = arith.addf %357, %358 : vector<2x128xf32>
    %360 = vector.extract_strided_slice %319 {offsets = [0, 0], sizes = [2, 128], strides = [1, 1]} : vector<2x384xf32> to vector<2x128xf32>
    %361 = vector.extract_strided_slice %333 {offsets = [0, 0], sizes = [2, 128], strides = [1, 1]} : vector<2x384xf32> to vector<2x128xf32>
    %362 = arith.addf %360, %361 : vector<2x128xf32>
    %363 = arith.negf %362 : vector<2x128xf32>
    %364 = math.exp %363 : vector<2x128xf32>
    %cst_157 = arith.constant 1.000000e+00 : f32
    %365 = vector.broadcast %cst_157 : f32 to vector<2x128xf32>
    %366 = arith.addf %365, %364 : vector<2x128xf32>
    %367 = arith.divf %365, %366 : vector<2x128xf32>
    %368 = vector.extract_strided_slice %319 {offsets = [0, 128], sizes = [2, 128], strides = [1, 1]} : vector<2x384xf32> to vector<2x128xf32>
    %369 = vector.extract_strided_slice %333 {offsets = [0, 128], sizes = [2, 128], strides = [1, 1]} : vector<2x384xf32> to vector<2x128xf32>
    %370 = arith.addf %368, %369 : vector<2x128xf32>
    %371 = arith.negf %370 : vector<2x128xf32>
    %372 = math.exp %371 : vector<2x128xf32>
    %cst_158 = arith.constant 1.000000e+00 : f32
    %373 = vector.broadcast %cst_158 : f32 to vector<2x128xf32>
    %374 = arith.addf %373, %372 : vector<2x128xf32>
    %375 = arith.divf %373, %374 : vector<2x128xf32>
    %376 = vector.extract_strided_slice %319 {offsets = [0, 256], sizes = [2, 128], strides = [1, 1]} : vector<2x384xf32> to vector<2x128xf32>
    %377 = vector.extract_strided_slice %333 {offsets = [0, 256], sizes = [2, 128], strides = [1, 1]} : vector<2x384xf32> to vector<2x128xf32>
    %378 = arith.mulf %367, %377 : vector<2x128xf32>
    %379 = arith.addf %376, %378 : vector<2x128xf32>
    %380 = math.tanh %379 : vector<2x128xf32>
    %cst_159 = arith.constant 1.000000e+00 : f32
    %381 = vector.broadcast %cst_159 : f32 to vector<2x128xf32>
    %382 = arith.subf %381, %375 : vector<2x128xf32>
    %383 = arith.mulf %382, %380 : vector<2x128xf32>
    %384 = arith.mulf %375, %315 : vector<2x128xf32>
    %385 = arith.addf %383, %384 : vector<2x128xf32>
    %c4_160 = arith.constant 4 : index
    %c0_161 = arith.constant 0 : index
    %386 = vector.load %arg19[%c4_160, %c0_161] : memref<32x256xf32, #tpu.memory_space<vmem>>, vector<2x128xf32>
    tpu.vector_store %arg19[%c4_160, %c0_161], %359 {strides = array<i32>} : memref<32x256xf32, #tpu.memory_space<vmem>>, vector<2x128xf32>,
    %c26_162 = arith.constant 26 : index
    %c128_163 = arith.constant 128 : index
    %387 = vector.load %arg19[%c26_162, %c128_163] : memref<32x256xf32, #tpu.memory_space<vmem>>, vector<2x128xf32>
    tpu.vector_store %arg19[%c26_162, %c128_163], %385 {strides = array<i32>} : memref<32x256xf32, #tpu.memory_space<vmem>>, vector<2x128xf32>,
    %c6 = arith.constant 6 : index
    %c0_164 = arith.constant 0 : index
    %388 = vector.load %arg18[%c6, %c0_164] : memref<32x768xf32, #tpu.memory_space<vmem>>, vector<2x384xf32>
    %c24 = arith.constant 24 : index
    %c384_165 = arith.constant 384 : index
    %389 = vector.load %arg18[%c24, %c384_165] : memref<32x768xf32, #tpu.memory_space<vmem>>, vector<2x384xf32>
    %390 = arith.truncf %359 : vector<2x128xf32> to vector<2x128xbf16>
    %c0_166 = arith.constant 0 : index
    %c0_167 = arith.constant 0 : index
    %c0_168 = arith.constant 0 : index
    %391 = vector.load %arg12[%c0_166, %c0_167, %c0_168] : memref<2x128x384xbf16, #tpu.memory_space<vmem>>, vector<1x128x384xbf16>
    %392 = vector.shape_cast %391 : vector<1x128x384xbf16> to vector<128x384xbf16>
    %cst_169 = arith.constant dense<0.000000e+00> : vector<2x384xf32>
    %393 = tpu.matmul %390, %392, %cst_169 {dimension_numbers = #tpu.dot_dimension_numbers<[1], [0], [0], [1], [0, 0, 1, 1], [], []>} : vector<2x128xbf16>, vector<128x384xbf16>, vector<2x384xf32> -> vector<2x384xf32>
    %c0_170 = arith.constant 0 : index
    %c0_171 = arith.constant 0 : index
    %394 = vector.load %arg13[%c0_170, %c0_171] : memref<2x384xf32, #tpu.memory_space<vmem>>, vector<1x384xf32>
    %395 = vector.broadcast %394 : vector<1x384xf32> to vector<2x384xf32>
    %396 = arith.addf %393, %395 : vector<2x384xf32>
    %397 = arith.truncf %385 : vector<2x128xf32> to vector<2x128xbf16>
    %c1_172 = arith.constant 1 : index
    %c0_173 = arith.constant 0 : index
    %c0_174 = arith.constant 0 : index
    %398 = vector.load %arg12[%c1_172, %c0_173, %c0_174] : memref<2x128x384xbf16, #tpu.memory_space<vmem>>, vector<1x128x384xbf16>
    %399 = vector.shape_cast %398 : vector<1x128x384xbf16> to vector<128x384xbf16>
    %cst_175 = arith.constant dense<0.000000e+00> : vector<2x384xf32>
    %400 = tpu.matmul %397, %399, %cst_175 {dimension_numbers = #tpu.dot_dimension_numbers<[1], [0], [0], [1], [0, 0, 1, 1], [], []>} : vector<2x128xbf16>, vector<128x384xbf16>, vector<2x384xf32> -> vector<2x384xf32>
    %c1_176 = arith.constant 1 : index
    %c0_177 = arith.constant 0 : index
    %401 = vector.load %arg13[%c1_176, %c0_177] : memref<2x384xf32, #tpu.memory_space<vmem>>, vector<1x384xf32>
    %402 = vector.broadcast %401 : vector<1x384xf32> to vector<2x384xf32>
    %403 = arith.addf %400, %402 : vector<2x384xf32>
    %404 = vector.extract_strided_slice %388 {offsets = [0, 0], sizes = [2, 128], strides = [1, 1]} : vector<2x384xf32> to vector<2x128xf32>
    %405 = vector.extract_strided_slice %396 {offsets = [0, 0], sizes = [2, 128], strides = [1, 1]} : vector<2x384xf32> to vector<2x128xf32>
    %406 = arith.addf %404, %405 : vector<2x128xf32>
    %407 = arith.negf %406 : vector<2x128xf32>
    %408 = math.exp %407 : vector<2x128xf32>
    %cst_178 = arith.constant 1.000000e+00 : f32
    %409 = vector.broadcast %cst_178 : f32 to vector<2x128xf32>
    %410 = arith.addf %409, %408 : vector<2x128xf32>
    %411 = arith.divf %409, %410 : vector<2x128xf32>
    %412 = vector.extract_strided_slice %388 {offsets = [0, 128], sizes = [2, 128], strides = [1, 1]} : vector<2x384xf32> to vector<2x128xf32>
    %413 = vector.extract_strided_slice %396 {offsets = [0, 128], sizes = [2, 128], strides = [1, 1]} : vector<2x384xf32> to vector<2x128xf32>
    %414 = arith.addf %412, %413 : vector<2x128xf32>
    %415 = arith.negf %414 : vector<2x128xf32>
    %416 = math.exp %415 : vector<2x128xf32>
    %cst_179 = arith.constant 1.000000e+00 : f32
    %417 = vector.broadcast %cst_179 : f32 to vector<2x128xf32>
    %418 = arith.addf %417, %416 : vector<2x128xf32>
    %419 = arith.divf %417, %418 : vector<2x128xf32>
    %420 = vector.extract_strided_slice %388 {offsets = [0, 256], sizes = [2, 128], strides = [1, 1]} : vector<2x384xf32> to vector<2x128xf32>
    %421 = vector.extract_strided_slice %396 {offsets = [0, 256], sizes = [2, 128], strides = [1, 1]} : vector<2x384xf32> to vector<2x128xf32>
    %422 = arith.mulf %411, %421 : vector<2x128xf32>
    %423 = arith.addf %420, %422 : vector<2x128xf32>
    %424 = math.tanh %423 : vector<2x128xf32>
    %cst_180 = arith.constant 1.000000e+00 : f32
    %425 = vector.broadcast %cst_180 : f32 to vector<2x128xf32>
    %426 = arith.subf %425, %419 : vector<2x128xf32>
    %427 = arith.mulf %426, %424 : vector<2x128xf32>
    %428 = arith.mulf %419, %359 : vector<2x128xf32>
    %429 = arith.addf %427, %428 : vector<2x128xf32>
    %430 = vector.extract_strided_slice %389 {offsets = [0, 0], sizes = [2, 128], strides = [1, 1]} : vector<2x384xf32> to vector<2x128xf32>
    %431 = vector.extract_strided_slice %403 {offsets = [0, 0], sizes = [2, 128], strides = [1, 1]} : vector<2x384xf32> to vector<2x128xf32>
    %432 = arith.addf %430, %431 : vector<2x128xf32>
    %433 = arith.negf %432 : vector<2x128xf32>
    %434 = math.exp %433 : vector<2x128xf32>
    %cst_181 = arith.constant 1.000000e+00 : f32
    %435 = vector.broadcast %cst_181 : f32 to vector<2x128xf32>
    %436 = arith.addf %435, %434 : vector<2x128xf32>
    %437 = arith.divf %435, %436 : vector<2x128xf32>
    %438 = vector.extract_strided_slice %389 {offsets = [0, 128], sizes = [2, 128], strides = [1, 1]} : vector<2x384xf32> to vector<2x128xf32>
    %439 = vector.extract_strided_slice %403 {offsets = [0, 128], sizes = [2, 128], strides = [1, 1]} : vector<2x384xf32> to vector<2x128xf32>
    %440 = arith.addf %438, %439 : vector<2x128xf32>
    %441 = arith.negf %440 : vector<2x128xf32>
    %442 = math.exp %441 : vector<2x128xf32>
    %cst_182 = arith.constant 1.000000e+00 : f32
    %443 = vector.broadcast %cst_182 : f32 to vector<2x128xf32>
    %444 = arith.addf %443, %442 : vector<2x128xf32>
    %445 = arith.divf %443, %444 : vector<2x128xf32>
    %446 = vector.extract_strided_slice %389 {offsets = [0, 256], sizes = [2, 128], strides = [1, 1]} : vector<2x384xf32> to vector<2x128xf32>
    %447 = vector.extract_strided_slice %403 {offsets = [0, 256], sizes = [2, 128], strides = [1, 1]} : vector<2x384xf32> to vector<2x128xf32>
    %448 = arith.mulf %437, %447 : vector<2x128xf32>
    %449 = arith.addf %446, %448 : vector<2x128xf32>
    %450 = math.tanh %449 : vector<2x128xf32>
    %cst_183 = arith.constant 1.000000e+00 : f32
    %451 = vector.broadcast %cst_183 : f32 to vector<2x128xf32>
    %452 = arith.subf %451, %445 : vector<2x128xf32>
    %453 = arith.mulf %452, %450 : vector<2x128xf32>
    %454 = arith.mulf %445, %385 : vector<2x128xf32>
    %455 = arith.addf %453, %454 : vector<2x128xf32>
    %c6_184 = arith.constant 6 : index
    %c0_185 = arith.constant 0 : index
    %456 = vector.load %arg19[%c6_184, %c0_185] : memref<32x256xf32, #tpu.memory_space<vmem>>, vector<2x128xf32>
    tpu.vector_store %arg19[%c6_184, %c0_185], %429 {strides = array<i32>} : memref<32x256xf32, #tpu.memory_space<vmem>>, vector<2x128xf32>,
    %c24_186 = arith.constant 24 : index
    %c128_187 = arith.constant 128 : index
    %457 = vector.load %arg19[%c24_186, %c128_187] : memref<32x256xf32, #tpu.memory_space<vmem>>, vector<2x128xf32>
    tpu.vector_store %arg19[%c24_186, %c128_187], %455 {strides = array<i32>} : memref<32x256xf32, #tpu.memory_space<vmem>>, vector<2x128xf32>,
    %c8 = arith.constant 8 : index
    %c0_188 = arith.constant 0 : index
    %458 = vector.load %arg18[%c8, %c0_188] : memref<32x768xf32, #tpu.memory_space<vmem>>, vector<2x384xf32>
    %c22 = arith.constant 22 : index
    %c384_189 = arith.constant 384 : index
    %459 = vector.load %arg18[%c22, %c384_189] : memref<32x768xf32, #tpu.memory_space<vmem>>, vector<2x384xf32>
    %460 = arith.truncf %429 : vector<2x128xf32> to vector<2x128xbf16>
    %c0_190 = arith.constant 0 : index
    %c0_191 = arith.constant 0 : index
    %c0_192 = arith.constant 0 : index
    %461 = vector.load %arg12[%c0_190, %c0_191, %c0_192] : memref<2x128x384xbf16, #tpu.memory_space<vmem>>, vector<1x128x384xbf16>
    %462 = vector.shape_cast %461 : vector<1x128x384xbf16> to vector<128x384xbf16>
    %cst_193 = arith.constant dense<0.000000e+00> : vector<2x384xf32>
    %463 = tpu.matmul %460, %462, %cst_193 {dimension_numbers = #tpu.dot_dimension_numbers<[1], [0], [0], [1], [0, 0, 1, 1], [], []>} : vector<2x128xbf16>, vector<128x384xbf16>, vector<2x384xf32> -> vector<2x384xf32>
    %c0_194 = arith.constant 0 : index
    %c0_195 = arith.constant 0 : index
    %464 = vector.load %arg13[%c0_194, %c0_195] : memref<2x384xf32, #tpu.memory_space<vmem>>, vector<1x384xf32>
    %465 = vector.broadcast %464 : vector<1x384xf32> to vector<2x384xf32>
    %466 = arith.addf %463, %465 : vector<2x384xf32>
    %467 = arith.truncf %455 : vector<2x128xf32> to vector<2x128xbf16>
    %c1_196 = arith.constant 1 : index
    %c0_197 = arith.constant 0 : index
    %c0_198 = arith.constant 0 : index
    %468 = vector.load %arg12[%c1_196, %c0_197, %c0_198] : memref<2x128x384xbf16, #tpu.memory_space<vmem>>, vector<1x128x384xbf16>
    %469 = vector.shape_cast %468 : vector<1x128x384xbf16> to vector<128x384xbf16>
    %cst_199 = arith.constant dense<0.000000e+00> : vector<2x384xf32>
    %470 = tpu.matmul %467, %469, %cst_199 {dimension_numbers = #tpu.dot_dimension_numbers<[1], [0], [0], [1], [0, 0, 1, 1], [], []>} : vector<2x128xbf16>, vector<128x384xbf16>, vector<2x384xf32> -> vector<2x384xf32>
    %c1_200 = arith.constant 1 : index
    %c0_201 = arith.constant 0 : index
    %471 = vector.load %arg13[%c1_200, %c0_201] : memref<2x384xf32, #tpu.memory_space<vmem>>, vector<1x384xf32>
    %472 = vector.broadcast %471 : vector<1x384xf32> to vector<2x384xf32>
    %473 = arith.addf %470, %472 : vector<2x384xf32>
    %474 = vector.extract_strided_slice %458 {offsets = [0, 0], sizes = [2, 128], strides = [1, 1]} : vector<2x384xf32> to vector<2x128xf32>
    %475 = vector.extract_strided_slice %466 {offsets = [0, 0], sizes = [2, 128], strides = [1, 1]} : vector<2x384xf32> to vector<2x128xf32>
    %476 = arith.addf %474, %475 : vector<2x128xf32>
    %477 = arith.negf %476 : vector<2x128xf32>
    %478 = math.exp %477 : vector<2x128xf32>
    %cst_202 = arith.constant 1.000000e+00 : f32
    %479 = vector.broadcast %cst_202 : f32 to vector<2x128xf32>
    %480 = arith.addf %479, %478 : vector<2x128xf32>
    %481 = arith.divf %479, %480 : vector<2x128xf32>
    %482 = vector.extract_strided_slice %458 {offsets = [0, 128], sizes = [2, 128], strides = [1, 1]} : vector<2x384xf32> to vector<2x128xf32>
    %483 = vector.extract_strided_slice %466 {offsets = [0, 128], sizes = [2, 128], strides = [1, 1]} : vector<2x384xf32> to vector<2x128xf32>
    %484 = arith.addf %482, %483 : vector<2x128xf32>
    %485 = arith.negf %484 : vector<2x128xf32>
    %486 = math.exp %485 : vector<2x128xf32>
    %cst_203 = arith.constant 1.000000e+00 : f32
    %487 = vector.broadcast %cst_203 : f32 to vector<2x128xf32>
    %488 = arith.addf %487, %486 : vector<2x128xf32>
    %489 = arith.divf %487, %488 : vector<2x128xf32>
    %490 = vector.extract_strided_slice %458 {offsets = [0, 256], sizes = [2, 128], strides = [1, 1]} : vector<2x384xf32> to vector<2x128xf32>
    %491 = vector.extract_strided_slice %466 {offsets = [0, 256], sizes = [2, 128], strides = [1, 1]} : vector<2x384xf32> to vector<2x128xf32>
    %492 = arith.mulf %481, %491 : vector<2x128xf32>
    %493 = arith.addf %490, %492 : vector<2x128xf32>
    %494 = math.tanh %493 : vector<2x128xf32>
    %cst_204 = arith.constant 1.000000e+00 : f32
    %495 = vector.broadcast %cst_204 : f32 to vector<2x128xf32>
    %496 = arith.subf %495, %489 : vector<2x128xf32>
    %497 = arith.mulf %496, %494 : vector<2x128xf32>
    %498 = arith.mulf %489, %429 : vector<2x128xf32>
    %499 = arith.addf %497, %498 : vector<2x128xf32>
    %500 = vector.extract_strided_slice %459 {offsets = [0, 0], sizes = [2, 128], strides = [1, 1]} : vector<2x384xf32> to vector<2x128xf32>
    %501 = vector.extract_strided_slice %473 {offsets = [0, 0], sizes = [2, 128], strides = [1, 1]} : vector<2x384xf32> to vector<2x128xf32>
    %502 = arith.addf %500, %501 : vector<2x128xf32>
    %503 = arith.negf %502 : vector<2x128xf32>
    %504 = math.exp %503 : vector<2x128xf32>
    %cst_205 = arith.constant 1.000000e+00 : f32
    %505 = vector.broadcast %cst_205 : f32 to vector<2x128xf32>
    %506 = arith.addf %505, %504 : vector<2x128xf32>
    %507 = arith.divf %505, %506 : vector<2x128xf32>
    %508 = vector.extract_strided_slice %459 {offsets = [0, 128], sizes = [2, 128], strides = [1, 1]} : vector<2x384xf32> to vector<2x128xf32>
    %509 = vector.extract_strided_slice %473 {offsets = [0, 128], sizes = [2, 128], strides = [1, 1]} : vector<2x384xf32> to vector<2x128xf32>
    %510 = arith.addf %508, %509 : vector<2x128xf32>
    %511 = arith.negf %510 : vector<2x128xf32>
    %512 = math.exp %511 : vector<2x128xf32>
    %cst_206 = arith.constant 1.000000e+00 : f32
    %513 = vector.broadcast %cst_206 : f32 to vector<2x128xf32>
    %514 = arith.addf %513, %512 : vector<2x128xf32>
    %515 = arith.divf %513, %514 : vector<2x128xf32>
    %516 = vector.extract_strided_slice %459 {offsets = [0, 256], sizes = [2, 128], strides = [1, 1]} : vector<2x384xf32> to vector<2x128xf32>
    %517 = vector.extract_strided_slice %473 {offsets = [0, 256], sizes = [2, 128], strides = [1, 1]} : vector<2x384xf32> to vector<2x128xf32>
    %518 = arith.mulf %507, %517 : vector<2x128xf32>
    %519 = arith.addf %516, %518 : vector<2x128xf32>
    %520 = math.tanh %519 : vector<2x128xf32>
    %cst_207 = arith.constant 1.000000e+00 : f32
    %521 = vector.broadcast %cst_207 : f32 to vector<2x128xf32>
    %522 = arith.subf %521, %515 : vector<2x128xf32>
    %523 = arith.mulf %522, %520 : vector<2x128xf32>
    %524 = arith.mulf %515, %455 : vector<2x128xf32>
    %525 = arith.addf %523, %524 : vector<2x128xf32>
    %c8_208 = arith.constant 8 : index
    %c0_209 = arith.constant 0 : index
    %526 = vector.load %arg19[%c8_208, %c0_209] : memref<32x256xf32, #tpu.memory_space<vmem>>, vector<2x128xf32>
    tpu.vector_store %arg19[%c8_208, %c0_209], %499 {strides = array<i32>} : memref<32x256xf32, #tpu.memory_space<vmem>>, vector<2x128xf32>,
    %c22_210 = arith.constant 22 : index
    %c128_211 = arith.constant 128 : index
    %527 = vector.load %arg19[%c22_210, %c128_211] : memref<32x256xf32, #tpu.memory_space<vmem>>, vector<2x128xf32>
    tpu.vector_store %arg19[%c22_210, %c128_211], %525 {strides = array<i32>} : memref<32x256xf32, #tpu.memory_space<vmem>>, vector<2x128xf32>,
    %c10 = arith.constant 10 : index
    %c0_212 = arith.constant 0 : index
    %528 = vector.load %arg18[%c10, %c0_212] : memref<32x768xf32, #tpu.memory_space<vmem>>, vector<2x384xf32>
    %c20 = arith.constant 20 : index
    %c384_213 = arith.constant 384 : index
    %529 = vector.load %arg18[%c20, %c384_213] : memref<32x768xf32, #tpu.memory_space<vmem>>, vector<2x384xf32>
    %530 = arith.truncf %499 : vector<2x128xf32> to vector<2x128xbf16>
    %c0_214 = arith.constant 0 : index
    %c0_215 = arith.constant 0 : index
    %c0_216 = arith.constant 0 : index
    %531 = vector.load %arg12[%c0_214, %c0_215, %c0_216] : memref<2x128x384xbf16, #tpu.memory_space<vmem>>, vector<1x128x384xbf16>
    %532 = vector.shape_cast %531 : vector<1x128x384xbf16> to vector<128x384xbf16>
    %cst_217 = arith.constant dense<0.000000e+00> : vector<2x384xf32>
    %533 = tpu.matmul %530, %532, %cst_217 {dimension_numbers = #tpu.dot_dimension_numbers<[1], [0], [0], [1], [0, 0, 1, 1], [], []>} : vector<2x128xbf16>, vector<128x384xbf16>, vector<2x384xf32> -> vector<2x384xf32>
    %c0_218 = arith.constant 0 : index
    %c0_219 = arith.constant 0 : index
    %534 = vector.load %arg13[%c0_218, %c0_219] : memref<2x384xf32, #tpu.memory_space<vmem>>, vector<1x384xf32>
    %535 = vector.broadcast %534 : vector<1x384xf32> to vector<2x384xf32>
    %536 = arith.addf %533, %535 : vector<2x384xf32>
    %537 = arith.truncf %525 : vector<2x128xf32> to vector<2x128xbf16>
    %c1_220 = arith.constant 1 : index
    %c0_221 = arith.constant 0 : index
    %c0_222 = arith.constant 0 : index
    %538 = vector.load %arg12[%c1_220, %c0_221, %c0_222] : memref<2x128x384xbf16, #tpu.memory_space<vmem>>, vector<1x128x384xbf16>
    %539 = vector.shape_cast %538 : vector<1x128x384xbf16> to vector<128x384xbf16>
    %cst_223 = arith.constant dense<0.000000e+00> : vector<2x384xf32>
    %540 = tpu.matmul %537, %539, %cst_223 {dimension_numbers = #tpu.dot_dimension_numbers<[1], [0], [0], [1], [0, 0, 1, 1], [], []>} : vector<2x128xbf16>, vector<128x384xbf16>, vector<2x384xf32> -> vector<2x384xf32>
    %c1_224 = arith.constant 1 : index
    %c0_225 = arith.constant 0 : index
    %541 = vector.load %arg13[%c1_224, %c0_225] : memref<2x384xf32, #tpu.memory_space<vmem>>, vector<1x384xf32>
    %542 = vector.broadcast %541 : vector<1x384xf32> to vector<2x384xf32>
    %543 = arith.addf %540, %542 : vector<2x384xf32>
    %544 = vector.extract_strided_slice %528 {offsets = [0, 0], sizes = [2, 128], strides = [1, 1]} : vector<2x384xf32> to vector<2x128xf32>
    %545 = vector.extract_strided_slice %536 {offsets = [0, 0], sizes = [2, 128], strides = [1, 1]} : vector<2x384xf32> to vector<2x128xf32>
    %546 = arith.addf %544, %545 : vector<2x128xf32>
    %547 = arith.negf %546 : vector<2x128xf32>
    %548 = math.exp %547 : vector<2x128xf32>
    %cst_226 = arith.constant 1.000000e+00 : f32
    %549 = vector.broadcast %cst_226 : f32 to vector<2x128xf32>
    %550 = arith.addf %549, %548 : vector<2x128xf32>
    %551 = arith.divf %549, %550 : vector<2x128xf32>
    %552 = vector.extract_strided_slice %528 {offsets = [0, 128], sizes = [2, 128], strides = [1, 1]} : vector<2x384xf32> to vector<2x128xf32>
    %553 = vector.extract_strided_slice %536 {offsets = [0, 128], sizes = [2, 128], strides = [1, 1]} : vector<2x384xf32> to vector<2x128xf32>
    %554 = arith.addf %552, %553 : vector<2x128xf32>
    %555 = arith.negf %554 : vector<2x128xf32>
    %556 = math.exp %555 : vector<2x128xf32>
    %cst_227 = arith.constant 1.000000e+00 : f32
    %557 = vector.broadcast %cst_227 : f32 to vector<2x128xf32>
    %558 = arith.addf %557, %556 : vector<2x128xf32>
    %559 = arith.divf %557, %558 : vector<2x128xf32>
    %560 = vector.extract_strided_slice %528 {offsets = [0, 256], sizes = [2, 128], strides = [1, 1]} : vector<2x384xf32> to vector<2x128xf32>
    %561 = vector.extract_strided_slice %536 {offsets = [0, 256], sizes = [2, 128], strides = [1, 1]} : vector<2x384xf32> to vector<2x128xf32>
    %562 = arith.mulf %551, %561 : vector<2x128xf32>
    %563 = arith.addf %560, %562 : vector<2x128xf32>
    %564 = math.tanh %563 : vector<2x128xf32>
    %cst_228 = arith.constant 1.000000e+00 : f32
    %565 = vector.broadcast %cst_228 : f32 to vector<2x128xf32>
    %566 = arith.subf %565, %559 : vector<2x128xf32>
    %567 = arith.mulf %566, %564 : vector<2x128xf32>
    %568 = arith.mulf %559, %499 : vector<2x128xf32>
    %569 = arith.addf %567, %568 : vector<2x128xf32>
    %570 = vector.extract_strided_slice %529 {offsets = [0, 0], sizes = [2, 128], strides = [1, 1]} : vector<2x384xf32> to vector<2x128xf32>
    %571 = vector.extract_strided_slice %543 {offsets = [0, 0], sizes = [2, 128], strides = [1, 1]} : vector<2x384xf32> to vector<2x128xf32>
    %572 = arith.addf %570, %571 : vector<2x128xf32>
    %573 = arith.negf %572 : vector<2x128xf32>
    %574 = math.exp %573 : vector<2x128xf32>
    %cst_229 = arith.constant 1.000000e+00 : f32
    %575 = vector.broadcast %cst_229 : f32 to vector<2x128xf32>
    %576 = arith.addf %575, %574 : vector<2x128xf32>
    %577 = arith.divf %575, %576 : vector<2x128xf32>
    %578 = vector.extract_strided_slice %529 {offsets = [0, 128], sizes = [2, 128], strides = [1, 1]} : vector<2x384xf32> to vector<2x128xf32>
    %579 = vector.extract_strided_slice %543 {offsets = [0, 128], sizes = [2, 128], strides = [1, 1]} : vector<2x384xf32> to vector<2x128xf32>
    %580 = arith.addf %578, %579 : vector<2x128xf32>
    %581 = arith.negf %580 : vector<2x128xf32>
    %582 = math.exp %581 : vector<2x128xf32>
    %cst_230 = arith.constant 1.000000e+00 : f32
    %583 = vector.broadcast %cst_230 : f32 to vector<2x128xf32>
    %584 = arith.addf %583, %582 : vector<2x128xf32>
    %585 = arith.divf %583, %584 : vector<2x128xf32>
    %586 = vector.extract_strided_slice %529 {offsets = [0, 256], sizes = [2, 128], strides = [1, 1]} : vector<2x384xf32> to vector<2x128xf32>
    %587 = vector.extract_strided_slice %543 {offsets = [0, 256], sizes = [2, 128], strides = [1, 1]} : vector<2x384xf32> to vector<2x128xf32>
    %588 = arith.mulf %577, %587 : vector<2x128xf32>
    %589 = arith.addf %586, %588 : vector<2x128xf32>
    %590 = math.tanh %589 : vector<2x128xf32>
    %cst_231 = arith.constant 1.000000e+00 : f32
    %591 = vector.broadcast %cst_231 : f32 to vector<2x128xf32>
    %592 = arith.subf %591, %585 : vector<2x128xf32>
    %593 = arith.mulf %592, %590 : vector<2x128xf32>
    %594 = arith.mulf %585, %525 : vector<2x128xf32>
    %595 = arith.addf %593, %594 : vector<2x128xf32>
    %c10_232 = arith.constant 10 : index
    %c0_233 = arith.constant 0 : index
    %596 = vector.load %arg19[%c10_232, %c0_233] : memref<32x256xf32, #tpu.memory_space<vmem>>, vector<2x128xf32>
    tpu.vector_store %arg19[%c10_232, %c0_233], %569 {strides = array<i32>} : memref<32x256xf32, #tpu.memory_space<vmem>>, vector<2x128xf32>,
    %c20_234 = arith.constant 20 : index
    %c128_235 = arith.constant 128 : index
    %597 = vector.load %arg19[%c20_234, %c128_235] : memref<32x256xf32, #tpu.memory_space<vmem>>, vector<2x128xf32>
    tpu.vector_store %arg19[%c20_234, %c128_235], %595 {strides = array<i32>} : memref<32x256xf32, #tpu.memory_space<vmem>>, vector<2x128xf32>,
    %c12 = arith.constant 12 : index
    %c0_236 = arith.constant 0 : index
    %598 = vector.load %arg18[%c12, %c0_236] : memref<32x768xf32, #tpu.memory_space<vmem>>, vector<2x384xf32>
    %c18 = arith.constant 18 : index
    %c384_237 = arith.constant 384 : index
    %599 = vector.load %arg18[%c18, %c384_237] : memref<32x768xf32, #tpu.memory_space<vmem>>, vector<2x384xf32>
    %600 = arith.truncf %569 : vector<2x128xf32> to vector<2x128xbf16>
    %c0_238 = arith.constant 0 : index
    %c0_239 = arith.constant 0 : index
    %c0_240 = arith.constant 0 : index
    %601 = vector.load %arg12[%c0_238, %c0_239, %c0_240] : memref<2x128x384xbf16, #tpu.memory_space<vmem>>, vector<1x128x384xbf16>
    %602 = vector.shape_cast %601 : vector<1x128x384xbf16> to vector<128x384xbf16>
    %cst_241 = arith.constant dense<0.000000e+00> : vector<2x384xf32>
    %603 = tpu.matmul %600, %602, %cst_241 {dimension_numbers = #tpu.dot_dimension_numbers<[1], [0], [0], [1], [0, 0, 1, 1], [], []>} : vector<2x128xbf16>, vector<128x384xbf16>, vector<2x384xf32> -> vector<2x384xf32>
    %c0_242 = arith.constant 0 : index
    %c0_243 = arith.constant 0 : index
    %604 = vector.load %arg13[%c0_242, %c0_243] : memref<2x384xf32, #tpu.memory_space<vmem>>, vector<1x384xf32>
    %605 = vector.broadcast %604 : vector<1x384xf32> to vector<2x384xf32>
    %606 = arith.addf %603, %605 : vector<2x384xf32>
    %607 = arith.truncf %595 : vector<2x128xf32> to vector<2x128xbf16>
    %c1_244 = arith.constant 1 : index
    %c0_245 = arith.constant 0 : index
    %c0_246 = arith.constant 0 : index
    %608 = vector.load %arg12[%c1_244, %c0_245, %c0_246] : memref<2x128x384xbf16, #tpu.memory_space<vmem>>, vector<1x128x384xbf16>
    %609 = vector.shape_cast %608 : vector<1x128x384xbf16> to vector<128x384xbf16>
    %cst_247 = arith.constant dense<0.000000e+00> : vector<2x384xf32>
    %610 = tpu.matmul %607, %609, %cst_247 {dimension_numbers = #tpu.dot_dimension_numbers<[1], [0], [0], [1], [0, 0, 1, 1], [], []>} : vector<2x128xbf16>, vector<128x384xbf16>, vector<2x384xf32> -> vector<2x384xf32>
    %c1_248 = arith.constant 1 : index
    %c0_249 = arith.constant 0 : index
    %611 = vector.load %arg13[%c1_248, %c0_249] : memref<2x384xf32, #tpu.memory_space<vmem>>, vector<1x384xf32>
    %612 = vector.broadcast %611 : vector<1x384xf32> to vector<2x384xf32>
    %613 = arith.addf %610, %612 : vector<2x384xf32>
    %614 = vector.extract_strided_slice %598 {offsets = [0, 0], sizes = [2, 128], strides = [1, 1]} : vector<2x384xf32> to vector<2x128xf32>
    %615 = vector.extract_strided_slice %606 {offsets = [0, 0], sizes = [2, 128], strides = [1, 1]} : vector<2x384xf32> to vector<2x128xf32>
    %616 = arith.addf %614, %615 : vector<2x128xf32>
    %617 = arith.negf %616 : vector<2x128xf32>
    %618 = math.exp %617 : vector<2x128xf32>
    %cst_250 = arith.constant 1.000000e+00 : f32
    %619 = vector.broadcast %cst_250 : f32 to vector<2x128xf32>
    %620 = arith.addf %619, %618 : vector<2x128xf32>
    %621 = arith.divf %619, %620 : vector<2x128xf32>
    %622 = vector.extract_strided_slice %598 {offsets = [0, 128], sizes = [2, 128], strides = [1, 1]} : vector<2x384xf32> to vector<2x128xf32>
    %623 = vector.extract_strided_slice %606 {offsets = [0, 128], sizes = [2, 128], strides = [1, 1]} : vector<2x384xf32> to vector<2x128xf32>
    %624 = arith.addf %622, %623 : vector<2x128xf32>
    %625 = arith.negf %624 : vector<2x128xf32>
    %626 = math.exp %625 : vector<2x128xf32>
    %cst_251 = arith.constant 1.000000e+00 : f32
    %627 = vector.broadcast %cst_251 : f32 to vector<2x128xf32>
    %628 = arith.addf %627, %626 : vector<2x128xf32>
    %629 = arith.divf %627, %628 : vector<2x128xf32>
    %630 = vector.extract_strided_slice %598 {offsets = [0, 256], sizes = [2, 128], strides = [1, 1]} : vector<2x384xf32> to vector<2x128xf32>
    %631 = vector.extract_strided_slice %606 {offsets = [0, 256], sizes = [2, 128], strides = [1, 1]} : vector<2x384xf32> to vector<2x128xf32>
    %632 = arith.mulf %621, %631 : vector<2x128xf32>
    %633 = arith.addf %630, %632 : vector<2x128xf32>
    %634 = math.tanh %633 : vector<2x128xf32>
    %cst_252 = arith.constant 1.000000e+00 : f32
    %635 = vector.broadcast %cst_252 : f32 to vector<2x128xf32>
    %636 = arith.subf %635, %629 : vector<2x128xf32>
    %637 = arith.mulf %636, %634 : vector<2x128xf32>
    %638 = arith.mulf %629, %569 : vector<2x128xf32>
    %639 = arith.addf %637, %638 : vector<2x128xf32>
    %640 = vector.extract_strided_slice %599 {offsets = [0, 0], sizes = [2, 128], strides = [1, 1]} : vector<2x384xf32> to vector<2x128xf32>
    %641 = vector.extract_strided_slice %613 {offsets = [0, 0], sizes = [2, 128], strides = [1, 1]} : vector<2x384xf32> to vector<2x128xf32>
    %642 = arith.addf %640, %641 : vector<2x128xf32>
    %643 = arith.negf %642 : vector<2x128xf32>
    %644 = math.exp %643 : vector<2x128xf32>
    %cst_253 = arith.constant 1.000000e+00 : f32
    %645 = vector.broadcast %cst_253 : f32 to vector<2x128xf32>
    %646 = arith.addf %645, %644 : vector<2x128xf32>
    %647 = arith.divf %645, %646 : vector<2x128xf32>
    %648 = vector.extract_strided_slice %599 {offsets = [0, 128], sizes = [2, 128], strides = [1, 1]} : vector<2x384xf32> to vector<2x128xf32>
    %649 = vector.extract_strided_slice %613 {offsets = [0, 128], sizes = [2, 128], strides = [1, 1]} : vector<2x384xf32> to vector<2x128xf32>
    %650 = arith.addf %648, %649 : vector<2x128xf32>
    %651 = arith.negf %650 : vector<2x128xf32>
    %652 = math.exp %651 : vector<2x128xf32>
    %cst_254 = arith.constant 1.000000e+00 : f32
    %653 = vector.broadcast %cst_254 : f32 to vector<2x128xf32>
    %654 = arith.addf %653, %652 : vector<2x128xf32>
    %655 = arith.divf %653, %654 : vector<2x128xf32>
    %656 = vector.extract_strided_slice %599 {offsets = [0, 256], sizes = [2, 128], strides = [1, 1]} : vector<2x384xf32> to vector<2x128xf32>
    %657 = vector.extract_strided_slice %613 {offsets = [0, 256], sizes = [2, 128], strides = [1, 1]} : vector<2x384xf32> to vector<2x128xf32>
    %658 = arith.mulf %647, %657 : vector<2x128xf32>
    %659 = arith.addf %656, %658 : vector<2x128xf32>
    %660 = math.tanh %659 : vector<2x128xf32>
    %cst_255 = arith.constant 1.000000e+00 : f32
    %661 = vector.broadcast %cst_255 : f32 to vector<2x128xf32>
    %662 = arith.subf %661, %655 : vector<2x128xf32>
    %663 = arith.mulf %662, %660 : vector<2x128xf32>
    %664 = arith.mulf %655, %595 : vector<2x128xf32>
    %665 = arith.addf %663, %664 : vector<2x128xf32>
    %c12_256 = arith.constant 12 : index
    %c0_257 = arith.constant 0 : index
    %666 = vector.load %arg19[%c12_256, %c0_257] : memref<32x256xf32, #tpu.memory_space<vmem>>, vector<2x128xf32>
    tpu.vector_store %arg19[%c12_256, %c0_257], %639 {strides = array<i32>} : memref<32x256xf32, #tpu.memory_space<vmem>>, vector<2x128xf32>,
    %c18_258 = arith.constant 18 : index
    %c128_259 = arith.constant 128 : index
    %667 = vector.load %arg19[%c18_258, %c128_259] : memref<32x256xf32, #tpu.memory_space<vmem>>, vector<2x128xf32>
    tpu.vector_store %arg19[%c18_258, %c128_259], %665 {strides = array<i32>} : memref<32x256xf32, #tpu.memory_space<vmem>>, vector<2x128xf32>,
    %c14 = arith.constant 14 : index
    %c0_260 = arith.constant 0 : index
    %668 = vector.load %arg18[%c14, %c0_260] : memref<32x768xf32, #tpu.memory_space<vmem>>, vector<2x384xf32>
    %c16 = arith.constant 16 : index
    %c384_261 = arith.constant 384 : index
    %669 = vector.load %arg18[%c16, %c384_261] : memref<32x768xf32, #tpu.memory_space<vmem>>, vector<2x384xf32>
    %670 = arith.truncf %639 : vector<2x128xf32> to vector<2x128xbf16>
    %c0_262 = arith.constant 0 : index
    %c0_263 = arith.constant 0 : index
    %c0_264 = arith.constant 0 : index
    %671 = vector.load %arg12[%c0_262, %c0_263, %c0_264] : memref<2x128x384xbf16, #tpu.memory_space<vmem>>, vector<1x128x384xbf16>
    %672 = vector.shape_cast %671 : vector<1x128x384xbf16> to vector<128x384xbf16>
    %cst_265 = arith.constant dense<0.000000e+00> : vector<2x384xf32>
    %673 = tpu.matmul %670, %672, %cst_265 {dimension_numbers = #tpu.dot_dimension_numbers<[1], [0], [0], [1], [0, 0, 1, 1], [], []>} : vector<2x128xbf16>, vector<128x384xbf16>, vector<2x384xf32> -> vector<2x384xf32>
    %c0_266 = arith.constant 0 : index
    %c0_267 = arith.constant 0 : index
    %674 = vector.load %arg13[%c0_266, %c0_267] : memref<2x384xf32, #tpu.memory_space<vmem>>, vector<1x384xf32>
    %675 = vector.broadcast %674 : vector<1x384xf32> to vector<2x384xf32>
    %676 = arith.addf %673, %675 : vector<2x384xf32>
    %677 = arith.truncf %665 : vector<2x128xf32> to vector<2x128xbf16>
    %c1_268 = arith.constant 1 : index
    %c0_269 = arith.constant 0 : index
    %c0_270 = arith.constant 0 : index
    %678 = vector.load %arg12[%c1_268, %c0_269, %c0_270] : memref<2x128x384xbf16, #tpu.memory_space<vmem>>, vector<1x128x384xbf16>
    %679 = vector.shape_cast %678 : vector<1x128x384xbf16> to vector<128x384xbf16>
    %cst_271 = arith.constant dense<0.000000e+00> : vector<2x384xf32>
    %680 = tpu.matmul %677, %679, %cst_271 {dimension_numbers = #tpu.dot_dimension_numbers<[1], [0], [0], [1], [0, 0, 1, 1], [], []>} : vector<2x128xbf16>, vector<128x384xbf16>, vector<2x384xf32> -> vector<2x384xf32>
    %c1_272 = arith.constant 1 : index
    %c0_273 = arith.constant 0 : index
    %681 = vector.load %arg13[%c1_272, %c0_273] : memref<2x384xf32, #tpu.memory_space<vmem>>, vector<1x384xf32>
    %682 = vector.broadcast %681 : vector<1x384xf32> to vector<2x384xf32>
    %683 = arith.addf %680, %682 : vector<2x384xf32>
    %684 = vector.extract_strided_slice %668 {offsets = [0, 0], sizes = [2, 128], strides = [1, 1]} : vector<2x384xf32> to vector<2x128xf32>
    %685 = vector.extract_strided_slice %676 {offsets = [0, 0], sizes = [2, 128], strides = [1, 1]} : vector<2x384xf32> to vector<2x128xf32>
    %686 = arith.addf %684, %685 : vector<2x128xf32>
    %687 = arith.negf %686 : vector<2x128xf32>
    %688 = math.exp %687 : vector<2x128xf32>
    %cst_274 = arith.constant 1.000000e+00 : f32
    %689 = vector.broadcast %cst_274 : f32 to vector<2x128xf32>
    %690 = arith.addf %689, %688 : vector<2x128xf32>
    %691 = arith.divf %689, %690 : vector<2x128xf32>
    %692 = vector.extract_strided_slice %668 {offsets = [0, 128], sizes = [2, 128], strides = [1, 1]} : vector<2x384xf32> to vector<2x128xf32>
    %693 = vector.extract_strided_slice %676 {offsets = [0, 128], sizes = [2, 128], strides = [1, 1]} : vector<2x384xf32> to vector<2x128xf32>
    %694 = arith.addf %692, %693 : vector<2x128xf32>
    %695 = arith.negf %694 : vector<2x128xf32>
    %696 = math.exp %695 : vector<2x128xf32>
    %cst_275 = arith.constant 1.000000e+00 : f32
    %697 = vector.broadcast %cst_275 : f32 to vector<2x128xf32>
    %698 = arith.addf %697, %696 : vector<2x128xf32>
    %699 = arith.divf %697, %698 : vector<2x128xf32>
    %700 = vector.extract_strided_slice %668 {offsets = [0, 256], sizes = [2, 128], strides = [1, 1]} : vector<2x384xf32> to vector<2x128xf32>
    %701 = vector.extract_strided_slice %676 {offsets = [0, 256], sizes = [2, 128], strides = [1, 1]} : vector<2x384xf32> to vector<2x128xf32>
    %702 = arith.mulf %691, %701 : vector<2x128xf32>
    %703 = arith.addf %700, %702 : vector<2x128xf32>
    %704 = math.tanh %703 : vector<2x128xf32>
    %cst_276 = arith.constant 1.000000e+00 : f32
    %705 = vector.broadcast %cst_276 : f32 to vector<2x128xf32>
    %706 = arith.subf %705, %699 : vector<2x128xf32>
    %707 = arith.mulf %706, %704 : vector<2x128xf32>
    %708 = arith.mulf %699, %639 : vector<2x128xf32>
    %709 = arith.addf %707, %708 : vector<2x128xf32>
    %710 = vector.extract_strided_slice %669 {offsets = [0, 0], sizes = [2, 128], strides = [1, 1]} : vector<2x384xf32> to vector<2x128xf32>
    %711 = vector.extract_strided_slice %683 {offsets = [0, 0], sizes = [2, 128], strides = [1, 1]} : vector<2x384xf32> to vector<2x128xf32>
    %712 = arith.addf %710, %711 : vector<2x128xf32>
    %713 = arith.negf %712 : vector<2x128xf32>
    %714 = math.exp %713 : vector<2x128xf32>
    %cst_277 = arith.constant 1.000000e+00 : f32
    %715 = vector.broadcast %cst_277 : f32 to vector<2x128xf32>
    %716 = arith.addf %715, %714 : vector<2x128xf32>
    %717 = arith.divf %715, %716 : vector<2x128xf32>
    %718 = vector.extract_strided_slice %669 {offsets = [0, 128], sizes = [2, 128], strides = [1, 1]} : vector<2x384xf32> to vector<2x128xf32>
    %719 = vector.extract_strided_slice %683 {offsets = [0, 128], sizes = [2, 128], strides = [1, 1]} : vector<2x384xf32> to vector<2x128xf32>
    %720 = arith.addf %718, %719 : vector<2x128xf32>
    %721 = arith.negf %720 : vector<2x128xf32>
    %722 = math.exp %721 : vector<2x128xf32>
    %cst_278 = arith.constant 1.000000e+00 : f32
    %723 = vector.broadcast %cst_278 : f32 to vector<2x128xf32>
    %724 = arith.addf %723, %722 : vector<2x128xf32>
    %725 = arith.divf %723, %724 : vector<2x128xf32>
    %726 = vector.extract_strided_slice %669 {offsets = [0, 256], sizes = [2, 128], strides = [1, 1]} : vector<2x384xf32> to vector<2x128xf32>
    %727 = vector.extract_strided_slice %683 {offsets = [0, 256], sizes = [2, 128], strides = [1, 1]} : vector<2x384xf32> to vector<2x128xf32>
    %728 = arith.mulf %717, %727 : vector<2x128xf32>
    %729 = arith.addf %726, %728 : vector<2x128xf32>
    %730 = math.tanh %729 : vector<2x128xf32>
    %cst_279 = arith.constant 1.000000e+00 : f32
    %731 = vector.broadcast %cst_279 : f32 to vector<2x128xf32>
    %732 = arith.subf %731, %725 : vector<2x128xf32>
    %733 = arith.mulf %732, %730 : vector<2x128xf32>
    %734 = arith.mulf %725, %665 : vector<2x128xf32>
    %735 = arith.addf %733, %734 : vector<2x128xf32>
    %c14_280 = arith.constant 14 : index
    %c0_281 = arith.constant 0 : index
    %736 = vector.load %arg19[%c14_280, %c0_281] : memref<32x256xf32, #tpu.memory_space<vmem>>, vector<2x128xf32>
    tpu.vector_store %arg19[%c14_280, %c0_281], %709 {strides = array<i32>} : memref<32x256xf32, #tpu.memory_space<vmem>>, vector<2x128xf32>,
    %c16_282 = arith.constant 16 : index
    %c128_283 = arith.constant 128 : index
    %737 = vector.load %arg19[%c16_282, %c128_283] : memref<32x256xf32, #tpu.memory_space<vmem>>, vector<2x128xf32>
    tpu.vector_store %arg19[%c16_282, %c128_283], %735 {strides = array<i32>} : memref<32x256xf32, #tpu.memory_space<vmem>>, vector<2x128xf32>,
    %c16_284 = arith.constant 16 : index
    %c0_285 = arith.constant 0 : index
    %738 = vector.load %arg18[%c16_284, %c0_285] : memref<32x768xf32, #tpu.memory_space<vmem>>, vector<2x384xf32>
    %c14_286 = arith.constant 14 : index
    %c384_287 = arith.constant 384 : index
    %739 = vector.load %arg18[%c14_286, %c384_287] : memref<32x768xf32, #tpu.memory_space<vmem>>, vector<2x384xf32>
    %740 = arith.truncf %709 : vector<2x128xf32> to vector<2x128xbf16>
    %c0_288 = arith.constant 0 : index
    %c0_289 = arith.constant 0 : index
    %c0_290 = arith.constant 0 : index
    %741 = vector.load %arg12[%c0_288, %c0_289, %c0_290] : memref<2x128x384xbf16, #tpu.memory_space<vmem>>, vector<1x128x384xbf16>
    %742 = vector.shape_cast %741 : vector<1x128x384xbf16> to vector<128x384xbf16>
    %cst_291 = arith.constant dense<0.000000e+00> : vector<2x384xf32>
    %743 = tpu.matmul %740, %742, %cst_291 {dimension_numbers = #tpu.dot_dimension_numbers<[1], [0], [0], [1], [0, 0, 1, 1], [], []>} : vector<2x128xbf16>, vector<128x384xbf16>, vector<2x384xf32> -> vector<2x384xf32>
    %c0_292 = arith.constant 0 : index
    %c0_293 = arith.constant 0 : index
    %744 = vector.load %arg13[%c0_292, %c0_293] : memref<2x384xf32, #tpu.memory_space<vmem>>, vector<1x384xf32>
    %745 = vector.broadcast %744 : vector<1x384xf32> to vector<2x384xf32>
    %746 = arith.addf %743, %745 : vector<2x384xf32>
    %747 = arith.truncf %735 : vector<2x128xf32> to vector<2x128xbf16>
    %c1_294 = arith.constant 1 : index
    %c0_295 = arith.constant 0 : index
    %c0_296 = arith.constant 0 : index
    %748 = vector.load %arg12[%c1_294, %c0_295, %c0_296] : memref<2x128x384xbf16, #tpu.memory_space<vmem>>, vector<1x128x384xbf16>
    %749 = vector.shape_cast %748 : vector<1x128x384xbf16> to vector<128x384xbf16>
    %cst_297 = arith.constant dense<0.000000e+00> : vector<2x384xf32>
    %750 = tpu.matmul %747, %749, %cst_297 {dimension_numbers = #tpu.dot_dimension_numbers<[1], [0], [0], [1], [0, 0, 1, 1], [], []>} : vector<2x128xbf16>, vector<128x384xbf16>, vector<2x384xf32> -> vector<2x384xf32>
    %c1_298 = arith.constant 1 : index
    %c0_299 = arith.constant 0 : index
    %751 = vector.load %arg13[%c1_298, %c0_299] : memref<2x384xf32, #tpu.memory_space<vmem>>, vector<1x384xf32>
    %752 = vector.broadcast %751 : vector<1x384xf32> to vector<2x384xf32>
    %753 = arith.addf %750, %752 : vector<2x384xf32>
    %754 = vector.extract_strided_slice %738 {offsets = [0, 0], sizes = [2, 128], strides = [1, 1]} : vector<2x384xf32> to vector<2x128xf32>
    %755 = vector.extract_strided_slice %746 {offsets = [0, 0], sizes = [2, 128], strides = [1, 1]} : vector<2x384xf32> to vector<2x128xf32>
    %756 = arith.addf %754, %755 : vector<2x128xf32>
    %757 = arith.negf %756 : vector<2x128xf32>
    %758 = math.exp %757 : vector<2x128xf32>
    %cst_300 = arith.constant 1.000000e+00 : f32
    %759 = vector.broadcast %cst_300 : f32 to vector<2x128xf32>
    %760 = arith.addf %759, %758 : vector<2x128xf32>
    %761 = arith.divf %759, %760 : vector<2x128xf32>
    %762 = vector.extract_strided_slice %738 {offsets = [0, 128], sizes = [2, 128], strides = [1, 1]} : vector<2x384xf32> to vector<2x128xf32>
    %763 = vector.extract_strided_slice %746 {offsets = [0, 128], sizes = [2, 128], strides = [1, 1]} : vector<2x384xf32> to vector<2x128xf32>
    %764 = arith.addf %762, %763 : vector<2x128xf32>
    %765 = arith.negf %764 : vector<2x128xf32>
    %766 = math.exp %765 : vector<2x128xf32>
    %cst_301 = arith.constant 1.000000e+00 : f32
    %767 = vector.broadcast %cst_301 : f32 to vector<2x128xf32>
    %768 = arith.addf %767, %766 : vector<2x128xf32>
    %769 = arith.divf %767, %768 : vector<2x128xf32>
    %770 = vector.extract_strided_slice %738 {offsets = [0, 256], sizes = [2, 128], strides = [1, 1]} : vector<2x384xf32> to vector<2x128xf32>
    %771 = vector.extract_strided_slice %746 {offsets = [0, 256], sizes = [2, 128], strides = [1, 1]} : vector<2x384xf32> to vector<2x128xf32>
    %772 = arith.mulf %761, %771 : vector<2x128xf32>
    %773 = arith.addf %770, %772 : vector<2x128xf32>
    %774 = math.tanh %773 : vector<2x128xf32>
    %cst_302 = arith.constant 1.000000e+00 : f32
    %775 = vector.broadcast %cst_302 : f32 to vector<2x128xf32>
    %776 = arith.subf %775, %769 : vector<2x128xf32>
    %777 = arith.mulf %776, %774 : vector<2x128xf32>
    %778 = arith.mulf %769, %709 : vector<2x128xf32>
    %779 = arith.addf %777, %778 : vector<2x128xf32>
    %780 = vector.extract_strided_slice %739 {offsets = [0, 0], sizes = [2, 128], strides = [1, 1]} : vector<2x384xf32> to vector<2x128xf32>
    %781 = vector.extract_strided_slice %753 {offsets = [0, 0], sizes = [2, 128], strides = [1, 1]} : vector<2x384xf32> to vector<2x128xf32>
    %782 = arith.addf %780, %781 : vector<2x128xf32>
    %783 = arith.negf %782 : vector<2x128xf32>
    %784 = math.exp %783 : vector<2x128xf32>
    %cst_303 = arith.constant 1.000000e+00 : f32
    %785 = vector.broadcast %cst_303 : f32 to vector<2x128xf32>
    %786 = arith.addf %785, %784 : vector<2x128xf32>
    %787 = arith.divf %785, %786 : vector<2x128xf32>
    %788 = vector.extract_strided_slice %739 {offsets = [0, 128], sizes = [2, 128], strides = [1, 1]} : vector<2x384xf32> to vector<2x128xf32>
    %789 = vector.extract_strided_slice %753 {offsets = [0, 128], sizes = [2, 128], strides = [1, 1]} : vector<2x384xf32> to vector<2x128xf32>
    %790 = arith.addf %788, %789 : vector<2x128xf32>
    %791 = arith.negf %790 : vector<2x128xf32>
    %792 = math.exp %791 : vector<2x128xf32>
    %cst_304 = arith.constant 1.000000e+00 : f32
    %793 = vector.broadcast %cst_304 : f32 to vector<2x128xf32>
    %794 = arith.addf %793, %792 : vector<2x128xf32>
    %795 = arith.divf %793, %794 : vector<2x128xf32>
    %796 = vector.extract_strided_slice %739 {offsets = [0, 256], sizes = [2, 128], strides = [1, 1]} : vector<2x384xf32> to vector<2x128xf32>
    %797 = vector.extract_strided_slice %753 {offsets = [0, 256], sizes = [2, 128], strides = [1, 1]} : vector<2x384xf32> to vector<2x128xf32>
    %798 = arith.mulf %787, %797 : vector<2x128xf32>
    %799 = arith.addf %796, %798 : vector<2x128xf32>
    %800 = math.tanh %799 : vector<2x128xf32>
    %cst_305 = arith.constant 1.000000e+00 : f32
    %801 = vector.broadcast %cst_305 : f32 to vector<2x128xf32>
    %802 = arith.subf %801, %795 : vector<2x128xf32>
    %803 = arith.mulf %802, %800 : vector<2x128xf32>
    %804 = arith.mulf %795, %735 : vector<2x128xf32>
    %805 = arith.addf %803, %804 : vector<2x128xf32>
    %c16_306 = arith.constant 16 : index
    %c0_307 = arith.constant 0 : index
    %806 = vector.load %arg19[%c16_306, %c0_307] : memref<32x256xf32, #tpu.memory_space<vmem>>, vector<2x128xf32>
    tpu.vector_store %arg19[%c16_306, %c0_307], %779 {strides = array<i32>} : memref<32x256xf32, #tpu.memory_space<vmem>>, vector<2x128xf32>,
    %c14_308 = arith.constant 14 : index
    %c128_309 = arith.constant 128 : index
    %807 = vector.load %arg19[%c14_308, %c128_309] : memref<32x256xf32, #tpu.memory_space<vmem>>, vector<2x128xf32>
    tpu.vector_store %arg19[%c14_308, %c128_309], %805 {strides = array<i32>} : memref<32x256xf32, #tpu.memory_space<vmem>>, vector<2x128xf32>,
    %c18_310 = arith.constant 18 : index
    %c0_311 = arith.constant 0 : index
    %808 = vector.load %arg18[%c18_310, %c0_311] : memref<32x768xf32, #tpu.memory_space<vmem>>, vector<2x384xf32>
    %c12_312 = arith.constant 12 : index
    %c384_313 = arith.constant 384 : index
    %809 = vector.load %arg18[%c12_312, %c384_313] : memref<32x768xf32, #tpu.memory_space<vmem>>, vector<2x384xf32>
    %810 = arith.truncf %779 : vector<2x128xf32> to vector<2x128xbf16>
    %c0_314 = arith.constant 0 : index
    %c0_315 = arith.constant 0 : index
    %c0_316 = arith.constant 0 : index
    %811 = vector.load %arg12[%c0_314, %c0_315, %c0_316] : memref<2x128x384xbf16, #tpu.memory_space<vmem>>, vector<1x128x384xbf16>
    %812 = vector.shape_cast %811 : vector<1x128x384xbf16> to vector<128x384xbf16>
    %cst_317 = arith.constant dense<0.000000e+00> : vector<2x384xf32>
    %813 = tpu.matmul %810, %812, %cst_317 {dimension_numbers = #tpu.dot_dimension_numbers<[1], [0], [0], [1], [0, 0, 1, 1], [], []>} : vector<2x128xbf16>, vector<128x384xbf16>, vector<2x384xf32> -> vector<2x384xf32>
    %c0_318 = arith.constant 0 : index
    %c0_319 = arith.constant 0 : index
    %814 = vector.load %arg13[%c0_318, %c0_319] : memref<2x384xf32, #tpu.memory_space<vmem>>, vector<1x384xf32>
    %815 = vector.broadcast %814 : vector<1x384xf32> to vector<2x384xf32>
    %816 = arith.addf %813, %815 : vector<2x384xf32>
    %817 = arith.truncf %805 : vector<2x128xf32> to vector<2x128xbf16>
    %c1_320 = arith.constant 1 : index
    %c0_321 = arith.constant 0 : index
    %c0_322 = arith.constant 0 : index
    %818 = vector.load %arg12[%c1_320, %c0_321, %c0_322] : memref<2x128x384xbf16, #tpu.memory_space<vmem>>, vector<1x128x384xbf16>
    %819 = vector.shape_cast %818 : vector<1x128x384xbf16> to vector<128x384xbf16>
    %cst_323 = arith.constant dense<0.000000e+00> : vector<2x384xf32>
    %820 = tpu.matmul %817, %819, %cst_323 {dimension_numbers = #tpu.dot_dimension_numbers<[1], [0], [0], [1], [0, 0, 1, 1], [], []>} : vector<2x128xbf16>, vector<128x384xbf16>, vector<2x384xf32> -> vector<2x384xf32>
    %c1_324 = arith.constant 1 : index
    %c0_325 = arith.constant 0 : index
    %821 = vector.load %arg13[%c1_324, %c0_325] : memref<2x384xf32, #tpu.memory_space<vmem>>, vector<1x384xf32>
    %822 = vector.broadcast %821 : vector<1x384xf32> to vector<2x384xf32>
    %823 = arith.addf %820, %822 : vector<2x384xf32>
    %824 = vector.extract_strided_slice %808 {offsets = [0, 0], sizes = [2, 128], strides = [1, 1]} : vector<2x384xf32> to vector<2x128xf32>
    %825 = vector.extract_strided_slice %816 {offsets = [0, 0], sizes = [2, 128], strides = [1, 1]} : vector<2x384xf32> to vector<2x128xf32>
    %826 = arith.addf %824, %825 : vector<2x128xf32>
    %827 = arith.negf %826 : vector<2x128xf32>
    %828 = math.exp %827 : vector<2x128xf32>
    %cst_326 = arith.constant 1.000000e+00 : f32
    %829 = vector.broadcast %cst_326 : f32 to vector<2x128xf32>
    %830 = arith.addf %829, %828 : vector<2x128xf32>
    %831 = arith.divf %829, %830 : vector<2x128xf32>
    %832 = vector.extract_strided_slice %808 {offsets = [0, 128], sizes = [2, 128], strides = [1, 1]} : vector<2x384xf32> to vector<2x128xf32>
    %833 = vector.extract_strided_slice %816 {offsets = [0, 128], sizes = [2, 128], strides = [1, 1]} : vector<2x384xf32> to vector<2x128xf32>
    %834 = arith.addf %832, %833 : vector<2x128xf32>
    %835 = arith.negf %834 : vector<2x128xf32>
    %836 = math.exp %835 : vector<2x128xf32>
    %cst_327 = arith.constant 1.000000e+00 : f32
    %837 = vector.broadcast %cst_327 : f32 to vector<2x128xf32>
    %838 = arith.addf %837, %836 : vector<2x128xf32>
    %839 = arith.divf %837, %838 : vector<2x128xf32>
    %840 = vector.extract_strided_slice %808 {offsets = [0, 256], sizes = [2, 128], strides = [1, 1]} : vector<2x384xf32> to vector<2x128xf32>
    %841 = vector.extract_strided_slice %816 {offsets = [0, 256], sizes = [2, 128], strides = [1, 1]} : vector<2x384xf32> to vector<2x128xf32>
    %842 = arith.mulf %831, %841 : vector<2x128xf32>
    %843 = arith.addf %840, %842 : vector<2x128xf32>
    %844 = math.tanh %843 : vector<2x128xf32>
    %cst_328 = arith.constant 1.000000e+00 : f32
    %845 = vector.broadcast %cst_328 : f32 to vector<2x128xf32>
    %846 = arith.subf %845, %839 : vector<2x128xf32>
    %847 = arith.mulf %846, %844 : vector<2x128xf32>
    %848 = arith.mulf %839, %779 : vector<2x128xf32>
    %849 = arith.addf %847, %848 : vector<2x128xf32>
    %850 = vector.extract_strided_slice %809 {offsets = [0, 0], sizes = [2, 128], strides = [1, 1]} : vector<2x384xf32> to vector<2x128xf32>
    %851 = vector.extract_strided_slice %823 {offsets = [0, 0], sizes = [2, 128], strides = [1, 1]} : vector<2x384xf32> to vector<2x128xf32>
    %852 = arith.addf %850, %851 : vector<2x128xf32>
    %853 = arith.negf %852 : vector<2x128xf32>
    %854 = math.exp %853 : vector<2x128xf32>
    %cst_329 = arith.constant 1.000000e+00 : f32
    %855 = vector.broadcast %cst_329 : f32 to vector<2x128xf32>
    %856 = arith.addf %855, %854 : vector<2x128xf32>
    %857 = arith.divf %855, %856 : vector<2x128xf32>
    %858 = vector.extract_strided_slice %809 {offsets = [0, 128], sizes = [2, 128], strides = [1, 1]} : vector<2x384xf32> to vector<2x128xf32>
    %859 = vector.extract_strided_slice %823 {offsets = [0, 128], sizes = [2, 128], strides = [1, 1]} : vector<2x384xf32> to vector<2x128xf32>
    %860 = arith.addf %858, %859 : vector<2x128xf32>
    %861 = arith.negf %860 : vector<2x128xf32>
    %862 = math.exp %861 : vector<2x128xf32>
    %cst_330 = arith.constant 1.000000e+00 : f32
    %863 = vector.broadcast %cst_330 : f32 to vector<2x128xf32>
    %864 = arith.addf %863, %862 : vector<2x128xf32>
    %865 = arith.divf %863, %864 : vector<2x128xf32>
    %866 = vector.extract_strided_slice %809 {offsets = [0, 256], sizes = [2, 128], strides = [1, 1]} : vector<2x384xf32> to vector<2x128xf32>
    %867 = vector.extract_strided_slice %823 {offsets = [0, 256], sizes = [2, 128], strides = [1, 1]} : vector<2x384xf32> to vector<2x128xf32>
    %868 = arith.mulf %857, %867 : vector<2x128xf32>
    %869 = arith.addf %866, %868 : vector<2x128xf32>
    %870 = math.tanh %869 : vector<2x128xf32>
    %cst_331 = arith.constant 1.000000e+00 : f32
    %871 = vector.broadcast %cst_331 : f32 to vector<2x128xf32>
    %872 = arith.subf %871, %865 : vector<2x128xf32>
    %873 = arith.mulf %872, %870 : vector<2x128xf32>
    %874 = arith.mulf %865, %805 : vector<2x128xf32>
    %875 = arith.addf %873, %874 : vector<2x128xf32>
    %c18_332 = arith.constant 18 : index
    %c0_333 = arith.constant 0 : index
    %876 = vector.load %arg19[%c18_332, %c0_333] : memref<32x256xf32, #tpu.memory_space<vmem>>, vector<2x128xf32>
    tpu.vector_store %arg19[%c18_332, %c0_333], %849 {strides = array<i32>} : memref<32x256xf32, #tpu.memory_space<vmem>>, vector<2x128xf32>,
    %c12_334 = arith.constant 12 : index
    %c128_335 = arith.constant 128 : index
    %877 = vector.load %arg19[%c12_334, %c128_335] : memref<32x256xf32, #tpu.memory_space<vmem>>, vector<2x128xf32>
    tpu.vector_store %arg19[%c12_334, %c128_335], %875 {strides = array<i32>} : memref<32x256xf32, #tpu.memory_space<vmem>>, vector<2x128xf32>,
    %c20_336 = arith.constant 20 : index
    %c0_337 = arith.constant 0 : index
    %878 = vector.load %arg18[%c20_336, %c0_337] : memref<32x768xf32, #tpu.memory_space<vmem>>, vector<2x384xf32>
    %c10_338 = arith.constant 10 : index
    %c384_339 = arith.constant 384 : index
    %879 = vector.load %arg18[%c10_338, %c384_339] : memref<32x768xf32, #tpu.memory_space<vmem>>, vector<2x384xf32>
    %880 = arith.truncf %849 : vector<2x128xf32> to vector<2x128xbf16>
    %c0_340 = arith.constant 0 : index
    %c0_341 = arith.constant 0 : index
    %c0_342 = arith.constant 0 : index
    %881 = vector.load %arg12[%c0_340, %c0_341, %c0_342] : memref<2x128x384xbf16, #tpu.memory_space<vmem>>, vector<1x128x384xbf16>
    %882 = vector.shape_cast %881 : vector<1x128x384xbf16> to vector<128x384xbf16>
    %cst_343 = arith.constant dense<0.000000e+00> : vector<2x384xf32>
    %883 = tpu.matmul %880, %882, %cst_343 {dimension_numbers = #tpu.dot_dimension_numbers<[1], [0], [0], [1], [0, 0, 1, 1], [], []>} : vector<2x128xbf16>, vector<128x384xbf16>, vector<2x384xf32> -> vector<2x384xf32>
    %c0_344 = arith.constant 0 : index
    %c0_345 = arith.constant 0 : index
    %884 = vector.load %arg13[%c0_344, %c0_345] : memref<2x384xf32, #tpu.memory_space<vmem>>, vector<1x384xf32>
    %885 = vector.broadcast %884 : vector<1x384xf32> to vector<2x384xf32>
    %886 = arith.addf %883, %885 : vector<2x384xf32>
    %887 = arith.truncf %875 : vector<2x128xf32> to vector<2x128xbf16>
    %c1_346 = arith.constant 1 : index
    %c0_347 = arith.constant 0 : index
    %c0_348 = arith.constant 0 : index
    %888 = vector.load %arg12[%c1_346, %c0_347, %c0_348] : memref<2x128x384xbf16, #tpu.memory_space<vmem>>, vector<1x128x384xbf16>
    %889 = vector.shape_cast %888 : vector<1x128x384xbf16> to vector<128x384xbf16>
    %cst_349 = arith.constant dense<0.000000e+00> : vector<2x384xf32>
    %890 = tpu.matmul %887, %889, %cst_349 {dimension_numbers = #tpu.dot_dimension_numbers<[1], [0], [0], [1], [0, 0, 1, 1], [], []>} : vector<2x128xbf16>, vector<128x384xbf16>, vector<2x384xf32> -> vector<2x384xf32>
    %c1_350 = arith.constant 1 : index
    %c0_351 = arith.constant 0 : index
    %891 = vector.load %arg13[%c1_350, %c0_351] : memref<2x384xf32, #tpu.memory_space<vmem>>, vector<1x384xf32>
    %892 = vector.broadcast %891 : vector<1x384xf32> to vector<2x384xf32>
    %893 = arith.addf %890, %892 : vector<2x384xf32>
    %894 = vector.extract_strided_slice %878 {offsets = [0, 0], sizes = [2, 128], strides = [1, 1]} : vector<2x384xf32> to vector<2x128xf32>
    %895 = vector.extract_strided_slice %886 {offsets = [0, 0], sizes = [2, 128], strides = [1, 1]} : vector<2x384xf32> to vector<2x128xf32>
    %896 = arith.addf %894, %895 : vector<2x128xf32>
    %897 = arith.negf %896 : vector<2x128xf32>
    %898 = math.exp %897 : vector<2x128xf32>
    %cst_352 = arith.constant 1.000000e+00 : f32
    %899 = vector.broadcast %cst_352 : f32 to vector<2x128xf32>
    %900 = arith.addf %899, %898 : vector<2x128xf32>
    %901 = arith.divf %899, %900 : vector<2x128xf32>
    %902 = vector.extract_strided_slice %878 {offsets = [0, 128], sizes = [2, 128], strides = [1, 1]} : vector<2x384xf32> to vector<2x128xf32>
    %903 = vector.extract_strided_slice %886 {offsets = [0, 128], sizes = [2, 128], strides = [1, 1]} : vector<2x384xf32> to vector<2x128xf32>
    %904 = arith.addf %902, %903 : vector<2x128xf32>
    %905 = arith.negf %904 : vector<2x128xf32>
    %906 = math.exp %905 : vector<2x128xf32>
    %cst_353 = arith.constant 1.000000e+00 : f32
    %907 = vector.broadcast %cst_353 : f32 to vector<2x128xf32>
    %908 = arith.addf %907, %906 : vector<2x128xf32>
    %909 = arith.divf %907, %908 : vector<2x128xf32>
    %910 = vector.extract_strided_slice %878 {offsets = [0, 256], sizes = [2, 128], strides = [1, 1]} : vector<2x384xf32> to vector<2x128xf32>
    %911 = vector.extract_strided_slice %886 {offsets = [0, 256], sizes = [2, 128], strides = [1, 1]} : vector<2x384xf32> to vector<2x128xf32>
    %912 = arith.mulf %901, %911 : vector<2x128xf32>
    %913 = arith.addf %910, %912 : vector<2x128xf32>
    %914 = math.tanh %913 : vector<2x128xf32>
    %cst_354 = arith.constant 1.000000e+00 : f32
    %915 = vector.broadcast %cst_354 : f32 to vector<2x128xf32>
    %916 = arith.subf %915, %909 : vector<2x128xf32>
    %917 = arith.mulf %916, %914 : vector<2x128xf32>
    %918 = arith.mulf %909, %849 : vector<2x128xf32>
    %919 = arith.addf %917, %918 : vector<2x128xf32>
    %920 = vector.extract_strided_slice %879 {offsets = [0, 0], sizes = [2, 128], strides = [1, 1]} : vector<2x384xf32> to vector<2x128xf32>
    %921 = vector.extract_strided_slice %893 {offsets = [0, 0], sizes = [2, 128], strides = [1, 1]} : vector<2x384xf32> to vector<2x128xf32>
    %922 = arith.addf %920, %921 : vector<2x128xf32>
    %923 = arith.negf %922 : vector<2x128xf32>
    %924 = math.exp %923 : vector<2x128xf32>
    %cst_355 = arith.constant 1.000000e+00 : f32
    %925 = vector.broadcast %cst_355 : f32 to vector<2x128xf32>
    %926 = arith.addf %925, %924 : vector<2x128xf32>
    %927 = arith.divf %925, %926 : vector<2x128xf32>
    %928 = vector.extract_strided_slice %879 {offsets = [0, 128], sizes = [2, 128], strides = [1, 1]} : vector<2x384xf32> to vector<2x128xf32>
    %929 = vector.extract_strided_slice %893 {offsets = [0, 128], sizes = [2, 128], strides = [1, 1]} : vector<2x384xf32> to vector<2x128xf32>
    %930 = arith.addf %928, %929 : vector<2x128xf32>
    %931 = arith.negf %930 : vector<2x128xf32>
    %932 = math.exp %931 : vector<2x128xf32>
    %cst_356 = arith.constant 1.000000e+00 : f32
    %933 = vector.broadcast %cst_356 : f32 to vector<2x128xf32>
    %934 = arith.addf %933, %932 : vector<2x128xf32>
    %935 = arith.divf %933, %934 : vector<2x128xf32>
    %936 = vector.extract_strided_slice %879 {offsets = [0, 256], sizes = [2, 128], strides = [1, 1]} : vector<2x384xf32> to vector<2x128xf32>
    %937 = vector.extract_strided_slice %893 {offsets = [0, 256], sizes = [2, 128], strides = [1, 1]} : vector<2x384xf32> to vector<2x128xf32>
    %938 = arith.mulf %927, %937 : vector<2x128xf32>
    %939 = arith.addf %936, %938 : vector<2x128xf32>
    %940 = math.tanh %939 : vector<2x128xf32>
    %cst_357 = arith.constant 1.000000e+00 : f32
    %941 = vector.broadcast %cst_357 : f32 to vector<2x128xf32>
    %942 = arith.subf %941, %935 : vector<2x128xf32>
    %943 = arith.mulf %942, %940 : vector<2x128xf32>
    %944 = arith.mulf %935, %875 : vector<2x128xf32>
    %945 = arith.addf %943, %944 : vector<2x128xf32>
    %c20_358 = arith.constant 20 : index
    %c0_359 = arith.constant 0 : index
    %946 = vector.load %arg19[%c20_358, %c0_359] : memref<32x256xf32, #tpu.memory_space<vmem>>, vector<2x128xf32>
    tpu.vector_store %arg19[%c20_358, %c0_359], %919 {strides = array<i32>} : memref<32x256xf32, #tpu.memory_space<vmem>>, vector<2x128xf32>,
    %c10_360 = arith.constant 10 : index
    %c128_361 = arith.constant 128 : index
    %947 = vector.load %arg19[%c10_360, %c128_361] : memref<32x256xf32, #tpu.memory_space<vmem>>, vector<2x128xf32>
    tpu.vector_store %arg19[%c10_360, %c128_361], %945 {strides = array<i32>} : memref<32x256xf32, #tpu.memory_space<vmem>>, vector<2x128xf32>,
    %c22_362 = arith.constant 22 : index
    %c0_363 = arith.constant 0 : index
    %948 = vector.load %arg18[%c22_362, %c0_363] : memref<32x768xf32, #tpu.memory_space<vmem>>, vector<2x384xf32>
    %c8_364 = arith.constant 8 : index
    %c384_365 = arith.constant 384 : index
    %949 = vector.load %arg18[%c8_364, %c384_365] : memref<32x768xf32, #tpu.memory_space<vmem>>, vector<2x384xf32>
    %950 = arith.truncf %919 : vector<2x128xf32> to vector<2x128xbf16>
    %c0_366 = arith.constant 0 : index
    %c0_367 = arith.constant 0 : index
    %c0_368 = arith.constant 0 : index
    %951 = vector.load %arg12[%c0_366, %c0_367, %c0_368] : memref<2x128x384xbf16, #tpu.memory_space<vmem>>, vector<1x128x384xbf16>
    %952 = vector.shape_cast %951 : vector<1x128x384xbf16> to vector<128x384xbf16>
    %cst_369 = arith.constant dense<0.000000e+00> : vector<2x384xf32>
    %953 = tpu.matmul %950, %952, %cst_369 {dimension_numbers = #tpu.dot_dimension_numbers<[1], [0], [0], [1], [0, 0, 1, 1], [], []>} : vector<2x128xbf16>, vector<128x384xbf16>, vector<2x384xf32> -> vector<2x384xf32>
    %c0_370 = arith.constant 0 : index
    %c0_371 = arith.constant 0 : index
    %954 = vector.load %arg13[%c0_370, %c0_371] : memref<2x384xf32, #tpu.memory_space<vmem>>, vector<1x384xf32>
    %955 = vector.broadcast %954 : vector<1x384xf32> to vector<2x384xf32>
    %956 = arith.addf %953, %955 : vector<2x384xf32>
    %957 = arith.truncf %945 : vector<2x128xf32> to vector<2x128xbf16>
    %c1_372 = arith.constant 1 : index
    %c0_373 = arith.constant 0 : index
    %c0_374 = arith.constant 0 : index
    %958 = vector.load %arg12[%c1_372, %c0_373, %c0_374] : memref<2x128x384xbf16, #tpu.memory_space<vmem>>, vector<1x128x384xbf16>
    %959 = vector.shape_cast %958 : vector<1x128x384xbf16> to vector<128x384xbf16>
    %cst_375 = arith.constant dense<0.000000e+00> : vector<2x384xf32>
    %960 = tpu.matmul %957, %959, %cst_375 {dimension_numbers = #tpu.dot_dimension_numbers<[1], [0], [0], [1], [0, 0, 1, 1], [], []>} : vector<2x128xbf16>, vector<128x384xbf16>, vector<2x384xf32> -> vector<2x384xf32>
    %c1_376 = arith.constant 1 : index
    %c0_377 = arith.constant 0 : index
    %961 = vector.load %arg13[%c1_376, %c0_377] : memref<2x384xf32, #tpu.memory_space<vmem>>, vector<1x384xf32>
    %962 = vector.broadcast %961 : vector<1x384xf32> to vector<2x384xf32>
    %963 = arith.addf %960, %962 : vector<2x384xf32>
    %964 = vector.extract_strided_slice %948 {offsets = [0, 0], sizes = [2, 128], strides = [1, 1]} : vector<2x384xf32> to vector<2x128xf32>
    %965 = vector.extract_strided_slice %956 {offsets = [0, 0], sizes = [2, 128], strides = [1, 1]} : vector<2x384xf32> to vector<2x128xf32>
    %966 = arith.addf %964, %965 : vector<2x128xf32>
    %967 = arith.negf %966 : vector<2x128xf32>
    %968 = math.exp %967 : vector<2x128xf32>
    %cst_378 = arith.constant 1.000000e+00 : f32
    %969 = vector.broadcast %cst_378 : f32 to vector<2x128xf32>
    %970 = arith.addf %969, %968 : vector<2x128xf32>
    %971 = arith.divf %969, %970 : vector<2x128xf32>
    %972 = vector.extract_strided_slice %948 {offsets = [0, 128], sizes = [2, 128], strides = [1, 1]} : vector<2x384xf32> to vector<2x128xf32>
    %973 = vector.extract_strided_slice %956 {offsets = [0, 128], sizes = [2, 128], strides = [1, 1]} : vector<2x384xf32> to vector<2x128xf32>
    %974 = arith.addf %972, %973 : vector<2x128xf32>
    %975 = arith.negf %974 : vector<2x128xf32>
    %976 = math.exp %975 : vector<2x128xf32>
    %cst_379 = arith.constant 1.000000e+00 : f32
    %977 = vector.broadcast %cst_379 : f32 to vector<2x128xf32>
    %978 = arith.addf %977, %976 : vector<2x128xf32>
    %979 = arith.divf %977, %978 : vector<2x128xf32>
    %980 = vector.extract_strided_slice %948 {offsets = [0, 256], sizes = [2, 128], strides = [1, 1]} : vector<2x384xf32> to vector<2x128xf32>
    %981 = vector.extract_strided_slice %956 {offsets = [0, 256], sizes = [2, 128], strides = [1, 1]} : vector<2x384xf32> to vector<2x128xf32>
    %982 = arith.mulf %971, %981 : vector<2x128xf32>
    %983 = arith.addf %980, %982 : vector<2x128xf32>
    %984 = math.tanh %983 : vector<2x128xf32>
    %cst_380 = arith.constant 1.000000e+00 : f32
    %985 = vector.broadcast %cst_380 : f32 to vector<2x128xf32>
    %986 = arith.subf %985, %979 : vector<2x128xf32>
    %987 = arith.mulf %986, %984 : vector<2x128xf32>
    %988 = arith.mulf %979, %919 : vector<2x128xf32>
    %989 = arith.addf %987, %988 : vector<2x128xf32>
    %990 = vector.extract_strided_slice %949 {offsets = [0, 0], sizes = [2, 128], strides = [1, 1]} : vector<2x384xf32> to vector<2x128xf32>
    %991 = vector.extract_strided_slice %963 {offsets = [0, 0], sizes = [2, 128], strides = [1, 1]} : vector<2x384xf32> to vector<2x128xf32>
    %992 = arith.addf %990, %991 : vector<2x128xf32>
    %993 = arith.negf %992 : vector<2x128xf32>
    %994 = math.exp %993 : vector<2x128xf32>
    %cst_381 = arith.constant 1.000000e+00 : f32
    %995 = vector.broadcast %cst_381 : f32 to vector<2x128xf32>
    %996 = arith.addf %995, %994 : vector<2x128xf32>
    %997 = arith.divf %995, %996 : vector<2x128xf32>
    %998 = vector.extract_strided_slice %949 {offsets = [0, 128], sizes = [2, 128], strides = [1, 1]} : vector<2x384xf32> to vector<2x128xf32>
    %999 = vector.extract_strided_slice %963 {offsets = [0, 128], sizes = [2, 128], strides = [1, 1]} : vector<2x384xf32> to vector<2x128xf32>
    %1000 = arith.addf %998, %999 : vector<2x128xf32>
    %1001 = arith.negf %1000 : vector<2x128xf32>
    %1002 = math.exp %1001 : vector<2x128xf32>
    %cst_382 = arith.constant 1.000000e+00 : f32
    %1003 = vector.broadcast %cst_382 : f32 to vector<2x128xf32>
    %1004 = arith.addf %1003, %1002 : vector<2x128xf32>
    %1005 = arith.divf %1003, %1004 : vector<2x128xf32>
    %1006 = vector.extract_strided_slice %949 {offsets = [0, 256], sizes = [2, 128], strides = [1, 1]} : vector<2x384xf32> to vector<2x128xf32>
    %1007 = vector.extract_strided_slice %963 {offsets = [0, 256], sizes = [2, 128], strides = [1, 1]} : vector<2x384xf32> to vector<2x128xf32>
    %1008 = arith.mulf %997, %1007 : vector<2x128xf32>
    %1009 = arith.addf %1006, %1008 : vector<2x128xf32>
    %1010 = math.tanh %1009 : vector<2x128xf32>
    %cst_383 = arith.constant 1.000000e+00 : f32
    %1011 = vector.broadcast %cst_383 : f32 to vector<2x128xf32>
    %1012 = arith.subf %1011, %1005 : vector<2x128xf32>
    %1013 = arith.mulf %1012, %1010 : vector<2x128xf32>
    %1014 = arith.mulf %1005, %945 : vector<2x128xf32>
    %1015 = arith.addf %1013, %1014 : vector<2x128xf32>
    %c22_384 = arith.constant 22 : index
    %c0_385 = arith.constant 0 : index
    %1016 = vector.load %arg19[%c22_384, %c0_385] : memref<32x256xf32, #tpu.memory_space<vmem>>, vector<2x128xf32>
    tpu.vector_store %arg19[%c22_384, %c0_385], %989 {strides = array<i32>} : memref<32x256xf32, #tpu.memory_space<vmem>>, vector<2x128xf32>,
    %c8_386 = arith.constant 8 : index
    %c128_387 = arith.constant 128 : index
    %1017 = vector.load %arg19[%c8_386, %c128_387] : memref<32x256xf32, #tpu.memory_space<vmem>>, vector<2x128xf32>
    tpu.vector_store %arg19[%c8_386, %c128_387], %1015 {strides = array<i32>} : memref<32x256xf32, #tpu.memory_space<vmem>>, vector<2x128xf32>,
    %c24_388 = arith.constant 24 : index
    %c0_389 = arith.constant 0 : index
    %1018 = vector.load %arg18[%c24_388, %c0_389] : memref<32x768xf32, #tpu.memory_space<vmem>>, vector<2x384xf32>
    %c6_390 = arith.constant 6 : index
    %c384_391 = arith.constant 384 : index
    %1019 = vector.load %arg18[%c6_390, %c384_391] : memref<32x768xf32, #tpu.memory_space<vmem>>, vector<2x384xf32>
    %1020 = arith.truncf %989 : vector<2x128xf32> to vector<2x128xbf16>
    %c0_392 = arith.constant 0 : index
    %c0_393 = arith.constant 0 : index
    %c0_394 = arith.constant 0 : index
    %1021 = vector.load %arg12[%c0_392, %c0_393, %c0_394] : memref<2x128x384xbf16, #tpu.memory_space<vmem>>, vector<1x128x384xbf16>
    %1022 = vector.shape_cast %1021 : vector<1x128x384xbf16> to vector<128x384xbf16>
    %cst_395 = arith.constant dense<0.000000e+00> : vector<2x384xf32>
    %1023 = tpu.matmul %1020, %1022, %cst_395 {dimension_numbers = #tpu.dot_dimension_numbers<[1], [0], [0], [1], [0, 0, 1, 1], [], []>} : vector<2x128xbf16>, vector<128x384xbf16>, vector<2x384xf32> -> vector<2x384xf32>
    %c0_396 = arith.constant 0 : index
    %c0_397 = arith.constant 0 : index
    %1024 = vector.load %arg13[%c0_396, %c0_397] : memref<2x384xf32, #tpu.memory_space<vmem>>, vector<1x384xf32>
    %1025 = vector.broadcast %1024 : vector<1x384xf32> to vector<2x384xf32>
    %1026 = arith.addf %1023, %1025 : vector<2x384xf32>
    %1027 = arith.truncf %1015 : vector<2x128xf32> to vector<2x128xbf16>
    %c1_398 = arith.constant 1 : index
    %c0_399 = arith.constant 0 : index
    %c0_400 = arith.constant 0 : index
    %1028 = vector.load %arg12[%c1_398, %c0_399, %c0_400] : memref<2x128x384xbf16, #tpu.memory_space<vmem>>, vector<1x128x384xbf16>
    %1029 = vector.shape_cast %1028 : vector<1x128x384xbf16> to vector<128x384xbf16>
    %cst_401 = arith.constant dense<0.000000e+00> : vector<2x384xf32>
    %1030 = tpu.matmul %1027, %1029, %cst_401 {dimension_numbers = #tpu.dot_dimension_numbers<[1], [0], [0], [1], [0, 0, 1, 1], [], []>} : vector<2x128xbf16>, vector<128x384xbf16>, vector<2x384xf32> -> vector<2x384xf32>
    %c1_402 = arith.constant 1 : index
    %c0_403 = arith.constant 0 : index
    %1031 = vector.load %arg13[%c1_402, %c0_403] : memref<2x384xf32, #tpu.memory_space<vmem>>, vector<1x384xf32>
    %1032 = vector.broadcast %1031 : vector<1x384xf32> to vector<2x384xf32>
    %1033 = arith.addf %1030, %1032 : vector<2x384xf32>
    %1034 = vector.extract_strided_slice %1018 {offsets = [0, 0], sizes = [2, 128], strides = [1, 1]} : vector<2x384xf32> to vector<2x128xf32>
    %1035 = vector.extract_strided_slice %1026 {offsets = [0, 0], sizes = [2, 128], strides = [1, 1]} : vector<2x384xf32> to vector<2x128xf32>
    %1036 = arith.addf %1034, %1035 : vector<2x128xf32>
    %1037 = arith.negf %1036 : vector<2x128xf32>
    %1038 = math.exp %1037 : vector<2x128xf32>
    %cst_404 = arith.constant 1.000000e+00 : f32
    %1039 = vector.broadcast %cst_404 : f32 to vector<2x128xf32>
    %1040 = arith.addf %1039, %1038 : vector<2x128xf32>
    %1041 = arith.divf %1039, %1040 : vector<2x128xf32>
    %1042 = vector.extract_strided_slice %1018 {offsets = [0, 128], sizes = [2, 128], strides = [1, 1]} : vector<2x384xf32> to vector<2x128xf32>
    %1043 = vector.extract_strided_slice %1026 {offsets = [0, 128], sizes = [2, 128], strides = [1, 1]} : vector<2x384xf32> to vector<2x128xf32>
    %1044 = arith.addf %1042, %1043 : vector<2x128xf32>
    %1045 = arith.negf %1044 : vector<2x128xf32>
    %1046 = math.exp %1045 : vector<2x128xf32>
    %cst_405 = arith.constant 1.000000e+00 : f32
    %1047 = vector.broadcast %cst_405 : f32 to vector<2x128xf32>
    %1048 = arith.addf %1047, %1046 : vector<2x128xf32>
    %1049 = arith.divf %1047, %1048 : vector<2x128xf32>
    %1050 = vector.extract_strided_slice %1018 {offsets = [0, 256], sizes = [2, 128], strides = [1, 1]} : vector<2x384xf32> to vector<2x128xf32>
    %1051 = vector.extract_strided_slice %1026 {offsets = [0, 256], sizes = [2, 128], strides = [1, 1]} : vector<2x384xf32> to vector<2x128xf32>
    %1052 = arith.mulf %1041, %1051 : vector<2x128xf32>
    %1053 = arith.addf %1050, %1052 : vector<2x128xf32>
    %1054 = math.tanh %1053 : vector<2x128xf32>
    %cst_406 = arith.constant 1.000000e+00 : f32
    %1055 = vector.broadcast %cst_406 : f32 to vector<2x128xf32>
    %1056 = arith.subf %1055, %1049 : vector<2x128xf32>
    %1057 = arith.mulf %1056, %1054 : vector<2x128xf32>
    %1058 = arith.mulf %1049, %989 : vector<2x128xf32>
    %1059 = arith.addf %1057, %1058 : vector<2x128xf32>
    %1060 = vector.extract_strided_slice %1019 {offsets = [0, 0], sizes = [2, 128], strides = [1, 1]} : vector<2x384xf32> to vector<2x128xf32>
    %1061 = vector.extract_strided_slice %1033 {offsets = [0, 0], sizes = [2, 128], strides = [1, 1]} : vector<2x384xf32> to vector<2x128xf32>
    %1062 = arith.addf %1060, %1061 : vector<2x128xf32>
    %1063 = arith.negf %1062 : vector<2x128xf32>
    %1064 = math.exp %1063 : vector<2x128xf32>
    %cst_407 = arith.constant 1.000000e+00 : f32
    %1065 = vector.broadcast %cst_407 : f32 to vector<2x128xf32>
    %1066 = arith.addf %1065, %1064 : vector<2x128xf32>
    %1067 = arith.divf %1065, %1066 : vector<2x128xf32>
    %1068 = vector.extract_strided_slice %1019 {offsets = [0, 128], sizes = [2, 128], strides = [1, 1]} : vector<2x384xf32> to vector<2x128xf32>
    %1069 = vector.extract_strided_slice %1033 {offsets = [0, 128], sizes = [2, 128], strides = [1, 1]} : vector<2x384xf32> to vector<2x128xf32>
    %1070 = arith.addf %1068, %1069 : vector<2x128xf32>
    %1071 = arith.negf %1070 : vector<2x128xf32>
    %1072 = math.exp %1071 : vector<2x128xf32>
    %cst_408 = arith.constant 1.000000e+00 : f32
    %1073 = vector.broadcast %cst_408 : f32 to vector<2x128xf32>
    %1074 = arith.addf %1073, %1072 : vector<2x128xf32>
    %1075 = arith.divf %1073, %1074 : vector<2x128xf32>
    %1076 = vector.extract_strided_slice %1019 {offsets = [0, 256], sizes = [2, 128], strides = [1, 1]} : vector<2x384xf32> to vector<2x128xf32>
    %1077 = vector.extract_strided_slice %1033 {offsets = [0, 256], sizes = [2, 128], strides = [1, 1]} : vector<2x384xf32> to vector<2x128xf32>
    %1078 = arith.mulf %1067, %1077 : vector<2x128xf32>
    %1079 = arith.addf %1076, %1078 : vector<2x128xf32>
    %1080 = math.tanh %1079 : vector<2x128xf32>
    %cst_409 = arith.constant 1.000000e+00 : f32
    %1081 = vector.broadcast %cst_409 : f32 to vector<2x128xf32>
    %1082 = arith.subf %1081, %1075 : vector<2x128xf32>
    %1083 = arith.mulf %1082, %1080 : vector<2x128xf32>
    %1084 = arith.mulf %1075, %1015 : vector<2x128xf32>
    %1085 = arith.addf %1083, %1084 : vector<2x128xf32>
    %c24_410 = arith.constant 24 : index
    %c0_411 = arith.constant 0 : index
    %1086 = vector.load %arg19[%c24_410, %c0_411] : memref<32x256xf32, #tpu.memory_space<vmem>>, vector<2x128xf32>
    tpu.vector_store %arg19[%c24_410, %c0_411], %1059 {strides = array<i32>} : memref<32x256xf32, #tpu.memory_space<vmem>>, vector<2x128xf32>,
    %c6_412 = arith.constant 6 : index
    %c128_413 = arith.constant 128 : index
    %1087 = vector.load %arg19[%c6_412, %c128_413] : memref<32x256xf32, #tpu.memory_space<vmem>>, vector<2x128xf32>
    tpu.vector_store %arg19[%c6_412, %c128_413], %1085 {strides = array<i32>} : memref<32x256xf32, #tpu.memory_space<vmem>>, vector<2x128xf32>,
    %c26_414 = arith.constant 26 : index
    %c0_415 = arith.constant 0 : index
    %1088 = vector.load %arg18[%c26_414, %c0_415] : memref<32x768xf32, #tpu.memory_space<vmem>>, vector<2x384xf32>
    %c4_416 = arith.constant 4 : index
    %c384_417 = arith.constant 384 : index
    %1089 = vector.load %arg18[%c4_416, %c384_417] : memref<32x768xf32, #tpu.memory_space<vmem>>, vector<2x384xf32>
    %1090 = arith.truncf %1059 : vector<2x128xf32> to vector<2x128xbf16>
    %c0_418 = arith.constant 0 : index
    %c0_419 = arith.constant 0 : index
    %c0_420 = arith.constant 0 : index
    %1091 = vector.load %arg12[%c0_418, %c0_419, %c0_420] : memref<2x128x384xbf16, #tpu.memory_space<vmem>>, vector<1x128x384xbf16>
    %1092 = vector.shape_cast %1091 : vector<1x128x384xbf16> to vector<128x384xbf16>
    %cst_421 = arith.constant dense<0.000000e+00> : vector<2x384xf32>
    %1093 = tpu.matmul %1090, %1092, %cst_421 {dimension_numbers = #tpu.dot_dimension_numbers<[1], [0], [0], [1], [0, 0, 1, 1], [], []>} : vector<2x128xbf16>, vector<128x384xbf16>, vector<2x384xf32> -> vector<2x384xf32>
    %c0_422 = arith.constant 0 : index
    %c0_423 = arith.constant 0 : index
    %1094 = vector.load %arg13[%c0_422, %c0_423] : memref<2x384xf32, #tpu.memory_space<vmem>>, vector<1x384xf32>
    %1095 = vector.broadcast %1094 : vector<1x384xf32> to vector<2x384xf32>
    %1096 = arith.addf %1093, %1095 : vector<2x384xf32>
    %1097 = arith.truncf %1085 : vector<2x128xf32> to vector<2x128xbf16>
    %c1_424 = arith.constant 1 : index
    %c0_425 = arith.constant 0 : index
    %c0_426 = arith.constant 0 : index
    %1098 = vector.load %arg12[%c1_424, %c0_425, %c0_426] : memref<2x128x384xbf16, #tpu.memory_space<vmem>>, vector<1x128x384xbf16>
    %1099 = vector.shape_cast %1098 : vector<1x128x384xbf16> to vector<128x384xbf16>
    %cst_427 = arith.constant dense<0.000000e+00> : vector<2x384xf32>
    %1100 = tpu.matmul %1097, %1099, %cst_427 {dimension_numbers = #tpu.dot_dimension_numbers<[1], [0], [0], [1], [0, 0, 1, 1], [], []>} : vector<2x128xbf16>, vector<128x384xbf16>, vector<2x384xf32> -> vector<2x384xf32>
    %c1_428 = arith.constant 1 : index
    %c0_429 = arith.constant 0 : index
    %1101 = vector.load %arg13[%c1_428, %c0_429] : memref<2x384xf32, #tpu.memory_space<vmem>>, vector<1x384xf32>
    %1102 = vector.broadcast %1101 : vector<1x384xf32> to vector<2x384xf32>
    %1103 = arith.addf %1100, %1102 : vector<2x384xf32>
    %1104 = vector.extract_strided_slice %1088 {offsets = [0, 0], sizes = [2, 128], strides = [1, 1]} : vector<2x384xf32> to vector<2x128xf32>
    %1105 = vector.extract_strided_slice %1096 {offsets = [0, 0], sizes = [2, 128], strides = [1, 1]} : vector<2x384xf32> to vector<2x128xf32>
    %1106 = arith.addf %1104, %1105 : vector<2x128xf32>
    %1107 = arith.negf %1106 : vector<2x128xf32>
    %1108 = math.exp %1107 : vector<2x128xf32>
    %cst_430 = arith.constant 1.000000e+00 : f32
    %1109 = vector.broadcast %cst_430 : f32 to vector<2x128xf32>
    %1110 = arith.addf %1109, %1108 : vector<2x128xf32>
    %1111 = arith.divf %1109, %1110 : vector<2x128xf32>
    %1112 = vector.extract_strided_slice %1088 {offsets = [0, 128], sizes = [2, 128], strides = [1, 1]} : vector<2x384xf32> to vector<2x128xf32>
    %1113 = vector.extract_strided_slice %1096 {offsets = [0, 128], sizes = [2, 128], strides = [1, 1]} : vector<2x384xf32> to vector<2x128xf32>
    %1114 = arith.addf %1112, %1113 : vector<2x128xf32>
    %1115 = arith.negf %1114 : vector<2x128xf32>
    %1116 = math.exp %1115 : vector<2x128xf32>
    %cst_431 = arith.constant 1.000000e+00 : f32
    %1117 = vector.broadcast %cst_431 : f32 to vector<2x128xf32>
    %1118 = arith.addf %1117, %1116 : vector<2x128xf32>
    %1119 = arith.divf %1117, %1118 : vector<2x128xf32>
    %1120 = vector.extract_strided_slice %1088 {offsets = [0, 256], sizes = [2, 128], strides = [1, 1]} : vector<2x384xf32> to vector<2x128xf32>
    %1121 = vector.extract_strided_slice %1096 {offsets = [0, 256], sizes = [2, 128], strides = [1, 1]} : vector<2x384xf32> to vector<2x128xf32>
    %1122 = arith.mulf %1111, %1121 : vector<2x128xf32>
    %1123 = arith.addf %1120, %1122 : vector<2x128xf32>
    %1124 = math.tanh %1123 : vector<2x128xf32>
    %cst_432 = arith.constant 1.000000e+00 : f32
    %1125 = vector.broadcast %cst_432 : f32 to vector<2x128xf32>
    %1126 = arith.subf %1125, %1119 : vector<2x128xf32>
    %1127 = arith.mulf %1126, %1124 : vector<2x128xf32>
    %1128 = arith.mulf %1119, %1059 : vector<2x128xf32>
    %1129 = arith.addf %1127, %1128 : vector<2x128xf32>
    %1130 = vector.extract_strided_slice %1089 {offsets = [0, 0], sizes = [2, 128], strides = [1, 1]} : vector<2x384xf32> to vector<2x128xf32>
    %1131 = vector.extract_strided_slice %1103 {offsets = [0, 0], sizes = [2, 128], strides = [1, 1]} : vector<2x384xf32> to vector<2x128xf32>
    %1132 = arith.addf %1130, %1131 : vector<2x128xf32>
    %1133 = arith.negf %1132 : vector<2x128xf32>
    %1134 = math.exp %1133 : vector<2x128xf32>
    %cst_433 = arith.constant 1.000000e+00 : f32
    %1135 = vector.broadcast %cst_433 : f32 to vector<2x128xf32>
    %1136 = arith.addf %1135, %1134 : vector<2x128xf32>
    %1137 = arith.divf %1135, %1136 : vector<2x128xf32>
    %1138 = vector.extract_strided_slice %1089 {offsets = [0, 128], sizes = [2, 128], strides = [1, 1]} : vector<2x384xf32> to vector<2x128xf32>
    %1139 = vector.extract_strided_slice %1103 {offsets = [0, 128], sizes = [2, 128], strides = [1, 1]} : vector<2x384xf32> to vector<2x128xf32>
    %1140 = arith.addf %1138, %1139 : vector<2x128xf32>
    %1141 = arith.negf %1140 : vector<2x128xf32>
    %1142 = math.exp %1141 : vector<2x128xf32>
    %cst_434 = arith.constant 1.000000e+00 : f32
    %1143 = vector.broadcast %cst_434 : f32 to vector<2x128xf32>
    %1144 = arith.addf %1143, %1142 : vector<2x128xf32>
    %1145 = arith.divf %1143, %1144 : vector<2x128xf32>
    %1146 = vector.extract_strided_slice %1089 {offsets = [0, 256], sizes = [2, 128], strides = [1, 1]} : vector<2x384xf32> to vector<2x128xf32>
    %1147 = vector.extract_strided_slice %1103 {offsets = [0, 256], sizes = [2, 128], strides = [1, 1]} : vector<2x384xf32> to vector<2x128xf32>
    %1148 = arith.mulf %1137, %1147 : vector<2x128xf32>
    %1149 = arith.addf %1146, %1148 : vector<2x128xf32>
    %1150 = math.tanh %1149 : vector<2x128xf32>
    %cst_435 = arith.constant 1.000000e+00 : f32
    %1151 = vector.broadcast %cst_435 : f32 to vector<2x128xf32>
    %1152 = arith.subf %1151, %1145 : vector<2x128xf32>
    %1153 = arith.mulf %1152, %1150 : vector<2x128xf32>
    %1154 = arith.mulf %1145, %1085 : vector<2x128xf32>
    %1155 = arith.addf %1153, %1154 : vector<2x128xf32>
    %c26_436 = arith.constant 26 : index
    %c0_437 = arith.constant 0 : index
    %1156 = vector.load %arg19[%c26_436, %c0_437] : memref<32x256xf32, #tpu.memory_space<vmem>>, vector<2x128xf32>
    tpu.vector_store %arg19[%c26_436, %c0_437], %1129 {strides = array<i32>} : memref<32x256xf32, #tpu.memory_space<vmem>>, vector<2x128xf32>,
    %c4_438 = arith.constant 4 : index
    %c128_439 = arith.constant 128 : index
    %1157 = vector.load %arg19[%c4_438, %c128_439] : memref<32x256xf32, #tpu.memory_space<vmem>>, vector<2x128xf32>
    tpu.vector_store %arg19[%c4_438, %c128_439], %1155 {strides = array<i32>} : memref<32x256xf32, #tpu.memory_space<vmem>>, vector<2x128xf32>,
    %c28_440 = arith.constant 28 : index
    %c0_441 = arith.constant 0 : index
    %1158 = vector.load %arg18[%c28_440, %c0_441] : memref<32x768xf32, #tpu.memory_space<vmem>>, vector<2x384xf32>
    %c2_442 = arith.constant 2 : index
    %c384_443 = arith.constant 384 : index
    %1159 = vector.load %arg18[%c2_442, %c384_443] : memref<32x768xf32, #tpu.memory_space<vmem>>, vector<2x384xf32>
    %1160 = arith.truncf %1129 : vector<2x128xf32> to vector<2x128xbf16>
    %c0_444 = arith.constant 0 : index
    %c0_445 = arith.constant 0 : index
    %c0_446 = arith.constant 0 : index
    %1161 = vector.load %arg12[%c0_444, %c0_445, %c0_446] : memref<2x128x384xbf16, #tpu.memory_space<vmem>>, vector<1x128x384xbf16>
    %1162 = vector.shape_cast %1161 : vector<1x128x384xbf16> to vector<128x384xbf16>
    %cst_447 = arith.constant dense<0.000000e+00> : vector<2x384xf32>
    %1163 = tpu.matmul %1160, %1162, %cst_447 {dimension_numbers = #tpu.dot_dimension_numbers<[1], [0], [0], [1], [0, 0, 1, 1], [], []>} : vector<2x128xbf16>, vector<128x384xbf16>, vector<2x384xf32> -> vector<2x384xf32>
    %c0_448 = arith.constant 0 : index
    %c0_449 = arith.constant 0 : index
    %1164 = vector.load %arg13[%c0_448, %c0_449] : memref<2x384xf32, #tpu.memory_space<vmem>>, vector<1x384xf32>
    %1165 = vector.broadcast %1164 : vector<1x384xf32> to vector<2x384xf32>
    %1166 = arith.addf %1163, %1165 : vector<2x384xf32>
    %1167 = arith.truncf %1155 : vector<2x128xf32> to vector<2x128xbf16>
    %c1_450 = arith.constant 1 : index
    %c0_451 = arith.constant 0 : index
    %c0_452 = arith.constant 0 : index
    %1168 = vector.load %arg12[%c1_450, %c0_451, %c0_452] : memref<2x128x384xbf16, #tpu.memory_space<vmem>>, vector<1x128x384xbf16>
    %1169 = vector.shape_cast %1168 : vector<1x128x384xbf16> to vector<128x384xbf16>
    %cst_453 = arith.constant dense<0.000000e+00> : vector<2x384xf32>
    %1170 = tpu.matmul %1167, %1169, %cst_453 {dimension_numbers = #tpu.dot_dimension_numbers<[1], [0], [0], [1], [0, 0, 1, 1], [], []>} : vector<2x128xbf16>, vector<128x384xbf16>, vector<2x384xf32> -> vector<2x384xf32>
    %c1_454 = arith.constant 1 : index
    %c0_455 = arith.constant 0 : index
    %1171 = vector.load %arg13[%c1_454, %c0_455] : memref<2x384xf32, #tpu.memory_space<vmem>>, vector<1x384xf32>
    %1172 = vector.broadcast %1171 : vector<1x384xf32> to vector<2x384xf32>
    %1173 = arith.addf %1170, %1172 : vector<2x384xf32>
    %1174 = vector.extract_strided_slice %1158 {offsets = [0, 0], sizes = [2, 128], strides = [1, 1]} : vector<2x384xf32> to vector<2x128xf32>
    %1175 = vector.extract_strided_slice %1166 {offsets = [0, 0], sizes = [2, 128], strides = [1, 1]} : vector<2x384xf32> to vector<2x128xf32>
    %1176 = arith.addf %1174, %1175 : vector<2x128xf32>
    %1177 = arith.negf %1176 : vector<2x128xf32>
    %1178 = math.exp %1177 : vector<2x128xf32>
    %cst_456 = arith.constant 1.000000e+00 : f32
    %1179 = vector.broadcast %cst_456 : f32 to vector<2x128xf32>
    %1180 = arith.addf %1179, %1178 : vector<2x128xf32>
    %1181 = arith.divf %1179, %1180 : vector<2x128xf32>
    %1182 = vector.extract_strided_slice %1158 {offsets = [0, 128], sizes = [2, 128], strides = [1, 1]} : vector<2x384xf32> to vector<2x128xf32>
    %1183 = vector.extract_strided_slice %1166 {offsets = [0, 128], sizes = [2, 128], strides = [1, 1]} : vector<2x384xf32> to vector<2x128xf32>
    %1184 = arith.addf %1182, %1183 : vector<2x128xf32>
    %1185 = arith.negf %1184 : vector<2x128xf32>
    %1186 = math.exp %1185 : vector<2x128xf32>
    %cst_457 = arith.constant 1.000000e+00 : f32
    %1187 = vector.broadcast %cst_457 : f32 to vector<2x128xf32>
    %1188 = arith.addf %1187, %1186 : vector<2x128xf32>
    %1189 = arith.divf %1187, %1188 : vector<2x128xf32>
    %1190 = vector.extract_strided_slice %1158 {offsets = [0, 256], sizes = [2, 128], strides = [1, 1]} : vector<2x384xf32> to vector<2x128xf32>
    %1191 = vector.extract_strided_slice %1166 {offsets = [0, 256], sizes = [2, 128], strides = [1, 1]} : vector<2x384xf32> to vector<2x128xf32>
    %1192 = arith.mulf %1181, %1191 : vector<2x128xf32>
    %1193 = arith.addf %1190, %1192 : vector<2x128xf32>
    %1194 = math.tanh %1193 : vector<2x128xf32>
    %cst_458 = arith.constant 1.000000e+00 : f32
    %1195 = vector.broadcast %cst_458 : f32 to vector<2x128xf32>
    %1196 = arith.subf %1195, %1189 : vector<2x128xf32>
    %1197 = arith.mulf %1196, %1194 : vector<2x128xf32>
    %1198 = arith.mulf %1189, %1129 : vector<2x128xf32>
    %1199 = arith.addf %1197, %1198 : vector<2x128xf32>
    %1200 = vector.extract_strided_slice %1159 {offsets = [0, 0], sizes = [2, 128], strides = [1, 1]} : vector<2x384xf32> to vector<2x128xf32>
    %1201 = vector.extract_strided_slice %1173 {offsets = [0, 0], sizes = [2, 128], strides = [1, 1]} : vector<2x384xf32> to vector<2x128xf32>
    %1202 = arith.addf %1200, %1201 : vector<2x128xf32>
    %1203 = arith.negf %1202 : vector<2x128xf32>
    %1204 = math.exp %1203 : vector<2x128xf32>
    %cst_459 = arith.constant 1.000000e+00 : f32
    %1205 = vector.broadcast %cst_459 : f32 to vector<2x128xf32>
    %1206 = arith.addf %1205, %1204 : vector<2x128xf32>
    %1207 = arith.divf %1205, %1206 : vector<2x128xf32>
    %1208 = vector.extract_strided_slice %1159 {offsets = [0, 128], sizes = [2, 128], strides = [1, 1]} : vector<2x384xf32> to vector<2x128xf32>
    %1209 = vector.extract_strided_slice %1173 {offsets = [0, 128], sizes = [2, 128], strides = [1, 1]} : vector<2x384xf32> to vector<2x128xf32>
    %1210 = arith.addf %1208, %1209 : vector<2x128xf32>
    %1211 = arith.negf %1210 : vector<2x128xf32>
    %1212 = math.exp %1211 : vector<2x128xf32>
    %cst_460 = arith.constant 1.000000e+00 : f32
    %1213 = vector.broadcast %cst_460 : f32 to vector<2x128xf32>
    %1214 = arith.addf %1213, %1212 : vector<2x128xf32>
    %1215 = arith.divf %1213, %1214 : vector<2x128xf32>
    %1216 = vector.extract_strided_slice %1159 {offsets = [0, 256], sizes = [2, 128], strides = [1, 1]} : vector<2x384xf32> to vector<2x128xf32>
    %1217 = vector.extract_strided_slice %1173 {offsets = [0, 256], sizes = [2, 128], strides = [1, 1]} : vector<2x384xf32> to vector<2x128xf32>
    %1218 = arith.mulf %1207, %1217 : vector<2x128xf32>
    %1219 = arith.addf %1216, %1218 : vector<2x128xf32>
    %1220 = math.tanh %1219 : vector<2x128xf32>
    %cst_461 = arith.constant 1.000000e+00 : f32
    %1221 = vector.broadcast %cst_461 : f32 to vector<2x128xf32>
    %1222 = arith.subf %1221, %1215 : vector<2x128xf32>
    %1223 = arith.mulf %1222, %1220 : vector<2x128xf32>
    %1224 = arith.mulf %1215, %1155 : vector<2x128xf32>
    %1225 = arith.addf %1223, %1224 : vector<2x128xf32>
    %c28_462 = arith.constant 28 : index
    %c0_463 = arith.constant 0 : index
    %1226 = vector.load %arg19[%c28_462, %c0_463] : memref<32x256xf32, #tpu.memory_space<vmem>>, vector<2x128xf32>
    tpu.vector_store %arg19[%c28_462, %c0_463], %1199 {strides = array<i32>} : memref<32x256xf32, #tpu.memory_space<vmem>>, vector<2x128xf32>,
    %c2_464 = arith.constant 2 : index
    %c128_465 = arith.constant 128 : index
    %1227 = vector.load %arg19[%c2_464, %c128_465] : memref<32x256xf32, #tpu.memory_space<vmem>>, vector<2x128xf32>
    tpu.vector_store %arg19[%c2_464, %c128_465], %1225 {strides = array<i32>} : memref<32x256xf32, #tpu.memory_space<vmem>>, vector<2x128xf32>,
    %c30_466 = arith.constant 30 : index
    %c0_467 = arith.constant 0 : index
    %1228 = vector.load %arg18[%c30_466, %c0_467] : memref<32x768xf32, #tpu.memory_space<vmem>>, vector<2x384xf32>
    %c0_468 = arith.constant 0 : index
    %c384_469 = arith.constant 384 : index
    %1229 = vector.load %arg18[%c0_468, %c384_469] : memref<32x768xf32, #tpu.memory_space<vmem>>, vector<2x384xf32>
    %1230 = arith.truncf %1199 : vector<2x128xf32> to vector<2x128xbf16>
    %c0_470 = arith.constant 0 : index
    %c0_471 = arith.constant 0 : index
    %c0_472 = arith.constant 0 : index
    %1231 = vector.load %arg12[%c0_470, %c0_471, %c0_472] : memref<2x128x384xbf16, #tpu.memory_space<vmem>>, vector<1x128x384xbf16>
    %1232 = vector.shape_cast %1231 : vector<1x128x384xbf16> to vector<128x384xbf16>
    %cst_473 = arith.constant dense<0.000000e+00> : vector<2x384xf32>
    %1233 = tpu.matmul %1230, %1232, %cst_473 {dimension_numbers = #tpu.dot_dimension_numbers<[1], [0], [0], [1], [0, 0, 1, 1], [], []>} : vector<2x128xbf16>, vector<128x384xbf16>, vector<2x384xf32> -> vector<2x384xf32>
    %c0_474 = arith.constant 0 : index
    %c0_475 = arith.constant 0 : index
    %1234 = vector.load %arg13[%c0_474, %c0_475] : memref<2x384xf32, #tpu.memory_space<vmem>>, vector<1x384xf32>
    %1235 = vector.broadcast %1234 : vector<1x384xf32> to vector<2x384xf32>
    %1236 = arith.addf %1233, %1235 : vector<2x384xf32>
    %1237 = arith.truncf %1225 : vector<2x128xf32> to vector<2x128xbf16>
    %c1_476 = arith.constant 1 : index
    %c0_477 = arith.constant 0 : index
    %c0_478 = arith.constant 0 : index
    %1238 = vector.load %arg12[%c1_476, %c0_477, %c0_478] : memref<2x128x384xbf16, #tpu.memory_space<vmem>>, vector<1x128x384xbf16>
    %1239 = vector.shape_cast %1238 : vector<1x128x384xbf16> to vector<128x384xbf16>
    %cst_479 = arith.constant dense<0.000000e+00> : vector<2x384xf32>
    %1240 = tpu.matmul %1237, %1239, %cst_479 {dimension_numbers = #tpu.dot_dimension_numbers<[1], [0], [0], [1], [0, 0, 1, 1], [], []>} : vector<2x128xbf16>, vector<128x384xbf16>, vector<2x384xf32> -> vector<2x384xf32>
    %c1_480 = arith.constant 1 : index
    %c0_481 = arith.constant 0 : index
    %1241 = vector.load %arg13[%c1_480, %c0_481] : memref<2x384xf32, #tpu.memory_space<vmem>>, vector<1x384xf32>
    %1242 = vector.broadcast %1241 : vector<1x384xf32> to vector<2x384xf32>
    %1243 = arith.addf %1240, %1242 : vector<2x384xf32>
    %1244 = vector.extract_strided_slice %1228 {offsets = [0, 0], sizes = [2, 128], strides = [1, 1]} : vector<2x384xf32> to vector<2x128xf32>
    %1245 = vector.extract_strided_slice %1236 {offsets = [0, 0], sizes = [2, 128], strides = [1, 1]} : vector<2x384xf32> to vector<2x128xf32>
    %1246 = arith.addf %1244, %1245 : vector<2x128xf32>
    %1247 = arith.negf %1246 : vector<2x128xf32>
    %1248 = math.exp %1247 : vector<2x128xf32>
    %cst_482 = arith.constant 1.000000e+00 : f32
    %1249 = vector.broadcast %cst_482 : f32 to vector<2x128xf32>
    %1250 = arith.addf %1249, %1248 : vector<2x128xf32>
    %1251 = arith.divf %1249, %1250 : vector<2x128xf32>
    %1252 = vector.extract_strided_slice %1228 {offsets = [0, 128], sizes = [2, 128], strides = [1, 1]} : vector<2x384xf32> to vector<2x128xf32>
    %1253 = vector.extract_strided_slice %1236 {offsets = [0, 128], sizes = [2, 128], strides = [1, 1]} : vector<2x384xf32> to vector<2x128xf32>
    %1254 = arith.addf %1252, %1253 : vector<2x128xf32>
    %1255 = arith.negf %1254 : vector<2x128xf32>
    %1256 = math.exp %1255 : vector<2x128xf32>
    %cst_483 = arith.constant 1.000000e+00 : f32
    %1257 = vector.broadcast %cst_483 : f32 to vector<2x128xf32>
    %1258 = arith.addf %1257, %1256 : vector<2x128xf32>
    %1259 = arith.divf %1257, %1258 : vector<2x128xf32>
    %1260 = vector.extract_strided_slice %1228 {offsets = [0, 256], sizes = [2, 128], strides = [1, 1]} : vector<2x384xf32> to vector<2x128xf32>
    %1261 = vector.extract_strided_slice %1236 {offsets = [0, 256], sizes = [2, 128], strides = [1, 1]} : vector<2x384xf32> to vector<2x128xf32>
    %1262 = arith.mulf %1251, %1261 : vector<2x128xf32>
    %1263 = arith.addf %1260, %1262 : vector<2x128xf32>
    %1264 = math.tanh %1263 : vector<2x128xf32>
    %cst_484 = arith.constant 1.000000e+00 : f32
    %1265 = vector.broadcast %cst_484 : f32 to vector<2x128xf32>
    %1266 = arith.subf %1265, %1259 : vector<2x128xf32>
    %1267 = arith.mulf %1266, %1264 : vector<2x128xf32>
    %1268 = arith.mulf %1259, %1199 : vector<2x128xf32>
    %1269 = arith.addf %1267, %1268 : vector<2x128xf32>
    %1270 = vector.extract_strided_slice %1229 {offsets = [0, 0], sizes = [2, 128], strides = [1, 1]} : vector<2x384xf32> to vector<2x128xf32>
    %1271 = vector.extract_strided_slice %1243 {offsets = [0, 0], sizes = [2, 128], strides = [1, 1]} : vector<2x384xf32> to vector<2x128xf32>
    %1272 = arith.addf %1270, %1271 : vector<2x128xf32>
    %1273 = arith.negf %1272 : vector<2x128xf32>
    %1274 = math.exp %1273 : vector<2x128xf32>
    %cst_485 = arith.constant 1.000000e+00 : f32
    %1275 = vector.broadcast %cst_485 : f32 to vector<2x128xf32>
    %1276 = arith.addf %1275, %1274 : vector<2x128xf32>
    %1277 = arith.divf %1275, %1276 : vector<2x128xf32>
    %1278 = vector.extract_strided_slice %1229 {offsets = [0, 128], sizes = [2, 128], strides = [1, 1]} : vector<2x384xf32> to vector<2x128xf32>
    %1279 = vector.extract_strided_slice %1243 {offsets = [0, 128], sizes = [2, 128], strides = [1, 1]} : vector<2x384xf32> to vector<2x128xf32>
    %1280 = arith.addf %1278, %1279 : vector<2x128xf32>
    %1281 = arith.negf %1280 : vector<2x128xf32>
    %1282 = math.exp %1281 : vector<2x128xf32>
    %cst_486 = arith.constant 1.000000e+00 : f32
    %1283 = vector.broadcast %cst_486 : f32 to vector<2x128xf32>
    %1284 = arith.addf %1283, %1282 : vector<2x128xf32>
    %1285 = arith.divf %1283, %1284 : vector<2x128xf32>
    %1286 = vector.extract_strided_slice %1229 {offsets = [0, 256], sizes = [2, 128], strides = [1, 1]} : vector<2x384xf32> to vector<2x128xf32>
    %1287 = vector.extract_strided_slice %1243 {offsets = [0, 256], sizes = [2, 128], strides = [1, 1]} : vector<2x384xf32> to vector<2x128xf32>
    %1288 = arith.mulf %1277, %1287 : vector<2x128xf32>
    %1289 = arith.addf %1286, %1288 : vector<2x128xf32>
    %1290 = math.tanh %1289 : vector<2x128xf32>
    %cst_487 = arith.constant 1.000000e+00 : f32
    %1291 = vector.broadcast %cst_487 : f32 to vector<2x128xf32>
    %1292 = arith.subf %1291, %1285 : vector<2x128xf32>
    %1293 = arith.mulf %1292, %1290 : vector<2x128xf32>
    %1294 = arith.mulf %1285, %1225 : vector<2x128xf32>
    %1295 = arith.addf %1293, %1294 : vector<2x128xf32>
    %c30_488 = arith.constant 30 : index
    %c0_489 = arith.constant 0 : index
    %1296 = vector.load %arg19[%c30_488, %c0_489] : memref<32x256xf32, #tpu.memory_space<vmem>>, vector<2x128xf32>
    tpu.vector_store %arg19[%c30_488, %c0_489], %1269 {strides = array<i32>} : memref<32x256xf32, #tpu.memory_space<vmem>>, vector<2x128xf32>,
    %c0_490 = arith.constant 0 : index
    %c128_491 = arith.constant 128 : index
    %1297 = vector.load %arg19[%c0_490, %c128_491] : memref<32x256xf32, #tpu.memory_space<vmem>>, vector<2x128xf32>
    tpu.vector_store %arg19[%c0_490, %c128_491], %1295 {strides = array<i32>} : memref<32x256xf32, #tpu.memory_space<vmem>>, vector<2x128xf32>,
    %c0_492 = arith.constant 0 : index
    %c0_493 = arith.constant 0 : index
    %1298 = vector.load %arg19[%c0_492, %c0_493] : memref<32x256xf32, #tpu.memory_space<vmem>>, vector<32x256xf32>
    %1299 = tpu.concatenate %1298, %168 in 1 : vector<32x256xf32>, vector<32x128xf32> -> vector<32x384xf32>
    %1300 = arith.truncf %1299 : vector<32x384xf32> to vector<32x384xbf16>
    %c0_494 = arith.constant 0 : index
    %c0_495 = arith.constant 0 : index
    %1301 = vector.load %arg14[%c0_494, %c0_495] : memref<384x128xbf16, #tpu.memory_space<vmem>>, vector<384x128xbf16>
    %cst_496 = arith.constant dense<0.000000e+00> : vector<32x128xf32>
    %1302 = tpu.matmul %1300, %1301, %cst_496 {dimension_numbers = #tpu.dot_dimension_numbers<[1], [0], [0], [1], [0, 0, 1, 1], [], []>} : vector<32x384xbf16>, vector<384x128xbf16>, vector<32x128xf32> -> vector<32x128xf32>
    %c0_497 = arith.constant 0 : index
    %c0_498 = arith.constant 0 : index
    %1303 = vector.load %arg15[%c0_497, %c0_498] : memref<1x128xf32, #tpu.memory_space<vmem>>, vector<1x128xf32>
    %1304 = vector.broadcast %1303 : vector<1x128xf32> to vector<32x128xf32>
    %1305 = arith.addf %1302, %1304 : vector<32x128xf32>
    %c0_499 = arith.constant 0 : index
    %c0_500 = arith.constant 0 : index
    %1306 = vector.load %arg16[%c0_499, %c0_500] : memref<32x128xf32, #tpu.memory_space<vmem>>, vector<32x128xf32>
    tpu.vector_store %arg16[%c0_499, %c0_500], %1305 {strides = array<i32>} : memref<32x128xf32, #tpu.memory_space<vmem>>, vector<32x128xf32>,
    return
  }
  func.func @transform_0(%arg0: i32) -> (i32, i32) {
    %c0_i32 = arith.constant 0 : i32
    %c0_i32_0 = arith.constant 0 : i32
    %c0_i32_1 = arith.constant 0 : i32
    return %c0_i32, %c0_i32_0 : i32, i32
  }
  func.func @transform_1(%arg0: i32) -> (i32, i32, i32) {
    %c0_i32 = arith.constant 0 : i32
    %c0_i32_0 = arith.constant 0 : i32
    %c0_i32_1 = arith.constant 0 : i32
    %c0_i32_2 = arith.constant 0 : i32
    return %c0_i32, %c0_i32_0, %c0_i32_1 : i32, i32, i32
  }
  func.func @transform_2(%arg0: i32) -> (i32, i32) {
    %c0_i32 = arith.constant 0 : i32
    %c0_i32_0 = arith.constant 0 : i32
    %c0_i32_1 = arith.constant 0 : i32
    return %c0_i32, %c0_i32_0 : i32, i32
  }
  func.func @transform_3(%arg0: i32) -> (i32, i32, i32) {
    %c0_i32 = arith.constant 0 : i32
    %c0_i32_0 = arith.constant 0 : i32
    %c0_i32_1 = arith.constant 0 : i32
    %c0_i32_2 = arith.constant 0 : i32
    return %c0_i32, %c0_i32_0, %c0_i32_1 : i32, i32, i32
  }
  func.func @transform_4(%arg0: i32) -> (i32, i32) {
    %c0_i32 = arith.constant 0 : i32
    %c0_i32_0 = arith.constant 0 : i32
    %c0_i32_1 = arith.constant 0 : i32
    return %c0_i32, %c0_i32_0 : i32, i32
  }
  func.func @transform_5(%arg0: i32) -> (i32, i32) {
    %c0_i32 = arith.constant 0 : i32
    %c0_i32_0 = arith.constant 0 : i32
    %c0_i32_1 = arith.constant 0 : i32
    return %c0_i32, %c0_i32_0 : i32, i32
  }
  func.func @transform_6(%arg0: i32) -> (i32, i32) {
    %c0_i32 = arith.constant 0 : i32
    %c0_i32_0 = arith.constant 0 : i32
    %c0_i32_1 = arith.constant 0 : i32
    return %c0_i32, %c0_i32_0 : i32, i32
  }
  func.func @transform_7(%arg0: i32) -> (i32, i32) {
    %c0_i32 = arith.constant 0 : i32
    %c0_i32_0 = arith.constant 0 : i32
    %c0_i32_1 = arith.constant 0 : i32
    return %c0_i32, %c0_i32_0 : i32, i32
  }
  func.func @transform_8(%arg0: i32) -> (i32, i32) {
    %c0_i32 = arith.constant 0 : i32
    %c0_i32_0 = arith.constant 0 : i32
    %c0_i32_1 = arith.constant 0 : i32
    return %c0_i32, %c0_i32_0 : i32, i32
  }
  func.func @transform_9(%arg0: i32) -> (i32, i32) {
    %c0_i32 = arith.constant 0 : i32
    %c0_i32_0 = arith.constant 0 : i32
    %c0_i32_1 = arith.constant 0 : i32
    return %c0_i32, %c0_i32_0 : i32, i32
  }
  func.func @transform_10(%arg0: i32) -> (i32, i32) {
    %c0_i32 = arith.constant 0 : i32
    %c0_i32_0 = arith.constant 0 : i32
    %c0_i32_1 = arith.constant 0 : i32
    return %c0_i32, %c0_i32_0 : i32, i32
  }
  func.func @transform_11(%arg0: i32) -> (i32, i32, i32) {
    %c0_i32 = arith.constant 0 : i32
    %c0_i32_0 = arith.constant 0 : i32
    %c0_i32_1 = arith.constant 0 : i32
    %c0_i32_2 = arith.constant 0 : i32
    return %c0_i32, %c0_i32_0, %c0_i32_1 : i32, i32, i32
  }
  func.func @transform_12(%arg0: i32) -> (i32, i32) {
    %c0_i32 = arith.constant 0 : i32
    %c0_i32_0 = arith.constant 0 : i32
    %c0_i32_1 = arith.constant 0 : i32
    return %c0_i32, %c0_i32_0 : i32, i32
  }
  func.func @transform_13(%arg0: i32) -> (i32, i32) {
    %c0_i32 = arith.constant 0 : i32
    %c0_i32_0 = arith.constant 0 : i32
    %c0_i32_1 = arith.constant 0 : i32
    return %c0_i32, %c0_i32_0 : i32, i32
  }
  func.func @transform_14(%arg0: i32) -> (i32, i32) {
    %c0_i32 = arith.constant 0 : i32
    %c0_i32_0 = arith.constant 0 : i32
    %c0_i32_1 = arith.constant 0 : i32
    return %c0_i32, %c0_i32_0 : i32, i32
  }
  func.func @transform_15(%arg0: i32) -> (i32, i32) {
    %c0_i32 = arith.constant 0 : i32
    %c0_i32_0 = arith.constant 0 : i32
    %c0_i32_1 = arith.constant 0 : i32
    return %c0_i32, %c0_i32_0 : i32, i32
  }
}

</mosaic_0001>

<bundles_post_ra>
// kernel: forward.1
= control target key start
LH: loop header
LB: loop body
LE: loop exit
PB: predicated region body
PF: predicated region fallthrough
CT: control target
= control target key end

     0   :  { %20 = vsyncpa [#allocation6], 0  ;;  %s18626_s0 = inlined_call_operand.vmem [shape: f32[32,16], index: 0, kind: input, shape index: {}]   ;;  %s18627_s1 = inlined_call_operand.vmem [shape: bf16[3,16,512], index: 1, kind: input, shape index: {}]   ;;  %s18628_s2 = inlined_call_operand.vmem [shape: f32[1,512], index: 2, kind: input, shape index: {}]   ;;  %s18629_s3 = inlined_call_operand.hbm [shape: bf16[3,256,128], index: 3, kind: input, shape index: {}]   ;;  %s18630_s4 = inlined_call_operand.hbm [shape: f32[2,128], index: 4, kind: input, shape index: {}]   ;;  %s18631_s5 = inlined_call_operand.hbm [shape: bf16[256,128], index: 5, kind: input, shape index: {}]   ;;  %s18632_s6 = inlined_call_operand.vmem [shape: f32[1,128], index: 6, kind: input, shape index: {}]   ;;  %s18633_s7 = inlined_call_operand.hbm [shape: bf16[128,256], index: 7, kind: input, shape index: {}]   ;;  %s18634_s8 = inlined_call_operand.hbm [shape: f32[1,256], index: 8, kind: input, shape index: {}]   ;;  %s18635_s9 = inlined_call_operand.hbm [shape: bf16[128,768], index: 9, kind: input, shape index: {}]   ;;  %s18636_s10 = inlined_call_operand.hbm [shape: f32[1,768], index: 10, kind: input, shape index: {}]   ;;  %s18637_s11 = inlined_call_operand.hbm [shape: bf16[2,128,384], index: 11, kind: input, shape index: {}]   ;;  %s18638_s12 = inlined_call_operand.hbm [shape: f32[2,384], index: 12, kind: input, shape index: {}]   ;;  %s18639_s13 = inlined_call_operand.hbm [shape: bf16[384,128], index: 13, kind: input, shape index: {}]   ;;  %s18640_s14 = inlined_call_operand.hbm [shape: f32[1,128], index: 14, kind: input, shape index: {}]   ;;  %s18641_s15 = inlined_call_operand.vmem [shape: f32[32,128], index: 15, kind: output, shape index: {}]  }
   0x1   :  { %21 = vsyncpa [#allocation8], 0 }
   0x2   :  { %22 = vsyncpa [#allocation11], 0 }
   0x3   :  { %23 = vsyncpa [#allocation14], 0 }
   0x4   :  { %24 = vsyncpa [#allocation17], 0 }
   0x5   :  { %25 = vsyncpa [#allocation20], 0  ;;  %s16102_s18 = smov [#allocation7]   ;;  %s16103_s20 = smov [#allocation10]  }
   0x6   :  { %s50_s19 = sshll.u32 %s16102_s18, 4  ;;  %s73_s21 = sshll.u32 %s16103_s20, 4  ;;  %s51_s19 = int_to_ptr.vmem [resolvable:$true] %s50_s19  ;;  %s16205_s21 = int_to_ptr.vmem [resolvable:$true] %s73_s21 }
   0x7   :  { %s15848_s24 = scalar_lea.hbm %s18630_s4, 32 }
   0x8   :  { %p15849_p0 = scmp.ne.s32.totalorder %s18630_s4, %s15848_s24  ;;  %p15852_p1 = scmp.lt.u32.totalorder %s15848_s24, %s18630_s4 }
   0xa   :  { %p15854_p2 = pnand %p15852_p1, %p15849_p0 }
   0xc   :  { %15857 = shalt.err (!%p15854_p2)
}
   0xd   :  { %s15858_s29 = scalar_lea.vmem %s51_s19, 32  ;;  %p15863_p4 = scmp.lt.s32.totalorder %s51_s19, %s51_s19 }
   0xe   :  { %p15859_p3 = scmp.ne.s32.totalorder %s51_s19, %s15858_s29  ;;  %p15864_p5 = scmp.lt.s32.totalorder %s15858_s29, %s15858_s29 }
  0x10   :  { %p15865_p6 = por %p15864_p5, %p15863_p4 }
  0x12   :  { %p15866_p7 = pnand %p15865_p6, %p15859_p3 }
  0x14   :  { %15869 = shalt.err (!%p15866_p7)
}
  0x15   :  { %53 = dma.hbm_to_vmem [thread:$0]  %s18630_s4, 32, %s51_s19, [#allocation8]  }
  0x16   :  { %s15870_s20 = scalar_lea.hbm %s18633_s7, 2048 }
  0x17   :  { %p15871_p8 = scmp.ne.s32.totalorder %s18633_s7, %s15870_s20  ;;  %p15874_p9 = scmp.lt.u32.totalorder %s15870_s20, %s18633_s7 }
  0x19   :  { %p15876_p10 = pnand %p15874_p9, %p15871_p8 }
  0x1b   :  { %15879 = shalt.err (!%p15876_p10)
}
  0x1c   :  { %s15880_s26 = scalar_lea.vmem %s16205_s21, 2048  ;;  %p15885_p12 = scmp.lt.s32.totalorder %s16205_s21, %s16205_s21 }
  0x1d   :  { %p15881_p11 = scmp.ne.s32.totalorder %s16205_s21, %s15880_s26  ;;  %p15886_p13 = scmp.lt.s32.totalorder %s15880_s26, %s15880_s26 }
  0x1f   :  { %p15887_p0 = por %p15886_p13, %p15885_p12 }
  0x21   :  { %p15888_p1 = pnand %p15887_p0, %p15881_p11 }
  0x23   :  { %15891 = shalt.err (!%p15888_p1)
}
  0x24   :  { %s16104_s4 = smov 128   ;;  %s16105_s19 = smov 8  }
  0x25   :  { %79 = dma.hbm_to_vmem [thread:$0]  %s18633_s7, 2048, %s16205_s21, [#allocation11], %s16104_s4, %s16104_s4, %s16105_s19  }
  0x26   :  { %s16106_s29 = smov [#allocation13]   ;;  %s15892_s18 = scalar_lea.hbm %s18635_s9, 6144 }
  0x27   :  { %s95_s30 = sshll.u32 %s16106_s29, 4  ;;  %p15893_p2 = scmp.ne.s32.totalorder %s18635_s9, %s15892_s18  ;;  %s96_s30 = int_to_ptr.vmem [resolvable:$true] %s95_s30 }
  0x28   :  { %p15896_p3 = scmp.lt.u32.totalorder %s15892_s18, %s18635_s9 }
  0x2a   :  { %p15898_p4 = pnand %p15896_p3, %p15893_p2 }
  0x2c   :  { %15901 = shalt.err (!%p15898_p4)
}
  0x2d   :  { %s15902_s25 = scalar_lea.vmem %s96_s30, 6144  ;;  %p15907_p6 = scmp.lt.s32.totalorder %s96_s30, %s96_s30 }
  0x2e   :  { %p15903_p5 = scmp.ne.s32.totalorder %s96_s30, %s15902_s25  ;;  %p15908_p7 = scmp.lt.s32.totalorder %s15902_s25, %s15902_s25 }
  0x30   :  { %p15909_p8 = por %p15908_p7, %p15907_p6 }
  0x32   :  { %p15910_p9 = pnand %p15909_p8, %p15903_p5 }
  0x34   :  { %15913 = shalt.err (!%p15910_p9)
}
  0x35   :  { %s16107_s7 = smov 384   ;;  %s16108_s21 = smov 24  }
  0x36   :  { %101 = dma.hbm_to_vmem [thread:$0]  %s18635_s9, 6144, %s96_s30, [#allocation14], %s16107_s7, %s16107_s7, %s16108_s21  }
  0x37   :  { %s16109_s19 = smov [#allocation16]   ;;  %s15914_s16 = scalar_lea.hbm %s18637_s11, 6144 }
  0x38   :  { %s117_s27 = sshll.u32 %s16109_s19, 4  ;;  %p15915_p10 = scmp.ne.s32.totalorder %s18637_s11, %s15914_s16  ;;  %s118_s27 = int_to_ptr.vmem [resolvable:$true] %s117_s27 }
  0x39   :  { %p15918_p11 = scmp.lt.u32.totalorder %s15914_s16, %s18637_s11 }
  0x3b   :  { %p15920_p12 = pnand %p15918_p11, %p15915_p10 }
  0x3d   :  { %15923 = shalt.err (!%p15920_p12)
}
  0x3e   :  { %s15924_s23 = scalar_lea.vmem %s118_s27, 6144  ;;  %p15929_p0 = scmp.lt.s32.totalorder %s118_s27, %s118_s27 }
  0x3f   :  { %p15925_p13 = scmp.ne.s32.totalorder %s118_s27, %s15924_s23  ;;  %p15930_p1 = scmp.lt.s32.totalorder %s15924_s23, %s15924_s23 }
  0x41   :  { %p15931_p2 = por %p15930_p1, %p15929_p0 }
  0x43   :  { %p15932_p3 = pnand %p15931_p2, %p15925_p13 }
  0x45   :  { %15935 = shalt.err (!%p15932_p3)
}
  0x46   :  { %s16110_s9 = smov 192   ;;  %s16111_s30 = smov 12  }
  0x47   :  { %123 = dma.hbm_to_vmem [thread:$0]  %s18637_s11, 6144, %s118_s27, [#allocation17], %s16110_s9, %s16110_s9, %s16111_s30  }
  0x48   :  { %s16112_s7 = smov [#allocation19]   ;;  %s16113_s26 = smov [#allocation5]  }
  0x49   :  { %s139_s21 = sshll.u32 %s16112_s7, 4  ;;  %s37_s4 = sshll.u32 %s16113_s26, 4  ;;  %s140_s21 = int_to_ptr.vmem [resolvable:$true] %s139_s21  ;;  %s16260_s4 = int_to_ptr.vmem [resolvable:$true] %s37_s4 }
  0x4a   :  { %s15936_s29 = scalar_lea.hbm %s18639_s13, 3072 }
  0x4b   :  { %p15937_p4 = scmp.ne.s32.totalorder %s18639_s13, %s15936_s29  ;;  %p15940_p5 = scmp.lt.u32.totalorder %s15936_s29, %s18639_s13 }
  0x4d   :  { %p15942_p6 = pnand %p15940_p5, %p15937_p4 }
  0x4f   :  { %15945 = shalt.err (!%p15942_p6)
}
  0x50   :  { %s15946_s11 = scalar_lea.vmem %s140_s21, 3072  ;;  %p15951_p8 = scmp.lt.s32.totalorder %s140_s21, %s140_s21 }
  0x51   :  { %p15947_p7 = scmp.ne.s32.totalorder %s140_s21, %s15946_s11  ;;  %p15952_p9 = scmp.lt.s32.totalorder %s15946_s11, %s15946_s11 }
  0x53   :  { %p15953_p10 = por %p15952_p9, %p15951_p8 }
  0x55   :  { %p15954_p11 = pnand %p15953_p10, %p15947_p7 }
  0x57   :  { %15957 = shalt.err (!%p15954_p11)
}
  0x58   :  { %s16114_s27 = smov 64   ;;  %s16115_s22 = smov 4  }
  0x59   :  { %145 = dma.hbm_to_vmem [thread:$0]  %s18639_s13, 3072, %s140_s21, [#allocation20], %s16114_s27, %s16114_s27, %s16115_s22  }
  0x5a   :  { %s15958_s25 = scalar_lea.hbm %s18629_s3, 6144 }
  0x5b   :  { %p15959_p12 = scmp.ne.s32.totalorder %s18629_s3, %s15958_s25  ;;  %p15962_p13 = scmp.lt.u32.totalorder %s15958_s25, %s18629_s3 }
  0x5d   :  { %p15964_p0 = pnand %p15962_p13, %p15959_p12 }
  0x5f   :  { %15967 = shalt.err (!%p15964_p0)
}
  0x60   :  { %s15968_s29 = scalar_lea.vmem %s16260_s4, 6144  ;;  %p15973_p2 = scmp.lt.s32.totalorder %s16260_s4, %s16260_s4 }
  0x61   :  { %p15969_p1 = scmp.ne.s32.totalorder %s16260_s4, %s15968_s29  ;;  %p15974_p3 = scmp.lt.s32.totalorder %s15968_s29, %s15968_s29 }
  0x63   :  { %p15975_p4 = por %p15974_p3, %p15973_p2 }
  0x65   :  { %p15976_p5 = pnand %p15975_p4, %p15969_p1 }
  0x67   :  { %15979 = shalt.err (!%p15976_p5)
}
  0x68   :  { %43 = dma.hbm_to_vmem [thread:$0]  %s18629_s3, 6144, %s16260_s4, [#allocation6], %s16114_s27, %s16114_s27, %s16115_s22  }
  0x69   :  { %s16116_s16 = smov [#allocation9]   ;;  %s16117_s18 = smov [#allocation12]  }
  0x6a   :  { %s59_s17 = sshll.u32 %s16116_s16, 4  ;;  %s86_s20 = sshll.u32 %s16117_s18, 4  ;;  %s60_s17 = int_to_ptr.vmem [resolvable:$true] %s59_s17  ;;  %s87_s20 = int_to_ptr.vmem [resolvable:$true] %s86_s20 }
  0x6b   :  { %s15980_s9 = scalar_lea.hbm %s18631_s5, 2048 }
  0x6c   :  { %p15981_p6 = scmp.ne.s32.totalorder %s18631_s5, %s15980_s9  ;;  %p15984_p7 = scmp.lt.u32.totalorder %s15980_s9, %s18631_s5 }
  0x6e   :  { %p15986_p8 = pnand %p15984_p7, %p15981_p6 }
  0x70   :  { %15989 = shalt.err (!%p15986_p8)
}
  0x71   :  { %s15990_s3 = scalar_lea.vmem %s60_s17, 2048  ;;  %p15995_p10 = scmp.lt.s32.totalorder %s60_s17, %s60_s17 }
  0x72   :  { %p15991_p9 = scmp.ne.s32.totalorder %s60_s17, %s15990_s3  ;;  %p15996_p11 = scmp.lt.s32.totalorder %s15990_s3, %s15990_s3 }
  0x74   :  { %p15997_p12 = por %p15996_p11, %p15995_p10 }
  0x76   :  { %p15998_p13 = pnand %p15997_p12, %p15991_p9 }
  0x78   :  { %16001 = shalt.err (!%p15998_p13)
}
  0x79   :  { %65 = dma.hbm_to_vmem [thread:$0]  %s18631_s5, 2048, %s60_s17, [#allocation8], %s16114_s27, %s16114_s27, %s16115_s22  }
  0x7a   :  { %s16002_s29 = scalar_lea.hbm %s18634_s8, 32 }
  0x7b   :  { %p16003_p0 = scmp.ne.s32.totalorder %s18634_s8, %s16002_s29  ;;  %p16006_p1 = scmp.lt.u32.totalorder %s16002_s29, %s18634_s8 }
  0x7d   :  { %p16008_p2 = pnand %p16006_p1, %p16003_p0 }
  0x7f   :  { %16011 = shalt.err (!%p16008_p2)
}
  0x80   :  { %s16012_s11 = scalar_lea.vmem %s87_s20, 32  ;;  %p16017_p4 = scmp.lt.s32.totalorder %s87_s20, %s87_s20 }
  0x81   :  { %p16013_p3 = scmp.ne.s32.totalorder %s87_s20, %s16012_s11  ;;  %p16018_p5 = scmp.lt.s32.totalorder %s16012_s11, %s16012_s11 }
  0x83   :  { %p16019_p6 = por %p16018_p5, %p16017_p4 }
  0x85   :  { %p16020_p7 = pnand %p16019_p6, %p16013_p3 }
  0x87   :  { %16023 = shalt.err (!%p16020_p7)
}
  0x88   :  { %89 = dma.hbm_to_vmem [thread:$0]  %s18634_s8, 32, %s87_s20, [#allocation11]  }
  0x89   :  { %s16118_s22 = smov [#allocation15]   ;;  %s16119_s23 = smov [#allocation18]  }
  0x8a   :  { %s108_s17 = sshll.u32 %s16118_s22, 4  ;;  %s130_s9 = sshll.u32 %s16119_s23, 4  ;;  %s109_s17 = int_to_ptr.vmem [resolvable:$true] %s108_s17  ;;  %s131_s9 = int_to_ptr.vmem [resolvable:$true] %s130_s9 }
  0x8b   :  { %s16024_s25 = scalar_lea.hbm %s18636_s10, 96 }
  0x8c   :  { %p16025_p8 = scmp.ne.s32.totalorder %s18636_s10, %s16024_s25  ;;  %p16028_p9 = scmp.lt.u32.totalorder %s16024_s25, %s18636_s10 }
  0x8e   :  { %p16030_p10 = pnand %p16028_p9, %p16025_p8 }
  0x90   :  { %16033 = shalt.err (!%p16030_p10)
}
  0x91   :  { %s16034_s8 = scalar_lea.vmem %s109_s17, 96  ;;  %p16039_p12 = scmp.lt.s32.totalorder %s109_s17, %s109_s17 }
  0x92   :  { %p16035_p11 = scmp.ne.s32.totalorder %s109_s17, %s16034_s8  ;;  %p16040_p13 = scmp.lt.s32.totalorder %s16034_s8, %s16034_s8 }
  0x94   :  { %p16041_p0 = por %p16040_p13, %p16039_p12 }
  0x96   :  { %p16042_p1 = pnand %p16041_p0, %p16035_p11 }
  0x98   :  { %16045 = shalt.err (!%p16042_p1)
}
  0x99   :  { %111 = dma.hbm_to_vmem [thread:$0]  %s18636_s10, 96, %s109_s17, [#allocation14]  }
  0x9a   :  { %s16046_s13 = scalar_lea.hbm %s18638_s12, 96 }
  0x9b   :  { %p16047_p2 = scmp.ne.s32.totalorder %s18638_s12, %s16046_s13  ;;  %p16050_p3 = scmp.lt.u32.totalorder %s16046_s13, %s18638_s12 }
  0x9d   :  { %p16052_p4 = pnand %p16050_p3, %p16047_p2 }
  0x9f   :  { %16055 = shalt.err (!%p16052_p4)
}
  0xa0   :  { %s16056_s5 = scalar_lea.vmem %s131_s9, 96  ;;  %p16061_p6 = scmp.lt.s32.totalorder %s131_s9, %s131_s9 }
  0xa1   :  { %p16057_p5 = scmp.ne.s32.totalorder %s131_s9, %s16056_s5  ;;  %p16062_p7 = scmp.lt.s32.totalorder %s16056_s5, %s16056_s5 }
  0xa3   :  { %p16063_p8 = por %p16062_p7, %p16061_p6 }
  0xa5   :  { %p16064_p9 = pnand %p16063_p8, %p16057_p5 }
  0xa7   :  { %16067 = shalt.err (!%p16064_p9)
}
  0xa8   :  { %133 = dma.hbm_to_vmem [thread:$0]  %s18638_s12, 96, %s131_s9, [#allocation17]  }
  0xa9   :  { %s16120_s22 = smov [#allocation21]   ;;  %s16068_s24 = scalar_lea.hbm %s18640_s14, 16 }
  0xaa   :  { %s152_s17 = sshll.u32 %s16120_s22, 4  ;;  %p16069_p10 = scmp.ne.s32.totalorder %s18640_s14, %s16068_s24  ;;  %s153_s17 = int_to_ptr.vmem [resolvable:$true] %s152_s17 }
  0xab   :  { %p16072_p11 = scmp.lt.u32.totalorder %s16068_s24, %s18640_s14 }
  0xad   :  { %p16074_p12 = pnand %p16072_p11, %p16069_p10 }
  0xaf   :  { %16077 = shalt.err (!%p16074_p12)
}
  0xb0   :  { %s16078_s26 = scalar_lea.vmem %s153_s17, 16  ;;  %s16082_s12 = scalar_lea.vmem %s153_s17, 32 }
  0xb1   :  { %p16079_p13 = scmp.ne.s32.totalorder %s153_s17, %s16078_s26  ;;  %p16083_p0 = scmp.lt.s32.totalorder %s153_s17, %s153_s17 }
  0xb2   :  { %p16084_p1 = scmp.lt.s32.totalorder %s16082_s12, %s16078_s26 }
  0xb4   :  { %p16085_p2 = por %p16084_p1, %p16083_p0 }
  0xb6   :  { %p16086_p3 = pnand %p16085_p2, %p16079_p13 }
  0xb8   :  { %16089 = shalt.err (!%p16086_p3)
}
  0xb9   :  { %155 = dma.hbm_to_vmem [thread:$0]  %s18640_s14, 16, %s153_s17, [#allocation20]  }
  0xba   :  { %16090 = dma.done.wait [#allocation6], 6144  }
  0xbb   :  { %16091 = vsyncadd [#allocation6], 4294961152 }
  0xbc   :  { %16092 = dma.done.wait [#allocation8], 2080  }
  0xbd   :  { %16093 = vsyncadd [#allocation8], 4294965216 }
  0xbe   :  { %16094 = dma.done.wait [#allocation11], 2080  }
  0xbf   :  { %16095 = vsyncadd [#allocation11], 4294965216 }
  0xc0   :  { %16096 = dma.done.wait [#allocation14], 6240  }
  0xc1   :  { %16097 = vsyncadd [#allocation14], 4294961056 }
  0xc2   :  { %16098 = dma.done.wait [#allocation17], 6240  }
  0xc3   :  { %16099 = vsyncadd [#allocation17], 4294961056 }
  0xc4   :  { %16100 = dma.done.wait [#allocation20], 3088  }
  0xc5   :  { %16101 = vsyncadd [#allocation20], 4294964208  ;;  %vm194_vm0 = vcmask 130048   ;;  %v18645_v0 = vmov 0   ;;  %v18643_v1 = vmov 0.0   ;;  %v190_v7 = vld [vmem:[%s18626_s0] sm:$0xff] }
  0xc6   :  { %279 = vmatprep.mubr.bf16.mxu1 %v18645_v0  ;;  %411 = vmatprep.mubr.bf16.mxu0 %v18645_v0  ;;  %199 = vst.msk [vmem:[#allocation2 + $0x20] sm:$0xff] %vm194_vm0, %v18643_v1  ;;  %v14654_v2 = vld [vmem:[%s18627_s1 + $0x24] ss:$16 sps:$4 sm:$0xff]   ;;  %v14656_v3 = vld [vmem:[%s18627_s1 + $0x20] ss:$16 sps:$4 sm:$0xff]   ;;  %v191_v8 = vld [vmem:[%s18626_s0 + $0x8] sm:$0xff] }
  0xc7   :  { %247 = vmatprep.subr.bf16.mxu1 %v14654_v2  ;;  %v14657_v4 = vld [vmem:[%s18627_s1 + $0x4] ss:$16 sps:$4 sm:$0xff]   ;;  %v14659_v5 = vld [vmem:[%s18627_s1] ss:$16 sps:$4 sm:$0xff]   ;;  %v14662_v6 = vld [vmem:[%s18627_s1 + $0x2c] ss:$16 sps:$4 sm:$0xff]  }
  0xc8   :  { %248 = vmatpush1.bf16.msra.mxu1 %v14656_v3  ;;  %379 = vmatprep.subr.bf16.mxu0 %v14657_v4  ;;  %v192_v9 = vld [vmem:[%s18626_s0 + $0x10] sm:$0xff]  ;;  %195 = vst.msk [vmem:[#allocation2] sm:$0xff] %vm194_vm0, %v190_v7  ;;  %196 = vst.msk [vmem:[#allocation2 + $0x8] sm:$0xff] %vm194_vm0, %v191_v8  ;;  %v193_v10 = vld [vmem:[%s18626_s0 + $0x18] sm:$0xff]  ;;  %vm16123_vm6 = vmmov 1   ;;  %vm16124_vm12 = vmmov 0  }
  0xc9   :  { %380 = vmatpush1.bf16.msra.mxu0 %v14659_v5  ;;  %300 = vmatprep.subr.bf16.mxu1 %v14662_v6  ;;  %197 = vst.msk [vmem:[#allocation2 + $0x10] sm:$0xff] %vm194_vm0, %v192_v9  ;;  %198 = vst.msk [vmem:[#allocation2 + $0x18] sm:$0xff] %vm194_vm0, %v193_v10  ;;  %v14665_v11 = vld [vmem:[%s18627_s1 + $0x44] ss:$16 sps:$4 sm:$0xff]   ;;  %v14660_v12 = vld [vmem:[%s18627_s1 + $0x28] ss:$16 sps:$4 sm:$0xff]  }
  0xca   :  { %522 = vmatprep.subr.bf16.mxu0 %v14665_v11  ;;  %v14663_v20 = vld [vmem:[%s18627_s1 + $0x40] ss:$16 sps:$4 sm:$0xff]   ;;  %v14668_v21 = vld [vmem:[%s18627_s1 + $0xc] ss:$16 sps:$4 sm:$0xff]   ;;  %v14666_v29 = vld [vmem:[%s18627_s1 + $0x8] ss:$16 sps:$4 sm:$0xff]   ;;  %v646_v11 = vlaneseq }
  0xcb   :  { %v14671_v31 = vld [vmem:[%s18627_s1 + $0x4c] ss:$16 sps:$4 sm:$0xff]   ;;  %v14669_v35 = vld [vmem:[%s18627_s1 + $0x48] ss:$16 sps:$4 sm:$0xff]   ;;  %v14674_v38 = vld [vmem:[#allocation5 + $0xc8] sm:$0xff]  }
  0xcc   :  { %v14672_v36 = vld [vmem:[#allocation5 + $0xc0] sm:$0xff]   ;;  %v14675_v39 = vld [vmem:[#allocation5 + $0x88] sm:$0xff]   ;;  %v14676_v40 = vld [vmem:[#allocation5 + $0xd0] sm:$0xff]  }
  0xcd   :  { %v14673_v37 = vld [vmem:[#allocation5 + $0x80] sm:$0xff]   ;;  %v14677_v41 = vld [vmem:[#allocation5 + $0x90] sm:$0xff]   ;;  %v14678_v42 = vld [vmem:[#allocation5 + $0xd8] sm:$0xff]  }
  0xce   :  { %v14679_v43 = vld [vmem:[#allocation5 + $0x98] sm:$0xff]   ;;  %v14680_v44 = vld [vmem:[#allocation5 + $0xe0] sm:$0xff]   ;;  %v14682_v46 = vld [vmem:[#allocation5 + $0xe8] sm:$0xff]  }
  0xcf   :  { %v210_v13 = vld [vmem:[#allocation2 + $0x2] sm:$0xff]  ;;  %v14683_v47 = vld [vmem:[#allocation5 + $0xa8] sm:$0xff]   ;;  %v14684_v48 = vld [vmem:[#allocation5 + $0xf0] sm:$0xff]  }
  0xd0   :  { %v211_v14 = vld [vmem:[#allocation2 + $0xa] sm:$0xff]  ;;  %v200_v15 = vld [vmem:[#allocation2] sm:$0xff]  ;;  %v212_v19 = vld [vmem:[#allocation2 + $0x12] sm:$0xff] }
  0xd1   :  { %v214_v16 = vpack.c.bf16 %v211_v14, %v210_v13  ;;  %v201_v17 = vld [vmem:[#allocation2 + $0x8] sm:$0xff]  ;;  %v213_v22 = vld [vmem:[#allocation2 + $0x1a] sm:$0xff]  ;;  %v202_v23 = vld [vmem:[#allocation2 + $0x10] sm:$0xff] }
  0xd2   :  { %v204_v18 = vpack.c.bf16 %v201_v17, %v200_v15  ;;  %v203_v24 = vld [vmem:[#allocation2 + $0x18] sm:$0xff]  ;;  %v215_v25 = vpack.c.bf16 %v213_v22, %v212_v19  ;;  %v485_v27 = vld [vmem:[#allocation2 + $0x4] sm:$0xff]  ;;  %v486_v28 = vld [vmem:[#allocation2 + $0xc] sm:$0xff] }
  0xd3   :  { %12421 = vmatmul.mubr.msk.bf16.vlgmr.msra.gmra.mrb[0].mxu1 %vm194_vm0, %v214_v16  ;;  %v205_v26 = vpack.c.bf16 %v203_v24, %v202_v23  ;;  %v489_v30 = vpack.c.bf16 %v486_v28, %v485_v27  ;;  %v487_v32 = vld [vmem:[#allocation2 + $0x14] sm:$0xff]  ;;  %v488_v33 = vld [vmem:[#allocation2 + $0x1c] sm:$0xff]  ;;  %v14681_v45 = vld [vmem:[#allocation5 + $0xa0] sm:$0xff]  }
  0xd4   :  { %301 = vmatpush1.bf16.msra.mxu1 %v14660_v12  ;;  %12429 = vmatmul.mubr.msk.bf16.vlgmr.msra.gmra.mrb[0].mxu0 %vm194_vm0, %v204_v18  ;;  %v490_v34 = vpack.c.bf16 %v488_v33, %v487_v32  ;;  %v14685_v49 = vld [vmem:[#allocation5 + $0xb0] sm:$0xff]   ;;  %v14686_v50 = vld [vmem:[#allocation5 + $0xf8] sm:$0xff]   ;;  %v14688_v52 = vld [vmem:[#allocation5 + $0x40] sm:$0xff]   ;;  %v16438_v12 = vshrl.u32 %v646_v11, 7 }
  0xd5   :  { %289 = vmatprep.mubr.bf16.mxu1 %v18645_v0  ;;  %421 = vmatprep.mubr.bf16.mxu0 %v18645_v0  ;;  %v14687_v51 = vld [vmem:[#allocation5 + $0xb8] sm:$0xff]   ;;  %v14689_v53 = vld [vmem:[#allocation5] sm:$0xff]   ;;  %v14690_v54 = vld [vmem:[#allocation5 + $0x48] sm:$0xff]  }
  0xd6   :  { %523 = vmatpush1.bf16.msra.mxu0 %v14663_v20  ;;  %432 = vmatprep.subr.bf16.mxu1 %v14668_v21  ;;  %v14691_v55 = vld [vmem:[#allocation5 + $0x8] sm:$0xff]   ;;  %v14692_v56 = vld [vmem:[#allocation5 + $0x50] sm:$0xff]   ;;  %v14694_v58 = vld [vmem:[#allocation5 + $0x140] sm:$0xff]   ;;  %v16447_v19 = vsub.s32 0, %v16438_v12  ;;  %v16450_v20 = vsub.s32 1, %v16438_v12  ;;  %v16455_v23 = vsub.s32 2, %v16438_v12 }
  0xd7   :  { %13465 = vmatprep.subr.bf16.mxu0 %v14672_v36  ;;  %v14693_v57 = vld [vmem:[#allocation5 + $0x10] sm:$0xff]   ;;  %v14696_v59 = vld [vmem:[#allocation5 + $0x58] sm:$0xff]   ;;  %v14700_v61 = vld [vmem:[#allocation5 + $0x60] sm:$0xff]   ;;  %vm716_vm1 = vcmp.lt.s32.totalorder %v16438_v12, 6  ;;  %vm836_vm3 = vcmp.lt.s32.totalorder %v16438_v12, 2 }
  0xd8   :  { %v14697_v60 = vld [vmem:[#allocation5 + $0x18] sm:$0xff]   ;;  %v14701_v62 = vld [vmem:[#allocation5 + $0x20] sm:$0xff]   ;;  %v14704_v63 = vld [vmem:[#allocation5 + $0x68] sm:$0xff]  }
  0xd9   :  { %v14705_v2 = vld [vmem:[#allocation5 + $0x28] sm:$0xff]   ;;  %v14708_v3 = vld [vmem:[#allocation5 + $0x70] sm:$0xff]   ;;  %v14712_v5 = vld [vmem:[#allocation5 + $0x78] sm:$0xff]  }
  0xda   :  { %v14709_v4 = vld [vmem:[#allocation5 + $0x30] sm:$0xff]   ;;  %v14713_v6 = vld [vmem:[#allocation5 + $0x38] sm:$0xff]  }
  0xdb   :  { %12422 = vmatmul.mubr.msk.bf16.gmra.mrb[4].mxu1 %vm194_vm0, %v215_v25 }
  0xdc   :  { %12430 = vmatmul.mubr.msk.bf16.gmra.mrb[4].mxu0 %vm194_vm0, %v205_v26  ;;  %332 = vmatprep.mubr.bf16.mxu1 %v18645_v0 }
  0xdd   :  { %554 = vmatprep.mubr.bf16.mxu0 %v18645_v0 }
  0xe3   :  { %12423 = vmatmul.mubr.msk.bf16.vlgmr.msra.gmra.mrb[8].mxu1 %vm194_vm0, %v214_v16  ;;  %v735_v16 = vadd.s32 24, %v16438_v12 }
  0xe4   :  { %433 = vmatpush1.bf16.msra.mxu1 %v14666_v29  ;;  %12441 = vmatmul.mubr.msk.bf16.vlgmr.msra.gmra.mrb[0].mxu0 %vm194_vm0, %v489_v30 }
  0xe5   :  { %342 = vmatprep.mubr.bf16.mxu1 %v18645_v0  ;;  %564 = vmatprep.mubr.bf16.mxu0 %v18645_v0  ;;  %v761_v21 = vand.u32 31, %v735_v16 }
  0xe6   :  { %575 = vmatprep.subr.bf16.mxu1 %v14671_v31  ;;  %13466 = vmatpush3.bf16.msra.mxu0 %v14673_v37 }
  0xe7   :  { %13467 = vmatprep.subr.bf16.mxu0 %v14674_v38  ;;  %vm16461_vm2 = vcmp.lt.s32.totalorder %v761_v21, 30 }
  0xe8   :  { %vm16728_vm9 = vmpackc.low %vm16461_vm2, %vm16123_vm6 }
  0xea   :  { %13468 = vmatpush3.bf16.msra.mxu0 %v14675_v39 }
  0xeb   :  { %12424 = vmatmul.mubr.msk.bf16.gmra.mrb[12].mxu1 %vm194_vm0, %v215_v25  ;;  %13469 = vmatprep.subr.bf16.mxu0 %v14676_v40 }
  0xec   :  { %12442 = vmatmul.mubr.msk.bf16.gmra.mrb[4].mxu0 %vm194_vm0, %v490_v34  ;;  %464 = vmatprep.mubr.bf16.mxu1 %v18645_v0 }
  0xee   :  { %13470 = vmatpush3.bf16.msra.mxu0 %v14677_v41 }
  0xef   :  { %13471 = vmatprep.subr.bf16.mxu0 %v14678_v42 }
  0xf2   :  { %13472 = vmatpush3.bf16.msra.mxu0 %v14679_v43 }
  0xf3   :  { %12431 = vmatmul.mubr.msk.bf16.vlgmr.msra.gmra.mrb[8].mxu1 %vm194_vm0, %v204_v18  ;;  %13473 = vmatprep.subr.bf16.mxu0 %v14680_v44  ;;  %v16444_v18 = vld [vmem:[%s18628_s2] sm:$0xf] }
  0xf4   :  { %576 = vmatpush1.bf16.msra.mxu1 %v14669_v35  ;;  %474 = vmatprep.mubr.bf16.mxu1 %v18645_v0  ;;  %v649_v22 = vrot.slane %v16444_v18, %v16447_v19  ;;  %v653_v25 = vrot.slane %v16444_v18, %v16450_v20 }
  0xf5   :  { %13505 = vmatprep.subr.bf16.mxu1 %v14688_v52 }
  0xf6   :  { %13474 = vmatpush3.bf16.msra.mxu0 %v14681_v45 }
  0xf7   :  { %13475 = vmatprep.subr.bf16.mxu0 %v14682_v46 }
  0xfa   :  { %13476 = vmatpush3.bf16.msra.mxu0 %v14683_v47 }
  0xfb   :  { %12432 = vmatmul.mubr.msk.bf16.gmra.mrb[12].mxu1 %vm194_vm0, %v205_v26  ;;  %13477 = vmatprep.subr.bf16.mxu0 %v14684_v48  ;;  %v18642_v26 = vsub.s32 3, %v16438_v12 }
  0xfc   :  { %607 = vmatprep.mubr.bf16.mxu1 %v18645_v0 }
  0xfe   :  { %13478 = vmatpush3.bf16.msra.mxu0 %v14685_v49 }
  0xff   :  { %13479 = vmatprep.subr.bf16.mxu0 %v14686_v50 }
 0x102   :  { %13480 = vmatpush3.bf16.msra.mxu0 %v14687_v51 }
 0x103   :  { %12443 = vmatmul.mubr.msk.bf16.vlgmr.msra.gmra.mrb[8].mxu1 %vm194_vm0, %v489_v30  ;;  %13545 = vmatprep.subr.bf16.mxu0 %v14694_v58 }
 0x104   :  { %617 = vmatprep.mubr.bf16.mxu1 %v18645_v0  ;;  %13506 = vmatpush3.bf16.msra.mxu1 %v14689_v53  ;;  %v14717_v0 = vld [vmem:[#allocation5 + $0x130] sm:$0xff]  }
 0x105   :  { %13507 = vmatprep.subr.bf16.mxu1 %v14690_v54 }
 0x108   :  { %13508 = vmatpush3.bf16.msra.mxu1 %v14691_v55 }
 0x109   :  { %13509 = vmatprep.subr.bf16.mxu1 %v14692_v56 }
 0x10b   :  { %12444 = vmatmul.mubr.msk.bf16.gmra.mrb[12].mxu1 %vm194_vm0, %v490_v34 }
 0x10c   :  { %13510 = vmatpush3.bf16.msra.mxu1 %v14693_v57 }
 0x10d   :  { %13511 = vmatprep.subr.bf16.mxu1 %v14696_v59 }
 0x110   :  { %13512 = vmatpush3.bf16.msra.mxu1 %v14697_v60 }
 0x111   :  { %13513 = vmatprep.subr.bf16.mxu1 %v14700_v61 }
 0x114   :  { %13514 = vmatpush3.bf16.msra.mxu1 %v14701_v62 }
 0x115   :  { %13515 = vmatprep.subr.bf16.mxu1 %v14704_v63 }
 0x118   :  { %13516 = vmatpush3.bf16.msra.mxu1 %v14705_v2 }
 0x119   :  { %13517 = vmatprep.subr.bf16.mxu1 %v14708_v3 }
 0x11c   :  { %13518 = vmatpush3.bf16.msra.mxu1 %v14709_v4 }
 0x11d   :  { %13519 = vmatprep.subr.bf16.mxu1 %v14712_v5 }
 0x120   :  { %13520 = vmatpush3.bf16.msra.mxu1 %v14713_v6 }
 0x1a6   :  { %v281_v7 = vpop.f32.mrb[0].mxu1 }
 0x1a7   :  { %v283_v8 = vpop.f32.mrb[1].mxu1 }
 0x1a8   :  { %v285_v9 = vpop.f32.mrb[2].mxu1 }
 0x1a9   :  { %v287_v10 = vpop.f32.mrb[3].mxu1 }
 0x1ae   :  { %v291_v13 = vpop.f32.mrb[4].mxu1 }
 0x1af   :  { %v293_v14 = vpop.f32.mrb[5].mxu1 }
 0x1b0   :  { %v295_v15 = vpop.f32.mrb[6].mxu1 }
 0x1b1   :  { %v297_v17 = vpop.f32.mrb[7].mxu1 }
 0x1b7   :  { %v556_v24 = vpop.f32.mrb[0].mxu0 }
 0x1b8   :  { %v14599_v27 = vadd.f32 %v556_v24, %v281_v7  ;;  %v558_v28 = vpop.f32.mrb[1].mxu0 }
 0x1b9   :  { %v14600_v29 = vadd.f32 %v558_v28, %v283_v8  ;;  %v560_v30 = vpop.f32.mrb[2].mxu0 }
 0x1ba   :  { %v666_v31 = vadd.f32 %v14599_v27, %v649_v22  ;;  %v14601_v32 = vadd.f32 %v560_v30, %v285_v9  ;;  %v562_v33 = vpop.f32.mrb[3].mxu0  ;;  %v14695_v27 = vld [vmem:[#allocation5 + $0x100] sm:$0xff]  }
 0x1bb   :  { %v667_v34 = vadd.f32 %v14600_v29, %v653_v25  ;;  %v14602_v35 = vadd.f32 %v562_v33, %v287_v10 }
 0x1bc   :  { %v682_v36 = vmax.f32 %v666_v31, 0.0  ;;  %v670_v37 = vadd.f32 %v14601_v32, %v649_v22  ;;  %v14698_v32 = vld [vmem:[#allocation5 + $0x148] sm:$0xff]  }
 0x1bd   :  { %v683_v38 = vmax.f32 %v667_v34, 0.0  ;;  %v671_v39 = vadd.f32 %v14602_v35, %v653_v25 }
 0x1be   :  { %v698_v40 = vrot.slane %v682_v36, 2  ;;  %v686_v41 = vmax.f32 %v670_v37, 0.0 }
 0x1bf   :  { %v699_v42 = vrot.slane %v683_v38, 2  ;;  %v687_v43 = vmax.f32 %v671_v39, 0.0  ;;  %v566_v44 = vpop.f32.mrb[4].mxu0 }
 0x1c0   :  { %v702_v45 = vrot.slane %v686_v41, 2  ;;  %v14603_v46 = vadd.f32 %v566_v44, %v291_v13  ;;  %v568_v47 = vpop.f32.mrb[5].mxu0 }
 0x1c1   :  { %v703_v49 = vrot.slane %v687_v43, 2  ;;  %v14604_v50 = vadd.f32 %v568_v47, %v293_v14  ;;  %v570_v51 = vpop.f32.mrb[6].mxu0 }
 0x1c2   :  { %v725_v52 = vsel %vm716_vm1, %v698_v40, %v702_v45  ;;  %v674_v53 = vadd.f32 %v14603_v46, %v649_v22  ;;  %v14605_v54 = vadd.f32 %v570_v51, %v295_v15  ;;  %v572_v55 = vpop.f32.mrb[7].mxu0 }
 0x1c3   :  { %v16468_v56 = vmax.f32 %v682_v36, %v725_v52  ;;  %v675_v57 = vadd.f32 %v14604_v50, %v653_v25  ;;  %v14606_v58 = vadd.f32 %v572_v55, %v297_v17  ;;  %v726_v59 = vsel %vm716_vm1, %v699_v42, %v703_v49 }
 0x1c4   :  { %v690_v60 = vmax.f32 %v674_v53, 0.0  ;;  %v678_v61 = vadd.f32 %v14605_v54, %v649_v22  ;;  %v16472_v62 = vmax.f32 %v683_v38, %v726_v59  ;;  %v16484_v17 = vrot.slane %v16444_v18, %v16455_v23 }
 0x1c5   :  { %v820_v63 = vrot.slane %v16468_v56, 6  ;;  %v1332_v2 = vrot.slane %v16468_v56, 2  ;;  %v691_v3 = vmax.f32 %v675_v57, 0.0  ;;  %v679_v4 = vadd.f32 %v14606_v58, %v653_v25 }
 0x1c6   :  { %v706_v5 = vrot.slane %v690_v60, 2  ;;  %v694_v6 = vmax.f32 %v678_v61, 0.0  ;;  %v821_v7 = vrot.slane %v16472_v62, 6  ;;  %v1333_v8 = vrot.slane %v16472_v62, 2 }
 0x1c7   :  { %v707_v9 = vrot.slane %v691_v3, 2  ;;  %v695_v10 = vmax.f32 %v679_v4, 0.0  ;;  %v16493_v25 = vrot.slane %v16444_v18, %v18642_v26 }
 0x1c8   :  { %v721_v11 = vsel %vm716_vm1, %v702_v45, %v706_v5  ;;  %v710_v13 = vrot.slane %v694_v6, 2 }
 0x1c9   :  { %v808_v14 = vmax.f32 %v686_v41, %v721_v11  ;;  %v711_v15 = vrot.slane %v695_v10, 2  ;;  %v722_v16 = vsel %vm716_vm1, %v703_v49, %v707_v9  ;;  %v14702_v49 = vld [vmem:[#allocation5 + $0x150] sm:$0xff]  }
 0x1ca   :  { %v729_v21 = vsel %vm716_vm1, %v710_v13, %v698_v40  ;;  %v809_v22 = vmax.f32 %v687_v43, %v722_v16  ;;  %v717_v24 = vsel %vm716_vm1, %v706_v5, %v710_v13 }
 0x1cb   :  { %v822_v28 = vrot.slane %v808_v14, 6  ;;  %v1334_v29 = vrot.slane %v808_v14, 2  ;;  %v800_v30 = vsel %vm16461_vm2, %v729_v21, 0.0  ;;  %v730_v31 = vsel %vm716_vm1, %v711_v15, %v699_v42  ;;  %v14699_v42 = vld [vmem:[#allocation5 + $0x108] sm:$0xff]  }
 0x1cc   :  { %v16499_v33 = vmax.f32 %v694_v6, %v800_v30  ;;  %v801_v34 = vsel %vm16461_vm2, %v730_v31, 0.0  ;;  %v970_v35 = vpack.c.bf16 %v809_v22, %v16472_v62  ;;  %v969_v18 = vpack.c.bf16 %v808_v14, %v16468_v56  ;;  %v14706_v6 = vld [vmem:[#allocation5 + $0x158] sm:$0xff]   ;;  %v14710_v30 = vld [vmem:[#allocation5 + $0x160] sm:$0xff]  }
 0x1cd   :  { %v16505_v36 = vmax.f32 %v695_v10, %v801_v34  ;;  %v718_v37 = vsel %vm716_vm1, %v707_v9, %v711_v15  ;;  %v812_v38 = vmax.f32 %v690_v60, %v717_v24  ;;  %v16513_v39 = vsel %vm836_vm3, %v820_v63, %v822_v28  ;;  %v14703_v60 = vld [vmem:[#allocation5 + $0x110] sm:$0xff]  }
 0x1ce   :  { %v1338_v40 = vrot.slane %v16499_v33, 2  ;;  %1138 = vmatprep.mubr.bf16.mxu0 %v970_v35  ;;  %v813_v41 = vmax.f32 %v691_v3, %v718_v37  ;;  %v823_v43 = vrot.slane %v809_v22, 6  ;;  %v1335_v44 = vrot.slane %v809_v22, 2 }
 0x1cf   :  { %v1339_v45 = vrot.slane %v16505_v36, 2  ;;  %1139 = vmatmul.mubr.bf16.vlgmr.msra.gmra.mrb[8].mxu0 %v969_v18  ;;  %v971_v46 = vpack.c.bf16 %v16499_v33, %v812_v38  ;;  %v1336_v47 = vrot.slane %v812_v38, 2  ;;  %v827_v50 = vrot.slane %v16505_v36, 6 }
 0x1d0   :  { %v972_v51 = vpack.c.bf16 %v16505_v36, %v813_v41  ;;  %13546 = vmatpush3.bf16.msra.mxu0 %v14695_v27  ;;  %v16524_v52 = vsel %vm836_vm3, %v821_v7, %v823_v43  ;;  %v825_v53 = vrot.slane %v813_v41, 6  ;;  %v1337_v54 = vrot.slane %v813_v41, 2  ;;  %v14707_v27 = vld [vmem:[#allocation5 + $0x118] sm:$0xff]  }
 0x1d1   :  { %13547 = vmatprep.subr.bf16.mxu0 %v14698_v32  ;;  %v16530_v55 = vsel %vm716_vm1, %v1333_v8, %v1335_v44  ;;  %v824_v57 = vrot.slane %v812_v38, 6  ;;  %v826_v58 = vrot.slane %v16499_v33, 6  ;;  %v16535_v59 = vsel %vm716_vm1, %v1334_v29, %v1336_v47 }
 0x1d2   :  { %1146 = vmatprep.mubr.bf16.mxu0 %v972_v51  ;;  %v16541_v61 = vsel %vm836_vm3, %v825_v53, %v827_v50  ;;  %v16545_v3 = vsel %vm836_vm3, %v823_v43, %v825_v53  ;;  %v16549_v4 = vsel %vm716_vm1, %v1335_v44, %v1337_v54  ;;  %v16555_v5 = vsel %vm716_vm1, %v1332_v2, %v1334_v29 }
 0x1d3   :  { %v932_v9 = vpack.c.bf16 %v16541_v61, %v16545_v3  ;;  %v1385_v10 = vpack.c.bf16 %v16549_v4, %v16530_v55  ;;  %v16565_v11 = vsel %vm836_vm3, %v824_v57, %v826_v58  ;;  %v16569_v13 = vsel %vm836_vm3, %v822_v28, %v824_v57  ;;  %v14720_v4 = vld [vmem:[#allocation9 + $0x40] sm:$0xff]  }
 0x1d4   :  { %13548 = vmatpush3.bf16.msra.mxu0 %v14699_v42  ;;  %v16579_v16 = vsel %vm716_vm1, %v1337_v54, %v1339_v45  ;;  %v16585_v21 = vsel %vm716_vm1, %v1336_v47, %v1338_v40  ;;  %v16588_v22 = vadd.s32 32, %v16438_v12  ;;  %v740_v34 = vand.u32 31, %v16438_v12  ;;  %v14711_v42 = vld [vmem:[#allocation5 + $0x120] sm:$0xff]   ;;  %v14714_v47 = vld [vmem:[#allocation5 + $0x168] sm:$0xff]   ;;  %13585 = vmatprep.subr.bf16.mxu1 %v14720_v4 }
 0x1d5   :  { %13549 = vmatprep.subr.bf16.mxu0 %v14702_v49  ;;  %v856_v61 = vadd.s32 56, %v16438_v12  ;;  %v18659_v3 = vpack.c.bf16 %v16565_v11, %v16569_v13  ;;  %v14723_v11 = vld [vmem:[#allocation9 + $0x8] sm:$0xff]   ;;  %v14724_v13 = vld [vmem:[#allocation9 + $0x50] sm:$0xff]  }
 0x1d6   :  { %v609_v24 = vpop.f32.mrb[8].mxu1  ;;  %v861_v43 = vand.u32 31, %v16588_v22  ;;  %vm16607_vm4 = vcmp.ge.s32.totalorder %v740_v34, 2 }
 0x1d7   :  { %v668_v28 = vadd.f32 %v16484_v17, %v609_v24  ;;  %1147 = vmatmul.mubr.bf16.gmra.mrb[12].mxu0 %v971_v46  ;;  %v611_v29 = vpop.f32.mrb[9].mxu1  ;;  %vm16675_vm7 = vmpackc.low %vm16123_vm6, %vm16607_vm4 }
 0x1d8   :  { %v669_v31 = vadd.f32 %v16493_v25, %v611_v29  ;;  %v613_v32 = vpop.f32.mrb[10].mxu1  ;;  %13550 = vmatpush3.bf16.msra.mxu0 %v14703_v60  ;;  %v14715_v60 = vld [vmem:[#allocation5 + $0x128] sm:$0xff]   ;;  %v14716_v29 = vld [vmem:[#allocation5 + $0x170] sm:$0xff]   ;;  %vm16638_vm5 = vcmp.ge.s32.totalorder %v861_v43, 2 }
 0x1d9   :  { %v684_v35 = vmax.f32 %v668_v28, 0.0  ;;  %v672_v18 = vadd.f32 %v16484_v17, %v613_v32  ;;  %v615_v37 = vpop.f32.mrb[11].mxu1  ;;  %13551 = vmatprep.subr.bf16.mxu0 %v14706_v6  ;;  %vm16704_vm8 = vmpackc.low %vm16123_vm6, %vm16638_vm5 }
 0x1da   :  { %v685_v38 = vmax.f32 %v669_v31, 0.0  ;;  %v673_v41 = vadd.f32 %v16493_v25, %v615_v37 }
 0x1db   :  { %v700_v44 = vrot.slane %v684_v35, 2  ;;  %v688_v46 = vmax.f32 %v672_v18, 0.0 }
 0x1dc   :  { %v701_v49 = vrot.slane %v685_v38, 2  ;;  %v689_v51 = vmax.f32 %v673_v41, 0.0  ;;  %13552 = vmatpush3.bf16.msra.mxu0 %v14707_v27 }
 0x1dd   :  { %v704_v53 = vrot.slane %v688_v46, 2  ;;  %13553 = vmatprep.subr.bf16.mxu0 %v14710_v30 }
 0x1de   :  { %v705_v54 = vrot.slane %v689_v51, 2  ;;  %v619_v57 = vpop.f32.mrb[12].mxu1 }
 0x1df   :  { %v727_v6 = vsel %vm716_vm1, %v700_v44, %v704_v53  ;;  %v676_v24 = vadd.f32 %v16484_v17, %v619_v57  ;;  %v621_v28 = vpop.f32.mrb[13].mxu1 }
 0x1e0   :  { %v728_v22 = vsel %vm716_vm1, %v701_v49, %v705_v54  ;;  %v677_v31 = vadd.f32 %v16493_v25, %v621_v28  ;;  %v623_v32 = vpop.f32.mrb[14].mxu1  ;;  %v16602_v18 = vmax.f32 %v684_v35, %v727_v6  ;;  %13554 = vmatpush3.bf16.msra.mxu0 %v14711_v42 }
 0x1e1   :  { %v692_v27 = vmax.f32 %v676_v24, 0.0  ;;  %v680_v30 = vadd.f32 %v16484_v17, %v623_v32  ;;  %v625_v37 = vpop.f32.mrb[15].mxu1  ;;  %v16605_v41 = vmax.f32 %v685_v38, %v728_v22  ;;  %13555 = vmatprep.subr.bf16.mxu0 %v14714_v47  ;;  %v14718_v24 = vld [vmem:[#allocation5 + $0x178] sm:$0xff]  }
 0x1e2   :  { %v693_v26 = vmax.f32 %v677_v31, 0.0  ;;  %v681_v1 = vadd.f32 %v16493_v25, %v625_v37  ;;  %v828_v28 = vrot.slane %v16602_v18, 6  ;;  %v1340_v35 = vrot.slane %v16602_v18, 2 }
 0x1e3   :  { %v708_v42 = vrot.slane %v692_v27, 2  ;;  %v696_v6 = vmax.f32 %v680_v30, 0.0  ;;  %v829_v17 = vrot.slane %v16605_v41, 6  ;;  %v1341_v38 = vrot.slane %v16605_v41, 2  ;;  %v14719_v30 = vld [vmem:[#allocation5 + $0x138] sm:$0xff]  }
 0x1e4   :  { %v709_v47 = vrot.slane %v693_v26, 2  ;;  %v697_v34 = vmax.f32 %v681_v1, 0.0  ;;  %13556 = vmatpush3.bf16.msra.mxu0 %v14715_v60  ;;  %v16620_v25 = vsel %vm836_vm3, %v826_v58, %v828_v28  ;;  %v16628_v22 = vsel %vm716_vm1, %v1338_v40, %v1340_v35 }
 0x1e5   :  { %v723_v31 = vsel %vm716_vm1, %v704_v53, %v708_v42  ;;  %v712_v32 = vrot.slane %v696_v6, 2  ;;  %13557 = vmatprep.subr.bf16.mxu0 %v14716_v29  ;;  %v16636_v1 = vsel %vm836_vm3, %v827_v50, %v829_v17  ;;  %v16646_v33 = vsel %vm716_vm1, %v1339_v45, %v1341_v38 }
 0x1e6   :  { %v724_v40 = vsel %vm716_vm1, %v705_v54, %v709_v47  ;;  %v713_v53 = vrot.slane %v697_v34, 2  ;;  %v16650_v60 = vmax.f32 %v688_v46, %v723_v31  ;;  %v18662_v55 = vpack.c.bf16 %v16628_v22, %v16585_v21  ;;  %v14726_v21 = vld [vmem:[#allocation9 + $0x58] sm:$0xff]   ;;  %v14728_v22 = vld [vmem:[#allocation9 + $0x60] sm:$0xff]  }
 0x1e7   :  { %v719_v43 = vsel %vm716_vm1, %v708_v42, %v712_v32  ;;  %v731_v29 = vsel %vm716_vm1, %v712_v32, %v700_v44  ;;  %v811_v36 = vmax.f32 %v689_v51, %v724_v40 }
 0x1e8   :  { %v802_v54 = vsel %vm16461_vm2, %v731_v29, 0.0  ;;  %v720_v46 = vsel %vm716_vm1, %v709_v47, %v713_v53  ;;  %v732_v37 = vsel %vm716_vm1, %v713_v53, %v701_v49  ;;  %v973_v42 = vpack.c.bf16 %v16650_v60, %v16602_v18  ;;  %13558 = vmatpush3.bf16.msra.mxu0 %v14717_v0 }
 0x1e9   :  { %v818_v31 = vmax.f32 %v696_v6, %v802_v54  ;;  %v803_v44 = vsel %vm16461_vm2, %v732_v37, 0.0  ;;  %v974_v51 = vpack.c.bf16 %v811_v36, %v16605_v41  ;;  %v815_v32 = vmax.f32 %v693_v26, %v720_v46  ;;  %13559 = vmatprep.subr.bf16.mxu0 %v14718_v24  ;;  %v16778_v26 = vld [vmem:[#allocation10 + $0x10] ss:$8 sps:$4 sm:$0xff]  }
 0x1ea   :  { %v819_v40 = vmax.f32 %v697_v34, %v803_v44  ;;  %v814_v29 = vmax.f32 %v692_v27, %v719_v43  ;;  %v831_v45 = vrot.slane %v811_v36, 6  ;;  %v830_v47 = vrot.slane %v16650_v60, 6 }
 0x1eb   :  { %v834_v50 = vrot.slane %v818_v31, 6  ;;  %v1346_v15 = vrot.slane %v818_v31, 2  ;;  %1154 = vmatprep.mubr.bf16.mxu0 %v974_v51  ;;  %v833_v49 = vrot.slane %v815_v32, 6  ;;  %v1343_v53 = vrot.slane %v811_v36, 2  ;;  %v14730_v51 = vld [vmem:[#allocation9 + $0x68] sm:$0xff]  }
 0x1ec   :  { %v835_v14 = vrot.slane %v819_v40, 6  ;;  %v1347_v0 = vrot.slane %v819_v40, 2  ;;  %1155 = vmatmul.mubr.bf16.gmra.mrb[16].mxu0 %v973_v42  ;;  %v976_v6 = vpack.c.bf16 %v819_v40, %v815_v32  ;;  %v975_v27 = vpack.c.bf16 %v818_v31, %v814_v29  ;;  %v14732_v40 = vld [vmem:[#allocation9 + $0x70] sm:$0xff]  }
 0x1ed   :  { %v851_v41 = vsel %vm836_vm3, %v834_v50, %v820_v63  ;;  %13560 = vmatpush3.bf16.msra.mxu0 %v14719_v30  ;;  %v842_v24 = vsel %vm836_vm3, %v829_v17, %v831_v45  ;;  %v841_v34 = vsel %vm836_vm3, %v828_v28, %v830_v47  ;;  %v840_v57 = vsel %vm836_vm3, %v831_v45, %v833_v49 }
 0x1ee   :  { %v12481_v43 = vpack.c.bf16 %v16513_v39, %v851_v41  ;;  %1162 = vmatprep.mubr.bf16.mxu0 %v976_v6  ;;  %v852_v36 = vsel %vm836_vm3, %v835_v14, %v821_v7  ;;  %v12484_v63 = vpack.c.bf16 %v842_v24, %v16636_v1  ;;  %v12487_v30 = vpack.c.bf16 %v841_v34, %v16620_v25  ;;  %v16775_v6 = vld [vmem:[#allocation10 + $0x14] ss:$8 sps:$4 sm:$0xff]   ;;  %v16784_v41 = vld [vmem:[#allocation10 + $0x20] ss:$8 sps:$4 sm:$0xff]   ;;  %v16790_v34 = vld [vmem:[#allocation10 + $0x30] ss:$8 sps:$4 sm:$0xff]  }
 0x1ef   :  { %v12478_v17 = vpack.c.bf16 %v16524_v52, %v852_v36  ;;  %v838_v28 = vsel %vm836_vm3, %v833_v49, %v835_v14  ;;  %v1345_v54 = vrot.slane %v815_v32, 2  ;;  %v1353_v45 = vsel %vm716_vm1, %v1341_v38, %v1343_v53  ;;  %v14731_v32 = vld [vmem:[#allocation9 + $0x28] sm:$0xff]   ;;  %v14735_v49 = vld [vmem:[#allocation9 + $0x38] sm:$0xff]  }
 0x1f0   :  { %v936_v7 = vpack.c.bf16 %v838_v28, %v840_v57  ;;  %v832_v1 = vrot.slane %v814_v29, 6  ;;  %v1342_v25 = vrot.slane %v16650_v60, 2  ;;  %v1344_v46 = vrot.slane %v814_v29, 2  ;;  %v14733_v29 = vld [vmem:[#allocation9 + $0x30] sm:$0xff]   ;;  %v16793_v57 = vld [vmem:[#allocation10 + $0x44] ss:$8 sps:$4 sm:$0xff]  }
 0x1f1   :  { %12479 = vmatprep.mubr.msk.bf16.mxu1 %vm16675_vm7, %v12478_v17  ;;  %v1351_v52 = vsel %vm716_vm1, %v1343_v53, %v1345_v54  ;;  %v1349_v14 = vsel %vm716_vm1, %v1345_v54, %v1347_v0  ;;  %v1363_v38 = vsel %vm716_vm1, %v1347_v0, %v1333_v8  ;;  %v1362_v58 = vsel %vm716_vm1, %v1346_v15, %v1332_v2  ;;  %v16773_v53 = vld [vmem:[#allocation10] ss:$8 sps:$4 sm:$0xff]   ;;  %v14738_v0 = vld [vmem:[#allocation10 + $0x4] ss:$8 sps:$4 sm:$0xff]   ;;  %v16787_v24 = vld [vmem:[#allocation10 + $0x34] ss:$8 sps:$4 sm:$0xff]  }
 0x1f2   :  { %12482 = vmatmul.mubr.msk.bf16.vlgmr.msra.gmra.mrb[16].mxu1 %vm16675_vm7, %v12481_v43  ;;  %v1389_v37 = vpack.c.bf16 %v1351_v52, %v1353_v45  ;;  %v837_v62 = vsel %vm836_vm3, %v832_v1, %v834_v50  ;;  %v839_v56 = vsel %vm836_vm3, %v830_v47, %v832_v1  ;;  %v1350_v2 = vsel %vm716_vm1, %v1342_v25, %v1344_v46  ;;  %v14734_v47 = vld [vmem:[#allocation9 + $0x78] sm:$0xff]   ;;  %v16796_v43 = vld [vmem:[#allocation10 + $0x40] ss:$8 sps:$4 sm:$0xff]  }
 0x1f3   :  { %1307 = vmatprep.mubr.bf16.mxu1 %v932_v9  ;;  %v935_v8 = vpack.c.bf16 %v837_v62, %v839_v56  ;;  %v1352_v48 = vsel %vm716_vm1, %v1340_v35, %v1342_v25  ;;  %v12512_v42 = vpack.c.bf16 %v1363_v38, %v1349_v14  ;;  %v1348_v50 = vsel %vm716_vm1, %v1344_v46, %v1346_v15  ;;  %v14727_v35 = vld [vmem:[#allocation9 + $0x18] sm:$0xff]  }
 0x1f4   :  { %1163 = vmatmul.mubr.bf16.gmra.mrb[20].mxu0 %v975_v27  ;;  %v1388_v31 = vpack.c.bf16 %v1350_v2, %v1352_v48  ;;  %v12515_v44 = vpack.c.bf16 %v1362_v58, %v1348_v50  ;;  %v882_v9 = vand.u32 31, %v856_v61  ;;  %v18660_v15 = vpack.c.bf16 %v16535_v59, %v16555_v5  ;;  %v14721_v5 = vld [vmem:[#allocation9] sm:$0xff]   ;;  %1926 = vmatprep.subr.bf16.mxu0 %v14738_v0  ;;  %v16799_v36 = vld [vmem:[#allocation10 + $0x54] ss:$8 sps:$4 sm:$0xff]  }
 0x1f5   :  { %1553 = vmatprep.mubr.bf16.mxu0 %v1385_v10  ;;  %v18661_v18 = vpack.c.bf16 %v16646_v33, %v16579_v16  ;;  %v18663_v59 = vmov 0   ;;  %13586 = vmatpush3.bf16.msra.mxu1 %v14721_v5  ;;  %v14722_v10 = vld [vmem:[#allocation9 + $0x48] sm:$0xff]   ;;  %v14725_v16 = vld [vmem:[#allocation9 + $0x10] sm:$0xff]   ;;  %v14729_v33 = vld [vmem:[#allocation9 + $0x20] sm:$0xff]  }
 0x1f6   :  { %vm1367_vm10 = vcmp.lt.s32.totalorder %v882_v9, 30  ;;  %13587 = vmatprep.subr.bf16.mxu1 %v14722_v10  ;;  %v16781_v27 = vld [vmem:[#allocation10 + $0x24] ss:$8 sps:$4 sm:$0xff]  }
 0x1f7   :  { %vm12511_vm11 = vmpackc.low %vm1367_vm10, %vm16123_vm6 }
 0x1f9   :  { %13588 = vmatpush3.bf16.msra.mxu1 %v14723_v11 }
 0x1fa   :  { %1308 = vmatmul.mubr.bf16.gmra.mrb[20].mxu1 %v18659_v3  ;;  %13589 = vmatprep.subr.bf16.mxu1 %v14724_v13 }
 0x1fb   :  { %12485 = vmatprep.mubr.msk.bf16.mxu1 %vm16704_vm8, %v12484_v63  ;;  %v16802_v63 = vld [vmem:[#allocation10 + $0x50] ss:$8 sps:$4 sm:$0xff]  }
 0x1fc   :  { %1554 = vmatmul.mubr.bf16.vlgmr.msra.gmra.mrb[24].mxu0 %v18660_v15 }
 0x1fd   :  { %12507 = vmatprep.mubr.msk.bf16.mxu0 %vm16728_vm9, %v18661_v18  ;;  %13590 = vmatpush3.bf16.msra.mxu1 %v14725_v16 }
 0x1fe   :  { %13591 = vmatprep.subr.bf16.mxu1 %v14726_v21  ;;  %1927 = vmatpush1.bf16.msra.mxu0 %v16773_v53 }
 0x1ff   :  { %1928 = vmatprep.subr.bf16.mxu0 %v16775_v6 }
 0x201   :  { %13592 = vmatpush3.bf16.msra.mxu1 %v14727_v35 }
 0x202   :  { %12488 = vmatmul.mubr.msk.bf16.gmra.mrb[24].mxu1 %vm16704_vm8, %v12487_v30  ;;  %13593 = vmatprep.subr.bf16.mxu1 %v14728_v22 }
 0x203   :  { %1323 = vmatprep.mubr.bf16.mxu1 %v936_v7  ;;  %1929 = vmatpush1.bf16.msra.mxu0 %v16778_v26 }
 0x204   :  { %12510 = vmatmul.mubr.msk.bf16.gmra.mrb[28].mxu0 %vm16728_vm9, %v18662_v55  ;;  %1930 = vmatprep.subr.bf16.mxu0 %v16781_v27 }
 0x205   :  { %1569 = vmatprep.mubr.bf16.mxu0 %v1389_v37  ;;  %13594 = vmatpush3.bf16.msra.mxu1 %v14729_v33 }
 0x206   :  { %13595 = vmatprep.subr.bf16.mxu1 %v14730_v51 }
 0x207   :  { %1931 = vmatpush1.bf16.msra.mxu0 %v16784_v41 }
 0x208   :  { %1932 = vmatprep.subr.bf16.mxu0 %v16787_v24 }
 0x209   :  { %13596 = vmatpush3.bf16.msra.mxu1 %v14731_v32 }
 0x20a   :  { %1324 = vmatmul.mubr.bf16.gmra.mrb[28].mxu1 %v935_v8  ;;  %13597 = vmatprep.subr.bf16.mxu1 %v14732_v40  ;;  %v16806_v40 = vld [vmem:[#allocation7] ss:$0 sm:$0xff] }
 0x20b   :  { %1933 = vmatpush1.bf16.msra.mxu0 %v16790_v34 }
 0x20c   :  { %1570 = vmatmul.mubr.bf16.gmra.mrb[32].mxu0 %v1388_v31  ;;  %1934 = vmatprep.subr.bf16.mxu0 %v16793_v57 }
 0x20d   :  { %12513 = vmatprep.mubr.msk.bf16.mxu0 %vm12511_vm11, %v12512_v42  ;;  %13598 = vmatpush3.bf16.msra.mxu1 %v14733_v29 }
 0x20e   :  { %13599 = vmatprep.subr.bf16.mxu1 %v14734_v47 }
 0x20f   :  { %1935 = vmatpush1.bf16.msra.mxu0 %v16796_v43 }
 0x210   :  { %1936 = vmatprep.subr.bf16.mxu0 %v16799_v36 }
 0x211   :  { %13600 = vmatpush3.bf16.msra.mxu1 %v14735_v49 }
 0x212   :  { %2025 = vmatprep.subr.bf16.mxu1 %v14738_v0 }
 0x213   :  { %1937 = vmatpush1.bf16.msra.mxu0 %v16802_v63 }
 0x214   :  { %12516 = vmatmul.mubr.msk.bf16.gmra.mrb[36].mxu0 %vm12511_vm11, %v12515_v44 }
 0x215   :  { %1958 = vmatprep.mubr.bf16.mxu0 %v18663_v59 }
 0x2a2   :  { %v13481_v30 = vpop.f32.mrb[8].mxu0 }
 0x2a3   :  { %v13482_v17 = vpop.f32.mrb[9].mxu0 }
 0x2a4   :  { %v13483_v28 = vadd.f32 %v13482_v17, %v13481_v30  ;;  %v13484_v54 = vpop.f32.mrb[10].mxu0  ;;  %v16808_v30 = vld [vmem:[#allocation7 + $0x1] ss:$0 sm:$0xff] }
 0x2a5   :  { %v13485_v45 = vpop.f32.mrb[11].mxu0 }
 0x2a6   :  { %v13486_v39 = vadd.f32 %v13485_v45, %v13484_v54 }
 0x2aa   :  { %v13487_v7 = vpop.f32.mrb[12].mxu0 }
 0x2ab   :  { %v13488_v1 = vpop.f32.mrb[13].mxu0 }
 0x2ac   :  { %v13489_v25 = vadd.f32 %v13488_v1, %v13487_v7  ;;  %v13490_v46 = vpop.f32.mrb[14].mxu0 }
 0x2ad   :  { %v13491_v52 = vpop.f32.mrb[15].mxu0 }
 0x2ae   :  { %v13492_v14 = vadd.f32 %v13491_v52, %v13490_v46 }
 0x2bf   :  { %v13493_v38 = vpop.f32.mrb[16].mxu0 }
 0x2c0   :  { %v13494_v58 = vpop.f32.mrb[17].mxu0 }
 0x2c1   :  { %v13495_v60 = vadd.f32 %v13494_v58, %v13493_v38  ;;  %v13496_v37 = vpop.f32.mrb[18].mxu0 }
 0x2c2   :  { %v13497_v62 = vpop.f32.mrb[19].mxu0 }
 0x2c3   :  { %v13498_v56 = vadd.f32 %v13497_v62, %v13496_v37 }
 0x2c5   :  { %v13521_v2 = vpop.f32.mrb[16].mxu1 }
 0x2c6   :  { %v13522_v8 = vpop.f32.mrb[17].mxu1 }
 0x2c7   :  { %v13523_v48 = vadd.f32 %v13522_v8, %v13521_v2  ;;  %v13499_v42 = vpop.f32.mrb[20].mxu0  ;;  %v13524_v50 = vpop.f32.mrb[18].mxu1 }
 0x2c8   :  { %v13500_v31 = vpop.f32.mrb[21].mxu0  ;;  %v13525_v44 = vpop.f32.mrb[19].mxu1 }
 0x2c9   :  { %v1302_v61 = vadd.f32 %v13523_v48, %v13483_v28  ;;  %v13501_v3 = vadd.f32 %v13500_v31, %v13499_v42  ;;  %v13526_v9 = vadd.f32 %v13525_v44, %v13524_v50  ;;  %v13502_v15 = vpop.f32.mrb[22].mxu0 }
 0x2ca   :  { %v13503_v18 = vpop.f32.mrb[23].mxu0 }
 0x2cb   :  { %v1305_v55 = vadd.f32 %v13526_v9, %v13486_v39  ;;  %v13504_v4 = vadd.f32 %v13503_v18, %v13502_v15 }
 0x2cd   :  { %v13527_v5 = vpop.f32.mrb[20].mxu1 }
 0x2ce   :  { %v13528_v10 = vpop.f32.mrb[21].mxu1 }
 0x2cf   :  { %v13529_v11 = vadd.f32 %v13528_v10, %v13527_v5  ;;  %v13530_v13 = vpop.f32.mrb[22].mxu1  ;;  %v13561_v16 = vpop.f32.mrb[24].mxu0 }
 0x2d0   :  { %v13531_v21 = vpop.f32.mrb[23].mxu1  ;;  %v13562_v35 = vpop.f32.mrb[25].mxu0 }
 0x2d1   :  { %v1310_v22 = vadd.f32 %v13529_v11, %v13489_v25  ;;  %v13532_v33 = vadd.f32 %v13531_v21, %v13530_v13  ;;  %v13563_v51 = vadd.f32 %v13562_v35, %v13561_v16  ;;  %v13564_v32 = vpop.f32.mrb[26].mxu0 }
 0x2d2   :  { %v13565_v29 = vpop.f32.mrb[27].mxu0 }
 0x2d3   :  { %v1313_v47 = vadd.f32 %v13532_v33, %v13492_v14  ;;  %v1586_v49 = vadd.f32 %v13563_v51, %v1302_v61  ;;  %v13566_v0 = vadd.f32 %v13565_v29, %v13564_v32 }
 0x2d5   :  { %v1599_v17 = vmul.f32 %v16806_v40, %v1586_v49  ;;  %v1587_v28 = vadd.f32 %v13566_v0, %v1305_v55  ;;  %v13533_v54 = vpop.f32.mrb[24].mxu1 }
 0x2d6   :  { %v13534_v45 = vpop.f32.mrb[25].mxu1 }
 0x2d7   :  { %v1612_v39 = vadd.f32 %v16808_v30, %v1599_v17  ;;  %v1600_v7 = vmul.f32 %v16806_v40, %v1587_v28  ;;  %v13535_v1 = vadd.f32 %v13534_v45, %v13533_v54  ;;  %v13536_v25 = vpop.f32.mrb[26].mxu1  ;;  %v13567_v46 = vpop.f32.mrb[28].mxu0 }
 0x2d8   :  { %v13537_v52 = vpop.f32.mrb[27].mxu1  ;;  %v13568_v38 = vpop.f32.mrb[29].mxu0 }
 0x2d9   :  { %v1613_v14 = vadd.f32 %v16808_v30, %v1600_v7  ;;  %v1318_v58 = vadd.f32 %v13535_v1, %v13495_v60  ;;  %v13538_v37 = vadd.f32 %v13537_v52, %v13536_v25  ;;  %v13570_v62 = vpop.f32.mrb[30].mxu0  ;;  %v13569_v2 = vadd.f32 %v13568_v38, %v13567_v46 }
 0x2da   :  { %v13571_v8 = vpop.f32.mrb[31].mxu0  ;;  %v1620_v48 = vmax.f32 %v1612_v39, 0.0 }
 0x2db   :  { %v1621_v42 = vmax.f32 %v1613_v14, 0.0  ;;  %v1321_v50 = vadd.f32 %v13538_v37, %v13498_v56  ;;  %v13572_v31 = vadd.f32 %v13571_v8, %v13570_v62  ;;  %v1588_v44 = vadd.f32 %v13569_v2, %v1310_v22 }
 0x2dd   :  { %v1628_v61 = vpack.c.bf16 %v1621_v42, %v1620_v48  ;;  %v1589_v9 = vadd.f32 %v13572_v31, %v1313_v47  ;;  %v13539_v15 = vpop.f32.mrb[28].mxu1  ;;  %v1601_v18 = vmul.f32 %v16806_v40, %v1588_v44 }
 0x2de   :  { %v13540_v55 = vpop.f32.mrb[29].mxu1 }
 0x2df   :  { %v1602_v5 = vmul.f32 %v16806_v40, %v1589_v9  ;;  %v13541_v10 = vadd.f32 %v13540_v55, %v13539_v15  ;;  %v13542_v11 = vpop.f32.mrb[30].mxu1  ;;  %v13573_v60 = vpop.f32.mrb[32].mxu0  ;;  %v1614_v21 = vadd.f32 %v16808_v30, %v1601_v18 }
 0x2e0   :  { %v13543_v13 = vpop.f32.mrb[31].mxu1  ;;  %v13574_v16 = vpop.f32.mrb[33].mxu0 }
 0x2e1   :  { %v1326_v35 = vadd.f32 %v13541_v10, %v13501_v3  ;;  %v13544_v33 = vadd.f32 %v13543_v13, %v13542_v11  ;;  %v13575_v56 = vadd.f32 %v13574_v16, %v13573_v60  ;;  %v13576_v51 = vpop.f32.mrb[34].mxu0  ;;  %v1615_v22 = vadd.f32 %v16808_v30, %v1602_v5 }
 0x2e2   :  { %v13577_v32 = vpop.f32.mrb[35].mxu0  ;;  %v1622_v29 = vmax.f32 %v1614_v21, 0.0  ;;  %v1834_v21 = vld [vmem:[#allocation12] sm:$0x3] }
 0x2e3   :  { %v1329_v47 = vadd.f32 %v13544_v33, %v13504_v4  ;;  %v1590_v49 = vadd.f32 %v13575_v56, %v1318_v58  ;;  %v13578_v0 = vadd.f32 %v13577_v32, %v13576_v51  ;;  %v1623_v17 = vmax.f32 %v1615_v22, 0.0 }
 0x2e5   :  { %v1603_v28 = vmul.f32 %v16806_v40, %v1590_v49  ;;  %v1591_v54 = vadd.f32 %v13578_v0, %v1321_v50  ;;  %v1630_v45 = vpack.c.bf16 %v1623_v17, %v1622_v29 }
 0x2e7   :  { %v1604_v39 = vmul.f32 %v16806_v40, %v1591_v54  ;;  %v13579_v7 = vpop.f32.mrb[36].mxu0  ;;  %v1616_v3 = vadd.f32 %v16808_v30, %v1603_v28 }
 0x2e8   :  { %v13580_v1 = vpop.f32.mrb[37].mxu0 }
 0x2e9   :  { %v13581_v25 = vadd.f32 %v13580_v1, %v13579_v7  ;;  %v13582_v46 = vpop.f32.mrb[38].mxu0  ;;  %v1617_v52 = vadd.f32 %v16808_v30, %v1604_v39  ;;  %v1624_v58 = vmax.f32 %v1616_v3, 0.0 }
 0x2ea   :  { %v13583_v38 = vpop.f32.mrb[39].mxu0 }
 0x2eb   :  { %v1592_v14 = vadd.f32 %v13581_v25, %v1326_v35  ;;  %v13584_v4 = vadd.f32 %v13583_v38, %v13582_v46  ;;  %v1625_v37 = vmax.f32 %v1617_v52, 0.0  ;;  %v16853_v35 = vrot.slane %v1834_v21, %v16450_v20 }
 0x2ec   :  { %v16860_v38 = vrot.slane %v1834_v21, %v16447_v19  ;;  %v14762_v21 = vld [vmem:[#allocation13 + $0x4] ss:$24 sps:$4 sm:$0xff]  }
 0x2ed   :  { %v1605_v62 = vmul.f32 %v16806_v40, %v1592_v14  ;;  %v1593_v2 = vadd.f32 %v13584_v4, %v1329_v47  ;;  %v1629_v8 = vpack.c.bf16 %v1625_v37, %v1624_v58 }
 0x2ef   :  { %v1606_v48 = vmul.f32 %v16806_v40, %v1593_v2  ;;  %1799 = vmatprep.mubr.bf16.mxu1 %v1629_v8  ;;  %v1618_v42 = vadd.f32 %v16808_v30, %v1605_v62 }
 0x2f0   :  { %1800 = vmatmul.mubr.bf16.vlgmr.msra.gmra.mrb[32].mxu1 %v1628_v61 }
 0x2f1   :  { %v1619_v50 = vadd.f32 %v16808_v30, %v1606_v48  ;;  %2026 = vmatpush1.bf16.msra.mxu1 %v16773_v53  ;;  %v1626_v31 = vmax.f32 %v1618_v42, 0.0  ;;  %v14754_v53 = vld [vmem:[#allocation10 + $0x60] ss:$8 sps:$4 sm:$0xff]  }
 0x2f2   :  { %2027 = vmatprep.subr.bf16.mxu1 %v16775_v6  ;;  %v14756_v6 = vld [vmem:[#allocation10 + $0x64] ss:$8 sps:$4 sm:$0xff]  }
 0x2f3   :  { %v1627_v44 = vmax.f32 %v1619_v50, 0.0  ;;  %1938 = vmatprep.subr.bf16.mxu0 %v14756_v6 }
 0x2f4   :  { %1939 = vmatpush1.bf16.msra.mxu0 %v14754_v53 }
 0x2f5   :  { %v1631_v9 = vpack.c.bf16 %v1627_v44, %v1626_v31  ;;  %2028 = vmatpush1.bf16.msra.mxu1 %v16778_v26  ;;  %v14757_v26 = vld [vmem:[#allocation10 + $0x70] ss:$8 sps:$4 sm:$0xff]  }
 0x2f6   :  { %2029 = vmatprep.subr.bf16.mxu1 %v16781_v27  ;;  %v14759_v27 = vld [vmem:[#allocation10 + $0x74] ss:$8 sps:$4 sm:$0xff]  }
 0x2f7   :  { %1807 = vmatprep.mubr.bf16.mxu1 %v1631_v9  ;;  %1940 = vmatprep.subr.bf16.mxu0 %v14759_v27 }
 0x2f8   :  { %1808 = vmatmul.mubr.bf16.gmra.mrb[36].mxu1 %v1630_v45  ;;  %1941 = vmatpush1.bf16.msra.mxu0 %v14757_v26 }
 0x2f9   :  { %2030 = vmatpush1.bf16.msra.mxu1 %v16784_v41  ;;  %2057 = vmatprep.mubr.bf16.mxu1 %v18663_v59 }
 0x2fa   :  { %2031 = vmatprep.subr.bf16.mxu1 %v16787_v24  ;;  %2444 = vmatprep.subr.bf16.mxu0 %v14762_v21 }
 0x2fd   :  { %2032 = vmatpush1.bf16.msra.mxu1 %v16790_v34 }
 0x2fe   :  { %2033 = vmatprep.subr.bf16.mxu1 %v16793_v57 }
 0x301   :  { %2034 = vmatpush1.bf16.msra.mxu1 %v16796_v43  ;;  %v12519_v43 = vld [vmem:[%s18632_s6] ss:$0 sm:$0xff] }
 0x302   :  { %2035 = vmatprep.subr.bf16.mxu1 %v16799_v36 }
 0x305   :  { %2036 = vmatpush1.bf16.msra.mxu1 %v16802_v63 }
 0x306   :  { %2037 = vmatprep.subr.bf16.mxu1 %v14756_v6 }
 0x309   :  { %2038 = vmatpush1.bf16.msra.mxu1 %v14754_v53 }
 0x30a   :  { %2039 = vmatprep.subr.bf16.mxu1 %v14759_v27 }
 0x30d   :  { %2040 = vmatpush1.bf16.msra.mxu1 %v14757_v26 }
 0x3c3   :  { %v13601_v41 = vpop.f32.mrb[32].mxu1 }
 0x3c4   :  { %v13602_v24 = vpop.f32.mrb[33].mxu1 }
 0x3c5   :  { %v13603_v34 = vadd.f32 %v13602_v24, %v13601_v41  ;;  %v13604_v57 = vpop.f32.mrb[34].mxu1 }
 0x3c6   :  { %v13605_v36 = vpop.f32.mrb[35].mxu1 }
 0x3c7   :  { %v13606_v63 = vadd.f32 %v13605_v36, %v13604_v57  ;;  %v1802_v40 = vadd.f32 %v13603_v34, %v12519_v43 }
 0x3c9   :  { %v16841_v30 = vadd.f32 %v13606_v63, %v12519_v43 }
 0x3cb   :  { %v1816_v61 = vpack.c.bf16 %v16841_v30, %v1802_v40  ;;  %v13607_v15 = vpop.f32.mrb[36].mxu1 }
 0x3cc   :  { %v13608_v18 = vpop.f32.mrb[37].mxu1 }
 0x3cd   :  { %v13609_v55 = vadd.f32 %v13608_v18, %v13607_v15  ;;  %v13610_v5 = vpop.f32.mrb[38].mxu1  ;;  %1959 = vmatmul.mubr.bf16.vlgmr.msra.gmra.mrb[40].mxu0 %v1816_v61 }
 0x3ce   :  { %v13611_v10 = vpop.f32.mrb[39].mxu1  ;;  %1968 = vmatprep.mubr.bf16.mxu0 %v18663_v59 }
 0x3cf   :  { %v13612_v11 = vadd.f32 %v13611_v10, %v13610_v5  ;;  %v16845_v60 = vadd.f32 %v13609_v55, %v12519_v43 }
 0x3d1   :  { %v16847_v13 = vadd.f32 %v13612_v11, %v12519_v43 }
 0x3d3   :  { %v1817_v16 = vpack.c.bf16 %v16847_v13, %v16845_v60 }
 0x3d5   :  { %1969 = vmatmul.mubr.bf16.gmra.mrb[44].mxu0 %v1817_v16 }
 0x3d6   :  { %2476 = vmatprep.mubr.bf16.mxu0 %v18663_v59 }
 0x4a0   :  { %v1960_v33 = vpop.f32.mrb[40].mxu0 }
 0x4a1   :  { %v1962_v56 = vpop.f32.mrb[41].mxu0  ;;  %v1961_v4 = vadd.f32 %v1960_v33, %v16860_v38  ;;  %v14765_v33 = vld [vmem:[#allocation13 + $0xc] ss:$24 sps:$4 sm:$0xff]  }
 0x4a2   :  { %v1963_v51 = vadd.f32 %v1962_v56, %v16853_v35  ;;  %v1964_v22 = vpop.f32.mrb[42].mxu0  ;;  %v14760_v56 = vld [vmem:[#allocation13] ss:$24 sps:$4 sm:$0xff]   ;;  %2497 = vmatprep.subr.bf16.mxu1 %v14765_v33 }
 0x4a3   :  { %v1966_v32 = vpop.f32.mrb[43].mxu0  ;;  %v1965_v62 = vadd.f32 %v1964_v22, %v16860_v38  ;;  %v1979_v8 = vmax.f32 %v1961_v4, 0.0  ;;  %2445 = vmatpush1.bf16.msra.mxu0 %v14760_v56  ;;  %v14766_v22 = vld [vmem:[#allocation13 + $0x30] ss:$24 sps:$4 sm:$0xff]   ;;  %v14798_v4 = vld [vmem:[#allocation13 + $0x124] ss:$24 sps:$4 sm:$0xff]  }
 0x4a4   :  { %v12552_v29 = vmul.f32 -1.442695, %v1963_v51  ;;  %v1967_v47 = vadd.f32 %v1966_v32, %v16853_v35  ;;  %v14763_v51 = vld [vmem:[#allocation13 + $0x8] ss:$24 sps:$4 sm:$0xff]   ;;  %v14769_v32 = vld [vmem:[#allocation13 + $0x38] ss:$24 sps:$4 sm:$0xff]  }
 0x4a5   :  { %v1980_v31 = vmax.f32 %v1965_v62, 0.0  ;;  %v14799_v62 = vld [vmem:[#allocation13 + $0x128] ss:$24 sps:$4 sm:$0xff]  }
 0x4a6   :  { %15496 = vpow2.f32 %v12552_v29  ;;  %v12553_v49 = vmul.f32 -1.442695, %v1967_v47  ;;  %v14774_v29 = vld [vmem:[#allocation13 + $0x64] ss:$24 sps:$4 sm:$0xff]  }
 0x4a7   :  { %v14777_v47 = vld [vmem:[#allocation13 + $0x6c] ss:$24 sps:$4 sm:$0xff]  }
 0x4a8   :  { %15498 = vpow2.f32 %v12553_v49  ;;  %v1970_v0 = vpop.f32.mrb[44].mxu0  ;;  %v14772_v49 = vld [vmem:[#allocation13 + $0x60] ss:$24 sps:$4 sm:$0xff]  }
 0x4a9   :  { %v1972_v17 = vpop.f32.mrb[45].mxu0  ;;  %v1971_v6 = vadd.f32 %v1970_v0, %v16860_v38  ;;  %v14775_v0 = vld [vmem:[#allocation13 + $0x68] ss:$24 sps:$4 sm:$0xff]  }
 0x4aa   :  { %v1973_v28 = vadd.f32 %v1972_v17, %v16853_v35  ;;  %v1974_v54 = vpop.f32.mrb[46].mxu0  ;;  %v14780_v17 = vld [vmem:[#allocation13 + $0x94] ss:$24 sps:$4 sm:$0xff]  }
 0x4ab   :  { %v1976_v45 = vpop.f32.mrb[47].mxu0  ;;  %v1975_v27 = vadd.f32 %v1974_v54, %v16860_v38  ;;  %v1981_v34 = vmax.f32 %v1971_v6, 0.0  ;;  %v14778_v54 = vld [vmem:[#allocation13 + $0x90] ss:$24 sps:$4 sm:$0xff]  }
 0x4ac   :  { %v12554_v39 = vmul.f32 -1.442695, %v1973_v28  ;;  %v1977_v7 = vadd.f32 %v1976_v45, %v16853_v35  ;;  %v14783_v28 = vld [vmem:[#allocation13 + $0x9c] ss:$24 sps:$4 sm:$0xff]   ;;  %v14781_v45 = vld [vmem:[#allocation13 + $0x98] ss:$24 sps:$4 sm:$0xff]  }
 0x4ad   :  { %v1982_v36 = vmax.f32 %v1975_v27, 0.0 }
 0x4ae   :  { %15500 = vpow2.f32 %v12554_v39  ;;  %v12555_v3 = vmul.f32 -1.442695, %v1977_v7  ;;  %v14786_v39 = vld [vmem:[#allocation13 + $0xc4] ss:$24 sps:$4 sm:$0xff]  }
 0x4af   :  { %v14789_v7 = vld [vmem:[#allocation13 + $0xcc] ss:$24 sps:$4 sm:$0xff]  }
 0x4b0   :  { %v15497_v1 = vpop.eup %15496  ;;  %15502 = vpow2.f32 %v12555_v3  ;;  %v14784_v3 = vld [vmem:[#allocation13 + $0xc0] ss:$24 sps:$4 sm:$0xff]  }
 0x4b1   :  { %v1995_v25 = vadd.f32 1.0, %v15497_v1  ;;  %v14787_v1 = vld [vmem:[#allocation13 + $0xc8] ss:$24 sps:$4 sm:$0xff]  }
 0x4b2   :  { %v15499_v46 = vpop.eup %15498 }
 0x4b3   :  { %15504 = vrcp.f32 %v1995_v25  ;;  %v1996_v52 = vadd.f32 1.0, %v15499_v46  ;;  %v14792_v25 = vld [vmem:[#allocation13 + $0xf4] ss:$24 sps:$4 sm:$0xff]   ;;  %v14790_v46 = vld [vmem:[#allocation13 + $0xf0] ss:$24 sps:$4 sm:$0xff]  }
 0x4b5   :  { %15506 = vrcp.f32 %v1996_v52  ;;  %v14793_v52 = vld [vmem:[#allocation13 + $0xf8] ss:$24 sps:$4 sm:$0xff]  }
 0x4b8   :  { %v15501_v14 = vpop.eup %15500 }
 0x4b9   :  { %v1997_v58 = vadd.f32 1.0, %v15501_v14  ;;  %v14795_v14 = vld [vmem:[#allocation13 + $0xfc] ss:$24 sps:$4 sm:$0xff]  }
 0x4ba   :  { %v15503_v37 = vpop.eup %15502 }
 0x4bb   :  { %15508 = vrcp.f32 %v1997_v58  ;;  %v1998_v2 = vadd.f32 1.0, %v15503_v37  ;;  %v14801_v58 = vld [vmem:[#allocation13 + $0x12c] ss:$24 sps:$4 sm:$0xff]   ;;  %v14796_v37 = vld [vmem:[#allocation13 + $0x120] ss:$24 sps:$4 sm:$0xff]  }
 0x4bd   :  { %v15505_v48 = vpop.eup %15504  ;;  %15510 = vrcp.f32 %v1998_v2  ;;  %v14804_v2 = vld [vmem:[#allocation13 + $0x154] ss:$24 sps:$4 sm:$0xff]  }
 0x4be   :  { %v2007_v42 = vmul.f32 %v15505_v48, %v1979_v8  ;;  %v2011_v50 = vsub.f32 1.0, %v15505_v48  ;;  %v14807_v8 = vld [vmem:[#allocation13 + $0x15c] ss:$24 sps:$4 sm:$0xff]   ;;  %v14802_v48 = vld [vmem:[#allocation13 + $0x150] ss:$24 sps:$4 sm:$0xff]  }
 0x4bf   :  { %v15507_v44 = vpop.eup %15506 }
 0x4c0   :  { %v2008_v9 = vmul.f32 %v15507_v44, %v1980_v31  ;;  %v2012_v53 = vsub.f32 1.0, %v15507_v44  ;;  %v2015_v26 = vmul.f32 %v2011_v50, %v1802_v40  ;;  %v14810_v50 = vld [vmem:[#allocation13 + $0x14] ss:$24 sps:$4 sm:$0xff]  }
 0x4c1   :  { %v16883_v31 = vld [vmem:[#allocation16 + $0x4] ss:$12 sps:$4 sm:$0xff]  }
 0x4c2   :  { %v2016_v41 = vmul.f32 %v2012_v53, %v16841_v30  ;;  %v16867_v24 = vadd.f32 %v2015_v26, %v2007_v42  ;;  %v14805_v42 = vld [vmem:[#allocation13 + $0x158] ss:$24 sps:$4 sm:$0xff]  }
 0x4c4   :  { %v16869_v57 = vadd.f32 %v2016_v41, %v2008_v9 }
 0x4c5   :  { %v15509_v43 = vpop.eup %15508 }
 0x4c6   :  { %v2023_v63 = vpack.c.bf16 %v16869_v57, %v16867_v24  ;;  %v2009_v61 = vmul.f32 %v15509_v43, %v1981_v34  ;;  %v2013_v15 = vsub.f32 1.0, %v15509_v43 }
 0x4c7   :  { %v15511_v18 = vpop.eup %15510 }
 0x4c8   :  { %2058 = vmatmul.mubr.bf16.vlgmr.msra.gmra.mrb[40].mxu1 %v2023_v63  ;;  %v2010_v55 = vmul.f32 %v15511_v18, %v1982_v36  ;;  %v2014_v40 = vsub.f32 1.0, %v15511_v18  ;;  %v2017_v5 = vmul.f32 %v2013_v15, %v16845_v60  ;;  %v14768_v60 = vld [vmem:[#allocation13 + $0x34] ss:$24 sps:$4 sm:$0xff]  }
 0x4c9   :  { %2067 = vmatprep.mubr.bf16.mxu1 %v18663_v59  ;;  %2498 = vmatpush1.bf16.msra.mxu1 %v14763_v51 }
 0x4ca   :  { %v2018_v30 = vmul.f32 %v2014_v40, %v16847_v13  ;;  %v16876_v10 = vadd.f32 %v2017_v5, %v2009_v61  ;;  %v14771_v13 = vld [vmem:[#allocation13 + $0x3c] ss:$24 sps:$4 sm:$0xff]   ;;  %2446 = vmatprep.subr.bf16.mxu0 %v14768_v60 }
 0x4cb   :  { %2499 = vmatprep.subr.bf16.mxu1 %v14771_v13  ;;  %2447 = vmatpush1.bf16.msra.mxu0 %v14766_v22 }
 0x4cc   :  { %v16878_v11 = vadd.f32 %v2018_v30, %v2010_v55  ;;  %2448 = vmatprep.subr.bf16.mxu0 %v14774_v29 }
 0x4cd   :  { %2500 = vmatpush1.bf16.msra.mxu1 %v14769_v32 }
 0x4ce   :  { %v2024_v16 = vpack.c.bf16 %v16878_v11, %v16876_v10  ;;  %2501 = vmatprep.subr.bf16.mxu1 %v14777_v47 }
 0x4cf   :  { %2449 = vmatpush1.bf16.msra.mxu0 %v14772_v49 }
 0x4d0   :  { %2068 = vmatmul.mubr.bf16.gmra.mrb[44].mxu1 %v2024_v16  ;;  %2450 = vmatprep.subr.bf16.mxu0 %v14780_v17 }
 0x4d1   :  { %2529 = vmatprep.mubr.bf16.mxu1 %v18663_v59  ;;  %2502 = vmatpush1.bf16.msra.mxu1 %v14775_v0 }
 0x4d2   :  { %2503 = vmatprep.subr.bf16.mxu1 %v14783_v28 }
 0x4d3   :  { %2451 = vmatpush1.bf16.msra.mxu0 %v14778_v54 }
 0x4d4   :  { %2452 = vmatprep.subr.bf16.mxu0 %v14786_v39 }
 0x4d5   :  { %2504 = vmatpush1.bf16.msra.mxu1 %v14781_v45 }
 0x4d6   :  { %2505 = vmatprep.subr.bf16.mxu1 %v14789_v7 }
 0x4d7   :  { %2453 = vmatpush1.bf16.msra.mxu0 %v14784_v3 }
 0x4d8   :  { %2454 = vmatprep.subr.bf16.mxu0 %v14792_v25 }
 0x4d9   :  { %2506 = vmatpush1.bf16.msra.mxu1 %v14787_v1 }
 0x4da   :  { %2507 = vmatprep.subr.bf16.mxu1 %v14795_v14  ;;  %v16896_v14 = vld [vmem:[#allocation16] ss:$12 sps:$4 sm:$0xff]  }
 0x4db   :  { %2455 = vmatpush1.bf16.msra.mxu0 %v14790_v46 }
 0x4dc   :  { %2456 = vmatprep.subr.bf16.mxu0 %v14798_v4 }
 0x4dd   :  { %2508 = vmatpush1.bf16.msra.mxu1 %v14793_v52  ;;  %v14808_v52 = vld [vmem:[#allocation13 + $0x10] ss:$24 sps:$4 sm:$0xff]  }
 0x4de   :  { %2509 = vmatprep.subr.bf16.mxu1 %v14801_v58 }
 0x4df   :  { %2457 = vmatpush1.bf16.msra.mxu0 %v14796_v37  ;;  %v14816_v37 = vld [vmem:[#allocation13 + $0x44] ss:$24 sps:$4 sm:$0xff]  }
 0x4e0   :  { %2458 = vmatprep.subr.bf16.mxu0 %v14804_v2 }
 0x4e1   :  { %2510 = vmatpush1.bf16.msra.mxu1 %v14799_v62  ;;  %v16900_v62 = vld [vmem:[#allocation16 + $0x1c] ss:$12 sps:$4 sm:$0xff]  }
 0x4e2   :  { %2511 = vmatprep.subr.bf16.mxu1 %v14807_v8 }
 0x4e3   :  { %2459 = vmatpush1.bf16.msra.mxu0 %v14802_v48 }
 0x4e4   :  { %2550 = vmatprep.subr.bf16.mxu0 %v14810_v50  ;;  %v16906_v50 = vld [vmem:[#allocation16 + $0x18] ss:$12 sps:$4 sm:$0xff]  }
 0x4e5   :  { %2512 = vmatpush1.bf16.msra.mxu1 %v14805_v42  ;;  %v14814_v42 = vld [vmem:[#allocation13 + $0x40] ss:$24 sps:$4 sm:$0xff]  }
 0x4e6   :  { %2810 = vmatprep.subr.bf16.mxu1 %v16883_v31 }
 0x59b   :  { %v2059_v44 = vpop.f32.mrb[40].mxu1 }
 0x59c   :  { %v2061_v9 = vpop.f32.mrb[41].mxu1  ;;  %v2060_v56 = vadd.f32 %v2059_v44, %v16860_v38  ;;  %v14822_v44 = vld [vmem:[#allocation13 + $0x74] ss:$24 sps:$4 sm:$0xff]  }
 0x59d   :  { %v2062_v53 = vadd.f32 %v2061_v9, %v16853_v35  ;;  %v2063_v6 = vpop.f32.mrb[42].mxu1  ;;  %v16909_v9 = vld [vmem:[#allocation16 + $0x34] ss:$12 sps:$4 sm:$0xff]  }
 0x59e   :  { %v2065_v26 = vpop.f32.mrb[43].mxu1  ;;  %v2064_v13 = vadd.f32 %v2063_v6, %v16860_v38  ;;  %v2078_v32 = vmax.f32 %v2060_v56, 0.0  ;;  %v16945_v56 = vld [vmem:[#allocation16 + $0x90] ss:$12 sps:$4 sm:$0xff]  }
 0x59f   :  { %v12556_v27 = vmul.f32 -1.442695, %v2062_v53  ;;  %v2066_v41 = vadd.f32 %v2065_v26, %v16853_v35  ;;  %v14820_v26 = vld [vmem:[#allocation13 + $0x70] ss:$24 sps:$4 sm:$0xff]  }
 0x5a0   :  { %v2079_v49 = vmax.f32 %v2064_v13, 0.0  ;;  %v14850_v13 = vld [vmem:[#allocation13 + $0x160] ss:$24 sps:$4 sm:$0xff]  }
 0x5a1   :  { %15512 = vpow2.f32 %v12556_v27  ;;  %v12557_v34 = vmul.f32 -1.442695, %v2066_v41  ;;  %v16915_v27 = vld [vmem:[#allocation16 + $0x30] ss:$12 sps:$4 sm:$0xff]  }
 0x5a3   :  { %15514 = vpow2.f32 %v12557_v34  ;;  %v2069_v43 = vpop.f32.mrb[44].mxu1  ;;  %v14828_v34 = vld [vmem:[#allocation13 + $0xa4] ss:$24 sps:$4 sm:$0xff]  }
 0x5a4   :  { %v2071_v36 = vpop.f32.mrb[45].mxu1  ;;  %v2070_v54 = vadd.f32 %v2069_v43, %v16860_v38  ;;  %v16920_v43 = vld [vmem:[#allocation16 + $0x4c] ss:$12 sps:$4 sm:$0xff]  }
 0x5a5   :  { %v2072_v63 = vadd.f32 %v2071_v36, %v16853_v35  ;;  %v2073_v61 = vpop.f32.mrb[46].mxu1  ;;  %v16925_v36 = vld [vmem:[#allocation16 + $0x48] ss:$12 sps:$4 sm:$0xff]  }
 0x5a6   :  { %v2075_v15 = vpop.f32.mrb[47].mxu1  ;;  %v2074_v39 = vadd.f32 %v2073_v61, %v16860_v38  ;;  %v2080_v1 = vmax.f32 %v2070_v54, 0.0  ;;  %v16928_v61 = vld [vmem:[#allocation16 + $0x64] ss:$12 sps:$4 sm:$0xff]  }
 0x5a7   :  { %v12558_v18 = vmul.f32 -1.442695, %v2072_v63  ;;  %v2076_v55 = vadd.f32 %v2075_v15, %v16853_v35  ;;  %v14834_v63 = vld [vmem:[#allocation13 + $0xd4] ss:$24 sps:$4 sm:$0xff]   ;;  %v14832_v15 = vld [vmem:[#allocation13 + $0xd0] ss:$24 sps:$4 sm:$0xff]  }
 0x5a8   :  { %v2081_v4 = vmax.f32 %v2074_v39, 0.0  ;;  %v16975_v54 = vld [vmem:[#allocation16 + $0xf0] ss:$12 sps:$4 sm:$0xff]   ;;  %v16979_v39 = vld [vmem:[#allocation16 + $0x10c] ss:$12 sps:$4 sm:$0xff]  }
 0x5a9   :  { %15516 = vpow2.f32 %v12558_v18  ;;  %v12559_v40 = vmul.f32 -1.442695, %v2076_v55  ;;  %v16933_v18 = vld [vmem:[#allocation16 + $0x60] ss:$12 sps:$4 sm:$0xff]  }
 0x5aa   :  { %v14840_v55 = vld [vmem:[#allocation13 + $0x104] ss:$24 sps:$4 sm:$0xff]  }
 0x5ab   :  { %v15513_v5 = vpop.eup %15512  ;;  %15518 = vpow2.f32 %v12559_v40  ;;  %v16936_v40 = vld [vmem:[#allocation16 + $0x7c] ss:$12 sps:$4 sm:$0xff]  }
 0x5ac   :  { %v2094_v30 = vadd.f32 1.0, %v15513_v5  ;;  %v14838_v5 = vld [vmem:[#allocation13 + $0x100] ss:$24 sps:$4 sm:$0xff]  }
 0x5ad   :  { %v15515_v16 = vpop.eup %15514 }
 0x5ae   :  { %15520 = vrcp.f32 %v2094_v30  ;;  %v2095_v21 = vadd.f32 1.0, %v15515_v16  ;;  %v16939_v30 = vld [vmem:[#allocation16 + $0x78] ss:$12 sps:$4 sm:$0xff]  }
 0x5af   :  { %v14846_v16 = vld [vmem:[#allocation13 + $0x134] ss:$24 sps:$4 sm:$0xff]  }
 0x5b0   :  { %15522 = vrcp.f32 %v2095_v21  ;;  %v16942_v21 = vld [vmem:[#allocation16 + $0x94] ss:$12 sps:$4 sm:$0xff]  }
 0x5b3   :  { %v15517_v33 = vpop.eup %15516 }
 0x5b4   :  { %v2096_v51 = vadd.f32 1.0, %v15517_v33  ;;  %v14844_v33 = vld [vmem:[#allocation13 + $0x130] ss:$24 sps:$4 sm:$0xff]  }
 0x5b5   :  { %v15519_v60 = vpop.eup %15518 }
 0x5b6   :  { %15524 = vrcp.f32 %v2096_v51  ;;  %v2097_v22 = vadd.f32 1.0, %v15519_v60  ;;  %v14852_v51 = vld [vmem:[#allocation13 + $0x164] ss:$24 sps:$4 sm:$0xff]  }
 0x5b7   :  { %v16948_v60 = vld [vmem:[#allocation16 + $0xac] ss:$12 sps:$4 sm:$0xff]  }
 0x5b8   :  { %v15521_v35 = vpop.eup %15520  ;;  %15526 = vrcp.f32 %v2097_v22  ;;  %v16951_v22 = vld [vmem:[#allocation16 + $0xa8] ss:$12 sps:$4 sm:$0xff]  }
 0x5b9   :  { %v2106_v29 = vmul.f32 %v15521_v35, %v2078_v32  ;;  %v2110_v47 = vsub.f32 1.0, %v15521_v35  ;;  %v16954_v32 = vld [vmem:[#allocation16 + $0xc4] ss:$12 sps:$4 sm:$0xff]   ;;  %v16957_v35 = vld [vmem:[#allocation16 + $0xc0] ss:$12 sps:$4 sm:$0xff]  }
 0x5ba   :  { %v15523_v0 = vpop.eup %15522 }
 0x5bb   :  { %v2107_v17 = vmul.f32 %v15523_v0, %v2079_v49  ;;  %v2111_v28 = vsub.f32 1.0, %v15523_v0  ;;  %v2114_v45 = vmul.f32 %v2110_v47, %v16867_v24  ;;  %v18664_v47 = vmov 0.0   ;;  %v16961_v49 = vld [vmem:[#allocation16 + $0xdc] ss:$12 sps:$4 sm:$0xff]   ;;  %v16966_v0 = vld [vmem:[#allocation16 + $0xd8] ss:$12 sps:$4 sm:$0xff]  }
 0x5bd   :  { %v2115_v7 = vmul.f32 %v2111_v28, %v16869_v57  ;;  %v2118_v3 = vadd.f32 %v2114_v45, %v2106_v29  ;;  %v14859_v29 = vld [vmem:[#allocation16 + $0x8] ss:$12 sps:$4 sm:$0xff]   ;;  %v14867_v45 = vld [vmem:[#allocation16 + $0x38] ss:$12 sps:$4 sm:$0xff]  }
 0x5be   :  { %v16970_v28 = vld [vmem:[#allocation16 + $0xf4] ss:$12 sps:$4 sm:$0xff]  }
 0x5bf   :  { %v2119_v25 = vadd.f32 %v2115_v7, %v2107_v17  ;;  %v14863_v17 = vld [vmem:[#allocation16 + $0x20] ss:$12 sps:$4 sm:$0xff]   ;;  %v16983_v7 = vld [vmem:[#allocation16 + $0x108] ss:$12 sps:$4 sm:$0xff]  }
 0x5c0   :  { %v15525_v46 = vpop.eup %15524 }
 0x5c1   :  { %v16898_v58 = vpack.c.bf16 %v2119_v25, %v2118_v3  ;;  %v2108_v2 = vmul.f32 %v15525_v46, %v2080_v1  ;;  %v2112_v8 = vsub.f32 1.0, %v15525_v46  ;;  %v14871_v3 = vld [vmem:[#allocation16 + $0x50] ss:$12 sps:$4 sm:$0xff]   ;;  %v16992_v25 = vld [vmem:[#allocation16 + $0x120] ss:$12 sps:$4 sm:$0xff]  }
 0x5c2   :  { %v15527_v24 = vpop.eup %15526  ;;  %v16987_v1 = vld [vmem:[#allocation16 + $0x124] ss:$12 sps:$4 sm:$0xff]   ;;  %v14875_v46 = vld [vmem:[#allocation16 + $0x68] ss:$12 sps:$4 sm:$0xff]  }
 0x5c3   :  { %2477 = vmatmul.mubr.bf16.vlgmr.msra.gmra.mrb[48].mxu0 %v16898_v58  ;;  %2530 = vmatmul.mubr.bf16.vlgmr.msra.gmra.mrb[48].mxu1 %v16898_v58  ;;  %v2109_v38 = vmul.f32 %v15527_v24, %v2081_v4  ;;  %v2113_v57 = vsub.f32 1.0, %v15527_v24  ;;  %v2116_v48 = vmul.f32 %v2112_v8, %v16876_v10  ;;  %v16999_v4 = vld [vmem:[#allocation16 + $0x138] ss:$12 sps:$4 sm:$0xff]   ;;  %v17006_v8 = vld [vmem:[#allocation16 + $0x150] ss:$12 sps:$4 sm:$0xff]  }
 0x5c4   :  { %2551 = vmatpush1.bf16.msra.mxu0 %v14808_v52  ;;  %2811 = vmatpush1.bf16.msra.mxu1 %v16896_v14  ;;  %v16996_v52 = vld [vmem:[#allocation16 + $0x13c] ss:$12 sps:$4 sm:$0xff]   ;;  %v14883_v24 = vld [vmem:[#allocation16 + $0x98] ss:$12 sps:$4 sm:$0xff]  }
 0x5c5   :  { %2552 = vmatprep.subr.bf16.mxu0 %v14816_v37  ;;  %2812 = vmatprep.subr.bf16.mxu1 %v16900_v62  ;;  %v2117_v53 = vmul.f32 %v2113_v57, %v16878_v11  ;;  %v2120_v6 = vadd.f32 %v2116_v48, %v2108_v2  ;;  %v14826_v11 = vld [vmem:[#allocation13 + $0xa0] ss:$24 sps:$4 sm:$0xff]   ;;  %v14879_v37 = vld [vmem:[#allocation16 + $0x80] ss:$12 sps:$4 sm:$0xff]  }
 0x5c6   :  { %2486 = vmatprep.mubr.bf16.mxu0 %v18663_v59  ;;  %2539 = vmatprep.mubr.bf16.mxu1 %v18663_v59  ;;  %v17003_v2 = vld [vmem:[#allocation16 + $0x154] ss:$12 sps:$4 sm:$0xff]   ;;  %v14887_v48 = vld [vmem:[#allocation16 + $0xb0] ss:$12 sps:$4 sm:$0xff]  }
 0x5c7   :  { %v2121_v10 = vadd.f32 %v2117_v53, %v2109_v38  ;;  %v17010_v38 = vld [vmem:[#allocation16 + $0x16c] ss:$12 sps:$4 sm:$0xff]   ;;  %v17013_v57 = vld [vmem:[#allocation16 + $0x168] ss:$12 sps:$4 sm:$0xff]  }
 0x5c8   :  { %2553 = vmatpush1.bf16.msra.mxu0 %v14814_v42  ;;  %2813 = vmatpush1.bf16.msra.mxu1 %v16906_v50  ;;  %v14888_v42 = vld [vmem:[#allocation16 + $0xc8] ss:$12 sps:$4 sm:$0xff]   ;;  %v14890_v53 = vld [vmem:[#allocation16 + $0xf8] ss:$12 sps:$4 sm:$0xff]  }
 0x5c9   :  { %2554 = vmatprep.subr.bf16.mxu0 %v14822_v44  ;;  %2814 = vmatprep.subr.bf16.mxu1 %v16909_v9  ;;  %v16918_v41 = vpack.c.bf16 %v2121_v10, %v2120_v6  ;;  %v14889_v44 = vld [vmem:[#allocation16 + $0xe0] ss:$12 sps:$4 sm:$0xff]   ;;  %v14896_v6 = vld [vmem:[#allocation16 + $0x8] ss:$12 sps:$4 sm:$0xff]  }
 0x5ca   :  { %v14897_v10 = vld [vmem:[#allocation16 + $0x20] ss:$12 sps:$4 sm:$0xff]  }
 0x5cb   :  { %2487 = vmatmul.mubr.bf16.gmra.mrb[52].mxu0 %v16918_v41  ;;  %2540 = vmatmul.mubr.bf16.gmra.mrb[52].mxu1 %v16918_v41 }
 0x5cc   :  { %2555 = vmatpush1.bf16.msra.mxu0 %v14820_v26  ;;  %2815 = vmatpush1.bf16.msra.mxu1 %v16915_v27  ;;  %v14898_v26 = vld [vmem:[#allocation16 + $0x38] ss:$12 sps:$4 sm:$0xff]  }
 0x5cd   :  { %2556 = vmatprep.subr.bf16.mxu0 %v14828_v34  ;;  %2816 = vmatprep.subr.bf16.mxu1 %v16920_v43  ;;  %v14900_v34 = vld [vmem:[#allocation16 + $0x68] ss:$12 sps:$4 sm:$0xff]  }
 0x5ce   :  { %2582 = vmatprep.mubr.bf16.mxu0 %v18663_v59  ;;  %2842 = vmatprep.mubr.bf16.mxu1 %v18663_v59 }
 0x5d0   :  { %2557 = vmatpush1.bf16.msra.mxu0 %v14826_v11  ;;  %2817 = vmatpush1.bf16.msra.mxu1 %v16925_v36  ;;  %v14902_v11 = vld [vmem:[#allocation16 + $0x98] ss:$12 sps:$4 sm:$0xff]  }
 0x5d1   :  { %2558 = vmatprep.subr.bf16.mxu0 %v14834_v63  ;;  %2818 = vmatprep.subr.bf16.mxu1 %v16928_v61  ;;  %v2172_v63 = vld [vmem:[#allocation15] sm:$0x3f] }
 0x5d4   :  { %2559 = vmatpush1.bf16.msra.mxu0 %v14832_v15  ;;  %2819 = vmatpush1.bf16.msra.mxu1 %v16933_v18  ;;  %v2185_v15 = vrot.slane %v2172_v63, %v16455_v23 }
 0x5d5   :  { %2560 = vmatprep.subr.bf16.mxu0 %v14840_v55  ;;  %2820 = vmatprep.subr.bf16.mxu1 %v16936_v40  ;;  %v18665_v55 = vsub.s32 3, %v16438_v12 }
 0x5d8   :  { %2561 = vmatpush1.bf16.msra.mxu0 %v14838_v5  ;;  %2821 = vmatpush1.bf16.msra.mxu1 %v16939_v30 }
 0x5d9   :  { %2562 = vmatprep.subr.bf16.mxu0 %v14846_v16  ;;  %2822 = vmatprep.subr.bf16.mxu1 %v16942_v21 }
 0x5dc   :  { %2563 = vmatpush1.bf16.msra.mxu0 %v14844_v33  ;;  %2823 = vmatpush1.bf16.msra.mxu1 %v16945_v56 }
 0x5dd   :  { %2564 = vmatprep.subr.bf16.mxu0 %v14852_v51  ;;  %2824 = vmatprep.subr.bf16.mxu1 %v16948_v60 }
 0x5e0   :  { %2565 = vmatpush1.bf16.msra.mxu0 %v14850_v13  ;;  %2825 = vmatpush1.bf16.msra.mxu1 %v16951_v22 }
 0x5e1   :  { %13939 = vmatprep.subr.bf16.mxu0 %v18664_v47  ;;  %3070 = vmatprep.subr.bf16.mxu1 %v16954_v32 }
 0x5e3   :  { %2583 = vmatmul.mubr.bf16.vlgmr.msra.gmra.mrb[56].mxu0 %v16898_v58  ;;  %2843 = vmatmul.mubr.bf16.vlgmr.msra.gmra.mrb[56].mxu1 %v18663_v59 }
 0x5e4   :  { %13940 = vmatpush3.bf16.msra.mxu0 %v14859_v29  ;;  %3071 = vmatpush1.bf16.msra.mxu1 %v16957_v35 }
 0x5e5   :  { %13941 = vmatprep.subr.bf16.mxu0 %v18664_v47  ;;  %3072 = vmatprep.subr.bf16.mxu1 %v16961_v49 }
 0x5e6   :  { %2592 = vmatprep.mubr.bf16.mxu0 %v18663_v59  ;;  %3102 = vmatprep.mubr.bf16.mxu1 %v18663_v59 }
 0x5e8   :  { %13942 = vmatpush3.bf16.msra.mxu0 %v14863_v17  ;;  %3073 = vmatpush1.bf16.msra.mxu1 %v16966_v0 }
 0x5e9   :  { %13943 = vmatprep.subr.bf16.mxu0 %v18664_v47  ;;  %3074 = vmatprep.subr.bf16.mxu1 %v16970_v28 }
 0x5eb   :  { %2593 = vmatmul.mubr.bf16.gmra.mrb[60].mxu0 %v16918_v41 }
 0x5ec   :  { %13944 = vmatpush3.bf16.msra.mxu0 %v14867_v45  ;;  %3075 = vmatpush1.bf16.msra.mxu1 %v16975_v54 }
 0x5ed   :  { %13945 = vmatprep.subr.bf16.mxu0 %v18664_v47  ;;  %3076 = vmatprep.subr.bf16.mxu1 %v16979_v39 }
 0x5ee   :  { %13955 = vmatprep.mubr.msk.bf16.mxu0 %vm16124_vm12, %v18664_v47 }
 0x5f0   :  { %13946 = vmatpush3.bf16.msra.mxu0 %v14871_v3  ;;  %3077 = vmatpush1.bf16.msra.mxu1 %v16983_v7 }
 0x5f1   :  { %13947 = vmatprep.subr.bf16.mxu0 %v18664_v47  ;;  %3078 = vmatprep.subr.bf16.mxu1 %v16987_v1 }
 0x5f4   :  { %13948 = vmatpush3.bf16.msra.mxu0 %v14875_v46  ;;  %3079 = vmatpush1.bf16.msra.mxu1 %v16992_v25 }
 0x5f5   :  { %13949 = vmatprep.subr.bf16.mxu0 %v18664_v47  ;;  %3080 = vmatprep.subr.bf16.mxu1 %v16996_v52 }
 0x5f8   :  { %13950 = vmatpush3.bf16.msra.mxu0 %v14879_v37  ;;  %3081 = vmatpush1.bf16.msra.mxu1 %v16999_v4 }
 0x5f9   :  { %13951 = vmatprep.subr.bf16.mxu0 %v18664_v47  ;;  %3082 = vmatprep.subr.bf16.mxu1 %v17003_v2 }
 0x5fc   :  { %13952 = vmatpush3.bf16.msra.mxu0 %v14883_v24  ;;  %3083 = vmatpush1.bf16.msra.mxu1 %v17006_v8 }
 0x5fd   :  { %13953 = vmatprep.subr.bf16.mxu0 %v18664_v47  ;;  %3084 = vmatprep.subr.bf16.mxu1 %v17010_v38 }
 0x600   :  { %13954 = vmatpush3.bf16.msra.mxu0 %v14887_v48  ;;  %3085 = vmatpush1.bf16.msra.mxu1 %v17013_v57 }
 0x601   :  { %13959 = vmatprep.subr.bf16.mxu0 %v18664_v47  ;;  %3388 = vmatprep.subr.bf16.mxu1 %v16883_v31  ;;  %v14891_v31 = vld [vmem:[#allocation16 + $0x110] ss:$12 sps:$4 sm:$0xff]  }
 0x603   :  { %13956 = vmatmul.mubr.bf16.vlgmr.msra.gmra.mrb[64].mxu0 %v18663_v59  ;;  %3103 = vmatmul.mubr.bf16.vlgmr.msra.gmra.mrb[60].mxu1 %v18663_v59 }
 0x604   :  { %13960 = vmatpush3.bf16.msra.mxu0 %v14888_v42  ;;  %13975 = vmatprep.mubr.msk.bf16.mxu0 %vm16124_vm12, %v18664_v47 }
 0x605   :  { %13961 = vmatprep.subr.bf16.mxu0 %v18664_v47  ;;  %3389 = vmatpush1.bf16.msra.mxu1 %v16896_v14  ;;  %v14892_v14 = vld [vmem:[#allocation16 + $0x128] ss:$12 sps:$4 sm:$0xff]  }
 0x606   :  { %3390 = vmatprep.subr.bf16.mxu1 %v16900_v62  ;;  %3420 = vmatprep.mubr.bf16.mxu1 %v18663_v59  ;;  %v14893_v62 = vld [vmem:[#allocation16 + $0x140] ss:$12 sps:$4 sm:$0xff]  }
 0x608   :  { %13962 = vmatpush3.bf16.msra.mxu0 %v14889_v44 }
 0x609   :  { %13963 = vmatprep.subr.bf16.mxu0 %v18664_v47  ;;  %3391 = vmatpush1.bf16.msra.mxu1 %v16906_v50  ;;  %v14894_v50 = vld [vmem:[#allocation16 + $0x158] ss:$12 sps:$4 sm:$0xff]  }
 0x60a   :  { %3392 = vmatprep.subr.bf16.mxu1 %v16909_v9  ;;  %v14895_v9 = vld [vmem:[#allocation16 + $0x170] ss:$12 sps:$4 sm:$0xff]  }
 0x60c   :  { %13964 = vmatpush3.bf16.msra.mxu0 %v14890_v53 }
 0x60d   :  { %13965 = vmatprep.subr.bf16.mxu0 %v18664_v47  ;;  %3393 = vmatpush1.bf16.msra.mxu1 %v16915_v27  ;;  %v14899_v27 = vld [vmem:[#allocation16 + $0x50] ss:$12 sps:$4 sm:$0xff]  }
 0x60e   :  { %3394 = vmatprep.subr.bf16.mxu1 %v16920_v43  ;;  %v14901_v43 = vld [vmem:[#allocation16 + $0x80] ss:$12 sps:$4 sm:$0xff]  }
 0x610   :  { %13966 = vmatpush3.bf16.msra.mxu0 %v14891_v31 }
 0x611   :  { %13967 = vmatprep.subr.bf16.mxu0 %v18664_v47  ;;  %3395 = vmatpush1.bf16.msra.mxu1 %v16925_v36  ;;  %v14903_v36 = vld [vmem:[#allocation16 + $0xb0] ss:$12 sps:$4 sm:$0xff]  }
 0x612   :  { %3396 = vmatprep.subr.bf16.mxu1 %v16928_v61  ;;  %v2177_v61 = vrot.slane %v2172_v63, %v16447_v19 }
 0x614   :  { %13968 = vmatpush3.bf16.msra.mxu0 %v14892_v14 }
 0x615   :  { %13969 = vmatprep.subr.bf16.mxu0 %v18664_v47  ;;  %3397 = vmatpush1.bf16.msra.mxu1 %v16933_v18  ;;  %v2181_v18 = vrot.slane %v2172_v63, %v16450_v20 }
 0x616   :  { %3398 = vmatprep.subr.bf16.mxu1 %v16936_v40  ;;  %v2189_v40 = vrot.slane %v2172_v63, %v18665_v55 }
 0x618   :  { %13970 = vmatpush3.bf16.msra.mxu0 %v14893_v62 }
 0x619   :  { %13971 = vmatprep.subr.bf16.mxu0 %v18664_v47  ;;  %3399 = vmatpush1.bf16.msra.mxu1 %v16939_v30 }
 0x61a   :  { %3400 = vmatprep.subr.bf16.mxu1 %v16942_v21 }
 0x61c   :  { %13972 = vmatpush3.bf16.msra.mxu0 %v14894_v50 }
 0x61d   :  { %13973 = vmatprep.subr.bf16.mxu0 %v18664_v47  ;;  %3401 = vmatpush1.bf16.msra.mxu1 %v16945_v56 }
 0x61e   :  { %3402 = vmatprep.subr.bf16.mxu1 %v16948_v60 }
 0x620   :  { %13974 = vmatpush3.bf16.msra.mxu0 %v14895_v9 }
 0x621   :  { %13979 = vmatprep.subr.bf16.mxu0 %v18664_v47  ;;  %3403 = vmatpush1.bf16.msra.mxu1 %v16951_v22 }
 0x622   :  { %3650 = vmatprep.subr.bf16.mxu1 %v16954_v32 }
 0x623   :  { %13976 = vmatmul.mubr.bf16.vlgmr.msra.gmra.mrb[68].mxu0 %v18663_v59 }
 0x624   :  { %13995 = vmatprep.mubr.msk.bf16.mxu0 %vm16124_vm12, %v18664_v47  ;;  %13980 = vmatpush3.bf16.msra.mxu0 %v14896_v6 }
 0x625   :  { %13981 = vmatprep.subr.bf16.mxu0 %v18664_v47 }
 0x628   :  { %13982 = vmatpush3.bf16.msra.mxu0 %v14897_v10 }
 0x629   :  { %13983 = vmatprep.subr.bf16.mxu0 %v18664_v47 }
 0x62c   :  { %13984 = vmatpush3.bf16.msra.mxu0 %v14898_v26 }
 0x62d   :  { %13985 = vmatprep.subr.bf16.mxu0 %v18664_v47 }
 0x630   :  { %13986 = vmatpush3.bf16.msra.mxu0 %v14899_v27 }
 0x631   :  { %13987 = vmatprep.subr.bf16.mxu0 %v18664_v47 }
 0x634   :  { %13988 = vmatpush3.bf16.msra.mxu0 %v14900_v34 }
 0x635   :  { %13989 = vmatprep.subr.bf16.mxu0 %v18664_v47 }
 0x638   :  { %13990 = vmatpush3.bf16.msra.mxu0 %v14901_v43  ;;  %v2192_v43 = vsub.s32 4, %v16438_v12 }
 0x639   :  { %13991 = vmatprep.subr.bf16.mxu0 %v18664_v47 }
 0x63a   :  { %v2193_v55 = vrot.slane %v2172_v63, %v2192_v43 }
 0x63c   :  { %13992 = vmatpush3.bf16.msra.mxu0 %v14902_v11  ;;  %v2665_v11 = vld [vmem:[#allocation18] ss:$2 sm:$0x7] }
 0x63d   :  { %13993 = vmatprep.subr.bf16.mxu0 %v18664_v47 }
 0x640   :  { %13994 = vmatpush3.bf16.msra.mxu0 %v14903_v36  ;;  %v2196_v36 = vsub.s32 5, %v16438_v12 }
 0x641   :  { %13999 = vmatprep.subr.bf16.mxu0 %v18664_v47 }
 0x696   :  { %v2478_v5 = vpop.f32.mrb[48].mxu0  ;;  %v2531_v30 = vpop.f32.mrb[48].mxu1 }
 0x697   :  { %v2479_v16 = vadd.f32 %v2478_v5, %v2177_v61  ;;  %v2532_v21 = vadd.f32 %v2531_v30, %v2185_v15  ;;  %v2480_v33 = vpop.f32.mrb[49].mxu0  ;;  %v2533_v56 = vpop.f32.mrb[49].mxu1  ;;  %v2670_v5 = vrot.slane %v2665_v11, %v16447_v19 }
 0x698   :  { %v2481_v51 = vadd.f32 %v2480_v33, %v2181_v18  ;;  %v2534_v60 = vadd.f32 %v2533_v56, %v2189_v40  ;;  %v2482_v13 = vpop.f32.mrb[50].mxu0  ;;  %v2535_v22 = vpop.f32.mrb[50].mxu1 }
 0x699   :  { %2603 = vst [vmem:[#allocation3] sm:$0xff] %v2479_v16  ;;  %2605 = vst [vmem:[#allocation3 + $0x10] sm:$0xff] %v2532_v21  ;;  %v2483_v32 = vadd.f32 %v2482_v13, %v2177_v61  ;;  %v2536_v29 = vadd.f32 %v2535_v22, %v2185_v15  ;;  %v2484_v17 = vpop.f32.mrb[51].mxu0  ;;  %v2537_v45 = vpop.f32.mrb[51].mxu1 }
 0x69a   :  { %2604 = vst [vmem:[#allocation3 + $0x8] sm:$0xff] %v2481_v51  ;;  %2606 = vst [vmem:[#allocation3 + $0x18] sm:$0xff] %v2534_v60  ;;  %v2485_v3 = vadd.f32 %v2484_v17, %v2181_v18  ;;  %v2538_v46 = vadd.f32 %v2537_v45, %v2189_v40  ;;  %v2674_v51 = vrot.slane %v2665_v11, %v16450_v20 }
 0x69b   :  { %2609 = vst [vmem:[#allocation3 + $0x30] sm:$0xff] %v2483_v32  ;;  %2611 = vst [vmem:[#allocation3 + $0x40] sm:$0xff] %v2536_v29 }
 0x69c   :  { %2610 = vst [vmem:[#allocation3 + $0x38] sm:$0xff] %v2485_v3  ;;  %2612 = vst [vmem:[#allocation3 + $0x48] sm:$0xff] %v2538_v46 }
 0x69e   :  { %v2488_v37 = vpop.f32.mrb[52].mxu0  ;;  %v2541_v24 = vpop.f32.mrb[52].mxu1 }
 0x69f   :  { %v2489_v48 = vadd.f32 %v2488_v37, %v2177_v61  ;;  %v2542_v42 = vadd.f32 %v2541_v24, %v2185_v15  ;;  %v2490_v44 = vpop.f32.mrb[53].mxu0  ;;  %v2543_v53 = vpop.f32.mrb[53].mxu1 }
 0x6a0   :  { %v2491_v31 = vadd.f32 %v2490_v44, %v2181_v18  ;;  %v2544_v14 = vadd.f32 %v2543_v53, %v2189_v40  ;;  %v2492_v62 = vpop.f32.mrb[54].mxu0  ;;  %v2545_v50 = vpop.f32.mrb[54].mxu1 }
 0x6a1   :  { %2615 = vst [vmem:[#allocation3 + $0x60] sm:$0xff] %v2489_v48  ;;  %2617 = vst [vmem:[#allocation3 + $0x70] sm:$0xff] %v2542_v42  ;;  %v2493_v9 = vadd.f32 %v2492_v62, %v2177_v61  ;;  %v2546_v6 = vadd.f32 %v2545_v50, %v2185_v15  ;;  %v2494_v10 = vpop.f32.mrb[55].mxu0  ;;  %v2547_v26 = vpop.f32.mrb[55].mxu1  ;;  %v2197_v61 = vrot.slane %v2172_v63, %v2196_v36  ;;  %v2628_v46 = vld [vmem:[#allocation3 + $0x8] sm:$0x3] }
 0x6a2   :  { %2616 = vst [vmem:[#allocation3 + $0x68] sm:$0xff] %v2491_v31  ;;  %2618 = vst [vmem:[#allocation3 + $0x78] sm:$0xff] %v2544_v14  ;;  %v2495_v27 = vadd.f32 %v2494_v10, %v2181_v18  ;;  %v2548_v34 = vadd.f32 %v2547_v26, %v2189_v40  ;;  %v2627_v40 = vld [vmem:[#allocation3] sm:$0x3]  ;;  %v2678_v26 = vrot.slane %v2665_v11, %v16455_v23 }
 0x6a3   :  { %2621 = vst [vmem:[#allocation3 + $0x90] sm:$0xff] %v2493_v9  ;;  %2623 = vst [vmem:[#allocation3 + $0xa0] sm:$0xff] %v2546_v6  ;;  %v17069_v6 = vld [vmem:[#allocation18 + $0x1] ss:$2 sm:$0x7] }
 0x6a4   :  { %2622 = vst [vmem:[#allocation3 + $0x98] sm:$0xff] %v2495_v27  ;;  %2624 = vst [vmem:[#allocation3 + $0xa8] sm:$0xff] %v2548_v34  ;;  %v2930_v27 = vrot.slane %v17069_v6, %v16447_v19 }
 0x6b6   :  { %v2584_v15 = vpop.f32.mrb[56].mxu0  ;;  %v2844_v30 = vpop.f32.mrb[56].mxu1 }
 0x6b7   :  { %v2585_v16 = vadd.f32 %v2584_v15, %v2193_v55  ;;  %v2845_v21 = vadd.f32 %v2844_v30, %v2670_v5  ;;  %v2586_v33 = vpop.f32.mrb[57].mxu0  ;;  %v2846_v18 = vpop.f32.mrb[57].mxu1 }
 0x6b8   :  { %v2587_v56 = vadd.f32 %v2586_v33, %v2197_v61  ;;  %v2588_v60 = vpop.f32.mrb[58].mxu0  ;;  %v2848_v13 = vpop.f32.mrb[58].mxu1  ;;  %v2847_v45 = vadd.f32 %v2846_v18, %v2674_v51  ;;  %v2629_v51 = vld [vmem:[#allocation3 + $0x10] sm:$0x3] }
 0x6b9   :  { %2607 = vst [vmem:[#allocation3 + $0x20] sm:$0xff] %v2585_v16  ;;  %v3151_v22 = vadd.f32 %v2845_v21, %v2627_v40  ;;  %v2589_v32 = vadd.f32 %v2588_v60, %v2193_v55  ;;  %v2590_v12 = vpop.f32.mrb[59].mxu0  ;;  %v2849_v29 = vpop.f32.mrb[59].mxu1  ;;  %v2630_v60 = vld [vmem:[#allocation3 + $0xa8] sm:$0xc0] }
 0x6ba   :  { %2608 = vst [vmem:[#allocation3 + $0x28] sm:$0xff] %v2587_v56  ;;  %v2591_v17 = vadd.f32 %v2590_v12, %v2197_v61  ;;  %v3158_v48 = vadd.f32 %v2847_v45, %v2628_v46 }
 0x6bb   :  { %v12656_v63 = vmul.f32 -1.442695, %v3151_v22  ;;  %2613 = vst [vmem:[#allocation3 + $0x50] sm:$0xff] %v2589_v32 }
 0x6bc   :  { %2614 = vst [vmem:[#allocation3 + $0x58] sm:$0xff] %v2591_v17  ;;  %v12657_v62 = vmul.f32 -1.442695, %v3158_v48 }
 0x6bd   :  { %15528 = vpow2.f32 %v12656_v63 }
 0x6be   :  { %v2594_v3 = vpop.f32.mrb[60].mxu0  ;;  %15530 = vpow2.f32 %v12657_v62  ;;  %v14905_v62 = vld [vmem:[#allocation16 + $0xe0] ss:$12 sps:$4 sm:$0xff]  }
 0x6bf   :  { %v2595_v37 = vadd.f32 %v2594_v3, %v2193_v55  ;;  %v2596_v24 = vpop.f32.mrb[61].mxu0 }
 0x6c0   :  { %v2597_v42 = vadd.f32 %v2596_v24, %v2197_v61  ;;  %v2598_v44 = vpop.f32.mrb[62].mxu0 }
 0x6c1   :  { %2619 = vst [vmem:[#allocation3 + $0x80] sm:$0xff] %v2595_v37  ;;  %v2599_v53 = vadd.f32 %v2598_v44, %v2193_v55  ;;  %v2600_v31 = vpop.f32.mrb[63].mxu0  ;;  %v2934_v55 = vrot.slane %v17069_v6, %v16450_v20 }
 0x6c2   :  { %2620 = vst [vmem:[#allocation3 + $0x88] sm:$0xff] %v2597_v42  ;;  %v2601_v14 = vadd.f32 %v2600_v31, %v2197_v61 }
 0x6c3   :  { %2625 = vst [vmem:[#allocation3 + $0xb0] sm:$0xff] %v2599_v53  ;;  %v14904_v53 = vld [vmem:[#allocation16 + $0xc8] ss:$12 sps:$4 sm:$0xff]  }
 0x6c4   :  { %2626 = vst [vmem:[#allocation3 + $0xb8] sm:$0xff] %v2601_v14 }
 0x6c7   :  { %v15529_v50 = vpop.eup %15528 }
 0x6c8   :  { %v3155_v9 = vadd.f32 1.0, %v15529_v50  ;;  %v15531_v10 = vpop.eup %15530  ;;  %v2938_v50 = vrot.slane %v17069_v6, %v16455_v23 }
 0x6c9   :  { %v3162_v34 = vadd.f32 1.0, %v15531_v10 }
 0x6ca   :  { %15532 = vrcp.f32 %v3155_v9  ;;  %v2631_v17 = vld [vmem:[#allocation3 + $0xb0] sm:$0xc0]  ;;  %v14906_v9 = vld [vmem:[#allocation16 + $0xf8] ss:$12 sps:$4 sm:$0xff]  }
 0x6cb   :  { %15534 = vrcp.f32 %v3162_v34  ;;  %v14907_v34 = vld [vmem:[#allocation16 + $0x110] ss:$12 sps:$4 sm:$0xff]  }
 0x6d4   :  { %v15533_v16 = vpop.eup %15532 }
 0x6d5   :  { %v15535_v45 = vpop.eup %15534 }
 0x6d6   :  { %v2885_v43 = vpop.f32.mrb[64].mxu0  ;;  %v3104_v36 = vpop.f32.mrb[60].mxu1  ;;  %v3168_v46 = vsub.f32 1.0, %v15535_v45  ;;  %v3170_v48 = vmul.f32 0.0, %v15535_v45  ;;  %v17158_v45 = vld [vmem:[#allocation16 + $0x94] ss:$12 sps:$4 sm:$0xff]  }
 0x6d7   :  { %v2886_v5 = vadd.f32 %v2885_v43, %v2678_v26  ;;  %v3105_v61 = vadd.f32 %v3104_v36, %v2930_v27  ;;  %v13957_v15 = vpop.f32.mrb[65].mxu0  ;;  %v3106_v30 = vpop.f32.mrb[61].mxu1 }
 0x6d8   :  { %v2888_v21 = vpop.f32.mrb[66].mxu0  ;;  %v3108_v33 = vpop.f32.mrb[62].mxu1  ;;  %v3107_v13 = vadd.f32 %v3106_v30, %v2934_v55  ;;  %v14908_v55 = vld [vmem:[#allocation16 + $0x128] ss:$12 sps:$4 sm:$0xff]  }
 0x6d9   :  { %v3165_v18 = vmul.f32 %v15533_v16, %v2886_v5  ;;  %v3173_v40 = vrot.slane %v3105_v61, 2  ;;  %v13958_v11 = vpop.f32.mrb[67].mxu0  ;;  %v3109_v56 = vpop.f32.mrb[63].mxu1  ;;  %v2632_v5 = vld [vmem:[#allocation3 + $0xb8] sm:$0xc0] }
 0x6da   :  { %v3183_v29 = vrot.slane %v3107_v13, 2  ;;  %v14911_v61 = vld [vmem:[#allocation16 + $0x170] ss:$12 sps:$4 sm:$0xff]   ;;  %v14915_v16 = vld [vmem:[#allocation16 + $0x8] ss:$12 sps:$4 sm:$0xff]  }
 0x6db   :  { %v3166_v22 = vadd.f32 %v3165_v18, %v2629_v51  ;;  %v3175_v32 = vadd.f32 %v3173_v40, %v2630_v60  ;;  %v17123_v21 = vld [vmem:[#allocation16 + $0x1c] ss:$12 sps:$4 sm:$0xff]   ;;  %v17126_v33 = vld [vmem:[#allocation16 + $0x18] ss:$12 sps:$4 sm:$0xff]   ;;  %v14919_v18 = vld [vmem:[#allocation16 + $0x20] ss:$12 sps:$4 sm:$0xff]  }
 0x6dc   :  { %v3185_v63 = vadd.f32 %v3183_v29, %v2631_v17  ;;  %v17130_v40 = vld [vmem:[#allocation16 + $0x30] ss:$12 sps:$4 sm:$0xff]   ;;  %v17132_v11 = vld [vmem:[#allocation16 + $0x34] ss:$12 sps:$4 sm:$0xff]   ;;  %v14923_v56 = vld [vmem:[#allocation16 + $0x38] ss:$12 sps:$4 sm:$0xff]  }
 0x6dd   :  { %15536 = vtanh.f32 %v3166_v22  ;;  %v12658_v12 = vmul.f32 -1.442695, %v3175_v32  ;;  %v17137_v51 = vld [vmem:[#allocation16 + $0x4c] ss:$12 sps:$4 sm:$0xff]   ;;  %v17140_v60 = vld [vmem:[#allocation16 + $0x48] ss:$12 sps:$4 sm:$0xff]  }
 0x6de   :  { %v12659_v3 = vmul.f32 -1.442695, %v3185_v63  ;;  %v14927_v13 = vld [vmem:[#allocation16 + $0x50] ss:$12 sps:$4 sm:$0xff]   ;;  %v17147_v32 = vld [vmem:[#allocation16 + $0x60] ss:$12 sps:$4 sm:$0xff]  }
 0x6df   :  { %15538 = vpow2.f32 %v12658_v12  ;;  %v17144_v22 = vld [vmem:[#allocation16 + $0x64] ss:$12 sps:$4 sm:$0xff]   ;;  %v14931_v12 = vld [vmem:[#allocation16 + $0x68] ss:$12 sps:$4 sm:$0xff]   ;;  %v14935_v63 = vld [vmem:[#allocation16 + $0x80] ss:$12 sps:$4 sm:$0xff]  }
 0x6e0   :  { %15540 = vpow2.f32 %v12659_v3  ;;  %v17151_v29 = vld [vmem:[#allocation16 + $0x7c] ss:$12 sps:$4 sm:$0xff]   ;;  %v17154_v17 = vld [vmem:[#allocation16 + $0x78] ss:$12 sps:$4 sm:$0xff]  }
 0x6e1   :  { %v17161_v3 = vld [vmem:[#allocation16 + $0x90] ss:$12 sps:$4 sm:$0xff]  }
 0x6e7   :  { %v15537_v37 = vpop.eup %15536 }
 0x6e8   :  { %v3169_v24 = vmul.f32 %v15537_v37, %v3168_v46  ;;  %v14939_v46 = vld [vmem:[#allocation16 + $0x98] ss:$12 sps:$4 sm:$0xff]  }
 0x6e9   :  { %v15539_v42 = vpop.eup %15538  ;;  %v17165_v37 = vld [vmem:[#allocation16 + $0xac] ss:$12 sps:$4 sm:$0xff]  }
 0x6ea   :  { %v17076_v44 = vadd.f32 %v3170_v48, %v3169_v24  ;;  %v3179_v31 = vadd.f32 1.0, %v15539_v42  ;;  %v17168_v24 = vld [vmem:[#allocation16 + $0xa8] ss:$12 sps:$4 sm:$0xff]   ;;  %v14943_v48 = vld [vmem:[#allocation16 + $0xb0] ss:$12 sps:$4 sm:$0xff]  }
 0x6eb   :  { %v17173_v42 = vld [vmem:[#allocation16 + $0xc4] ss:$12 sps:$4 sm:$0xff]  }
 0x6ec   :  { %3202 = vst [vmem:[#allocation4] sm:$0x3] %v17076_v44  ;;  %v3210_v14 = vpack.c.bf16 %v17076_v44, %v17076_v44  ;;  %15542 = vrcp.f32 %v3179_v31 }
 0x6ee   :  { %3421 = vmatmul.mubr.bf16.vlgmr.msra.gmra.mrb[64].mxu1 %v3210_v14  ;;  %13996 = vmatmul.mubr.bf16.vlgmr.msra.gmra.mrb[72].mxu0 %v3210_v14 }
 0x6ef   :  { %3651 = vmatpush1.bf16.msra.mxu1 %v16957_v35  ;;  %14000 = vmatpush3.bf16.msra.mxu0 %v14904_v53  ;;  %v15541_v35 = vpop.eup %15540  ;;  %v3243_v53 = vld [vmem:[#allocation18] ss:$2 sm:$0x7] }
 0x6f0   :  { %3652 = vmatprep.subr.bf16.mxu1 %v16961_v49  ;;  %14001 = vmatprep.subr.bf16.mxu0 %v18664_v47  ;;  %v3189_v10 = vadd.f32 1.0, %v15541_v35  ;;  %v3248_v31 = vrot.slane %v3243_v53, %v16447_v19  ;;  %v3252_v14 = vrot.slane %v3243_v53, %v16450_v20 }
 0x6f1   :  { %3682 = vmatprep.mubr.bf16.mxu1 %v18663_v59  ;;  %14015 = vmatprep.mubr.msk.bf16.mxu0 %vm16124_vm12, %v18664_v47 }
 0x6f2   :  { %15544 = vrcp.f32 %v3189_v10 }
 0x6f3   :  { %3653 = vmatpush1.bf16.msra.mxu1 %v16966_v0  ;;  %14002 = vmatpush3.bf16.msra.mxu0 %v14905_v62 }
 0x6f4   :  { %3654 = vmatprep.subr.bf16.mxu1 %v16970_v28  ;;  %14003 = vmatprep.subr.bf16.mxu0 %v18664_v47 }
 0x6f6   :  { %v3145_v49 = vpop.f32.mrb[68].mxu0  ;;  %v15543_v36 = vpop.eup %15542 }
 0x6f7   :  { %v3146_v26 = vadd.f32 %v3145_v49, %v2938_v50  ;;  %v13977_v27 = vpop.f32.mrb[69].mxu0  ;;  %3655 = vmatpush1.bf16.msra.mxu1 %v16975_v54  ;;  %14004 = vmatpush3.bf16.msra.mxu0 %v14906_v9 }
 0x6f8   :  { %v3148_v43 = vpop.f32.mrb[70].mxu0  ;;  %3656 = vmatprep.subr.bf16.mxu1 %v16979_v39  ;;  %14005 = vmatprep.subr.bf16.mxu0 %v18664_v47  ;;  %v14909_v39 = vld [vmem:[#allocation16 + $0x140] ss:$12 sps:$4 sm:$0xff]  }
 0x6f9   :  { %v3193_v0 = vrot.slane %v3146_v26, 2  ;;  %v13978_v6 = vpop.f32.mrb[71].mxu0 }
 0x6fa   :  { %v3204_v6 = vld [vmem:[#allocation3] sm:$0xc] }
 0x6fb   :  { %v3195_v28 = vmul.f32 %v15543_v36, %v3193_v0  ;;  %3657 = vmatpush1.bf16.msra.mxu1 %v16983_v7  ;;  %14006 = vmatpush3.bf16.msra.mxu0 %v14907_v34  ;;  %v14910_v7 = vld [vmem:[#allocation16 + $0x158] ss:$12 sps:$4 sm:$0xff]  }
 0x6fc   :  { %3658 = vmatprep.subr.bf16.mxu1 %v16987_v1  ;;  %14007 = vmatprep.subr.bf16.mxu0 %v18664_v47  ;;  %v15545_v1 = vpop.eup %15544 }
 0x6fd   :  { %v3196_v54 = vadd.f32 %v3195_v28, %v2632_v5  ;;  %v3200_v30 = vmul.f32 0.0, %v15545_v1 }
 0x6ff   :  { %15546 = vtanh.f32 %v3196_v54  ;;  %3659 = vmatpush1.bf16.msra.mxu1 %v16992_v25  ;;  %14008 = vmatpush3.bf16.msra.mxu0 %v14908_v55  ;;  %v3198_v25 = vsub.f32 1.0, %v15545_v1  ;;  %v3205_v55 = vld [vmem:[#allocation3 + $0x8] sm:$0xc] }
 0x700   :  { %3660 = vmatprep.subr.bf16.mxu1 %v16996_v52  ;;  %14009 = vmatprep.subr.bf16.mxu0 %v18664_v47 }
 0x703   :  { %3661 = vmatpush1.bf16.msra.mxu1 %v16999_v4  ;;  %14010 = vmatpush3.bf16.msra.mxu0 %v14909_v39 }
 0x704   :  { %3662 = vmatprep.subr.bf16.mxu1 %v17003_v2  ;;  %14011 = vmatprep.subr.bf16.mxu0 %v18664_v47 }
 0x707   :  { %3663 = vmatpush1.bf16.msra.mxu1 %v17006_v8  ;;  %14012 = vmatpush3.bf16.msra.mxu0 %v14910_v7 }
 0x708   :  { %3664 = vmatprep.subr.bf16.mxu1 %v17010_v38  ;;  %14013 = vmatprep.subr.bf16.mxu0 %v18664_v47  ;;  %v17117_v38 = vld [vmem:[#allocation16 + $0x4] ss:$12 sps:$4 sm:$0xff]  }
 0x709   :  { %v15547_v52 = vpop.eup %15546 }
 0x70a   :  { %v3199_v15 = vmul.f32 %v15547_v52, %v3198_v25  ;;  %v3256_v52 = vrot.slane %v3243_v53, %v16455_v23 }
 0x70b   :  { %3665 = vmatpush1.bf16.msra.mxu1 %v17013_v57  ;;  %14014 = vmatpush3.bf16.msra.mxu0 %v14911_v61  ;;  %v17119_v57 = vld [vmem:[#allocation16] ss:$12 sps:$4 sm:$0xff]  }
 0x70c   :  { %v17108_v4 = vadd.f32 %v3200_v30, %v3199_v15  ;;  %14019 = vmatprep.subr.bf16.mxu0 %v18664_v47  ;;  %3986 = vmatprep.subr.bf16.mxu1 %v17117_v38  ;;  %v17179_v30 = vld [vmem:[#allocation18 + $0x1] ss:$2 sm:$0x7] }
 0x70e   :  { %3203 = vst [vmem:[#allocation4 + $0x38] sm:$0xc0] %v17108_v4  ;;  %v3469_v2 = vpack.c.bf16 %v17108_v4, %v17108_v4 }
 0x710   :  { %v3520_v8 = vrot.slane %v3469_v2, 3 }
 0x712   :  { %3683 = vmatmul.mubr.bf16.vlgmr.msra.gmra.mrb[68].mxu1 %v3520_v8  ;;  %14016 = vmatmul.mubr.bf16.vlgmr.msra.gmra.mrb[76].mxu0 %v3520_v8 }
 0x713   :  { %4018 = vmatprep.mubr.bf16.mxu1 %v18663_v59  ;;  %14035 = vmatprep.mubr.msk.bf16.mxu0 %vm16124_vm12, %v18664_v47 }
 0x714   :  { %3987 = vmatpush1.bf16.msra.mxu1 %v17119_v57  ;;  %14020 = vmatpush3.bf16.msra.mxu0 %v14915_v16  ;;  %v3760_v16 = vrot.slane %v17076_v44, 6 }
 0x715   :  { %14021 = vmatprep.subr.bf16.mxu0 %v18664_v47  ;;  %3988 = vmatprep.subr.bf16.mxu1 %v17123_v21 }
 0x718   :  { %3989 = vmatpush1.bf16.msra.mxu1 %v17126_v33  ;;  %14022 = vmatpush3.bf16.msra.mxu0 %v14919_v18 }
 0x719   :  { %14023 = vmatprep.subr.bf16.mxu0 %v18664_v47  ;;  %3990 = vmatprep.subr.bf16.mxu1 %v17132_v11 }
 0x71c   :  { %3991 = vmatpush1.bf16.msra.mxu1 %v17130_v40  ;;  %14024 = vmatpush3.bf16.msra.mxu0 %v14923_v56 }
 0x71d   :  { %14025 = vmatprep.subr.bf16.mxu0 %v18664_v47  ;;  %3992 = vmatprep.subr.bf16.mxu1 %v17137_v51 }
 0x720   :  { %3993 = vmatpush1.bf16.msra.mxu1 %v17140_v60  ;;  %14026 = vmatpush3.bf16.msra.mxu0 %v14927_v13  ;;  %v3507_v13 = vrot.slane %v17179_v30, %v16447_v19 }
 0x721   :  { %14027 = vmatprep.subr.bf16.mxu0 %v18664_v47  ;;  %3994 = vmatprep.subr.bf16.mxu1 %v17144_v22 }
 0x724   :  { %3995 = vmatpush1.bf16.msra.mxu1 %v17147_v32  ;;  %14028 = vmatpush3.bf16.msra.mxu0 %v14931_v12  ;;  %v3206_v12 = vld [vmem:[#allocation3 + $0x10] sm:$0xc] }
 0x725   :  { %14029 = vmatprep.subr.bf16.mxu0 %v18664_v47  ;;  %3996 = vmatprep.subr.bf16.mxu1 %v17151_v29 }
 0x728   :  { %3997 = vmatpush1.bf16.msra.mxu1 %v17154_v17  ;;  %14030 = vmatpush3.bf16.msra.mxu0 %v14935_v63  ;;  %v3511_v63 = vrot.slane %v17179_v30, %v16450_v20 }
 0x729   :  { %14031 = vmatprep.subr.bf16.mxu0 %v18664_v47  ;;  %3998 = vmatprep.subr.bf16.mxu1 %v17158_v45 }
 0x72c   :  { %3999 = vmatpush1.bf16.msra.mxu1 %v17161_v3  ;;  %14032 = vmatpush3.bf16.msra.mxu0 %v14939_v46 }
 0x72d   :  { %14033 = vmatprep.subr.bf16.mxu0 %v18664_v47  ;;  %4000 = vmatprep.subr.bf16.mxu1 %v17165_v37 }
 0x730   :  { %4001 = vmatpush1.bf16.msra.mxu1 %v17168_v24  ;;  %14034 = vmatpush3.bf16.msra.mxu0 %v14943_v48 }
 0x731   :  { %14039 = vmatprep.subr.bf16.mxu0 %v18664_v47  ;;  %4248 = vmatprep.subr.bf16.mxu1 %v17173_v42 }
 0x7c1   :  { %v3422_v62 = vpop.f32.mrb[64].mxu1  ;;  %v3463_v50 = vpop.f32.mrb[72].mxu0 }
 0x7c2   :  { %v3423_v9 = vadd.f32 %v3422_v62, %v3248_v31  ;;  %v3424_v35 = vpop.f32.mrb[65].mxu1  ;;  %v13997_v49 = vpop.f32.mrb[73].mxu0  ;;  %v3464_v15 = vadd.f32 %v3463_v50, %v3256_v52  ;;  %v17193_v52 = vld [vmem:[#allocation16 + $0xdc] ss:$12 sps:$4 sm:$0xff]  }
 0x7c3   :  { %v3425_v10 = vadd.f32 %v3424_v35, %v3252_v14  ;;  %v3426_v26 = vpop.f32.mrb[66].mxu1  ;;  %v3466_v27 = vpop.f32.mrb[74].mxu0 }
 0x7c4   :  { %v3732_v34 = vrot.slane %v3423_v9, 6  ;;  %v3427_v43 = vpop.f32.mrb[67].mxu1  ;;  %v13998_v0 = vpop.f32.mrb[75].mxu0  ;;  %v3752_v2 = vrot.slane %v3464_v15, 6  ;;  %v3207_v27 = vld [vmem:[#allocation3 + $0xa8] sm:$0x30] }
 0x7c5   :  { %v3742_v36 = vrot.slane %v3425_v10, 6  ;;  %v3208_v0 = vld [vmem:[#allocation3 + $0xb0] sm:$0x30] }
 0x7c6   :  { %v3734_v28 = vadd.f32 %v3732_v34, %v3204_v6 }
 0x7c7   :  { %v3744_v5 = vadd.f32 %v3742_v36, %v3205_v55 }
 0x7c8   :  { %v12708_v54 = vmul.f32 -1.442695, %v3734_v28 }
 0x7c9   :  { %v12709_v39 = vmul.f32 -1.442695, %v3744_v5 }
 0x7ca   :  { %15548 = vpow2.f32 %v12708_v54 }
 0x7cb   :  { %15550 = vpow2.f32 %v12709_v39 }
 0x7d4   :  { %v15549_v7 = vpop.eup %15548 }
 0x7d5   :  { %v15551_v1 = vpop.eup %15550  ;;  %v3738_v61 = vadd.f32 1.0, %v15549_v7 }
 0x7d6   :  { %v3748_v25 = vadd.f32 1.0, %v15551_v1  ;;  %v17191_v1 = vld [vmem:[#allocation16 + $0xc0] ss:$12 sps:$4 sm:$0xff]  }
 0x7d7   :  { %15552 = vrcp.f32 %v3738_v61  ;;  %v14947_v61 = vld [vmem:[#allocation16 + $0xc8] ss:$12 sps:$4 sm:$0xff]  }
 0x7d8   :  { %15554 = vrcp.f32 %v3748_v25 }
 0x7e1   :  { %v15553_v8 = vpop.eup %15552 }
 0x7e2   :  { %v15555_v18 = vpop.eup %15554  ;;  %v3754_v56 = vmul.f32 %v15553_v8, %v3752_v2 }
 0x7e3   :  { %v3762_v46 = vmul.f32 %v15555_v18, %v3760_v16  ;;  %v3757_v55 = vsub.f32 1.0, %v15555_v18  ;;  %v17196_v18 = vld [vmem:[#allocation16 + $0xd8] ss:$12 sps:$4 sm:$0xff]  }
 0x7e4   :  { %v3755_v48 = vadd.f32 %v3754_v56, %v3206_v12  ;;  %v14951_v56 = vld [vmem:[#allocation16 + $0xe0] ss:$12 sps:$4 sm:$0xff]   ;;  %v3515_v12 = vrot.slane %v17179_v30, %v16455_v23  ;;  %v17215_v30 = vld [vmem:[#allocation16 + $0x108] ss:$12 sps:$4 sm:$0xff]  }
 0x7e5   :  { %v3684_v53 = vpop.f32.mrb[68].mxu1  ;;  %v3725_v31 = vpop.f32.mrb[76].mxu0 }
 0x7e6   :  { %15556 = vtanh.f32 %v3755_v48  ;;  %v3685_v14 = vadd.f32 %v3684_v53, %v3507_v13  ;;  %v3686_v62 = vpop.f32.mrb[69].mxu1  ;;  %v14017_v50 = vpop.f32.mrb[77].mxu0  ;;  %v17200_v13 = vld [vmem:[#allocation16 + $0xf4] ss:$12 sps:$4 sm:$0xff]   ;;  %v17212_v48 = vld [vmem:[#allocation16 + $0x10c] ss:$12 sps:$4 sm:$0xff]   ;;  %v3726_v53 = vadd.f32 %v3725_v31, %v3515_v12 }
 0x7e7   :  { %v3687_v9 = vadd.f32 %v3686_v62, %v3511_v63  ;;  %v3688_v35 = vpop.f32.mrb[70].mxu1  ;;  %v3728_v44 = vpop.f32.mrb[78].mxu0  ;;  %v17208_v63 = vld [vmem:[#allocation16 + $0xf0] ss:$12 sps:$4 sm:$0xff]   ;;  %v17223_v31 = vld [vmem:[#allocation16 + $0x120] ss:$12 sps:$4 sm:$0xff]  }
 0x7e8   :  { %v3765_v49 = vrot.slane %v3685_v14, 4  ;;  %v3689_v10 = vpop.f32.mrb[71].mxu1  ;;  %v14018_v26 = vpop.f32.mrb[79].mxu0  ;;  %v14959_v14 = vld [vmem:[#allocation16 + $0x110] ss:$12 sps:$4 sm:$0xff]   ;;  %v3785_v50 = vrot.slane %v3726_v53, 4 }
 0x7e9   :  { %v3775_v34 = vrot.slane %v3687_v9, 4  ;;  %v17219_v62 = vld [vmem:[#allocation16 + $0x124] ss:$12 sps:$4 sm:$0xff]   ;;  %v3793_v35 = vrot.slane %v17108_v4, 2  ;;  %v14963_v10 = vld [vmem:[#allocation16 + $0x128] ss:$12 sps:$4 sm:$0xff]  }
 0x7ea   :  { %v3767_v43 = vadd.f32 %v3765_v49, %v3207_v27  ;;  %v3209_v26 = vld [vmem:[#allocation3 + $0xb8] sm:$0x30]  ;;  %v17227_v27 = vld [vmem:[#allocation16 + $0x13c] ss:$12 sps:$4 sm:$0xff]   ;;  %v17230_v4 = vld [vmem:[#allocation16 + $0x138] ss:$12 sps:$4 sm:$0xff]  }
 0x7eb   :  { %v3777_v6 = vadd.f32 %v3775_v34, %v3208_v0  ;;  %v14967_v0 = vld [vmem:[#allocation16 + $0x140] ss:$12 sps:$4 sm:$0xff]  }
 0x7ec   :  { %v12710_v36 = vmul.f32 -1.442695, %v3767_v43 }
 0x7ed   :  { %v12711_v28 = vmul.f32 -1.442695, %v3777_v6  ;;  %v17234_v6 = vld [vmem:[#allocation16 + $0x154] ss:$12 sps:$4 sm:$0xff]  }
 0x7ee   :  { %15558 = vpow2.f32 %v12710_v36  ;;  %v17237_v36 = vld [vmem:[#allocation16 + $0x150] ss:$12 sps:$4 sm:$0xff]  }
 0x7ef   :  { %15560 = vpow2.f32 %v12711_v28  ;;  %v14971_v28 = vld [vmem:[#allocation16 + $0x158] ss:$12 sps:$4 sm:$0xff]  }
 0x7f0   :  { %v15557_v5 = vpop.eup %15556 }
 0x7f1   :  { %v3758_v54 = vmul.f32 %v15557_v5, %v3757_v55  ;;  %v17241_v55 = vld [vmem:[#allocation16 + $0x16c] ss:$12 sps:$4 sm:$0xff]   ;;  %v17244_v5 = vld [vmem:[#allocation16 + $0x168] ss:$12 sps:$4 sm:$0xff]  }
 0x7f3   :  { %v17186_v39 = vadd.f32 %v3762_v46, %v3758_v54  ;;  %v14955_v46 = vld [vmem:[#allocation16 + $0xf8] ss:$12 sps:$4 sm:$0xff]   ;;  %v14975_v54 = vld [vmem:[#allocation16 + $0x170] ss:$12 sps:$4 sm:$0xff]  }
 0x7f5   :  { %3797 = vst [vmem:[#allocation4] sm:$0xc] %v17186_v39  ;;  %v3805_v7 = vpack.c.bf16 %v17186_v39, %v17186_v39 }
 0x7f7   :  { %v3856_v25 = vrot.slane %v3805_v7, 1 }
 0x7f8   :  { %v15559_v15 = vpop.eup %15558 }
 0x7f9   :  { %v15561_v2 = vpop.eup %15560  ;;  %v3771_v8 = vadd.f32 1.0, %v15559_v15  ;;  %4019 = vmatmul.mubr.bf16.vlgmr.msra.gmra.mrb[72].mxu1 %v3856_v25  ;;  %14036 = vmatmul.mubr.bf16.vlgmr.msra.gmra.mrb[80].mxu0 %v3856_v25 }
 0x7fa   :  { %v3781_v16 = vadd.f32 1.0, %v15561_v2  ;;  %4249 = vmatpush1.bf16.msra.mxu1 %v17191_v1  ;;  %14040 = vmatpush3.bf16.msra.mxu0 %v14947_v61 }
 0x7fb   :  { %15562 = vrcp.f32 %v3771_v8  ;;  %4250 = vmatprep.subr.bf16.mxu1 %v17193_v52  ;;  %14041 = vmatprep.subr.bf16.mxu0 %v18664_v47 }
 0x7fc   :  { %15564 = vrcp.f32 %v3781_v16  ;;  %4280 = vmatprep.mubr.bf16.mxu1 %v18663_v59  ;;  %14055 = vmatprep.mubr.msk.bf16.mxu0 %vm16124_vm12, %v18664_v47 }
 0x7fe   :  { %4251 = vmatpush1.bf16.msra.mxu1 %v17196_v18  ;;  %14042 = vmatpush3.bf16.msra.mxu0 %v14951_v56 }
 0x7ff   :  { %4252 = vmatprep.subr.bf16.mxu1 %v17200_v13  ;;  %14043 = vmatprep.subr.bf16.mxu0 %v18664_v47 }
 0x802   :  { %4253 = vmatpush1.bf16.msra.mxu1 %v17208_v63  ;;  %14044 = vmatpush3.bf16.msra.mxu0 %v14955_v46 }
 0x803   :  { %4254 = vmatprep.subr.bf16.mxu1 %v17212_v48  ;;  %14045 = vmatprep.subr.bf16.mxu0 %v18664_v47 }
 0x805   :  { %v15563_v9 = vpop.eup %15562 }
 0x806   :  { %v15565_v44 = vpop.eup %15564  ;;  %v3787_v49 = vmul.f32 %v15563_v9, %v3785_v50  ;;  %4255 = vmatpush1.bf16.msra.mxu1 %v17215_v30  ;;  %14046 = vmatpush3.bf16.msra.mxu0 %v14959_v14  ;;  %v3799_v14 = vld [vmem:[#allocation3] sm:$0x30] }
 0x807   :  { %4256 = vmatprep.subr.bf16.mxu1 %v17219_v62  ;;  %14047 = vmatprep.subr.bf16.mxu0 %v18664_v47  ;;  %v3795_v34 = vmul.f32 %v15565_v44, %v3793_v35  ;;  %v3790_v7 = vsub.f32 1.0, %v15565_v44  ;;  %v3800_v35 = vld [vmem:[#allocation3 + $0x8] sm:$0x30] }
 0x808   :  { %v3788_v43 = vadd.f32 %v3787_v49, %v3209_v26 }
 0x80a   :  { %15566 = vtanh.f32 %v3788_v43  ;;  %4257 = vmatpush1.bf16.msra.mxu1 %v17223_v31  ;;  %14048 = vmatpush3.bf16.msra.mxu0 %v14963_v10 }
 0x80b   :  { %4258 = vmatprep.subr.bf16.mxu1 %v17227_v27  ;;  %14049 = vmatprep.subr.bf16.mxu0 %v18664_v47 }
 0x80e   :  { %4259 = vmatpush1.bf16.msra.mxu1 %v17230_v4  ;;  %14050 = vmatpush3.bf16.msra.mxu0 %v14967_v0 }
 0x80f   :  { %4260 = vmatprep.subr.bf16.mxu1 %v17234_v6  ;;  %14051 = vmatprep.subr.bf16.mxu0 %v18664_v47 }
 0x812   :  { %4261 = vmatpush1.bf16.msra.mxu1 %v17237_v36  ;;  %14052 = vmatpush3.bf16.msra.mxu0 %v14971_v28 }
 0x813   :  { %4262 = vmatprep.subr.bf16.mxu1 %v17241_v55  ;;  %14053 = vmatprep.subr.bf16.mxu0 %v18664_v47 }
 0x814   :  { %v15567_v61 = vpop.eup %15566 }
 0x815   :  { %v3791_v25 = vmul.f32 %v15567_v61, %v3790_v7  ;;  %v4100_v7 = vld [vmem:[#allocation18 + $0x1] ss:$2 sm:$0x7] }
 0x816   :  { %4263 = vmatpush1.bf16.msra.mxu1 %v17244_v5  ;;  %14054 = vmatpush3.bf16.msra.mxu0 %v14975_v54 }
 0x817   :  { %v17249_v15 = vadd.f32 %v3795_v34, %v3791_v25  ;;  %4584 = vmatprep.subr.bf16.mxu1 %v17117_v38  ;;  %14059 = vmatprep.subr.bf16.mxu0 %v18664_v47  ;;  %v14976_v38 = vld [vmem:[#allocation16 + $0x8] ss:$12 sps:$4 sm:$0xff]  }
 0x819   :  { %3798 = vst [vmem:[#allocation4 + $0x38] sm:$0x30] %v17249_v15  ;;  %v4067_v2 = vpack.c.bf16 %v17249_v15, %v17249_v15 }
 0x81b   :  { %v4118_v8 = vrot.slane %v4067_v2, 2  ;;  %v4358_v2 = vrot.slane %v17186_v39, 6 }
 0x81d   :  { %4281 = vmatmul.mubr.bf16.vlgmr.msra.gmra.mrb[76].mxu1 %v4118_v8  ;;  %14056 = vmatmul.mubr.bf16.vlgmr.msra.gmra.mrb[84].mxu0 %v4118_v8 }
 0x81e   :  { %4585 = vmatpush1.bf16.msra.mxu1 %v17119_v57  ;;  %4616 = vmatprep.mubr.bf16.mxu1 %v18663_v59  ;;  %v14977_v57 = vld [vmem:[#allocation16 + $0x20] ss:$12 sps:$4 sm:$0xff]  }
 0x81f   :  { %4586 = vmatprep.subr.bf16.mxu1 %v17123_v21  ;;  %14075 = vmatprep.mubr.msk.bf16.mxu0 %vm16124_vm12, %v18664_v47  ;;  %v14978_v21 = vld [vmem:[#allocation16 + $0x38] ss:$12 sps:$4 sm:$0xff]  }
 0x820   :  { %14060 = vmatpush3.bf16.msra.mxu0 %v14976_v38 }
 0x821   :  { %14061 = vmatprep.subr.bf16.mxu0 %v18664_v47 }
 0x822   :  { %4587 = vmatpush1.bf16.msra.mxu1 %v17126_v33  ;;  %v14979_v33 = vld [vmem:[#allocation16 + $0x50] ss:$12 sps:$4 sm:$0xff]  }
 0x823   :  { %4588 = vmatprep.subr.bf16.mxu1 %v17132_v11  ;;  %v14981_v11 = vld [vmem:[#allocation16 + $0x80] ss:$12 sps:$4 sm:$0xff]  }
 0x824   :  { %14062 = vmatpush3.bf16.msra.mxu0 %v14977_v57  ;;  %v4105_v57 = vrot.slane %v4100_v7, %v16447_v19 }
 0x825   :  { %14063 = vmatprep.subr.bf16.mxu0 %v18664_v47 }
 0x826   :  { %4589 = vmatpush1.bf16.msra.mxu1 %v17130_v40  ;;  %v14980_v40 = vld [vmem:[#allocation16 + $0x68] ss:$12 sps:$4 sm:$0xff]  }
 0x827   :  { %4590 = vmatprep.subr.bf16.mxu1 %v17137_v51  ;;  %v14982_v51 = vld [vmem:[#allocation16 + $0x98] ss:$12 sps:$4 sm:$0xff]  }
 0x828   :  { %14064 = vmatpush3.bf16.msra.mxu0 %v14978_v21  ;;  %v3801_v21 = vld [vmem:[#allocation3 + $0x10] sm:$0x30] }
 0x829   :  { %14065 = vmatprep.subr.bf16.mxu0 %v18664_v47 }
 0x82a   :  { %4591 = vmatpush1.bf16.msra.mxu1 %v17140_v60  ;;  %v14983_v60 = vld [vmem:[#allocation16 + $0xb0] ss:$12 sps:$4 sm:$0xff]  }
 0x82b   :  { %4592 = vmatprep.subr.bf16.mxu1 %v17144_v22  ;;  %v3838_v22 = vld [vmem:[#allocation18] ss:$2 sm:$0x7] }
 0x82c   :  { %14066 = vmatpush3.bf16.msra.mxu0 %v14979_v33  ;;  %v3851_v28 = vrot.slane %v3838_v22, %v16455_v23  ;;  %v4109_v33 = vrot.slane %v4100_v7, %v16450_v20 }
 0x82d   :  { %14067 = vmatprep.subr.bf16.mxu0 %v18664_v47 }
 0x82e   :  { %4593 = vmatpush1.bf16.msra.mxu1 %v17147_v32  ;;  %v3843_v32 = vrot.slane %v3838_v22, %v16447_v19 }
 0x82f   :  { %4594 = vmatprep.subr.bf16.mxu1 %v17151_v29  ;;  %v3847_v29 = vrot.slane %v3838_v22, %v16450_v20 }
 0x830   :  { %14068 = vmatpush3.bf16.msra.mxu0 %v14980_v40 }
 0x831   :  { %14069 = vmatprep.subr.bf16.mxu0 %v18664_v47 }
 0x832   :  { %4595 = vmatpush1.bf16.msra.mxu1 %v17154_v17 }
 0x833   :  { %4596 = vmatprep.subr.bf16.mxu1 %v17158_v45 }
 0x834   :  { %14070 = vmatpush3.bf16.msra.mxu0 %v14981_v11 }
 0x835   :  { %14071 = vmatprep.subr.bf16.mxu0 %v18664_v47 }
 0x836   :  { %4597 = vmatpush1.bf16.msra.mxu1 %v17161_v3 }
 0x837   :  { %4598 = vmatprep.subr.bf16.mxu1 %v17165_v37 }
 0x838   :  { %14072 = vmatpush3.bf16.msra.mxu0 %v14982_v51 }
 0x839   :  { %14073 = vmatprep.subr.bf16.mxu0 %v18664_v47 }
 0x83a   :  { %4599 = vmatpush1.bf16.msra.mxu1 %v17168_v24 }
 0x83b   :  { %4846 = vmatprep.subr.bf16.mxu1 %v17173_v42 }
 0x83c   :  { %14074 = vmatpush3.bf16.msra.mxu0 %v14983_v60 }
 0x83d   :  { %14079 = vmatprep.subr.bf16.mxu0 %v18664_v47 }
 0x8cc   :  { %v4020_v17 = vpop.f32.mrb[72].mxu1  ;;  %v4061_v45 = vpop.f32.mrb[80].mxu0 }
 0x8cd   :  { %v4021_v3 = vadd.f32 %v4020_v17, %v3843_v32  ;;  %v4022_v37 = vpop.f32.mrb[73].mxu1  ;;  %v14037_v24 = vpop.f32.mrb[81].mxu0  ;;  %v4062_v54 = vadd.f32 %v4061_v45, %v3851_v28 }
 0x8ce   :  { %v4023_v42 = vadd.f32 %v4022_v37, %v3847_v29  ;;  %v4024_v16 = vpop.f32.mrb[74].mxu1  ;;  %v4064_v56 = vpop.f32.mrb[82].mxu0 }
 0x8cf   :  { %v4330_v12 = vrot.slane %v4021_v3, 4  ;;  %v4025_v46 = vpop.f32.mrb[75].mxu1  ;;  %v14038_v53 = vpop.f32.mrb[83].mxu0  ;;  %v4350_v61 = vrot.slane %v4062_v54, 4  ;;  %v14985_v54 = vld [vmem:[#allocation16 + $0xe0] ss:$12 sps:$4 sm:$0xff]  }
 0x8d0   :  { %v4340_v50 = vrot.slane %v4023_v42, 4  ;;  %v3802_v42 = vld [vmem:[#allocation3 + $0xa8] sm:$0xc] }
 0x8d1   :  { %v4332_v9 = vadd.f32 %v4330_v12, %v3799_v14  ;;  %v3803_v12 = vld [vmem:[#allocation3 + $0xb0] sm:$0xc] }
 0x8d2   :  { %v4342_v44 = vadd.f32 %v4340_v50, %v3800_v35 }
 0x8d3   :  { %v12760_v49 = vmul.f32 -1.442695, %v4332_v9 }
 0x8d4   :  { %v12761_v10 = vmul.f32 -1.442695, %v4342_v44 }
 0x8d5   :  { %15568 = vpow2.f32 %v12760_v49 }
 0x8d6   :  { %15570 = vpow2.f32 %v12761_v10  ;;  %v14984_v10 = vld [vmem:[#allocation16 + $0xc8] ss:$12 sps:$4 sm:$0xff]  }
 0x8df   :  { %v15569_v26 = vpop.eup %15568 }
 0x8e0   :  { %v15571_v34 = vpop.eup %15570  ;;  %v4336_v43 = vadd.f32 1.0, %v15569_v26 }
 0x8e1   :  { %v4346_v0 = vadd.f32 1.0, %v15571_v34 }
 0x8e2   :  { %15572 = vrcp.f32 %v4336_v43 }
 0x8e3   :  { %15574 = vrcp.f32 %v4346_v0 }
 0x8ec   :  { %v15573_v25 = vpop.eup %15572 }
 0x8ed   :  { %v15575_v8 = vpop.eup %15574  ;;  %v4352_v38 = vmul.f32 %v15573_v25, %v4350_v61  ;;  %v4113_v61 = vrot.slane %v4100_v7, %v16455_v23  ;;  %v14986_v25 = vld [vmem:[#allocation16 + $0xf8] ss:$12 sps:$4 sm:$0xff]  }
 0x8ee   :  { %v4360_v40 = vmul.f32 %v15575_v8, %v4358_v2  ;;  %v4355_v50 = vsub.f32 1.0, %v15575_v8  ;;  %v4391_v8 = vrot.slane %v17249_v15, 2 }
 0x8ef   :  { %v4353_v11 = vadd.f32 %v4352_v38, %v3801_v21 }
 0x8f0   :  { %v4282_v51 = vpop.f32.mrb[76].mxu1  ;;  %v4323_v60 = vpop.f32.mrb[84].mxu0 }
 0x8f1   :  { %15576 = vtanh.f32 %v4353_v11  ;;  %v4283_v22 = vadd.f32 %v4282_v51, %v4105_v57  ;;  %v4284_v32 = vpop.f32.mrb[77].mxu1  ;;  %v14057_v29 = vpop.f32.mrb[85].mxu0  ;;  %v3804_v57 = vld [vmem:[#allocation3 + $0xb8] sm:$0xc]  ;;  %v17339_v11 = vld [vmem:[#allocation16 + $0x18] ss:$12 sps:$4 sm:$0xff]  }
 0x8f2   :  { %v4285_v17 = vadd.f32 %v4284_v32, %v4109_v33  ;;  %v4286_v45 = vpop.f32.mrb[78].mxu1  ;;  %v4326_v3 = vpop.f32.mrb[86].mxu0  ;;  %v14995_v33 = vld [vmem:[#allocation16 + $0x8] ss:$12 sps:$4 sm:$0xff]   ;;  %v14999_v51 = vld [vmem:[#allocation16 + $0x20] ss:$12 sps:$4 sm:$0xff]  }
 0x8f3   :  { %v4363_v37 = vrot.slane %v4283_v22, 6  ;;  %v4287_v39 = vpop.f32.mrb[79].mxu1  ;;  %v14058_v24 = vpop.f32.mrb[87].mxu0  ;;  %v17345_v22 = vld [vmem:[#allocation16 + $0x34] ss:$12 sps:$4 sm:$0xff]  }
 0x8f4   :  { %v4373_v16 = vrot.slane %v4285_v17, 6  ;;  %v15003_v32 = vld [vmem:[#allocation16 + $0x38] ss:$12 sps:$4 sm:$0xff]   ;;  %v17353_v17 = vld [vmem:[#allocation16 + $0x48] ss:$12 sps:$4 sm:$0xff]  }
 0x8f5   :  { %v4365_v56 = vadd.f32 %v4363_v37, %v3802_v42  ;;  %v17350_v29 = vld [vmem:[#allocation16 + $0x4c] ss:$12 sps:$4 sm:$0xff]   ;;  %v15007_v45 = vld [vmem:[#allocation16 + $0x50] ss:$12 sps:$4 sm:$0xff]   ;;  %v15011_v39 = vld [vmem:[#allocation16 + $0x68] ss:$12 sps:$4 sm:$0xff]  }
 0x8f6   :  { %v4375_v46 = vadd.f32 %v4373_v16, %v3803_v12  ;;  %v17357_v3 = vld [vmem:[#allocation16 + $0x64] ss:$12 sps:$4 sm:$0xff]   ;;  %v17360_v37 = vld [vmem:[#allocation16 + $0x60] ss:$12 sps:$4 sm:$0xff]   ;;  %v17364_v24 = vld [vmem:[#allocation16 + $0x7c] ss:$12 sps:$4 sm:$0xff]  }
 0x8f7   :  { %v12762_v53 = vmul.f32 -1.442695, %v4365_v56  ;;  %v17367_v42 = vld [vmem:[#allocation16 + $0x78] ss:$12 sps:$4 sm:$0xff]   ;;  %v15015_v16 = vld [vmem:[#allocation16 + $0x80] ss:$12 sps:$4 sm:$0xff]  }
 0x8f8   :  { %v12763_v14 = vmul.f32 -1.442695, %v4375_v46  ;;  %v17371_v56 = vld [vmem:[#allocation16 + $0x94] ss:$12 sps:$4 sm:$0xff]   ;;  %v17374_v12 = vld [vmem:[#allocation16 + $0x90] ss:$12 sps:$4 sm:$0xff]  }
 0x8f9   :  { %15578 = vpow2.f32 %v12762_v53  ;;  %v15019_v46 = vld [vmem:[#allocation16 + $0x98] ss:$12 sps:$4 sm:$0xff]  }
 0x8fa   :  { %15580 = vpow2.f32 %v12763_v14  ;;  %v17378_v53 = vld [vmem:[#allocation16 + $0xac] ss:$12 sps:$4 sm:$0xff]   ;;  %v17381_v14 = vld [vmem:[#allocation16 + $0xa8] ss:$12 sps:$4 sm:$0xff]  }
 0x8fb   :  { %v15577_v9 = vpop.eup %15576 }
 0x8fc   :  { %v4356_v35 = vmul.f32 %v15577_v9, %v4355_v50  ;;  %v15023_v50 = vld [vmem:[#allocation16 + $0xb0] ss:$12 sps:$4 sm:$0xff]  }
 0x8fd   :  { %v17385_v9 = vld [vmem:[#allocation16 + $0xc4] ss:$12 sps:$4 sm:$0xff]  }
 0x8fe   :  { %v17289_v44 = vadd.f32 %v4360_v40, %v4356_v35  ;;  %v17336_v40 = vld [vmem:[#allocation16 + $0x1c] ss:$12 sps:$4 sm:$0xff]   ;;  %v4436_v35 = vld [vmem:[#allocation18] ss:$2 sm:$0x7] }
 0x900   :  { %4395 = vst [vmem:[#allocation4] sm:$0x30] %v17289_v44  ;;  %v4403_v49 = vpack.c.bf16 %v17289_v44, %v17289_v44 }
 0x902   :  { %v4454_v26 = vrot.slane %v4403_v49, 2  ;;  %v4441_v49 = vrot.slane %v4436_v35, %v16447_v19 }
 0x903   :  { %v15579_v34 = vpop.eup %15578 }
 0x904   :  { %v15581_v43 = vpop.eup %15580  ;;  %v4369_v0 = vadd.f32 1.0, %v15579_v34  ;;  %4617 = vmatmul.mubr.bf16.vlgmr.msra.gmra.mrb[80].mxu1 %v4454_v26  ;;  %14076 = vmatmul.mubr.bf16.vlgmr.msra.gmra.mrb[88].mxu0 %v4454_v26 }
 0x905   :  { %v4379_v28 = vadd.f32 1.0, %v15581_v43  ;;  %4847 = vmatpush1.bf16.msra.mxu1 %v17191_v1  ;;  %14080 = vmatpush3.bf16.msra.mxu0 %v14984_v10  ;;  %v4324_v1 = vadd.f32 %v4323_v60, %v4113_v61  ;;  %v17343_v60 = vld [vmem:[#allocation16 + $0x30] ss:$12 sps:$4 sm:$0xff]   ;;  %v4445_v10 = vrot.slane %v4436_v35, %v16450_v20 }
 0x906   :  { %15582 = vrcp.f32 %v4369_v0  ;;  %4848 = vmatprep.subr.bf16.mxu1 %v17193_v52  ;;  %14081 = vmatprep.subr.bf16.mxu0 %v18664_v47  ;;  %v14987_v52 = vld [vmem:[#allocation16 + $0x110] ss:$12 sps:$4 sm:$0xff]  }
 0x907   :  { %15584 = vrcp.f32 %v4379_v28  ;;  %4878 = vmatprep.mubr.bf16.mxu1 %v18663_v59  ;;  %14095 = vmatprep.mubr.msk.bf16.mxu0 %vm16124_vm12, %v18664_v47  ;;  %v4383_v7 = vrot.slane %v4324_v1, 6 }
 0x909   :  { %4849 = vmatpush1.bf16.msra.mxu1 %v17196_v18  ;;  %14082 = vmatpush3.bf16.msra.mxu0 %v14985_v54 }
 0x90a   :  { %4850 = vmatprep.subr.bf16.mxu1 %v17200_v13  ;;  %14083 = vmatprep.subr.bf16.mxu0 %v18664_v47  ;;  %v14988_v13 = vld [vmem:[#allocation16 + $0x128] ss:$12 sps:$4 sm:$0xff]  }
 0x90d   :  { %4851 = vmatpush1.bf16.msra.mxu1 %v17208_v63  ;;  %14084 = vmatpush3.bf16.msra.mxu0 %v14986_v25 }
 0x90e   :  { %4852 = vmatprep.subr.bf16.mxu1 %v17212_v48  ;;  %14085 = vmatprep.subr.bf16.mxu0 %v18664_v47  ;;  %v14989_v48 = vld [vmem:[#allocation16 + $0x140] ss:$12 sps:$4 sm:$0xff]  }
 0x910   :  { %v15583_v2 = vpop.eup %15582 }
 0x911   :  { %v15585_v18 = vpop.eup %15584  ;;  %v4385_v38 = vmul.f32 %v15583_v2, %v4383_v7  ;;  %4853 = vmatpush1.bf16.msra.mxu1 %v17215_v30  ;;  %14086 = vmatpush3.bf16.msra.mxu0 %v14987_v52  ;;  %v14990_v30 = vld [vmem:[#allocation16 + $0x158] ss:$12 sps:$4 sm:$0xff]   ;;  %v4397_v2 = vld [vmem:[#allocation3] sm:$0xc0] }
 0x912   :  { %4854 = vmatprep.subr.bf16.mxu1 %v17219_v62  ;;  %14087 = vmatprep.subr.bf16.mxu0 %v18664_v47  ;;  %v4393_v63 = vmul.f32 %v15585_v18, %v4391_v8  ;;  %v14991_v62 = vld [vmem:[#allocation16 + $0x170] ss:$12 sps:$4 sm:$0xff]  }
 0x913   :  { %v4386_v21 = vadd.f32 %v4385_v38, %v3804_v57  ;;  %v4398_v38 = vld [vmem:[#allocation3 + $0x8] sm:$0xc0] }
 0x915   :  { %15586 = vtanh.f32 %v4386_v21  ;;  %4855 = vmatpush1.bf16.msra.mxu1 %v17223_v31  ;;  %14088 = vmatpush3.bf16.msra.mxu0 %v14988_v13  ;;  %v4388_v31 = vsub.f32 1.0, %v15585_v18 }
 0x916   :  { %4856 = vmatprep.subr.bf16.mxu1 %v17227_v27  ;;  %14089 = vmatprep.subr.bf16.mxu0 %v18664_v47 }
 0x919   :  { %4857 = vmatpush1.bf16.msra.mxu1 %v17230_v4  ;;  %14090 = vmatpush3.bf16.msra.mxu0 %v14989_v48 }
 0x91a   :  { %4858 = vmatprep.subr.bf16.mxu1 %v17234_v6  ;;  %14091 = vmatprep.subr.bf16.mxu0 %v18664_v47 }
 0x91d   :  { %4859 = vmatpush1.bf16.msra.mxu1 %v17237_v36  ;;  %14092 = vmatpush3.bf16.msra.mxu0 %v14990_v30 }
 0x91e   :  { %4860 = vmatprep.subr.bf16.mxu1 %v17241_v55  ;;  %14093 = vmatprep.subr.bf16.mxu0 %v18664_v47  ;;  %v17330_v55 = vld [vmem:[#allocation16 + $0x4] ss:$12 sps:$4 sm:$0xff]  }
 0x91f   :  { %v15587_v27 = vpop.eup %15586 }
 0x920   :  { %v4389_v15 = vmul.f32 %v15587_v27, %v4388_v31  ;;  %v4449_v31 = vrot.slane %v4436_v35, %v16455_v23 }
 0x921   :  { %4861 = vmatpush1.bf16.msra.mxu1 %v17244_v5  ;;  %14094 = vmatpush3.bf16.msra.mxu0 %v14991_v62  ;;  %v17332_v5 = vld [vmem:[#allocation16] ss:$12 sps:$4 sm:$0xff]  }
 0x922   :  { %v17321_v4 = vadd.f32 %v4393_v63, %v4389_v15  ;;  %14099 = vmatprep.subr.bf16.mxu0 %v18664_v47  ;;  %5173 = vmatprep.subr.bf16.mxu1 %v17330_v55  ;;  %v17392_v15 = vld [vmem:[#allocation18 + $0x1] ss:$2 sm:$0x7] }
 0x924   :  { %4396 = vst [vmem:[#allocation4 + $0x38] sm:$0xc] %v17321_v4  ;;  %v4665_v6 = vpack.c.bf16 %v17321_v4, %v17321_v4 }
 0x926   :  { %v4716_v36 = vrot.slane %v4665_v6, 1 }
 0x928   :  { %4879 = vmatmul.mubr.bf16.vlgmr.msra.gmra.mrb[84].mxu1 %v4716_v36  ;;  %14096 = vmatmul.mubr.bf16.vlgmr.msra.gmra.mrb[92].mxu0 %v4716_v36 }
 0x929   :  { %5205 = vmatprep.mubr.bf16.mxu1 %v18663_v59  ;;  %14115 = vmatprep.mubr.msk.bf16.mxu0 %vm16124_vm12, %v18664_v47 }
 0x92a   :  { %5174 = vmatpush1.bf16.msra.mxu1 %v17332_v5  ;;  %14100 = vmatpush3.bf16.msra.mxu0 %v14995_v33  ;;  %v4956_v33 = vrot.slane %v17289_v44, 6 }
 0x92b   :  { %14101 = vmatprep.subr.bf16.mxu0 %v18664_v47  ;;  %5175 = vmatprep.subr.bf16.mxu1 %v17336_v40 }
 0x92e   :  { %5176 = vmatpush1.bf16.msra.mxu1 %v17339_v11  ;;  %14102 = vmatpush3.bf16.msra.mxu0 %v14999_v51 }
 0x92f   :  { %14103 = vmatprep.subr.bf16.mxu0 %v18664_v47  ;;  %5177 = vmatprep.subr.bf16.mxu1 %v17345_v22 }
 0x932   :  { %5178 = vmatpush1.bf16.msra.mxu1 %v17343_v60  ;;  %14104 = vmatpush3.bf16.msra.mxu0 %v15003_v32 }
 0x933   :  { %14105 = vmatprep.subr.bf16.mxu0 %v18664_v47  ;;  %5179 = vmatprep.subr.bf16.mxu1 %v17350_v29 }
 0x936   :  { %5180 = vmatpush1.bf16.msra.mxu1 %v17353_v17  ;;  %14106 = vmatpush3.bf16.msra.mxu0 %v15007_v45  ;;  %v4703_v45 = vrot.slane %v17392_v15, %v16447_v19 }
 0x937   :  { %14107 = vmatprep.subr.bf16.mxu0 %v18664_v47  ;;  %5181 = vmatprep.subr.bf16.mxu1 %v17357_v3 }
 0x93a   :  { %5182 = vmatpush1.bf16.msra.mxu1 %v17360_v37  ;;  %14108 = vmatpush3.bf16.msra.mxu0 %v15011_v39  ;;  %v4399_v39 = vld [vmem:[#allocation3 + $0x10] sm:$0xc0] }
 0x93b   :  { %14109 = vmatprep.subr.bf16.mxu0 %v18664_v47  ;;  %5183 = vmatprep.subr.bf16.mxu1 %v17364_v24 }
 0x93e   :  { %5184 = vmatpush1.bf16.msra.mxu1 %v17367_v42  ;;  %14110 = vmatpush3.bf16.msra.mxu0 %v15015_v16  ;;  %v4707_v16 = vrot.slane %v17392_v15, %v16450_v20 }
 0x93f   :  { %14111 = vmatprep.subr.bf16.mxu0 %v18664_v47  ;;  %5185 = vmatprep.subr.bf16.mxu1 %v17371_v56 }
 0x942   :  { %5186 = vmatpush1.bf16.msra.mxu1 %v17374_v12  ;;  %14112 = vmatpush3.bf16.msra.mxu0 %v15019_v46 }
 0x943   :  { %14113 = vmatprep.subr.bf16.mxu0 %v18664_v47  ;;  %5187 = vmatprep.subr.bf16.mxu1 %v17378_v53 }
 0x946   :  { %5188 = vmatpush1.bf16.msra.mxu1 %v17381_v14  ;;  %14114 = vmatpush3.bf16.msra.mxu0 %v15023_v50 }
 0x947   :  { %14119 = vmatprep.subr.bf16.mxu0 %v18664_v47  ;;  %5432 = vmatprep.subr.bf16.mxu1 %v17385_v9 }
 0x9d7   :  { %v4618_v26 = vpop.f32.mrb[80].mxu1  ;;  %v4659_v34 = vpop.f32.mrb[88].mxu0 }
 0x9d8   :  { %v4619_v43 = vadd.f32 %v4618_v26, %v4441_v49  ;;  %v4620_v0 = vpop.f32.mrb[81].mxu1  ;;  %v14077_v28 = vpop.f32.mrb[89].mxu0  ;;  %v4660_v27 = vadd.f32 %v4659_v34, %v4449_v31 }
 0x9d9   :  { %v4621_v54 = vadd.f32 %v4620_v0, %v4445_v10  ;;  %v4622_v61 = vpop.f32.mrb[82].mxu1  ;;  %v4662_v25 = vpop.f32.mrb[90].mxu0 }
 0x9da   :  { %v4928_v1 = vrot.slane %v4619_v43, 2  ;;  %v4623_v52 = vpop.f32.mrb[83].mxu1  ;;  %v14078_v7 = vpop.f32.mrb[91].mxu0  ;;  %v4948_v6 = vrot.slane %v4660_v27, 2  ;;  %v4400_v43 = vld [vmem:[#allocation3 + $0xa8] sm:$0x3] }
 0x9db   :  { %v4938_v8 = vrot.slane %v4621_v54, 2  ;;  %v4401_v61 = vld [vmem:[#allocation3 + $0xb0] sm:$0x3]  ;;  %v17406_v27 = vld [vmem:[#allocation16 + $0xdc] ss:$12 sps:$4 sm:$0xff]  }
 0x9dc   :  { %v4930_v18 = vadd.f32 %v4928_v1, %v4397_v2 }
 0x9dd   :  { %v4940_v13 = vadd.f32 %v4938_v8, %v4398_v38 }
 0x9de   :  { %v12812_v57 = vmul.f32 -1.442695, %v4930_v18 }
 0x9df   :  { %v12813_v63 = vmul.f32 -1.442695, %v4940_v13 }
 0x9e0   :  { %15588 = vpow2.f32 %v12812_v57 }
 0x9e1   :  { %15590 = vpow2.f32 %v12813_v63 }
 0x9ea   :  { %v15589_v21 = vpop.eup %15588 }
 0x9eb   :  { %v15591_v48 = vpop.eup %15590  ;;  %v4934_v30 = vadd.f32 1.0, %v15589_v21  ;;  %v17404_v21 = vld [vmem:[#allocation16 + $0xc0] ss:$12 sps:$4 sm:$0xff]  }
 0x9ec   :  { %v4944_v62 = vadd.f32 1.0, %v15591_v48  ;;  %v15027_v48 = vld [vmem:[#allocation16 + $0xc8] ss:$12 sps:$4 sm:$0xff]  }
 0x9ed   :  { %15592 = vrcp.f32 %v4934_v30 }
 0x9ee   :  { %15594 = vrcp.f32 %v4944_v62 }
 0x9f7   :  { %v15593_v36 = vpop.eup %15592 }
 0x9f8   :  { %v15595_v51 = vpop.eup %15594  ;;  %v4950_v32 = vmul.f32 %v15593_v36, %v4948_v6  ;;  %v17409_v36 = vld [vmem:[#allocation16 + $0xd8] ss:$12 sps:$4 sm:$0xff]  }
 0x9f9   :  { %v4958_v46 = vmul.f32 %v15595_v51, %v4956_v33  ;;  %v4953_v8 = vsub.f32 1.0, %v15595_v51  ;;  %v15031_v33 = vld [vmem:[#allocation16 + $0xe0] ss:$12 sps:$4 sm:$0xff]  }
 0x9fa   :  { %v4951_v50 = vadd.f32 %v4950_v32, %v4399_v39  ;;  %v17413_v51 = vld [vmem:[#allocation16 + $0xf4] ss:$12 sps:$4 sm:$0xff]   ;;  %v4711_v32 = vrot.slane %v17392_v15, %v16455_v23  ;;  %v15035_v39 = vld [vmem:[#allocation16 + $0xf8] ss:$12 sps:$4 sm:$0xff]  }
 0x9fb   :  { %v4880_v35 = vpop.f32.mrb[84].mxu1  ;;  %v4921_v49 = vpop.f32.mrb[92].mxu0 }
 0x9fc   :  { %15596 = vtanh.f32 %v4951_v50  ;;  %v4881_v10 = vadd.f32 %v4880_v35, %v4703_v45  ;;  %v4882_v26 = vpop.f32.mrb[85].mxu1  ;;  %v14097_v34 = vpop.f32.mrb[93].mxu0  ;;  %v17421_v45 = vld [vmem:[#allocation16 + $0xf0] ss:$12 sps:$4 sm:$0xff]   ;;  %v17428_v50 = vld [vmem:[#allocation16 + $0x108] ss:$12 sps:$4 sm:$0xff]  }
 0x9fd   :  { %v4883_v0 = vadd.f32 %v4882_v26, %v4707_v16  ;;  %v4884_v44 = vpop.f32.mrb[86].mxu1  ;;  %v4924_v28 = vpop.f32.mrb[94].mxu0  ;;  %v17425_v16 = vld [vmem:[#allocation16 + $0x10c] ss:$12 sps:$4 sm:$0xff]   ;;  %v15039_v35 = vld [vmem:[#allocation16 + $0x110] ss:$12 sps:$4 sm:$0xff]  }
 0x9fe   :  { %v4960_v54 = vadd.f32 %v4881_v10, %v4400_v43  ;;  %v4885_v25 = vpop.f32.mrb[87].mxu1  ;;  %v14098_v1 = vpop.f32.mrb[95].mxu0  ;;  %v17432_v10 = vld [vmem:[#allocation16 + $0x124] ss:$12 sps:$4 sm:$0xff]   ;;  %v4980_v26 = vrot.slane %v17321_v4, 2 }
 0x9ff   :  { %v4967_v52 = vadd.f32 %v4883_v0, %v4401_v61  ;;  %v4402_v0 = vld [vmem:[#allocation3 + $0xb8] sm:$0x3]  ;;  %v17440_v61 = vld [vmem:[#allocation16 + $0x13c] ss:$12 sps:$4 sm:$0xff]   ;;  %v17443_v4 = vld [vmem:[#allocation16 + $0x138] ss:$12 sps:$4 sm:$0xff]  }
 0xa00   :  { %v12814_v7 = vmul.f32 -1.442695, %v4960_v54  ;;  %v17436_v28 = vld [vmem:[#allocation16 + $0x120] ss:$12 sps:$4 sm:$0xff]   ;;  %v15043_v54 = vld [vmem:[#allocation16 + $0x128] ss:$12 sps:$4 sm:$0xff]  }
 0xa01   :  { %v12815_v2 = vmul.f32 -1.442695, %v4967_v52  ;;  %v15047_v25 = vld [vmem:[#allocation16 + $0x140] ss:$12 sps:$4 sm:$0xff]   ;;  %v17450_v52 = vld [vmem:[#allocation16 + $0x150] ss:$12 sps:$4 sm:$0xff]  }
 0xa02   :  { %15598 = vpow2.f32 %v12814_v7  ;;  %v17447_v1 = vld [vmem:[#allocation16 + $0x154] ss:$12 sps:$4 sm:$0xff]   ;;  %v15051_v7 = vld [vmem:[#allocation16 + $0x158] ss:$12 sps:$4 sm:$0xff]  }
 0xa03   :  { %15600 = vpow2.f32 %v12815_v2  ;;  %v17454_v2 = vld [vmem:[#allocation16 + $0x16c] ss:$12 sps:$4 sm:$0xff]  }
 0xa06   :  { %v15597_v18 = vpop.eup %15596 }
 0xa07   :  { %v4954_v38 = vmul.f32 %v15597_v18, %v4953_v8 }
 0xa09   :  { %v17399_v13 = vadd.f32 %v4958_v46, %v4954_v38  ;;  %v4922_v46 = vadd.f32 %v4921_v49, %v4711_v32  ;;  %v17457_v38 = vld [vmem:[#allocation16 + $0x168] ss:$12 sps:$4 sm:$0xff]   ;;  %v4987_v32 = vld [vmem:[#allocation3 + $0x38] sm:$0x3] }
 0xa0b   :  { %4984 = vst [vmem:[#allocation4] sm:$0xc0] %v17399_v13  ;;  %v4992_v57 = vpack.c.bf16 %v17399_v13, %v17399_v13 }
 0xa0c   :  { %v15599_v63 = vpop.eup %15598 }
 0xa0d   :  { %v15601_v30 = vpop.eup %15600  ;;  %v4964_v62 = vadd.f32 1.0, %v15599_v63  ;;  %v5043_v31 = vrot.slane %v4992_v57, 3  ;;  %v15055_v57 = vld [vmem:[#allocation16 + $0x170] ss:$12 sps:$4 sm:$0xff]  }
 0xa0e   :  { %v4971_v6 = vadd.f32 1.0, %v15601_v30 }
 0xa0f   :  { %15602 = vrcp.f32 %v4964_v62  ;;  %5206 = vmatmul.mubr.bf16.vlgmr.msra.gmra.mrb[88].mxu1 %v5043_v31  ;;  %14116 = vmatmul.mubr.bf16.vlgmr.msra.gmra.mrb[96].mxu0 %v5043_v31 }
 0xa10   :  { %15604 = vrcp.f32 %v4971_v6  ;;  %5433 = vmatpush1.bf16.msra.mxu1 %v17404_v21  ;;  %14120 = vmatpush3.bf16.msra.mxu0 %v15027_v48 }
 0xa11   :  { %5434 = vmatprep.subr.bf16.mxu1 %v17406_v27  ;;  %14121 = vmatprep.subr.bf16.mxu0 %v18664_v47 }
 0xa12   :  { %5464 = vmatprep.mubr.bf16.mxu1 %v18663_v59  ;;  %14135 = vmatprep.mubr.msk.bf16.mxu0 %vm16124_vm12, %v18664_v47 }
 0xa14   :  { %5435 = vmatpush1.bf16.msra.mxu1 %v17409_v36  ;;  %14122 = vmatpush3.bf16.msra.mxu0 %v15031_v33 }
 0xa15   :  { %5436 = vmatprep.subr.bf16.mxu1 %v17413_v51  ;;  %14123 = vmatprep.subr.bf16.mxu0 %v18664_v47 }
 0xa18   :  { %5437 = vmatpush1.bf16.msra.mxu1 %v17421_v45  ;;  %14124 = vmatpush3.bf16.msra.mxu0 %v15035_v39 }
 0xa19   :  { %v15603_v15 = vpop.eup %15602  ;;  %5438 = vmatprep.subr.bf16.mxu1 %v17425_v16  ;;  %14125 = vmatprep.subr.bf16.mxu0 %v18664_v47 }
 0xa1a   :  { %v15605_v34 = vpop.eup %15604  ;;  %v4974_v43 = vmul.f32 %v15603_v15, %v4922_v46 }
 0xa1b   :  { %v4982_v44 = vmul.f32 %v15605_v34, %v4980_v26  ;;  %v4977_v8 = vsub.f32 1.0, %v15605_v34 }
 0xa1c   :  { %v4975_v49 = vadd.f32 %v4974_v43, %v4402_v0  ;;  %5439 = vmatpush1.bf16.msra.mxu1 %v17428_v50  ;;  %14126 = vmatpush3.bf16.msra.mxu0 %v15039_v35 }
 0xa1d   :  { %5440 = vmatprep.subr.bf16.mxu1 %v17432_v10  ;;  %14127 = vmatprep.subr.bf16.mxu0 %v18664_v47 }
 0xa1e   :  { %15606 = vtanh.f32 %v4975_v49 }
 0xa20   :  { %5441 = vmatpush1.bf16.msra.mxu1 %v17436_v28  ;;  %14128 = vmatpush3.bf16.msra.mxu0 %v15043_v54  ;;  %v5287_v54 = vld [vmem:[#allocation18 + $0x1] ss:$2 sm:$0x7] }
 0xa21   :  { %5442 = vmatprep.subr.bf16.mxu1 %v17440_v61  ;;  %14129 = vmatprep.subr.bf16.mxu0 %v18664_v47 }
 0xa24   :  { %5443 = vmatpush1.bf16.msra.mxu1 %v17443_v4  ;;  %14130 = vmatpush3.bf16.msra.mxu0 %v15047_v25 }
 0xa25   :  { %5444 = vmatprep.subr.bf16.mxu1 %v17447_v1  ;;  %14131 = vmatprep.subr.bf16.mxu0 %v18664_v47 }
 0xa28   :  { %v15607_v18 = vpop.eup %15606  ;;  %5445 = vmatpush1.bf16.msra.mxu1 %v17450_v52  ;;  %14132 = vmatpush3.bf16.msra.mxu0 %v15051_v7  ;;  %v5292_v7 = vrot.slane %v5287_v54, %v16447_v19 }
 0xa29   :  { %5446 = vmatprep.subr.bf16.mxu1 %v17454_v2  ;;  %14133 = vmatprep.subr.bf16.mxu0 %v18664_v47  ;;  %v4978_v63 = vmul.f32 %v15607_v18, %v4977_v8  ;;  %v5296_v18 = vrot.slane %v5287_v54, %v16450_v20 }
 0xa2b   :  { %v17461_v48 = vadd.f32 %v4982_v44, %v4978_v63 }
 0xa2c   :  { %5447 = vmatpush1.bf16.msra.mxu1 %v17457_v38  ;;  %14134 = vmatpush3.bf16.msra.mxu0 %v15055_v57  ;;  %v5533_v57 = vrot.slane %v17399_v13, 6 }
 0xa2d   :  { %4985 = vst [vmem:[#allocation4 + $0x38] sm:$0x3] %v17461_v48  ;;  %v5254_v30 = vpack.c.bf16 %v17461_v48, %v17461_v48  ;;  %5756 = vmatprep.subr.bf16.mxu1 %v17330_v55  ;;  %14139 = vmatprep.subr.bf16.mxu0 %v18664_v47  ;;  %v15056_v55 = vld [vmem:[#allocation16 + $0x8] ss:$12 sps:$4 sm:$0xff]  }
 0xa2f   :  { %5465 = vmatmul.mubr.bf16.vlgmr.msra.gmra.mrb[92].mxu1 %v5254_v30  ;;  %14136 = vmatmul.mubr.bf16.vlgmr.msra.gmra.mrb[100].mxu0 %v5254_v30 }
 0xa30   :  { %5757 = vmatpush1.bf16.msra.mxu1 %v17332_v5  ;;  %5788 = vmatprep.mubr.bf16.mxu1 %v18663_v59  ;;  %v15057_v5 = vld [vmem:[#allocation16 + $0x20] ss:$12 sps:$4 sm:$0xff]  }
 0xa31   :  { %5758 = vmatprep.subr.bf16.mxu1 %v17336_v40  ;;  %14155 = vmatprep.mubr.msk.bf16.mxu0 %vm16124_vm12, %v18664_v47  ;;  %v15058_v40 = vld [vmem:[#allocation16 + $0x38] ss:$12 sps:$4 sm:$0xff]  }
 0xa32   :  { %14140 = vmatpush3.bf16.msra.mxu0 %v15056_v55  ;;  %v4988_v55 = vld [vmem:[#allocation3 + $0x40] sm:$0x3] }
 0xa33   :  { %14141 = vmatprep.subr.bf16.mxu0 %v18664_v47 }
 0xa34   :  { %5759 = vmatpush1.bf16.msra.mxu1 %v17339_v11  ;;  %v15059_v11 = vld [vmem:[#allocation16 + $0x50] ss:$12 sps:$4 sm:$0xff]  }
 0xa35   :  { %5760 = vmatprep.subr.bf16.mxu1 %v17345_v22  ;;  %v15061_v22 = vld [vmem:[#allocation16 + $0x80] ss:$12 sps:$4 sm:$0xff]  }
 0xa36   :  { %14142 = vmatpush3.bf16.msra.mxu0 %v15057_v5 }
 0xa37   :  { %14143 = vmatprep.subr.bf16.mxu0 %v18664_v47 }
 0xa38   :  { %5761 = vmatpush1.bf16.msra.mxu1 %v17343_v60  ;;  %v15060_v60 = vld [vmem:[#allocation16 + $0x68] ss:$12 sps:$4 sm:$0xff]  }
 0xa39   :  { %5762 = vmatprep.subr.bf16.mxu1 %v17350_v29  ;;  %v15062_v29 = vld [vmem:[#allocation16 + $0x98] ss:$12 sps:$4 sm:$0xff]  }
 0xa3a   :  { %14144 = vmatpush3.bf16.msra.mxu0 %v15058_v40 }
 0xa3b   :  { %14145 = vmatprep.subr.bf16.mxu0 %v18664_v47 }
 0xa3c   :  { %5763 = vmatpush1.bf16.msra.mxu1 %v17353_v17  ;;  %v15063_v17 = vld [vmem:[#allocation16 + $0xb0] ss:$12 sps:$4 sm:$0xff]  }
 0xa3d   :  { %5764 = vmatprep.subr.bf16.mxu1 %v17357_v3  ;;  %v5025_v3 = vld [vmem:[#allocation18] ss:$2 sm:$0x7] }
 0xa3e   :  { %14146 = vmatpush3.bf16.msra.mxu0 %v15059_v11  ;;  %v5038_v49 = vrot.slane %v5025_v3, %v16455_v23 }
 0xa3f   :  { %14147 = vmatprep.subr.bf16.mxu0 %v18664_v47 }
 0xa40   :  { %5765 = vmatpush1.bf16.msra.mxu1 %v17360_v37  ;;  %v5030_v37 = vrot.slane %v5025_v3, %v16447_v19 }
 0xa41   :  { %5766 = vmatprep.subr.bf16.mxu1 %v17364_v24  ;;  %v5034_v24 = vrot.slane %v5025_v3, %v16450_v20 }
 0xa42   :  { %14148 = vmatpush3.bf16.msra.mxu0 %v15060_v60 }
 0xa43   :  { %14149 = vmatprep.subr.bf16.mxu0 %v18664_v47 }
 0xa44   :  { %5767 = vmatpush1.bf16.msra.mxu1 %v17367_v42 }
 0xa45   :  { %5768 = vmatprep.subr.bf16.mxu1 %v17371_v56 }
 0xa46   :  { %14150 = vmatpush3.bf16.msra.mxu0 %v15061_v22 }
 0xa47   :  { %14151 = vmatprep.subr.bf16.mxu0 %v18664_v47 }
 0xa48   :  { %5769 = vmatpush1.bf16.msra.mxu1 %v17374_v12 }
 0xa49   :  { %5770 = vmatprep.subr.bf16.mxu1 %v17378_v53 }
 0xa4a   :  { %14152 = vmatpush3.bf16.msra.mxu0 %v15062_v29 }
 0xa4b   :  { %14153 = vmatprep.subr.bf16.mxu0 %v18664_v47 }
 0xa4c   :  { %5771 = vmatpush1.bf16.msra.mxu1 %v17381_v14 }
 0xa4d   :  { %6018 = vmatprep.subr.bf16.mxu1 %v17385_v9  ;;  %v4986_v9 = vld [vmem:[#allocation3 + $0x30] sm:$0x3] }
 0xa4e   :  { %14154 = vmatpush3.bf16.msra.mxu0 %v15063_v17 }
 0xa4f   :  { %14159 = vmatprep.subr.bf16.mxu0 %v18664_v47 }
 0xae2   :  { %v5207_v42 = vpop.f32.mrb[88].mxu1  ;;  %v5248_v56 = vpop.f32.mrb[96].mxu0 }
 0xae3   :  { %v5208_v12 = vadd.f32 %v5207_v42, %v5030_v37  ;;  %v5209_v53 = vpop.f32.mrb[89].mxu1  ;;  %v14117_v14 = vpop.f32.mrb[97].mxu0  ;;  %v5249_v25 = vadd.f32 %v5248_v56, %v5038_v49  ;;  %v5300_v49 = vrot.slane %v5287_v54, %v16455_v23 }
 0xae4   :  { %v5210_v62 = vadd.f32 %v5209_v53, %v5034_v24  ;;  %v5211_v31 = vpop.f32.mrb[90].mxu1  ;;  %v5251_v6 = vpop.f32.mrb[98].mxu0  ;;  %v4989_v53 = vld [vmem:[#allocation3 + $0x78] sm:$0xc0] }
 0xae5   :  { %v5513_v33 = vadd.f32 %v5208_v12, %v4986_v9  ;;  %v5212_v39 = vpop.f32.mrb[91].mxu1  ;;  %v14118_v46 = vpop.f32.mrb[99].mxu0  ;;  %v4990_v9 = vld [vmem:[#allocation3 + $0x80] sm:$0xc0] }
 0xae6   :  { %v5520_v35 = vadd.f32 %v5210_v62, %v4987_v32 }
 0xae7   :  { %v12864_v15 = vmul.f32 -1.442695, %v5513_v33 }
 0xae8   :  { %v12865_v26 = vmul.f32 -1.442695, %v5520_v35  ;;  %v15064_v35 = vld [vmem:[#allocation16 + $0xc8] ss:$12 sps:$4 sm:$0xff]  }
 0xae9   :  { %15608 = vpow2.f32 %v12864_v15 }
 0xaea   :  { %15610 = vpow2.f32 %v12865_v26 }
 0xaf3   :  { %v15609_v34 = vpop.eup %15608 }
 0xaf4   :  { %v15611_v43 = vpop.eup %15610  ;;  %v5517_v0 = vadd.f32 1.0, %v15609_v34 }
 0xaf5   :  { %v5524_v44 = vadd.f32 1.0, %v15611_v43 }
 0xaf6   :  { %15612 = vrcp.f32 %v5517_v0 }
 0xaf7   :  { %15614 = vrcp.f32 %v5524_v44  ;;  %v15065_v44 = vld [vmem:[#allocation16 + $0xe0] ss:$12 sps:$4 sm:$0xff]  }
 0xb00   :  { %v15613_v8 = vpop.eup %15612 }
 0xb01   :  { %v15615_v63 = vpop.eup %15614  ;;  %v5527_v30 = vmul.f32 %v15613_v8, %v5249_v25  ;;  %v15066_v25 = vld [vmem:[#allocation16 + $0xf8] ss:$12 sps:$4 sm:$0xff]   ;;  %v5566_v8 = vrot.slane %v17461_v48, 2 }
 0xb02   :  { %v5466_v5 = vpop.f32.mrb[92].mxu1  ;;  %v5507_v40 = vpop.f32.mrb[100].mxu0  ;;  %v5535_v11 = vmul.f32 %v15615_v63, %v5533_v57  ;;  %v5530_v33 = vsub.f32 1.0, %v15615_v63  ;;  %v4991_v57 = vld [vmem:[#allocation3 + $0x88] sm:$0xc0] }
 0xb03   :  { %v5528_v60 = vadd.f32 %v5527_v30, %v4988_v55  ;;  %v5467_v22 = vadd.f32 %v5466_v5, %v5292_v7  ;;  %v5468_v29 = vpop.f32.mrb[93].mxu1  ;;  %v14137_v17 = vpop.f32.mrb[101].mxu0  ;;  %v15075_v30 = vld [vmem:[#allocation16 + $0x8] ss:$12 sps:$4 sm:$0xff]   ;;  %v17552_v5 = vld [vmem:[#allocation16 + $0x18] ss:$12 sps:$4 sm:$0xff]  }
 0xb04   :  { %v5469_v3 = vadd.f32 %v5468_v29, %v5296_v18  ;;  %v5470_v37 = vpop.f32.mrb[94].mxu1  ;;  %v5510_v24 = vpop.f32.mrb[102].mxu0  ;;  %v17549_v55 = vld [vmem:[#allocation16 + $0x1c] ss:$12 sps:$4 sm:$0xff]   ;;  %v17563_v29 = vld [vmem:[#allocation16 + $0x4c] ss:$12 sps:$4 sm:$0xff]  }
 0xb05   :  { %15616 = vtanh.f32 %v5528_v60  ;;  %v5538_v42 = vrot.slane %v5467_v22, 2  ;;  %v5471_v56 = vpop.f32.mrb[95].mxu1  ;;  %v14138_v12 = vpop.f32.mrb[103].mxu0  ;;  %v17558_v60 = vld [vmem:[#allocation16 + $0x34] ss:$12 sps:$4 sm:$0xff]  }
 0xb06   :  { %v5548_v14 = vrot.slane %v5469_v3, 2  ;;  %v15083_v22 = vld [vmem:[#allocation16 + $0x38] ss:$12 sps:$4 sm:$0xff]   ;;  %v17566_v17 = vld [vmem:[#allocation16 + $0x48] ss:$12 sps:$4 sm:$0xff]  }
 0xb07   :  { %v5540_v13 = vadd.f32 %v5538_v42, %v4989_v53  ;;  %v15087_v3 = vld [vmem:[#allocation16 + $0x50] ss:$12 sps:$4 sm:$0xff]   ;;  %v17573_v24 = vld [vmem:[#allocation16 + $0x60] ss:$12 sps:$4 sm:$0xff]   ;;  %v15091_v42 = vld [vmem:[#allocation16 + $0x68] ss:$12 sps:$4 sm:$0xff]  }
 0xb08   :  { %v5550_v62 = vadd.f32 %v5548_v14, %v4990_v9  ;;  %v17570_v37 = vld [vmem:[#allocation16 + $0x64] ss:$12 sps:$4 sm:$0xff]   ;;  %v17577_v56 = vld [vmem:[#allocation16 + $0x7c] ss:$12 sps:$4 sm:$0xff]   ;;  %v15095_v53 = vld [vmem:[#allocation16 + $0x80] ss:$12 sps:$4 sm:$0xff]  }
 0xb09   :  { %v12866_v31 = vmul.f32 -1.442695, %v5540_v13  ;;  %v17580_v12 = vld [vmem:[#allocation16 + $0x78] ss:$12 sps:$4 sm:$0xff]   ;;  %v17584_v14 = vld [vmem:[#allocation16 + $0x94] ss:$12 sps:$4 sm:$0xff]  }
 0xb0a   :  { %v12867_v6 = vmul.f32 -1.442695, %v5550_v62  ;;  %v17587_v13 = vld [vmem:[#allocation16 + $0x90] ss:$12 sps:$4 sm:$0xff]   ;;  %v15099_v9 = vld [vmem:[#allocation16 + $0x98] ss:$12 sps:$4 sm:$0xff]  }
 0xb0b   :  { %15618 = vpow2.f32 %v12866_v31  ;;  %v17591_v62 = vld [vmem:[#allocation16 + $0xac] ss:$12 sps:$4 sm:$0xff]   ;;  %v17594_v31 = vld [vmem:[#allocation16 + $0xa8] ss:$12 sps:$4 sm:$0xff]  }
 0xb0c   :  { %15620 = vpow2.f32 %v12867_v6  ;;  %v15103_v6 = vld [vmem:[#allocation16 + $0xb0] ss:$12 sps:$4 sm:$0xff]  }
 0xb0f   :  { %v15617_v32 = vpop.eup %15616 }
 0xb10   :  { %v5531_v39 = vmul.f32 %v15617_v32, %v5530_v33  ;;  %v17599_v33 = vld [vmem:[#allocation16 + $0xc4] ss:$12 sps:$4 sm:$0xff]  }
 0xb11   :  { %v5611_v32 = vld [vmem:[#allocation18] ss:$2 sm:$0x7] }
 0xb12   :  { %v17502_v46 = vadd.f32 %v5535_v11, %v5531_v39  ;;  %v17556_v11 = vld [vmem:[#allocation16 + $0x30] ss:$12 sps:$4 sm:$0xff]   ;;  %v5616_v39 = vrot.slane %v5611_v32, %v16447_v19 }
 0xb14   :  { %5570 = vst [vmem:[#allocation4 + $0x10] sm:$0x3] %v17502_v46  ;;  %v5578_v15 = vpack.c.bf16 %v17502_v46, %v17502_v46 }
 0xb15   :  { %v15619_v26 = vpop.eup %15618 }
 0xb16   :  { %v15621_v34 = vpop.eup %15620  ;;  %v5544_v43 = vadd.f32 1.0, %v15619_v26  ;;  %5789 = vmatmul.mubr.bf16.vlgmr.msra.gmra.mrb[96].mxu1 %v5578_v15  ;;  %14156 = vmatmul.mubr.bf16.vlgmr.msra.gmra.mrb[104].mxu0 %v5578_v15 }
 0xb17   :  { %v5554_v0 = vadd.f32 1.0, %v15621_v34  ;;  %6019 = vmatpush1.bf16.msra.mxu1 %v17404_v21  ;;  %14160 = vmatpush3.bf16.msra.mxu0 %v15064_v35  ;;  %v5508_v21 = vadd.f32 %v5507_v40, %v5300_v49  ;;  %v15079_v40 = vld [vmem:[#allocation16 + $0x20] ss:$12 sps:$4 sm:$0xff]   ;;  %v5620_v35 = vrot.slane %v5611_v32, %v16450_v20 }
 0xb18   :  { %15622 = vrcp.f32 %v5544_v43  ;;  %6020 = vmatprep.subr.bf16.mxu1 %v17406_v27  ;;  %14161 = vmatprep.subr.bf16.mxu0 %v18664_v47  ;;  %v15067_v27 = vld [vmem:[#allocation16 + $0x110] ss:$12 sps:$4 sm:$0xff]  }
 0xb19   :  { %15624 = vrcp.f32 %v5554_v0  ;;  %6050 = vmatprep.mubr.bf16.mxu1 %v18663_v59  ;;  %14175 = vmatprep.mubr.msk.bf16.mxu0 %vm16124_vm12, %v18664_v47  ;;  %v5558_v54 = vrot.slane %v5508_v21, 2 }
 0xb1b   :  { %6021 = vmatpush1.bf16.msra.mxu1 %v17409_v36  ;;  %14162 = vmatpush3.bf16.msra.mxu0 %v15065_v44 }
 0xb1c   :  { %6022 = vmatprep.subr.bf16.mxu1 %v17413_v51  ;;  %14163 = vmatprep.subr.bf16.mxu0 %v18664_v47  ;;  %v15068_v51 = vld [vmem:[#allocation16 + $0x128] ss:$12 sps:$4 sm:$0xff]  }
 0xb1f   :  { %6023 = vmatpush1.bf16.msra.mxu1 %v17421_v45  ;;  %14164 = vmatpush3.bf16.msra.mxu0 %v15066_v25 }
 0xb20   :  { %6024 = vmatprep.subr.bf16.mxu1 %v17425_v16  ;;  %14165 = vmatprep.subr.bf16.mxu0 %v18664_v47  ;;  %v15069_v16 = vld [vmem:[#allocation16 + $0x140] ss:$12 sps:$4 sm:$0xff]  }
 0xb22   :  { %v15623_v7 = vpop.eup %15622 }
 0xb23   :  { %v15625_v36 = vpop.eup %15624  ;;  %v5560_v18 = vmul.f32 %v15623_v7, %v5558_v54  ;;  %6025 = vmatpush1.bf16.msra.mxu1 %v17428_v50  ;;  %14166 = vmatpush3.bf16.msra.mxu0 %v15067_v27  ;;  %v15070_v50 = vld [vmem:[#allocation16 + $0x158] ss:$12 sps:$4 sm:$0xff]   ;;  %v5572_v7 = vld [vmem:[#allocation3 + $0x30] sm:$0xc] }
 0xb24   :  { %6026 = vmatprep.subr.bf16.mxu1 %v17432_v10  ;;  %14167 = vmatprep.subr.bf16.mxu0 %v18664_v47  ;;  %v5568_v45 = vmul.f32 %v15625_v36, %v5566_v8  ;;  %v15071_v10 = vld [vmem:[#allocation16 + $0x170] ss:$12 sps:$4 sm:$0xff]  }
 0xb25   :  { %v5561_v63 = vadd.f32 %v5560_v18, %v4991_v57  ;;  %v5573_v18 = vld [vmem:[#allocation3 + $0x38] sm:$0xc] }
 0xb27   :  { %15626 = vtanh.f32 %v5561_v63  ;;  %6027 = vmatpush1.bf16.msra.mxu1 %v17436_v28  ;;  %14168 = vmatpush3.bf16.msra.mxu0 %v15068_v51  ;;  %v5563_v28 = vsub.f32 1.0, %v15625_v36 }
 0xb28   :  { %6028 = vmatprep.subr.bf16.mxu1 %v17440_v61  ;;  %14169 = vmatprep.subr.bf16.mxu0 %v18664_v47 }
 0xb2b   :  { %6029 = vmatpush1.bf16.msra.mxu1 %v17443_v4  ;;  %14170 = vmatpush3.bf16.msra.mxu0 %v15069_v16 }
 0xb2c   :  { %6030 = vmatprep.subr.bf16.mxu1 %v17447_v1  ;;  %14171 = vmatprep.subr.bf16.mxu0 %v18664_v47 }
 0xb2f   :  { %6031 = vmatpush1.bf16.msra.mxu1 %v17450_v52  ;;  %14172 = vmatpush3.bf16.msra.mxu0 %v15070_v50 }
 0xb30   :  { %6032 = vmatprep.subr.bf16.mxu1 %v17454_v2  ;;  %14173 = vmatprep.subr.bf16.mxu0 %v18664_v47  ;;  %v17543_v2 = vld [vmem:[#allocation16 + $0x4] ss:$12 sps:$4 sm:$0xff]  }
 0xb31   :  { %v15627_v61 = vpop.eup %15626 }
 0xb32   :  { %v5564_v48 = vmul.f32 %v15627_v61, %v5563_v28  ;;  %v5624_v28 = vrot.slane %v5611_v32, %v16455_v23 }
 0xb33   :  { %6033 = vmatpush1.bf16.msra.mxu1 %v17457_v38  ;;  %14174 = vmatpush3.bf16.msra.mxu0 %v15071_v10  ;;  %v17545_v38 = vld [vmem:[#allocation16] ss:$12 sps:$4 sm:$0xff]  }
 0xb34   :  { %v17534_v4 = vadd.f32 %v5568_v45, %v5564_v48  ;;  %14179 = vmatprep.subr.bf16.mxu0 %v18664_v47  ;;  %6354 = vmatprep.subr.bf16.mxu1 %v17543_v2  ;;  %v17605_v48 = vld [vmem:[#allocation18 + $0x1] ss:$2 sm:$0x7] }
 0xb36   :  { %5571 = vst [vmem:[#allocation4 + $0x28] sm:$0xc0] %v17534_v4  ;;  %v5837_v1 = vpack.c.bf16 %v17534_v4, %v17534_v4 }
 0xb38   :  { %v5888_v52 = vrot.slane %v5837_v1, 3 }
 0xb3a   :  { %6051 = vmatmul.mubr.bf16.vlgmr.msra.gmra.mrb[100].mxu1 %v5888_v52  ;;  %14176 = vmatmul.mubr.bf16.vlgmr.msra.gmra.mrb[108].mxu0 %v5888_v52 }
 0xb3b   :  { %6386 = vmatprep.mubr.bf16.mxu1 %v18663_v59  ;;  %14195 = vmatprep.mubr.msk.bf16.mxu0 %vm16124_vm12, %v18664_v47 }
 0xb3c   :  { %6355 = vmatpush1.bf16.msra.mxu1 %v17545_v38  ;;  %14180 = vmatpush3.bf16.msra.mxu0 %v15075_v30  ;;  %v6128_v30 = vrot.slane %v17502_v46, 6 }
 0xb3d   :  { %14181 = vmatprep.subr.bf16.mxu0 %v18664_v47  ;;  %6356 = vmatprep.subr.bf16.mxu1 %v17549_v55 }
 0xb40   :  { %6357 = vmatpush1.bf16.msra.mxu1 %v17552_v5  ;;  %14182 = vmatpush3.bf16.msra.mxu0 %v15079_v40 }
 0xb41   :  { %14183 = vmatprep.subr.bf16.mxu0 %v18664_v47  ;;  %6358 = vmatprep.subr.bf16.mxu1 %v17558_v60 }
 0xb44   :  { %6359 = vmatpush1.bf16.msra.mxu1 %v17556_v11  ;;  %14184 = vmatpush3.bf16.msra.mxu0 %v15083_v22 }
 0xb45   :  { %14185 = vmatprep.subr.bf16.mxu0 %v18664_v47  ;;  %6360 = vmatprep.subr.bf16.mxu1 %v17563_v29 }
 0xb48   :  { %6361 = vmatpush1.bf16.msra.mxu1 %v17566_v17  ;;  %14186 = vmatpush3.bf16.msra.mxu0 %v15087_v3  ;;  %v5875_v3 = vrot.slane %v17605_v48, %v16447_v19 }
 0xb49   :  { %14187 = vmatprep.subr.bf16.mxu0 %v18664_v47  ;;  %6362 = vmatprep.subr.bf16.mxu1 %v17570_v37 }
 0xb4c   :  { %6363 = vmatpush1.bf16.msra.mxu1 %v17573_v24  ;;  %14188 = vmatpush3.bf16.msra.mxu0 %v15091_v42  ;;  %v5574_v42 = vld [vmem:[#allocation3 + $0x40] sm:$0xc] }
 0xb4d   :  { %14189 = vmatprep.subr.bf16.mxu0 %v18664_v47  ;;  %6364 = vmatprep.subr.bf16.mxu1 %v17577_v56 }
 0xb50   :  { %6365 = vmatpush1.bf16.msra.mxu1 %v17580_v12  ;;  %14190 = vmatpush3.bf16.msra.mxu0 %v15095_v53  ;;  %v5879_v53 = vrot.slane %v17605_v48, %v16450_v20 }
 0xb51   :  { %14191 = vmatprep.subr.bf16.mxu0 %v18664_v47  ;;  %6366 = vmatprep.subr.bf16.mxu1 %v17584_v14 }
 0xb54   :  { %6367 = vmatpush1.bf16.msra.mxu1 %v17587_v13  ;;  %14192 = vmatpush3.bf16.msra.mxu0 %v15099_v9 }
 0xb55   :  { %14193 = vmatprep.subr.bf16.mxu0 %v18664_v47  ;;  %6368 = vmatprep.subr.bf16.mxu1 %v17591_v62 }
 0xb58   :  { %6369 = vmatpush1.bf16.msra.mxu1 %v17594_v31  ;;  %14194 = vmatpush3.bf16.msra.mxu0 %v15103_v6 }
 0xb59   :  { %14199 = vmatprep.subr.bf16.mxu0 %v18664_v47  ;;  %6616 = vmatprep.subr.bf16.mxu1 %v17599_v33 }
 0xbe9   :  { %v5790_v15 = vpop.f32.mrb[96].mxu1  ;;  %v5831_v26 = vpop.f32.mrb[104].mxu0 }
 0xbea   :  { %v5791_v34 = vadd.f32 %v5790_v15, %v5616_v39  ;;  %v5792_v43 = vpop.f32.mrb[97].mxu1  ;;  %v14157_v0 = vpop.f32.mrb[105].mxu0  ;;  %v5832_v61 = vadd.f32 %v5831_v26, %v5624_v28  ;;  %v17619_v28 = vld [vmem:[#allocation16 + $0xdc] ss:$12 sps:$4 sm:$0xff]  }
 0xbeb   :  { %v5793_v44 = vadd.f32 %v5792_v43, %v5620_v35  ;;  %v5794_v49 = vpop.f32.mrb[98].mxu1  ;;  %v5834_v25 = vpop.f32.mrb[106].mxu0 }
 0xbec   :  { %v6100_v21 = vrot.slane %v5791_v34, 6  ;;  %v5795_v27 = vpop.f32.mrb[99].mxu1  ;;  %v14158_v54 = vpop.f32.mrb[107].mxu0  ;;  %v6120_v1 = vrot.slane %v5832_v61, 6  ;;  %v5575_v25 = vld [vmem:[#allocation3 + $0x78] sm:$0x30] }
 0xbed   :  { %v6110_v8 = vrot.slane %v5793_v44, 6  ;;  %v5576_v54 = vld [vmem:[#allocation3 + $0x80] sm:$0x30] }
 0xbee   :  { %v6102_v36 = vadd.f32 %v6100_v21, %v5572_v7 }
 0xbef   :  { %v6112_v51 = vadd.f32 %v6110_v8, %v5573_v18 }
 0xbf0   :  { %v12916_v57 = vmul.f32 -1.442695, %v6102_v36 }
 0xbf1   :  { %v12917_v45 = vmul.f32 -1.442695, %v6112_v51 }
 0xbf2   :  { %15628 = vpow2.f32 %v12916_v57 }
 0xbf3   :  { %15630 = vpow2.f32 %v12917_v45 }
 0xbfc   :  { %v15629_v63 = vpop.eup %15628 }
 0xbfd   :  { %v15631_v16 = vpop.eup %15630  ;;  %v6106_v50 = vadd.f32 1.0, %v15629_v63 }
 0xbfe   :  { %v6116_v10 = vadd.f32 1.0, %v15631_v16  ;;  %v17617_v16 = vld [vmem:[#allocation16 + $0xc0] ss:$12 sps:$4 sm:$0xff]  }
 0xbff   :  { %15632 = vrcp.f32 %v6106_v50  ;;  %v15107_v50 = vld [vmem:[#allocation16 + $0xc8] ss:$12 sps:$4 sm:$0xff]  }
 0xc00   :  { %15634 = vrcp.f32 %v6116_v10 }
 0xc09   :  { %v15633_v52 = vpop.eup %15632 }
 0xc0a   :  { %v15635_v40 = vpop.eup %15634  ;;  %v6122_v22 = vmul.f32 %v15633_v52, %v6120_v1 }
 0xc0b   :  { %v6130_v9 = vmul.f32 %v15635_v40, %v6128_v30  ;;  %v6125_v18 = vsub.f32 1.0, %v15635_v40  ;;  %v17622_v40 = vld [vmem:[#allocation16 + $0xd8] ss:$12 sps:$4 sm:$0xff]  }
 0xc0c   :  { %v6123_v6 = vadd.f32 %v6122_v22, %v5574_v42  ;;  %v15111_v22 = vld [vmem:[#allocation16 + $0xe0] ss:$12 sps:$4 sm:$0xff]   ;;  %v5883_v42 = vrot.slane %v17605_v48, %v16455_v23  ;;  %v17641_v48 = vld [vmem:[#allocation16 + $0x108] ss:$12 sps:$4 sm:$0xff]  }
 0xc0d   :  { %v6052_v32 = vpop.f32.mrb[100].mxu1  ;;  %v6093_v39 = vpop.f32.mrb[108].mxu0 }
 0xc0e   :  { %15636 = vtanh.f32 %v6123_v6  ;;  %v6053_v35 = vadd.f32 %v6052_v32, %v5875_v3  ;;  %v6054_v15 = vpop.f32.mrb[101].mxu1  ;;  %v14177_v26 = vpop.f32.mrb[109].mxu0  ;;  %v17626_v3 = vld [vmem:[#allocation16 + $0xf4] ss:$12 sps:$4 sm:$0xff]   ;;  %v17638_v6 = vld [vmem:[#allocation16 + $0x10c] ss:$12 sps:$4 sm:$0xff]   ;;  %v6094_v32 = vadd.f32 %v6093_v39, %v5883_v42 }
 0xc0f   :  { %v6055_v34 = vadd.f32 %v6054_v15, %v5879_v53  ;;  %v6056_v43 = vpop.f32.mrb[102].mxu1  ;;  %v6096_v46 = vpop.f32.mrb[110].mxu0  ;;  %v17634_v53 = vld [vmem:[#allocation16 + $0xf0] ss:$12 sps:$4 sm:$0xff]   ;;  %v17649_v39 = vld [vmem:[#allocation16 + $0x120] ss:$12 sps:$4 sm:$0xff]  }
 0xc10   :  { %v6133_v0 = vrot.slane %v6053_v35, 4  ;;  %v6057_v44 = vpop.f32.mrb[103].mxu1  ;;  %v14178_v49 = vpop.f32.mrb[111].mxu0  ;;  %v15119_v35 = vld [vmem:[#allocation16 + $0x110] ss:$12 sps:$4 sm:$0xff]   ;;  %v6153_v26 = vrot.slane %v6094_v32, 4 }
 0xc11   :  { %v6143_v21 = vrot.slane %v6055_v34, 4  ;;  %v17645_v15 = vld [vmem:[#allocation16 + $0x124] ss:$12 sps:$4 sm:$0xff]   ;;  %v6161_v43 = vrot.slane %v17534_v4, 2  ;;  %v15123_v44 = vld [vmem:[#allocation16 + $0x128] ss:$12 sps:$4 sm:$0xff]  }
 0xc12   :  { %v6135_v27 = vadd.f32 %v6133_v0, %v5575_v25  ;;  %v5577_v49 = vld [vmem:[#allocation3 + $0x88] sm:$0x30]  ;;  %v17653_v25 = vld [vmem:[#allocation16 + $0x13c] ss:$12 sps:$4 sm:$0xff]   ;;  %v17656_v4 = vld [vmem:[#allocation16 + $0x138] ss:$12 sps:$4 sm:$0xff]  }
 0xc13   :  { %v6145_v7 = vadd.f32 %v6143_v21, %v5576_v54  ;;  %v15127_v54 = vld [vmem:[#allocation16 + $0x140] ss:$12 sps:$4 sm:$0xff]  }
 0xc14   :  { %v12918_v8 = vmul.f32 -1.442695, %v6135_v27 }
 0xc15   :  { %v12919_v36 = vmul.f32 -1.442695, %v6145_v7  ;;  %v17660_v7 = vld [vmem:[#allocation16 + $0x154] ss:$12 sps:$4 sm:$0xff]  }
 0xc16   :  { %15638 = vpow2.f32 %v12918_v8  ;;  %v17663_v8 = vld [vmem:[#allocation16 + $0x150] ss:$12 sps:$4 sm:$0xff]  }
 0xc17   :  { %15640 = vpow2.f32 %v12919_v36  ;;  %v15131_v36 = vld [vmem:[#allocation16 + $0x158] ss:$12 sps:$4 sm:$0xff]  }
 0xc18   :  { %v15637_v51 = vpop.eup %15636 }
 0xc19   :  { %v6126_v57 = vmul.f32 %v15637_v51, %v6125_v18  ;;  %v17667_v18 = vld [vmem:[#allocation16 + $0x16c] ss:$12 sps:$4 sm:$0xff]   ;;  %v17670_v51 = vld [vmem:[#allocation16 + $0x168] ss:$12 sps:$4 sm:$0xff]  }
 0xc1b   :  { %v17612_v45 = vadd.f32 %v6130_v9, %v6126_v57  ;;  %v15115_v9 = vld [vmem:[#allocation16 + $0xf8] ss:$12 sps:$4 sm:$0xff]   ;;  %v15135_v57 = vld [vmem:[#allocation16 + $0x170] ss:$12 sps:$4 sm:$0xff]  }
 0xc1d   :  { %6165 = vst [vmem:[#allocation4 + $0x10] sm:$0xc] %v17612_v45  ;;  %v6173_v63 = vpack.c.bf16 %v17612_v45, %v17612_v45 }
 0xc1f   :  { %v6224_v10 = vrot.slane %v6173_v63, 1 }
 0xc20   :  { %v15639_v61 = vpop.eup %15638 }
 0xc21   :  { %v15641_v1 = vpop.eup %15640  ;;  %v6139_v52 = vadd.f32 1.0, %v15639_v61  ;;  %6387 = vmatmul.mubr.bf16.vlgmr.msra.gmra.mrb[104].mxu1 %v6224_v10  ;;  %14196 = vmatmul.mubr.bf16.vlgmr.msra.gmra.mrb[112].mxu0 %v6224_v10 }
 0xc22   :  { %v6149_v30 = vadd.f32 1.0, %v15641_v1  ;;  %6617 = vmatpush1.bf16.msra.mxu1 %v17617_v16  ;;  %14200 = vmatpush3.bf16.msra.mxu0 %v15107_v50 }
 0xc23   :  { %15642 = vrcp.f32 %v6139_v52  ;;  %6618 = vmatprep.subr.bf16.mxu1 %v17619_v28  ;;  %14201 = vmatprep.subr.bf16.mxu0 %v18664_v47 }
 0xc24   :  { %15644 = vrcp.f32 %v6149_v30  ;;  %6648 = vmatprep.mubr.bf16.mxu1 %v18663_v59  ;;  %14215 = vmatprep.mubr.msk.bf16.mxu0 %vm16124_vm12, %v18664_v47 }
 0xc26   :  { %6619 = vmatpush1.bf16.msra.mxu1 %v17622_v40  ;;  %14202 = vmatpush3.bf16.msra.mxu0 %v15111_v22 }
 0xc27   :  { %6620 = vmatprep.subr.bf16.mxu1 %v17626_v3  ;;  %14203 = vmatprep.subr.bf16.mxu0 %v18664_v47 }
 0xc2a   :  { %6621 = vmatpush1.bf16.msra.mxu1 %v17634_v53  ;;  %14204 = vmatpush3.bf16.msra.mxu0 %v15115_v9 }
 0xc2b   :  { %6622 = vmatprep.subr.bf16.mxu1 %v17638_v6  ;;  %14205 = vmatprep.subr.bf16.mxu0 %v18664_v47 }
 0xc2d   :  { %v15643_v34 = vpop.eup %15642 }
 0xc2e   :  { %v15645_v46 = vpop.eup %15644  ;;  %v6155_v0 = vmul.f32 %v15643_v34, %v6153_v26  ;;  %6623 = vmatpush1.bf16.msra.mxu1 %v17641_v48  ;;  %14206 = vmatpush3.bf16.msra.mxu0 %v15119_v35  ;;  %v6167_v35 = vld [vmem:[#allocation3 + $0x30] sm:$0x30] }
 0xc2f   :  { %6624 = vmatprep.subr.bf16.mxu1 %v17645_v15  ;;  %14207 = vmatprep.subr.bf16.mxu0 %v18664_v47  ;;  %v6163_v21 = vmul.f32 %v15645_v46, %v6161_v43  ;;  %v6158_v63 = vsub.f32 1.0, %v15645_v46  ;;  %v6168_v43 = vld [vmem:[#allocation3 + $0x38] sm:$0x30] }
 0xc30   :  { %v6156_v27 = vadd.f32 %v6155_v0, %v5577_v49 }
 0xc32   :  { %15646 = vtanh.f32 %v6156_v27  ;;  %6625 = vmatpush1.bf16.msra.mxu1 %v17649_v39  ;;  %14208 = vmatpush3.bf16.msra.mxu0 %v15123_v44 }
 0xc33   :  { %6626 = vmatprep.subr.bf16.mxu1 %v17653_v25  ;;  %14209 = vmatprep.subr.bf16.mxu0 %v18664_v47 }
 0xc36   :  { %6627 = vmatpush1.bf16.msra.mxu1 %v17656_v4  ;;  %14210 = vmatpush3.bf16.msra.mxu0 %v15127_v54 }
 0xc37   :  { %6628 = vmatprep.subr.bf16.mxu1 %v17660_v7  ;;  %14211 = vmatprep.subr.bf16.mxu0 %v18664_v47 }
 0xc3a   :  { %6629 = vmatpush1.bf16.msra.mxu1 %v17663_v8  ;;  %14212 = vmatpush3.bf16.msra.mxu0 %v15131_v36 }
 0xc3b   :  { %6630 = vmatprep.subr.bf16.mxu1 %v17667_v18  ;;  %14213 = vmatprep.subr.bf16.mxu0 %v18664_v47 }
 0xc3c   :  { %v15647_v50 = vpop.eup %15646 }
 0xc3d   :  { %v6159_v10 = vmul.f32 %v15647_v50, %v6158_v63  ;;  %v6468_v63 = vld [vmem:[#allocation18 + $0x1] ss:$2 sm:$0x7] }
 0xc3e   :  { %6631 = vmatpush1.bf16.msra.mxu1 %v17670_v51  ;;  %14214 = vmatpush3.bf16.msra.mxu0 %v15135_v57 }
 0xc3f   :  { %v17675_v61 = vadd.f32 %v6163_v21, %v6159_v10  ;;  %6952 = vmatprep.subr.bf16.mxu1 %v17543_v2  ;;  %14219 = vmatprep.subr.bf16.mxu0 %v18664_v47  ;;  %v15136_v2 = vld [vmem:[#allocation16 + $0x8] ss:$12 sps:$4 sm:$0xff]  }
 0xc41   :  { %6166 = vst [vmem:[#allocation4 + $0x28] sm:$0x30] %v17675_v61  ;;  %v6435_v1 = vpack.c.bf16 %v17675_v61, %v17675_v61 }
 0xc43   :  { %v6486_v52 = vrot.slane %v6435_v1, 2  ;;  %v6726_v1 = vrot.slane %v17612_v45, 6 }
 0xc45   :  { %6649 = vmatmul.mubr.bf16.vlgmr.msra.gmra.mrb[108].mxu1 %v6486_v52  ;;  %14216 = vmatmul.mubr.bf16.vlgmr.msra.gmra.mrb[116].mxu0 %v6486_v52 }
 0xc46   :  { %6953 = vmatpush1.bf16.msra.mxu1 %v17545_v38  ;;  %6984 = vmatprep.mubr.bf16.mxu1 %v18663_v59  ;;  %v15137_v38 = vld [vmem:[#allocation16 + $0x20] ss:$12 sps:$4 sm:$0xff]  }
 0xc47   :  { %6954 = vmatprep.subr.bf16.mxu1 %v17549_v55  ;;  %14235 = vmatprep.mubr.msk.bf16.mxu0 %vm16124_vm12, %v18664_v47  ;;  %v15138_v55 = vld [vmem:[#allocation16 + $0x38] ss:$12 sps:$4 sm:$0xff]  }
 0xc48   :  { %14220 = vmatpush3.bf16.msra.mxu0 %v15136_v2 }
 0xc49   :  { %14221 = vmatprep.subr.bf16.mxu0 %v18664_v47 }
 0xc4a   :  { %6955 = vmatpush1.bf16.msra.mxu1 %v17552_v5  ;;  %v15139_v5 = vld [vmem:[#allocation16 + $0x50] ss:$12 sps:$4 sm:$0xff]  }
 0xc4b   :  { %6956 = vmatprep.subr.bf16.mxu1 %v17558_v60  ;;  %v15141_v60 = vld [vmem:[#allocation16 + $0x80] ss:$12 sps:$4 sm:$0xff]  }
 0xc4c   :  { %14222 = vmatpush3.bf16.msra.mxu0 %v15137_v38  ;;  %v6473_v38 = vrot.slane %v6468_v63, %v16447_v19 }
 0xc4d   :  { %14223 = vmatprep.subr.bf16.mxu0 %v18664_v47 }
 0xc4e   :  { %6957 = vmatpush1.bf16.msra.mxu1 %v17556_v11  ;;  %v15140_v11 = vld [vmem:[#allocation16 + $0x68] ss:$12 sps:$4 sm:$0xff]  }
 0xc4f   :  { %6958 = vmatprep.subr.bf16.mxu1 %v17563_v29  ;;  %v15142_v29 = vld [vmem:[#allocation16 + $0x98] ss:$12 sps:$4 sm:$0xff]  }
 0xc50   :  { %14224 = vmatpush3.bf16.msra.mxu0 %v15138_v55  ;;  %v6169_v55 = vld [vmem:[#allocation3 + $0x40] sm:$0x30] }
 0xc51   :  { %14225 = vmatprep.subr.bf16.mxu0 %v18664_v47 }
 0xc52   :  { %6959 = vmatpush1.bf16.msra.mxu1 %v17566_v17  ;;  %v15143_v17 = vld [vmem:[#allocation16 + $0xb0] ss:$12 sps:$4 sm:$0xff]  }
 0xc53   :  { %6960 = vmatprep.subr.bf16.mxu1 %v17570_v37  ;;  %v6206_v37 = vld [vmem:[#allocation18] ss:$2 sm:$0x7] }
 0xc54   :  { %14226 = vmatpush3.bf16.msra.mxu0 %v15139_v5  ;;  %v6219_v36 = vrot.slane %v6206_v37, %v16455_v23  ;;  %v6477_v5 = vrot.slane %v6468_v63, %v16450_v20 }
 0xc55   :  { %14227 = vmatprep.subr.bf16.mxu0 %v18664_v47 }
 0xc56   :  { %6961 = vmatpush1.bf16.msra.mxu1 %v17573_v24  ;;  %v6211_v24 = vrot.slane %v6206_v37, %v16447_v19 }
 0xc57   :  { %6962 = vmatprep.subr.bf16.mxu1 %v17577_v56  ;;  %v6215_v56 = vrot.slane %v6206_v37, %v16450_v20 }
 0xc58   :  { %14228 = vmatpush3.bf16.msra.mxu0 %v15140_v11 }
 0xc59   :  { %14229 = vmatprep.subr.bf16.mxu0 %v18664_v47 }
 0xc5a   :  { %6963 = vmatpush1.bf16.msra.mxu1 %v17580_v12 }
 0xc5b   :  { %6964 = vmatprep.subr.bf16.mxu1 %v17584_v14 }
 0xc5c   :  { %14230 = vmatpush3.bf16.msra.mxu0 %v15141_v60 }
 0xc5d   :  { %14231 = vmatprep.subr.bf16.mxu0 %v18664_v47 }
 0xc5e   :  { %6965 = vmatpush1.bf16.msra.mxu1 %v17587_v13 }
 0xc5f   :  { %6966 = vmatprep.subr.bf16.mxu1 %v17591_v62 }
 0xc60   :  { %14232 = vmatpush3.bf16.msra.mxu0 %v15142_v29 }
 0xc61   :  { %14233 = vmatprep.subr.bf16.mxu0 %v18664_v47 }
 0xc62   :  { %6967 = vmatpush1.bf16.msra.mxu1 %v17594_v31 }
 0xc63   :  { %7214 = vmatprep.subr.bf16.mxu1 %v17599_v33 }
 0xc64   :  { %14234 = vmatpush3.bf16.msra.mxu0 %v15143_v17 }
 0xc65   :  { %14239 = vmatprep.subr.bf16.mxu0 %v18664_v47 }
 0xcf4   :  { %v6388_v12 = vpop.f32.mrb[104].mxu1  ;;  %v6429_v14 = vpop.f32.mrb[112].mxu0 }
 0xcf5   :  { %v6389_v13 = vadd.f32 %v6388_v12, %v6211_v24  ;;  %v6390_v62 = vpop.f32.mrb[105].mxu1  ;;  %v14197_v31 = vpop.f32.mrb[113].mxu0  ;;  %v6430_v57 = vadd.f32 %v6429_v14, %v6219_v36 }
 0xcf6   :  { %v6391_v33 = vadd.f32 %v6390_v62, %v6215_v56  ;;  %v6392_v30 = vpop.f32.mrb[106].mxu1  ;;  %v6432_v22 = vpop.f32.mrb[114].mxu0 }
 0xcf7   :  { %v6698_v42 = vrot.slane %v6389_v13, 4  ;;  %v6393_v9 = vpop.f32.mrb[107].mxu1  ;;  %v14198_v32 = vpop.f32.mrb[115].mxu0  ;;  %v6718_v50 = vrot.slane %v6430_v57, 4  ;;  %v15145_v57 = vld [vmem:[#allocation16 + $0xe0] ss:$12 sps:$4 sm:$0xff]  }
 0xcf8   :  { %v6708_v26 = vrot.slane %v6391_v33, 4  ;;  %v6170_v33 = vld [vmem:[#allocation3 + $0x78] sm:$0xc] }
 0xcf9   :  { %v6700_v34 = vadd.f32 %v6698_v42, %v6167_v35  ;;  %v6171_v42 = vld [vmem:[#allocation3 + $0x80] sm:$0xc] }
 0xcfa   :  { %v6710_v46 = vadd.f32 %v6708_v26, %v6168_v43 }
 0xcfb   :  { %v12968_v0 = vmul.f32 -1.442695, %v6700_v34 }
 0xcfc   :  { %v12969_v44 = vmul.f32 -1.442695, %v6710_v46 }
 0xcfd   :  { %15648 = vpow2.f32 %v12968_v0 }
 0xcfe   :  { %15650 = vpow2.f32 %v12969_v44  ;;  %v15144_v44 = vld [vmem:[#allocation16 + $0xc8] ss:$12 sps:$4 sm:$0xff]  }
 0xd07   :  { %v15649_v49 = vpop.eup %15648 }
 0xd08   :  { %v15651_v21 = vpop.eup %15650  ;;  %v6704_v27 = vadd.f32 1.0, %v15649_v49 }
 0xd09   :  { %v6714_v54 = vadd.f32 1.0, %v15651_v21 }
 0xd0a   :  { %15652 = vrcp.f32 %v6704_v27 }
 0xd0b   :  { %15654 = vrcp.f32 %v6714_v54 }
 0xd14   :  { %v15653_v10 = vpop.eup %15652 }
 0xd15   :  { %v15655_v52 = vpop.eup %15654  ;;  %v6720_v2 = vmul.f32 %v15653_v10, %v6718_v50  ;;  %v6481_v50 = vrot.slane %v6468_v63, %v16455_v23  ;;  %v15146_v10 = vld [vmem:[#allocation16 + $0xf8] ss:$12 sps:$4 sm:$0xff]  }
 0xd16   :  { %v6728_v11 = vmul.f32 %v15655_v52, %v6726_v1  ;;  %v6723_v26 = vsub.f32 1.0, %v15655_v52  ;;  %v6759_v52 = vrot.slane %v17675_v61, 2 }
 0xd17   :  { %v6721_v60 = vadd.f32 %v6720_v2, %v6169_v55 }
 0xd18   :  { %v6650_v29 = vpop.f32.mrb[108].mxu1  ;;  %v6691_v17 = vpop.f32.mrb[116].mxu0 }
 0xd19   :  { %15656 = vtanh.f32 %v6721_v60  ;;  %v6651_v37 = vadd.f32 %v6650_v29, %v6473_v38  ;;  %v6652_v24 = vpop.f32.mrb[109].mxu1  ;;  %v14217_v56 = vpop.f32.mrb[117].mxu0  ;;  %v6172_v38 = vld [vmem:[#allocation3 + $0x88] sm:$0xc]  ;;  %v17765_v60 = vld [vmem:[#allocation16 + $0x18] ss:$12 sps:$4 sm:$0xff]  }
 0xd1a   :  { %v6653_v12 = vadd.f32 %v6652_v24, %v6477_v5  ;;  %v6654_v14 = vpop.f32.mrb[110].mxu1  ;;  %v6694_v13 = vpop.f32.mrb[118].mxu0  ;;  %v15155_v5 = vld [vmem:[#allocation16 + $0x8] ss:$12 sps:$4 sm:$0xff]   ;;  %v15159_v29 = vld [vmem:[#allocation16 + $0x20] ss:$12 sps:$4 sm:$0xff]  }
 0xd1b   :  { %v6731_v62 = vrot.slane %v6651_v37, 6  ;;  %v6655_v45 = vpop.f32.mrb[111].mxu1  ;;  %v14218_v31 = vpop.f32.mrb[119].mxu0  ;;  %v17771_v37 = vld [vmem:[#allocation16 + $0x34] ss:$12 sps:$4 sm:$0xff]  }
 0xd1c   :  { %v6741_v30 = vrot.slane %v6653_v12, 6  ;;  %v15163_v24 = vld [vmem:[#allocation16 + $0x38] ss:$12 sps:$4 sm:$0xff]   ;;  %v17779_v12 = vld [vmem:[#allocation16 + $0x48] ss:$12 sps:$4 sm:$0xff]  }
 0xd1d   :  { %v6733_v22 = vadd.f32 %v6731_v62, %v6170_v33  ;;  %v17776_v56 = vld [vmem:[#allocation16 + $0x4c] ss:$12 sps:$4 sm:$0xff]   ;;  %v15167_v14 = vld [vmem:[#allocation16 + $0x50] ss:$12 sps:$4 sm:$0xff]   ;;  %v15171_v45 = vld [vmem:[#allocation16 + $0x68] ss:$12 sps:$4 sm:$0xff]  }
 0xd1e   :  { %v6743_v9 = vadd.f32 %v6741_v30, %v6171_v42  ;;  %v17783_v13 = vld [vmem:[#allocation16 + $0x64] ss:$12 sps:$4 sm:$0xff]   ;;  %v17786_v62 = vld [vmem:[#allocation16 + $0x60] ss:$12 sps:$4 sm:$0xff]   ;;  %v17790_v31 = vld [vmem:[#allocation16 + $0x7c] ss:$12 sps:$4 sm:$0xff]  }
 0xd1f   :  { %v12970_v32 = vmul.f32 -1.442695, %v6733_v22  ;;  %v17793_v33 = vld [vmem:[#allocation16 + $0x78] ss:$12 sps:$4 sm:$0xff]   ;;  %v15175_v30 = vld [vmem:[#allocation16 + $0x80] ss:$12 sps:$4 sm:$0xff]  }
 0xd20   :  { %v12971_v35 = vmul.f32 -1.442695, %v6743_v9  ;;  %v17797_v22 = vld [vmem:[#allocation16 + $0x94] ss:$12 sps:$4 sm:$0xff]   ;;  %v17800_v42 = vld [vmem:[#allocation16 + $0x90] ss:$12 sps:$4 sm:$0xff]  }
 0xd21   :  { %15658 = vpow2.f32 %v12970_v32  ;;  %v15179_v9 = vld [vmem:[#allocation16 + $0x98] ss:$12 sps:$4 sm:$0xff]  }
 0xd22   :  { %15660 = vpow2.f32 %v12971_v35  ;;  %v17804_v32 = vld [vmem:[#allocation16 + $0xac] ss:$12 sps:$4 sm:$0xff]   ;;  %v17807_v35 = vld [vmem:[#allocation16 + $0xa8] ss:$12 sps:$4 sm:$0xff]  }
 0xd23   :  { %v15657_v34 = vpop.eup %15656 }
 0xd24   :  { %v6724_v43 = vmul.f32 %v15657_v34, %v6723_v26  ;;  %v15183_v26 = vld [vmem:[#allocation16 + $0xb0] ss:$12 sps:$4 sm:$0xff]  }
 0xd25   :  { %v17811_v34 = vld [vmem:[#allocation16 + $0xc4] ss:$12 sps:$4 sm:$0xff]  }
 0xd26   :  { %v17715_v46 = vadd.f32 %v6728_v11, %v6724_v43  ;;  %v17762_v11 = vld [vmem:[#allocation16 + $0x1c] ss:$12 sps:$4 sm:$0xff]   ;;  %v6804_v43 = vld [vmem:[#allocation18] ss:$2 sm:$0x7] }
 0xd28   :  { %6763 = vst [vmem:[#allocation4 + $0x10] sm:$0x30] %v17715_v46  ;;  %v6771_v0 = vpack.c.bf16 %v17715_v46, %v17715_v46 }
 0xd2a   :  { %v6822_v49 = vrot.slane %v6771_v0, 2  ;;  %v6809_v0 = vrot.slane %v6804_v43, %v16447_v19 }
 0xd2b   :  { %v15659_v21 = vpop.eup %15658 }
 0xd2c   :  { %v15661_v27 = vpop.eup %15660  ;;  %v6737_v54 = vadd.f32 1.0, %v15659_v21  ;;  %6985 = vmatmul.mubr.bf16.vlgmr.msra.gmra.mrb[112].mxu1 %v6822_v49  ;;  %14236 = vmatmul.mubr.bf16.vlgmr.msra.gmra.mrb[120].mxu0 %v6822_v49 }
 0xd2d   :  { %v6747_v36 = vadd.f32 1.0, %v15661_v27  ;;  %7215 = vmatpush1.bf16.msra.mxu1 %v17617_v16  ;;  %14240 = vmatpush3.bf16.msra.mxu0 %v15144_v44  ;;  %v6692_v16 = vadd.f32 %v6691_v17, %v6481_v50  ;;  %v17769_v17 = vld [vmem:[#allocation16 + $0x30] ss:$12 sps:$4 sm:$0xff]   ;;  %v6813_v44 = vrot.slane %v6804_v43, %v16450_v20 }
 0xd2e   :  { %15662 = vrcp.f32 %v6737_v54  ;;  %7216 = vmatprep.subr.bf16.mxu1 %v17619_v28  ;;  %14241 = vmatprep.subr.bf16.mxu0 %v18664_v47  ;;  %v15147_v28 = vld [vmem:[#allocation16 + $0x110] ss:$12 sps:$4 sm:$0xff]  }
 0xd2f   :  { %15664 = vrcp.f32 %v6747_v36  ;;  %7246 = vmatprep.mubr.bf16.mxu1 %v18663_v59  ;;  %14255 = vmatprep.mubr.msk.bf16.mxu0 %vm16124_vm12, %v18664_v47  ;;  %v6751_v63 = vrot.slane %v6692_v16, 6 }
 0xd31   :  { %7217 = vmatpush1.bf16.msra.mxu1 %v17622_v40  ;;  %14242 = vmatpush3.bf16.msra.mxu0 %v15145_v57 }
 0xd32   :  { %7218 = vmatprep.subr.bf16.mxu1 %v17626_v3  ;;  %14243 = vmatprep.subr.bf16.mxu0 %v18664_v47  ;;  %v15148_v3 = vld [vmem:[#allocation16 + $0x128] ss:$12 sps:$4 sm:$0xff]  }
 0xd35   :  { %7219 = vmatpush1.bf16.msra.mxu1 %v17634_v53  ;;  %14244 = vmatpush3.bf16.msra.mxu0 %v15146_v10 }
 0xd36   :  { %7220 = vmatprep.subr.bf16.mxu1 %v17638_v6  ;;  %14245 = vmatprep.subr.bf16.mxu0 %v18664_v47  ;;  %v15149_v6 = vld [vmem:[#allocation16 + $0x140] ss:$12 sps:$4 sm:$0xff]  }
 0xd38   :  { %v15663_v1 = vpop.eup %15662 }
 0xd39   :  { %v15665_v40 = vpop.eup %15664  ;;  %v6753_v2 = vmul.f32 %v15663_v1, %v6751_v63  ;;  %7221 = vmatpush1.bf16.msra.mxu1 %v17641_v48  ;;  %14246 = vmatpush3.bf16.msra.mxu0 %v15147_v28  ;;  %v15150_v48 = vld [vmem:[#allocation16 + $0x158] ss:$12 sps:$4 sm:$0xff]   ;;  %v6765_v1 = vld [vmem:[#allocation3 + $0x30] sm:$0xc0] }
 0xd3a   :  { %7222 = vmatprep.subr.bf16.mxu1 %v17645_v15  ;;  %14247 = vmatprep.subr.bf16.mxu0 %v18664_v47  ;;  %v6761_v53 = vmul.f32 %v15665_v40, %v6759_v52  ;;  %v15151_v15 = vld [vmem:[#allocation16 + $0x170] ss:$12 sps:$4 sm:$0xff]  }
 0xd3b   :  { %v6754_v55 = vadd.f32 %v6753_v2, %v6172_v38  ;;  %v6766_v2 = vld [vmem:[#allocation3 + $0x38] sm:$0xc0] }
 0xd3d   :  { %15666 = vtanh.f32 %v6754_v55  ;;  %7223 = vmatpush1.bf16.msra.mxu1 %v17649_v39  ;;  %14248 = vmatpush3.bf16.msra.mxu0 %v15148_v3  ;;  %v6756_v39 = vsub.f32 1.0, %v15665_v40 }
 0xd3e   :  { %7224 = vmatprep.subr.bf16.mxu1 %v17653_v25  ;;  %14249 = vmatprep.subr.bf16.mxu0 %v18664_v47 }
 0xd41   :  { %7225 = vmatpush1.bf16.msra.mxu1 %v17656_v4  ;;  %14250 = vmatpush3.bf16.msra.mxu0 %v15149_v6 }
 0xd42   :  { %7226 = vmatprep.subr.bf16.mxu1 %v17660_v7  ;;  %14251 = vmatprep.subr.bf16.mxu0 %v18664_v47 }
 0xd45   :  { %7227 = vmatpush1.bf16.msra.mxu1 %v17663_v8  ;;  %14252 = vmatpush3.bf16.msra.mxu0 %v15150_v48 }
 0xd46   :  { %7228 = vmatprep.subr.bf16.mxu1 %v17667_v18  ;;  %14253 = vmatprep.subr.bf16.mxu0 %v18664_v47  ;;  %v17756_v18 = vld [vmem:[#allocation16 + $0x4] ss:$12 sps:$4 sm:$0xff]  }
 0xd47   :  { %v15667_v25 = vpop.eup %15666 }
 0xd48   :  { %v6757_v61 = vmul.f32 %v15667_v25, %v6756_v39  ;;  %v6817_v39 = vrot.slane %v6804_v43, %v16455_v23 }
 0xd49   :  { %7229 = vmatpush1.bf16.msra.mxu1 %v17670_v51  ;;  %14254 = vmatpush3.bf16.msra.mxu0 %v15151_v15  ;;  %v17758_v51 = vld [vmem:[#allocation16] ss:$12 sps:$4 sm:$0xff]  }
 0xd4a   :  { %v17747_v4 = vadd.f32 %v6761_v53, %v6757_v61  ;;  %14259 = vmatprep.subr.bf16.mxu0 %v18664_v47  ;;  %7541 = vmatprep.subr.bf16.mxu1 %v17756_v18  ;;  %v17818_v61 = vld [vmem:[#allocation18 + $0x1] ss:$2 sm:$0x7] }
 0xd4c   :  { %6764 = vst [vmem:[#allocation4 + $0x28] sm:$0xc] %v17747_v4  ;;  %v7033_v7 = vpack.c.bf16 %v17747_v4, %v17747_v4 }
 0xd4e   :  { %v7084_v8 = vrot.slane %v7033_v7, 1 }
 0xd50   :  { %7247 = vmatmul.mubr.bf16.vlgmr.msra.gmra.mrb[116].mxu1 %v7084_v8  ;;  %14256 = vmatmul.mubr.bf16.vlgmr.msra.gmra.mrb[124].mxu0 %v7084_v8 }
 0xd51   :  { %7573 = vmatprep.mubr.bf16.mxu1 %v18663_v59  ;;  %14275 = vmatprep.mubr.msk.bf16.mxu0 %vm16124_vm12, %v18664_v47 }
 0xd52   :  { %7542 = vmatpush1.bf16.msra.mxu1 %v17758_v51  ;;  %14260 = vmatpush3.bf16.msra.mxu0 %v15155_v5  ;;  %v7324_v5 = vrot.slane %v17715_v46, 6 }
 0xd53   :  { %14261 = vmatprep.subr.bf16.mxu0 %v18664_v47  ;;  %7543 = vmatprep.subr.bf16.mxu1 %v17762_v11 }
 0xd56   :  { %7544 = vmatpush1.bf16.msra.mxu1 %v17765_v60  ;;  %14262 = vmatpush3.bf16.msra.mxu0 %v15159_v29 }
 0xd57   :  { %14263 = vmatprep.subr.bf16.mxu0 %v18664_v47  ;;  %7545 = vmatprep.subr.bf16.mxu1 %v17771_v37 }
 0xd5a   :  { %7546 = vmatpush1.bf16.msra.mxu1 %v17769_v17  ;;  %14264 = vmatpush3.bf16.msra.mxu0 %v15163_v24 }
 0xd5b   :  { %14265 = vmatprep.subr.bf16.mxu0 %v18664_v47  ;;  %7547 = vmatprep.subr.bf16.mxu1 %v17776_v56 }
 0xd5e   :  { %7548 = vmatpush1.bf16.msra.mxu1 %v17779_v12  ;;  %14266 = vmatpush3.bf16.msra.mxu0 %v15167_v14  ;;  %v7071_v14 = vrot.slane %v17818_v61, %v16447_v19 }
 0xd5f   :  { %14267 = vmatprep.subr.bf16.mxu0 %v18664_v47  ;;  %7549 = vmatprep.subr.bf16.mxu1 %v17783_v13 }
 0xd62   :  { %7550 = vmatpush1.bf16.msra.mxu1 %v17786_v62  ;;  %14268 = vmatpush3.bf16.msra.mxu0 %v15171_v45  ;;  %v6767_v45 = vld [vmem:[#allocation3 + $0x40] sm:$0xc0] }
 0xd63   :  { %14269 = vmatprep.subr.bf16.mxu0 %v18664_v47  ;;  %7551 = vmatprep.subr.bf16.mxu1 %v17790_v31 }
 0xd66   :  { %7552 = vmatpush1.bf16.msra.mxu1 %v17793_v33  ;;  %14270 = vmatpush3.bf16.msra.mxu0 %v15175_v30  ;;  %v7075_v30 = vrot.slane %v17818_v61, %v16450_v20 }
 0xd67   :  { %14271 = vmatprep.subr.bf16.mxu0 %v18664_v47  ;;  %7553 = vmatprep.subr.bf16.mxu1 %v17797_v22 }
 0xd6a   :  { %7554 = vmatpush1.bf16.msra.mxu1 %v17800_v42  ;;  %14272 = vmatpush3.bf16.msra.mxu0 %v15179_v9 }
 0xd6b   :  { %14273 = vmatprep.subr.bf16.mxu0 %v18664_v47  ;;  %7555 = vmatprep.subr.bf16.mxu1 %v17804_v32 }
 0xd6e   :  { %7556 = vmatpush1.bf16.msra.mxu1 %v17807_v35  ;;  %14274 = vmatpush3.bf16.msra.mxu0 %v15183_v26 }
 0xd6f   :  { %14279 = vmatprep.subr.bf16.mxu0 %v18664_v47  ;;  %7800 = vmatprep.subr.bf16.mxu1 %v17811_v34 }
 0xdff   :  { %v6986_v49 = vpop.f32.mrb[112].mxu1  ;;  %v7027_v21 = vpop.f32.mrb[120].mxu0 }
 0xe00   :  { %v6987_v27 = vadd.f32 %v6986_v49, %v6809_v0  ;;  %v6988_v54 = vpop.f32.mrb[113].mxu1  ;;  %v14237_v36 = vpop.f32.mrb[121].mxu0  ;;  %v7028_v25 = vadd.f32 %v7027_v21, %v6817_v39 }
 0xe01   :  { %v6989_v57 = vadd.f32 %v6988_v54, %v6813_v44  ;;  %v6990_v50 = vpop.f32.mrb[114].mxu1  ;;  %v7030_v10 = vpop.f32.mrb[122].mxu0 }
 0xe02   :  { %v7296_v16 = vrot.slane %v6987_v27, 2  ;;  %v6991_v28 = vpop.f32.mrb[115].mxu1  ;;  %v14238_v63 = vpop.f32.mrb[123].mxu0  ;;  %v7316_v7 = vrot.slane %v7028_v25, 2  ;;  %v6768_v27 = vld [vmem:[#allocation3 + $0x78] sm:$0x3] }
 0xe03   :  { %v7306_v52 = vrot.slane %v6989_v57, 2  ;;  %v6769_v50 = vld [vmem:[#allocation3 + $0x80] sm:$0x3]  ;;  %v17832_v25 = vld [vmem:[#allocation16 + $0xdc] ss:$12 sps:$4 sm:$0xff]  }
 0xe04   :  { %v7298_v40 = vadd.f32 %v7296_v16, %v6765_v1 }
 0xe05   :  { %v7308_v3 = vadd.f32 %v7306_v52, %v6766_v2 }
 0xe06   :  { %v13020_v38 = vmul.f32 -1.442695, %v7298_v40 }
 0xe07   :  { %v13021_v53 = vmul.f32 -1.442695, %v7308_v3 }
 0xe08   :  { %15668 = vpow2.f32 %v13020_v38 }
 0xe09   :  { %15670 = vpow2.f32 %v13021_v53 }
 0xe12   :  { %v15669_v55 = vpop.eup %15668 }
 0xe13   :  { %v15671_v6 = vpop.eup %15670  ;;  %v7302_v48 = vadd.f32 1.0, %v15669_v55  ;;  %v17830_v55 = vld [vmem:[#allocation16 + $0xc0] ss:$12 sps:$4 sm:$0xff]  }
 0xe14   :  { %v7312_v15 = vadd.f32 1.0, %v15671_v6  ;;  %v15187_v6 = vld [vmem:[#allocation16 + $0xc8] ss:$12 sps:$4 sm:$0xff]  }
 0xe15   :  { %15672 = vrcp.f32 %v7302_v48 }
 0xe16   :  { %15674 = vrcp.f32 %v7312_v15 }
 0xe1f   :  { %v15673_v8 = vpop.eup %15672 }
 0xe20   :  { %v15675_v29 = vpop.eup %15674  ;;  %v7318_v24 = vmul.f32 %v15673_v8, %v7316_v7  ;;  %v17835_v8 = vld [vmem:[#allocation16 + $0xd8] ss:$12 sps:$4 sm:$0xff]  }
 0xe21   :  { %v7326_v9 = vmul.f32 %v15675_v29, %v7324_v5  ;;  %v7321_v52 = vsub.f32 1.0, %v15675_v29  ;;  %v15191_v5 = vld [vmem:[#allocation16 + $0xe0] ss:$12 sps:$4 sm:$0xff]  }
 0xe22   :  { %v7319_v26 = vadd.f32 %v7318_v24, %v6767_v45  ;;  %v17839_v29 = vld [vmem:[#allocation16 + $0xf4] ss:$12 sps:$4 sm:$0xff]   ;;  %v7079_v24 = vrot.slane %v17818_v61, %v16455_v23  ;;  %v15195_v45 = vld [vmem:[#allocation16 + $0xf8] ss:$12 sps:$4 sm:$0xff]  }
 0xe23   :  { %v7248_v43 = vpop.f32.mrb[116].mxu1  ;;  %v7289_v0 = vpop.f32.mrb[124].mxu0 }
 0xe24   :  { %15676 = vtanh.f32 %v7319_v26  ;;  %v7249_v44 = vadd.f32 %v7248_v43, %v7071_v14  ;;  %v7250_v49 = vpop.f32.mrb[117].mxu1  ;;  %v14257_v21 = vpop.f32.mrb[125].mxu0  ;;  %v17847_v14 = vld [vmem:[#allocation16 + $0xf0] ss:$12 sps:$4 sm:$0xff]   ;;  %v17854_v26 = vld [vmem:[#allocation16 + $0x108] ss:$12 sps:$4 sm:$0xff]  }
 0xe25   :  { %v7251_v54 = vadd.f32 %v7250_v49, %v7075_v30  ;;  %v7252_v46 = vpop.f32.mrb[118].mxu1  ;;  %v7292_v36 = vpop.f32.mrb[126].mxu0  ;;  %v17851_v30 = vld [vmem:[#allocation16 + $0x10c] ss:$12 sps:$4 sm:$0xff]   ;;  %v15199_v43 = vld [vmem:[#allocation16 + $0x110] ss:$12 sps:$4 sm:$0xff]  }
 0xe26   :  { %v7328_v57 = vadd.f32 %v7249_v44, %v6768_v27  ;;  %v7253_v10 = vpop.f32.mrb[119].mxu1  ;;  %v14258_v16 = vpop.f32.mrb[127].mxu0  ;;  %v17858_v44 = vld [vmem:[#allocation16 + $0x124] ss:$12 sps:$4 sm:$0xff]   ;;  %v7348_v49 = vrot.slane %v17747_v4, 2 }
 0xe27   :  { %v7335_v28 = vadd.f32 %v7251_v54, %v6769_v50  ;;  %v6770_v54 = vld [vmem:[#allocation3 + $0x88] sm:$0x3]  ;;  %v17862_v36 = vld [vmem:[#allocation16 + $0x120] ss:$12 sps:$4 sm:$0xff]   ;;  %v17869_v4 = vld [vmem:[#allocation16 + $0x138] ss:$12 sps:$4 sm:$0xff]  }
 0xe28   :  { %v13022_v63 = vmul.f32 -1.442695, %v7328_v57  ;;  %v15203_v57 = vld [vmem:[#allocation16 + $0x128] ss:$12 sps:$4 sm:$0xff]   ;;  %v15207_v10 = vld [vmem:[#allocation16 + $0x140] ss:$12 sps:$4 sm:$0xff]  }
 0xe29   :  { %v13023_v1 = vmul.f32 -1.442695, %v7335_v28  ;;  %v17866_v50 = vld [vmem:[#allocation16 + $0x13c] ss:$12 sps:$4 sm:$0xff]   ;;  %v17873_v16 = vld [vmem:[#allocation16 + $0x154] ss:$12 sps:$4 sm:$0xff]  }
 0xe2a   :  { %15678 = vpow2.f32 %v13022_v63  ;;  %v17876_v28 = vld [vmem:[#allocation16 + $0x150] ss:$12 sps:$4 sm:$0xff]   ;;  %v15211_v63 = vld [vmem:[#allocation16 + $0x158] ss:$12 sps:$4 sm:$0xff]  }
 0xe2b   :  { %15680 = vpow2.f32 %v13023_v1  ;;  %v17880_v1 = vld [vmem:[#allocation16 + $0x16c] ss:$12 sps:$4 sm:$0xff]  }
 0xe2e   :  { %v15677_v40 = vpop.eup %15676 }
 0xe2f   :  { %v7322_v2 = vmul.f32 %v15677_v40, %v7321_v52 }
 0xe31   :  { %v17825_v3 = vadd.f32 %v7326_v9, %v7322_v2  ;;  %v7290_v9 = vadd.f32 %v7289_v0, %v7079_v24  ;;  %v17883_v2 = vld [vmem:[#allocation16 + $0x168] ss:$12 sps:$4 sm:$0xff]   ;;  %v7355_v24 = vld [vmem:[#allocation3 + $0x68] sm:$0x3] }
 0xe33   :  { %7352 = vst [vmem:[#allocation4 + $0x10] sm:$0xc0] %v17825_v3  ;;  %v7360_v38 = vpack.c.bf16 %v17825_v3, %v17825_v3 }
 0xe34   :  { %v15679_v53 = vpop.eup %15678 }
 0xe35   :  { %v15681_v48 = vpop.eup %15680  ;;  %v7332_v15 = vadd.f32 1.0, %v15679_v53  ;;  %v7411_v39 = vrot.slane %v7360_v38, 3  ;;  %v15215_v38 = vld [vmem:[#allocation16 + $0x170] ss:$12 sps:$4 sm:$0xff]  }
 0xe36   :  { %v7339_v7 = vadd.f32 1.0, %v15681_v48 }
 0xe37   :  { %15682 = vrcp.f32 %v7332_v15  ;;  %7574 = vmatmul.mubr.bf16.vlgmr.msra.gmra.mrb[120].mxu1 %v7411_v39  ;;  %14276 = vmatmul.mubr.bf16.vlgmr.msra.gmra.mrb[128].mxu0 %v7411_v39 }
 0xe38   :  { %15684 = vrcp.f32 %v7339_v7  ;;  %7801 = vmatpush1.bf16.msra.mxu1 %v17830_v55  ;;  %14280 = vmatpush3.bf16.msra.mxu0 %v15187_v6 }
 0xe39   :  { %7802 = vmatprep.subr.bf16.mxu1 %v17832_v25  ;;  %14281 = vmatprep.subr.bf16.mxu0 %v18664_v47 }
 0xe3a   :  { %7832 = vmatprep.mubr.bf16.mxu1 %v18663_v59  ;;  %14295 = vmatprep.mubr.msk.bf16.mxu0 %vm16124_vm12, %v18664_v47 }
 0xe3c   :  { %7803 = vmatpush1.bf16.msra.mxu1 %v17835_v8  ;;  %14282 = vmatpush3.bf16.msra.mxu0 %v15191_v5 }
 0xe3d   :  { %7804 = vmatprep.subr.bf16.mxu1 %v17839_v29  ;;  %14283 = vmatprep.subr.bf16.mxu0 %v18664_v47 }
 0xe40   :  { %7805 = vmatpush1.bf16.msra.mxu1 %v17847_v14  ;;  %14284 = vmatpush3.bf16.msra.mxu0 %v15195_v45 }
 0xe41   :  { %v15683_v61 = vpop.eup %15682  ;;  %7806 = vmatprep.subr.bf16.mxu1 %v17851_v30  ;;  %14285 = vmatprep.subr.bf16.mxu0 %v18664_v47 }
 0xe42   :  { %v15685_v21 = vpop.eup %15684  ;;  %v7342_v27 = vmul.f32 %v15683_v61, %v7290_v9 }
 0xe43   :  { %v7350_v46 = vmul.f32 %v15685_v21, %v7348_v49  ;;  %v7345_v52 = vsub.f32 1.0, %v15685_v21 }
 0xe44   :  { %v7343_v0 = vadd.f32 %v7342_v27, %v6770_v54  ;;  %7807 = vmatpush1.bf16.msra.mxu1 %v17854_v26  ;;  %14286 = vmatpush3.bf16.msra.mxu0 %v15199_v43 }
 0xe45   :  { %7808 = vmatprep.subr.bf16.mxu1 %v17858_v44  ;;  %14287 = vmatprep.subr.bf16.mxu0 %v18664_v47 }
 0xe46   :  { %15686 = vtanh.f32 %v7343_v0 }
 0xe48   :  { %7809 = vmatpush1.bf16.msra.mxu1 %v17862_v36  ;;  %14288 = vmatpush3.bf16.msra.mxu0 %v15203_v57  ;;  %v7655_v57 = vld [vmem:[#allocation18 + $0x1] ss:$2 sm:$0x7] }
 0xe49   :  { %7810 = vmatprep.subr.bf16.mxu1 %v17866_v50  ;;  %14289 = vmatprep.subr.bf16.mxu0 %v18664_v47 }
 0xe4c   :  { %7811 = vmatpush1.bf16.msra.mxu1 %v17869_v4  ;;  %14290 = vmatpush3.bf16.msra.mxu0 %v15207_v10 }
 0xe4d   :  { %7812 = vmatprep.subr.bf16.mxu1 %v17873_v16  ;;  %14291 = vmatprep.subr.bf16.mxu0 %v18664_v47 }
 0xe50   :  { %v15687_v40 = vpop.eup %15686  ;;  %7813 = vmatpush1.bf16.msra.mxu1 %v17876_v28  ;;  %14292 = vmatpush3.bf16.msra.mxu0 %v15211_v63  ;;  %v7660_v63 = vrot.slane %v7655_v57, %v16447_v19 }
 0xe51   :  { %7814 = vmatprep.subr.bf16.mxu1 %v17880_v1  ;;  %14293 = vmatprep.subr.bf16.mxu0 %v18664_v47  ;;  %v7346_v53 = vmul.f32 %v15687_v40, %v7345_v52  ;;  %v7664_v40 = vrot.slane %v7655_v57, %v16450_v20 }
 0xe53   :  { %v17887_v6 = vadd.f32 %v7350_v46, %v7346_v53 }
 0xe54   :  { %7815 = vmatpush1.bf16.msra.mxu1 %v17883_v2  ;;  %14294 = vmatpush3.bf16.msra.mxu0 %v15215_v38  ;;  %v7901_v38 = vrot.slane %v17825_v3, 6 }
 0xe55   :  { %7353 = vst [vmem:[#allocation4 + $0x28] sm:$0x3] %v17887_v6  ;;  %v7622_v48 = vpack.c.bf16 %v17887_v6, %v17887_v6  ;;  %8124 = vmatprep.subr.bf16.mxu1 %v17756_v18  ;;  %14299 = vmatprep.subr.bf16.mxu0 %v18664_v47  ;;  %v15216_v18 = vld [vmem:[#allocation16 + $0x8] ss:$12 sps:$4 sm:$0xff]  }
 0xe57   :  { %7833 = vmatmul.mubr.bf16.vlgmr.msra.gmra.mrb[124].mxu1 %v7622_v48  ;;  %14296 = vmatmul.mubr.bf16.vlgmr.msra.gmra.mrb[132].mxu0 %v7622_v48 }
 0xe58   :  { %8125 = vmatpush1.bf16.msra.mxu1 %v17758_v51  ;;  %8156 = vmatprep.mubr.bf16.mxu1 %v18663_v59  ;;  %v15217_v51 = vld [vmem:[#allocation16 + $0x20] ss:$12 sps:$4 sm:$0xff]  }
 0xe59   :  { %8126 = vmatprep.subr.bf16.mxu1 %v17762_v11  ;;  %14315 = vmatprep.mubr.msk.bf16.mxu0 %vm16124_vm12, %v18664_v47  ;;  %v15218_v11 = vld [vmem:[#allocation16 + $0x38] ss:$12 sps:$4 sm:$0xff]  }
 0xe5a   :  { %14300 = vmatpush3.bf16.msra.mxu0 %v15216_v18  ;;  %v7356_v18 = vld [vmem:[#allocation3 + $0x70] sm:$0x3] }
 0xe5b   :  { %14301 = vmatprep.subr.bf16.mxu0 %v18664_v47 }
 0xe5c   :  { %8127 = vmatpush1.bf16.msra.mxu1 %v17765_v60  ;;  %v15219_v60 = vld [vmem:[#allocation16 + $0x50] ss:$12 sps:$4 sm:$0xff]  }
 0xe5d   :  { %8128 = vmatprep.subr.bf16.mxu1 %v17771_v37  ;;  %v15221_v37 = vld [vmem:[#allocation16 + $0x80] ss:$12 sps:$4 sm:$0xff]  }
 0xe5e   :  { %14302 = vmatpush3.bf16.msra.mxu0 %v15217_v51 }
 0xe5f   :  { %14303 = vmatprep.subr.bf16.mxu0 %v18664_v47 }
 0xe60   :  { %8129 = vmatpush1.bf16.msra.mxu1 %v17769_v17  ;;  %v15220_v17 = vld [vmem:[#allocation16 + $0x68] ss:$12 sps:$4 sm:$0xff]  }
 0xe61   :  { %8130 = vmatprep.subr.bf16.mxu1 %v17776_v56  ;;  %v15222_v56 = vld [vmem:[#allocation16 + $0x98] ss:$12 sps:$4 sm:$0xff]  }
 0xe62   :  { %14304 = vmatpush3.bf16.msra.mxu0 %v15218_v11 }
 0xe63   :  { %14305 = vmatprep.subr.bf16.mxu0 %v18664_v47 }
 0xe64   :  { %8131 = vmatpush1.bf16.msra.mxu1 %v17779_v12  ;;  %v15223_v12 = vld [vmem:[#allocation16 + $0xb0] ss:$12 sps:$4 sm:$0xff]  }
 0xe65   :  { %8132 = vmatprep.subr.bf16.mxu1 %v17783_v13  ;;  %v7393_v13 = vld [vmem:[#allocation18] ss:$2 sm:$0x7] }
 0xe66   :  { %14306 = vmatpush3.bf16.msra.mxu0 %v15219_v60  ;;  %v7406_v0 = vrot.slane %v7393_v13, %v16455_v23 }
 0xe67   :  { %14307 = vmatprep.subr.bf16.mxu0 %v18664_v47 }
 0xe68   :  { %8133 = vmatpush1.bf16.msra.mxu1 %v17786_v62  ;;  %v7398_v62 = vrot.slane %v7393_v13, %v16447_v19 }
 0xe69   :  { %8134 = vmatprep.subr.bf16.mxu1 %v17790_v31  ;;  %v7402_v31 = vrot.slane %v7393_v13, %v16450_v20 }
 0xe6a   :  { %14308 = vmatpush3.bf16.msra.mxu0 %v15220_v17 }
 0xe6b   :  { %14309 = vmatprep.subr.bf16.mxu0 %v18664_v47 }
 0xe6c   :  { %8135 = vmatpush1.bf16.msra.mxu1 %v17793_v33 }
 0xe6d   :  { %8136 = vmatprep.subr.bf16.mxu1 %v17797_v22 }
 0xe6e   :  { %14310 = vmatpush3.bf16.msra.mxu0 %v15221_v37 }
 0xe6f   :  { %14311 = vmatprep.subr.bf16.mxu0 %v18664_v47 }
 0xe70   :  { %8137 = vmatpush1.bf16.msra.mxu1 %v17800_v42 }
 0xe71   :  { %8138 = vmatprep.subr.bf16.mxu1 %v17804_v32 }
 0xe72   :  { %14312 = vmatpush3.bf16.msra.mxu0 %v15222_v56 }
 0xe73   :  { %14313 = vmatprep.subr.bf16.mxu0 %v18664_v47 }
 0xe74   :  { %8139 = vmatpush1.bf16.msra.mxu1 %v17807_v35 }
 0xe75   :  { %8386 = vmatprep.subr.bf16.mxu1 %v17811_v34  ;;  %v7354_v34 = vld [vmem:[#allocation3 + $0x60] sm:$0x3] }
 0xe76   :  { %14314 = vmatpush3.bf16.msra.mxu0 %v15223_v12 }
 0xe77   :  { %14319 = vmatprep.subr.bf16.mxu0 %v18664_v47 }
 0xf0a   :  { %v7575_v33 = vpop.f32.mrb[120].mxu1  ;;  %v7616_v22 = vpop.f32.mrb[128].mxu0 }
 0xf0b   :  { %v7576_v42 = vadd.f32 %v7575_v33, %v7398_v62  ;;  %v7577_v32 = vpop.f32.mrb[121].mxu1  ;;  %v14277_v35 = vpop.f32.mrb[129].mxu0  ;;  %v7617_v10 = vadd.f32 %v7616_v22, %v7406_v0  ;;  %v7668_v0 = vrot.slane %v7655_v57, %v16455_v23 }
 0xf0c   :  { %v7578_v15 = vadd.f32 %v7577_v32, %v7402_v31  ;;  %v7579_v39 = vpop.f32.mrb[122].mxu1  ;;  %v7619_v7 = vpop.f32.mrb[130].mxu0  ;;  %v7357_v32 = vld [vmem:[#allocation3 + $0x48] sm:$0xc0] }
 0xf0d   :  { %v7881_v5 = vadd.f32 %v7576_v42, %v7354_v34  ;;  %v7580_v45 = vpop.f32.mrb[123].mxu1  ;;  %v14278_v9 = vpop.f32.mrb[131].mxu0  ;;  %v7358_v34 = vld [vmem:[#allocation3 + $0x50] sm:$0xc0] }
 0xf0e   :  { %v7888_v43 = vadd.f32 %v7578_v15, %v7355_v24 }
 0xf0f   :  { %v13072_v61 = vmul.f32 -1.442695, %v7881_v5 }
 0xf10   :  { %v13073_v49 = vmul.f32 -1.442695, %v7888_v43  ;;  %v15224_v43 = vld [vmem:[#allocation16 + $0xc8] ss:$12 sps:$4 sm:$0xff]  }
 0xf11   :  { %15688 = vpow2.f32 %v13072_v61 }
 0xf12   :  { %15690 = vpow2.f32 %v13073_v49 }
 0xf1b   :  { %v15689_v21 = vpop.eup %15688 }
 0xf1c   :  { %v15691_v27 = vpop.eup %15690  ;;  %v7885_v54 = vadd.f32 1.0, %v15689_v21 }
 0xf1d   :  { %v7892_v46 = vadd.f32 1.0, %v15691_v27 }
 0xf1e   :  { %15692 = vrcp.f32 %v7885_v54 }
 0xf1f   :  { %15694 = vrcp.f32 %v7892_v46  ;;  %v15225_v46 = vld [vmem:[#allocation16 + $0xe0] ss:$12 sps:$4 sm:$0xff]  }
 0xf28   :  { %v15693_v52 = vpop.eup %15692 }
 0xf29   :  { %v15695_v53 = vpop.eup %15694  ;;  %v7895_v48 = vmul.f32 %v15693_v52, %v7617_v10  ;;  %v15226_v10 = vld [vmem:[#allocation16 + $0xf8] ss:$12 sps:$4 sm:$0xff]   ;;  %v7934_v52 = vrot.slane %v17887_v6, 2 }
 0xf2a   :  { %v7834_v51 = vpop.f32.mrb[124].mxu1  ;;  %v7875_v11 = vpop.f32.mrb[132].mxu0  ;;  %v7903_v60 = vmul.f32 %v15695_v53, %v7901_v38  ;;  %v7898_v5 = vsub.f32 1.0, %v15695_v53  ;;  %v7359_v38 = vld [vmem:[#allocation3 + $0x58] sm:$0xc0] }
 0xf2b   :  { %v7896_v17 = vadd.f32 %v7895_v48, %v7356_v18  ;;  %v7835_v37 = vadd.f32 %v7834_v51, %v7660_v63  ;;  %v7836_v56 = vpop.f32.mrb[125].mxu1  ;;  %v14297_v12 = vpop.f32.mrb[133].mxu0  ;;  %v15235_v48 = vld [vmem:[#allocation16 + $0x8] ss:$12 sps:$4 sm:$0xff]   ;;  %v17978_v51 = vld [vmem:[#allocation16 + $0x18] ss:$12 sps:$4 sm:$0xff]  }
 0xf2c   :  { %v7837_v13 = vadd.f32 %v7836_v56, %v7664_v40  ;;  %v7838_v62 = vpop.f32.mrb[126].mxu1  ;;  %v7878_v31 = vpop.f32.mrb[134].mxu0  ;;  %v17975_v18 = vld [vmem:[#allocation16 + $0x1c] ss:$12 sps:$4 sm:$0xff]   ;;  %v17990_v56 = vld [vmem:[#allocation16 + $0x4c] ss:$12 sps:$4 sm:$0xff]  }
 0xf2d   :  { %15696 = vtanh.f32 %v7896_v17  ;;  %v7906_v33 = vrot.slane %v7835_v37, 2  ;;  %v7839_v22 = vpop.f32.mrb[127].mxu1  ;;  %v14298_v42 = vpop.f32.mrb[135].mxu0  ;;  %v17984_v17 = vld [vmem:[#allocation16 + $0x34] ss:$12 sps:$4 sm:$0xff]  }
 0xf2e   :  { %v7916_v35 = vrot.slane %v7837_v13, 2  ;;  %v15243_v37 = vld [vmem:[#allocation16 + $0x38] ss:$12 sps:$4 sm:$0xff]   ;;  %v17992_v12 = vld [vmem:[#allocation16 + $0x48] ss:$12 sps:$4 sm:$0xff]  }
 0xf2f   :  { %v7908_v3 = vadd.f32 %v7906_v33, %v7357_v32  ;;  %v15247_v13 = vld [vmem:[#allocation16 + $0x50] ss:$12 sps:$4 sm:$0xff]   ;;  %v17999_v31 = vld [vmem:[#allocation16 + $0x60] ss:$12 sps:$4 sm:$0xff]   ;;  %v15251_v33 = vld [vmem:[#allocation16 + $0x68] ss:$12 sps:$4 sm:$0xff]  }
 0xf30   :  { %v7918_v15 = vadd.f32 %v7916_v35, %v7358_v34  ;;  %v17996_v62 = vld [vmem:[#allocation16 + $0x64] ss:$12 sps:$4 sm:$0xff]   ;;  %v18003_v22 = vld [vmem:[#allocation16 + $0x7c] ss:$12 sps:$4 sm:$0xff]   ;;  %v15255_v32 = vld [vmem:[#allocation16 + $0x80] ss:$12 sps:$4 sm:$0xff]  }
 0xf31   :  { %v13074_v39 = vmul.f32 -1.442695, %v7908_v3  ;;  %v18006_v42 = vld [vmem:[#allocation16 + $0x78] ss:$12 sps:$4 sm:$0xff]   ;;  %v18010_v35 = vld [vmem:[#allocation16 + $0x94] ss:$12 sps:$4 sm:$0xff]  }
 0xf32   :  { %v13075_v7 = vmul.f32 -1.442695, %v7918_v15  ;;  %v18013_v3 = vld [vmem:[#allocation16 + $0x90] ss:$12 sps:$4 sm:$0xff]   ;;  %v15259_v34 = vld [vmem:[#allocation16 + $0x98] ss:$12 sps:$4 sm:$0xff]  }
 0xf33   :  { %15698 = vpow2.f32 %v13074_v39  ;;  %v18017_v15 = vld [vmem:[#allocation16 + $0xac] ss:$12 sps:$4 sm:$0xff]   ;;  %v18020_v39 = vld [vmem:[#allocation16 + $0xa8] ss:$12 sps:$4 sm:$0xff]  }
 0xf34   :  { %15700 = vpow2.f32 %v13075_v7  ;;  %v15263_v7 = vld [vmem:[#allocation16 + $0xb0] ss:$12 sps:$4 sm:$0xff]  }
 0xf37   :  { %v15697_v24 = vpop.eup %15696 }
 0xf38   :  { %v7899_v45 = vmul.f32 %v15697_v24, %v7898_v5  ;;  %v18025_v5 = vld [vmem:[#allocation16 + $0xc4] ss:$12 sps:$4 sm:$0xff]  }
 0xf39   :  { %v7979_v24 = vld [vmem:[#allocation18] ss:$2 sm:$0x7] }
 0xf3a   :  { %v17928_v9 = vadd.f32 %v7903_v60, %v7899_v45  ;;  %v17982_v60 = vld [vmem:[#allocation16 + $0x30] ss:$12 sps:$4 sm:$0xff]   ;;  %v7984_v45 = vrot.slane %v7979_v24, %v16447_v19 }
 0xf3c   :  { %7938 = vst [vmem:[#allocation4 + $0x20] sm:$0x3] %v17928_v9  ;;  %v7946_v61 = vpack.c.bf16 %v17928_v9, %v17928_v9 }
 0xf3d   :  { %v15699_v49 = vpop.eup %15698 }
 0xf3e   :  { %v15701_v21 = vpop.eup %15700  ;;  %v7912_v27 = vadd.f32 1.0, %v15699_v49  ;;  %8157 = vmatmul.mubr.bf16.vlgmr.msra.gmra.mrb[128].mxu1 %v7946_v61  ;;  %14316 = vmatmul.mubr.bf16.vlgmr.msra.gmra.mrb[136].mxu0 %v7946_v61 }
 0xf3f   :  { %v7922_v54 = vadd.f32 1.0, %v15701_v21  ;;  %8387 = vmatpush1.bf16.msra.mxu1 %v17830_v55  ;;  %14320 = vmatpush3.bf16.msra.mxu0 %v15224_v43  ;;  %v7876_v55 = vadd.f32 %v7875_v11, %v7668_v0  ;;  %v15239_v11 = vld [vmem:[#allocation16 + $0x20] ss:$12 sps:$4 sm:$0xff]   ;;  %v7988_v43 = vrot.slane %v7979_v24, %v16450_v20 }
 0xf40   :  { %15702 = vrcp.f32 %v7912_v27  ;;  %8388 = vmatprep.subr.bf16.mxu1 %v17832_v25  ;;  %14321 = vmatprep.subr.bf16.mxu0 %v18664_v47  ;;  %v15227_v25 = vld [vmem:[#allocation16 + $0x110] ss:$12 sps:$4 sm:$0xff]  }
 0xf41   :  { %15704 = vrcp.f32 %v7922_v54  ;;  %8418 = vmatprep.mubr.bf16.mxu1 %v18663_v59  ;;  %14335 = vmatprep.mubr.msk.bf16.mxu0 %vm16124_vm12, %v18664_v47  ;;  %v7926_v57 = vrot.slane %v7876_v55, 2 }
 0xf43   :  { %8389 = vmatpush1.bf16.msra.mxu1 %v17835_v8  ;;  %14322 = vmatpush3.bf16.msra.mxu0 %v15225_v46 }
 0xf44   :  { %8390 = vmatprep.subr.bf16.mxu1 %v17839_v29  ;;  %14323 = vmatprep.subr.bf16.mxu0 %v18664_v47  ;;  %v15228_v29 = vld [vmem:[#allocation16 + $0x128] ss:$12 sps:$4 sm:$0xff]  }
 0xf47   :  { %8391 = vmatpush1.bf16.msra.mxu1 %v17847_v14  ;;  %14324 = vmatpush3.bf16.msra.mxu0 %v15226_v10 }
 0xf48   :  { %8392 = vmatprep.subr.bf16.mxu1 %v17851_v30  ;;  %14325 = vmatprep.subr.bf16.mxu0 %v18664_v47  ;;  %v15229_v30 = vld [vmem:[#allocation16 + $0x140] ss:$12 sps:$4 sm:$0xff]  }
 0xf4a   :  { %v15703_v63 = vpop.eup %15702 }
 0xf4b   :  { %v15705_v8 = vpop.eup %15704  ;;  %v7928_v40 = vmul.f32 %v15703_v63, %v7926_v57  ;;  %8393 = vmatpush1.bf16.msra.mxu1 %v17854_v26  ;;  %14326 = vmatpush3.bf16.msra.mxu0 %v15227_v25  ;;  %v15230_v26 = vld [vmem:[#allocation16 + $0x158] ss:$12 sps:$4 sm:$0xff]  }
 0xf4c   :  { %8394 = vmatprep.subr.bf16.mxu1 %v17858_v44  ;;  %14327 = vmatprep.subr.bf16.mxu0 %v18664_v47  ;;  %v7936_v14 = vmul.f32 %v15705_v8, %v7934_v52  ;;  %v15231_v44 = vld [vmem:[#allocation16 + $0x170] ss:$12 sps:$4 sm:$0xff]   ;;  %v7940_v63 = vld [vmem:[#allocation3 + $0x60] sm:$0xc] }
 0xf4d   :  { %v7929_v53 = vadd.f32 %v7928_v40, %v7359_v38  ;;  %v7941_v40 = vld [vmem:[#allocation3 + $0x68] sm:$0xc] }
 0xf4f   :  { %15706 = vtanh.f32 %v7929_v53  ;;  %8395 = vmatpush1.bf16.msra.mxu1 %v17862_v36  ;;  %14328 = vmatpush3.bf16.msra.mxu0 %v15228_v29  ;;  %v7931_v36 = vsub.f32 1.0, %v15705_v8 }
 0xf50   :  { %8396 = vmatprep.subr.bf16.mxu1 %v17866_v50  ;;  %14329 = vmatprep.subr.bf16.mxu0 %v18664_v47 }
 0xf53   :  { %8397 = vmatpush1.bf16.msra.mxu1 %v17869_v4  ;;  %14330 = vmatpush3.bf16.msra.mxu0 %v15229_v30 }
 0xf54   :  { %8398 = vmatprep.subr.bf16.mxu1 %v17873_v16  ;;  %14331 = vmatprep.subr.bf16.mxu0 %v18664_v47 }
 0xf57   :  { %8399 = vmatpush1.bf16.msra.mxu1 %v17876_v28  ;;  %14332 = vmatpush3.bf16.msra.mxu0 %v15230_v26 }
 0xf58   :  { %8400 = vmatprep.subr.bf16.mxu1 %v17880_v1  ;;  %14333 = vmatprep.subr.bf16.mxu0 %v18664_v47  ;;  %v17969_v1 = vld [vmem:[#allocation16 + $0x4] ss:$12 sps:$4 sm:$0xff]  }
 0xf59   :  { %v15707_v50 = vpop.eup %15706 }
 0xf5a   :  { %v7932_v6 = vmul.f32 %v15707_v50, %v7931_v36  ;;  %v7992_v36 = vrot.slane %v7979_v24, %v16455_v23 }
 0xf5b   :  { %8401 = vmatpush1.bf16.msra.mxu1 %v17883_v2  ;;  %14334 = vmatpush3.bf16.msra.mxu0 %v15231_v44  ;;  %v17971_v2 = vld [vmem:[#allocation16] ss:$12 sps:$4 sm:$0xff]  }
 0xf5c   :  { %v17960_v4 = vadd.f32 %v7936_v14, %v7932_v6  ;;  %14339 = vmatprep.subr.bf16.mxu0 %v18664_v47  ;;  %8722 = vmatprep.subr.bf16.mxu1 %v17969_v1  ;;  %v18031_v6 = vld [vmem:[#allocation18 + $0x1] ss:$2 sm:$0x7] }
 0xf5e   :  { %7939 = vst [vmem:[#allocation4 + $0x18] sm:$0xc0] %v17960_v4  ;;  %v8205_v16 = vpack.c.bf16 %v17960_v4, %v17960_v4 }
 0xf60   :  { %v8256_v28 = vrot.slane %v8205_v16, 3 }
 0xf62   :  { %8419 = vmatmul.mubr.bf16.vlgmr.msra.gmra.mrb[132].mxu1 %v8256_v28  ;;  %14336 = vmatmul.mubr.bf16.vlgmr.msra.gmra.mrb[140].mxu0 %v8256_v28 }
 0xf63   :  { %8754 = vmatprep.mubr.bf16.mxu1 %v18663_v59  ;;  %14355 = vmatprep.mubr.msk.bf16.mxu0 %vm16124_vm12, %v18664_v47 }
 0xf64   :  { %8723 = vmatpush1.bf16.msra.mxu1 %v17971_v2  ;;  %14340 = vmatpush3.bf16.msra.mxu0 %v15235_v48  ;;  %v8496_v48 = vrot.slane %v17928_v9, 6 }
 0xf65   :  { %14341 = vmatprep.subr.bf16.mxu0 %v18664_v47  ;;  %8724 = vmatprep.subr.bf16.mxu1 %v17975_v18 }
 0xf68   :  { %8725 = vmatpush1.bf16.msra.mxu1 %v17978_v51  ;;  %14342 = vmatpush3.bf16.msra.mxu0 %v15239_v11 }
 0xf69   :  { %14343 = vmatprep.subr.bf16.mxu0 %v18664_v47  ;;  %8726 = vmatprep.subr.bf16.mxu1 %v17984_v17 }
 0xf6c   :  { %8727 = vmatpush1.bf16.msra.mxu1 %v17982_v60  ;;  %14344 = vmatpush3.bf16.msra.mxu0 %v15243_v37 }
 0xf6d   :  { %14345 = vmatprep.subr.bf16.mxu0 %v18664_v47  ;;  %8728 = vmatprep.subr.bf16.mxu1 %v17990_v56 }
 0xf70   :  { %8729 = vmatpush1.bf16.msra.mxu1 %v17992_v12  ;;  %14346 = vmatpush3.bf16.msra.mxu0 %v15247_v13  ;;  %v8243_v13 = vrot.slane %v18031_v6, %v16447_v19 }
 0xf71   :  { %14347 = vmatprep.subr.bf16.mxu0 %v18664_v47  ;;  %8730 = vmatprep.subr.bf16.mxu1 %v17996_v62 }
 0xf74   :  { %8731 = vmatpush1.bf16.msra.mxu1 %v17999_v31  ;;  %14348 = vmatpush3.bf16.msra.mxu0 %v15251_v33  ;;  %v7942_v33 = vld [vmem:[#allocation3 + $0x70] sm:$0xc] }
 0xf75   :  { %14349 = vmatprep.subr.bf16.mxu0 %v18664_v47  ;;  %8732 = vmatprep.subr.bf16.mxu1 %v18003_v22 }
 0xf78   :  { %8733 = vmatpush1.bf16.msra.mxu1 %v18006_v42  ;;  %14350 = vmatpush3.bf16.msra.mxu0 %v15255_v32  ;;  %v8247_v32 = vrot.slane %v18031_v6, %v16450_v20 }
 0xf79   :  { %14351 = vmatprep.subr.bf16.mxu0 %v18664_v47  ;;  %8734 = vmatprep.subr.bf16.mxu1 %v18010_v35 }
 0xf7c   :  { %8735 = vmatpush1.bf16.msra.mxu1 %v18013_v3  ;;  %14352 = vmatpush3.bf16.msra.mxu0 %v15259_v34 }
 0xf7d   :  { %14353 = vmatprep.subr.bf16.mxu0 %v18664_v47  ;;  %8736 = vmatprep.subr.bf16.mxu1 %v18017_v15 }
 0xf80   :  { %8737 = vmatpush1.bf16.msra.mxu1 %v18020_v39  ;;  %14354 = vmatpush3.bf16.msra.mxu0 %v15263_v7 }
 0xf81   :  { %14359 = vmatprep.subr.bf16.mxu0 %v18664_v47  ;;  %8984 = vmatprep.subr.bf16.mxu1 %v18025_v5 }
0x1011   :  { %v8158_v61 = vpop.f32.mrb[128].mxu1  ;;  %v8199_v49 = vpop.f32.mrb[136].mxu0 }
0x1012   :  { %v8159_v21 = vadd.f32 %v8158_v61, %v7984_v45  ;;  %v8160_v27 = vpop.f32.mrb[129].mxu1  ;;  %v14317_v54 = vpop.f32.mrb[137].mxu0  ;;  %v8200_v50 = vadd.f32 %v8199_v49, %v7992_v36  ;;  %v18045_v36 = vld [vmem:[#allocation16 + $0xdc] ss:$12 sps:$4 sm:$0xff]  }
0x1013   :  { %v8161_v46 = vadd.f32 %v8160_v27, %v7988_v43  ;;  %v8162_v0 = vpop.f32.mrb[130].mxu1  ;;  %v8202_v10 = vpop.f32.mrb[138].mxu0 }
0x1014   :  { %v8468_v55 = vrot.slane %v8159_v21, 6  ;;  %v8163_v25 = vpop.f32.mrb[131].mxu1  ;;  %v14318_v57 = vpop.f32.mrb[139].mxu0  ;;  %v8488_v16 = vrot.slane %v8200_v50, 6  ;;  %v7943_v10 = vld [vmem:[#allocation3 + $0x48] sm:$0x30] }
0x1015   :  { %v8478_v52 = vrot.slane %v8161_v46, 6  ;;  %v7944_v57 = vld [vmem:[#allocation3 + $0x50] sm:$0x30] }
0x1016   :  { %v8470_v8 = vadd.f32 %v8468_v55, %v7940_v63 }
0x1017   :  { %v8480_v29 = vadd.f32 %v8478_v52, %v7941_v40 }
0x1018   :  { %v13124_v38 = vmul.f32 -1.442695, %v8470_v8 }
0x1019   :  { %v13125_v14 = vmul.f32 -1.442695, %v8480_v29 }
0x101a   :  { %15708 = vpow2.f32 %v13124_v38 }
0x101b   :  { %15710 = vpow2.f32 %v13125_v14 }
0x1024   :  { %v15709_v53 = vpop.eup %15708 }
0x1025   :  { %v15711_v30 = vpop.eup %15710  ;;  %v8474_v26 = vadd.f32 1.0, %v15709_v53 }
0x1026   :  { %v8484_v44 = vadd.f32 1.0, %v15711_v30  ;;  %v18043_v30 = vld [vmem:[#allocation16 + $0xc0] ss:$12 sps:$4 sm:$0xff]  }
0x1027   :  { %15712 = vrcp.f32 %v8474_v26  ;;  %v15267_v26 = vld [vmem:[#allocation16 + $0xc8] ss:$12 sps:$4 sm:$0xff]  }
0x1028   :  { %15714 = vrcp.f32 %v8484_v44 }
0x1031   :  { %v15713_v28 = vpop.eup %15712 }
0x1032   :  { %v15715_v11 = vpop.eup %15714  ;;  %v8490_v37 = vmul.f32 %v15713_v28, %v8488_v16 }
0x1033   :  { %v8498_v34 = vmul.f32 %v15715_v11, %v8496_v48  ;;  %v8493_v40 = vsub.f32 1.0, %v15715_v11  ;;  %v18048_v11 = vld [vmem:[#allocation16 + $0xd8] ss:$12 sps:$4 sm:$0xff]  }
0x1034   :  { %v8491_v7 = vadd.f32 %v8490_v37, %v7942_v33  ;;  %v15271_v37 = vld [vmem:[#allocation16 + $0xe0] ss:$12 sps:$4 sm:$0xff]   ;;  %v8251_v33 = vrot.slane %v18031_v6, %v16455_v23  ;;  %v18067_v6 = vld [vmem:[#allocation16 + $0x108] ss:$12 sps:$4 sm:$0xff]  }
0x1035   :  { %v8420_v24 = vpop.f32.mrb[132].mxu1  ;;  %v8461_v45 = vpop.f32.mrb[140].mxu0 }
0x1036   :  { %15716 = vtanh.f32 %v8491_v7  ;;  %v8421_v43 = vadd.f32 %v8420_v24, %v8243_v13  ;;  %v8422_v61 = vpop.f32.mrb[133].mxu1  ;;  %v14337_v49 = vpop.f32.mrb[141].mxu0  ;;  %v18052_v13 = vld [vmem:[#allocation16 + $0xf4] ss:$12 sps:$4 sm:$0xff]   ;;  %v18064_v7 = vld [vmem:[#allocation16 + $0x10c] ss:$12 sps:$4 sm:$0xff]   ;;  %v8462_v24 = vadd.f32 %v8461_v45, %v8251_v33 }
0x1037   :  { %v8423_v21 = vadd.f32 %v8422_v61, %v8247_v32  ;;  %v8424_v27 = vpop.f32.mrb[134].mxu1  ;;  %v8464_v9 = vpop.f32.mrb[142].mxu0  ;;  %v18060_v32 = vld [vmem:[#allocation16 + $0xf0] ss:$12 sps:$4 sm:$0xff]   ;;  %v18075_v45 = vld [vmem:[#allocation16 + $0x120] ss:$12 sps:$4 sm:$0xff]  }
0x1038   :  { %v8501_v54 = vrot.slane %v8421_v43, 4  ;;  %v8425_v46 = vpop.f32.mrb[135].mxu1  ;;  %v14338_v0 = vpop.f32.mrb[143].mxu0  ;;  %v15279_v43 = vld [vmem:[#allocation16 + $0x110] ss:$12 sps:$4 sm:$0xff]   ;;  %v8521_v49 = vrot.slane %v8462_v24, 4 }
0x1039   :  { %v8511_v55 = vrot.slane %v8423_v21, 4  ;;  %v18071_v61 = vld [vmem:[#allocation16 + $0x124] ss:$12 sps:$4 sm:$0xff]   ;;  %v8529_v27 = vrot.slane %v17960_v4, 2  ;;  %v15283_v46 = vld [vmem:[#allocation16 + $0x128] ss:$12 sps:$4 sm:$0xff]  }
0x103a   :  { %v8503_v25 = vadd.f32 %v8501_v54, %v7943_v10  ;;  %v7945_v0 = vld [vmem:[#allocation3 + $0x58] sm:$0x30]  ;;  %v18079_v10 = vld [vmem:[#allocation16 + $0x13c] ss:$12 sps:$4 sm:$0xff]   ;;  %v18082_v4 = vld [vmem:[#allocation16 + $0x138] ss:$12 sps:$4 sm:$0xff]  }
0x103b   :  { %v8513_v63 = vadd.f32 %v8511_v55, %v7944_v57  ;;  %v15287_v57 = vld [vmem:[#allocation16 + $0x140] ss:$12 sps:$4 sm:$0xff]  }
0x103c   :  { %v13126_v52 = vmul.f32 -1.442695, %v8503_v25 }
0x103d   :  { %v13127_v8 = vmul.f32 -1.442695, %v8513_v63  ;;  %v18086_v63 = vld [vmem:[#allocation16 + $0x154] ss:$12 sps:$4 sm:$0xff]  }
0x103e   :  { %15718 = vpow2.f32 %v13126_v52  ;;  %v18089_v52 = vld [vmem:[#allocation16 + $0x150] ss:$12 sps:$4 sm:$0xff]  }
0x103f   :  { %15720 = vpow2.f32 %v13127_v8  ;;  %v15291_v8 = vld [vmem:[#allocation16 + $0x158] ss:$12 sps:$4 sm:$0xff]  }
0x1040   :  { %v15717_v29 = vpop.eup %15716 }
0x1041   :  { %v8494_v38 = vmul.f32 %v15717_v29, %v8493_v40  ;;  %v18093_v40 = vld [vmem:[#allocation16 + $0x16c] ss:$12 sps:$4 sm:$0xff]   ;;  %v18096_v29 = vld [vmem:[#allocation16 + $0x168] ss:$12 sps:$4 sm:$0xff]  }
0x1043   :  { %v18038_v14 = vadd.f32 %v8498_v34, %v8494_v38  ;;  %v15275_v34 = vld [vmem:[#allocation16 + $0xf8] ss:$12 sps:$4 sm:$0xff]   ;;  %v15295_v38 = vld [vmem:[#allocation16 + $0x170] ss:$12 sps:$4 sm:$0xff]  }
0x1045   :  { %8533 = vst [vmem:[#allocation4 + $0x20] sm:$0xc] %v18038_v14  ;;  %v8541_v53 = vpack.c.bf16 %v18038_v14, %v18038_v14 }
0x1047   :  { %v8592_v44 = vrot.slane %v8541_v53, 1 }
0x1048   :  { %v15719_v50 = vpop.eup %15718 }
0x1049   :  { %v15721_v16 = vpop.eup %15720  ;;  %v8507_v28 = vadd.f32 1.0, %v15719_v50  ;;  %8755 = vmatmul.mubr.bf16.vlgmr.msra.gmra.mrb[136].mxu1 %v8592_v44  ;;  %14356 = vmatmul.mubr.bf16.vlgmr.msra.gmra.mrb[144].mxu0 %v8592_v44 }
0x104a   :  { %v8517_v48 = vadd.f32 1.0, %v15721_v16  ;;  %8985 = vmatpush1.bf16.msra.mxu1 %v18043_v30  ;;  %14360 = vmatpush3.bf16.msra.mxu0 %v15267_v26 }
0x104b   :  { %15722 = vrcp.f32 %v8507_v28  ;;  %8986 = vmatprep.subr.bf16.mxu1 %v18045_v36  ;;  %14361 = vmatprep.subr.bf16.mxu0 %v18664_v47 }
0x104c   :  { %15724 = vrcp.f32 %v8517_v48  ;;  %9016 = vmatprep.mubr.bf16.mxu1 %v18663_v59  ;;  %14375 = vmatprep.mubr.msk.bf16.mxu0 %vm16124_vm12, %v18664_v47 }
0x104e   :  { %8987 = vmatpush1.bf16.msra.mxu1 %v18048_v11  ;;  %14362 = vmatpush3.bf16.msra.mxu0 %v15271_v37 }
0x104f   :  { %8988 = vmatprep.subr.bf16.mxu1 %v18052_v13  ;;  %14363 = vmatprep.subr.bf16.mxu0 %v18664_v47 }
0x1052   :  { %8989 = vmatpush1.bf16.msra.mxu1 %v18060_v32  ;;  %14364 = vmatpush3.bf16.msra.mxu0 %v15275_v34 }
0x1053   :  { %8990 = vmatprep.subr.bf16.mxu1 %v18064_v7  ;;  %14365 = vmatprep.subr.bf16.mxu0 %v18664_v47 }
0x1055   :  { %v15723_v21 = vpop.eup %15722 }
0x1056   :  { %v15725_v9 = vpop.eup %15724  ;;  %v8523_v54 = vmul.f32 %v15723_v21, %v8521_v49  ;;  %8991 = vmatpush1.bf16.msra.mxu1 %v18067_v6  ;;  %14366 = vmatpush3.bf16.msra.mxu0 %v15279_v43  ;;  %v8535_v43 = vld [vmem:[#allocation3 + $0x60] sm:$0x30] }
0x1057   :  { %8992 = vmatprep.subr.bf16.mxu1 %v18071_v61  ;;  %14367 = vmatprep.subr.bf16.mxu0 %v18664_v47  ;;  %v8531_v55 = vmul.f32 %v15725_v9, %v8529_v27  ;;  %v8526_v53 = vsub.f32 1.0, %v15725_v9  ;;  %v8536_v27 = vld [vmem:[#allocation3 + $0x68] sm:$0x30] }
0x1058   :  { %v8524_v25 = vadd.f32 %v8523_v54, %v7945_v0 }
0x105a   :  { %15726 = vtanh.f32 %v8524_v25  ;;  %8993 = vmatpush1.bf16.msra.mxu1 %v18075_v45  ;;  %14368 = vmatpush3.bf16.msra.mxu0 %v15283_v46 }
0x105b   :  { %8994 = vmatprep.subr.bf16.mxu1 %v18079_v10  ;;  %14369 = vmatprep.subr.bf16.mxu0 %v18664_v47 }
0x105e   :  { %8995 = vmatpush1.bf16.msra.mxu1 %v18082_v4  ;;  %14370 = vmatpush3.bf16.msra.mxu0 %v15287_v57 }
0x105f   :  { %8996 = vmatprep.subr.bf16.mxu1 %v18086_v63  ;;  %14371 = vmatprep.subr.bf16.mxu0 %v18664_v47 }
0x1062   :  { %8997 = vmatpush1.bf16.msra.mxu1 %v18089_v52  ;;  %14372 = vmatpush3.bf16.msra.mxu0 %v15291_v8 }
0x1063   :  { %8998 = vmatprep.subr.bf16.mxu1 %v18093_v40  ;;  %14373 = vmatprep.subr.bf16.mxu0 %v18664_v47 }
0x1064   :  { %v15727_v26 = vpop.eup %15726 }
0x1065   :  { %v8527_v44 = vmul.f32 %v15727_v26, %v8526_v53  ;;  %v8836_v53 = vld [vmem:[#allocation18 + $0x1] ss:$2 sm:$0x7] }
0x1066   :  { %8999 = vmatpush1.bf16.msra.mxu1 %v18096_v29  ;;  %14374 = vmatpush3.bf16.msra.mxu0 %v15295_v38 }
0x1067   :  { %v18101_v50 = vadd.f32 %v8531_v55, %v8527_v44  ;;  %9320 = vmatprep.subr.bf16.mxu1 %v17969_v1  ;;  %14379 = vmatprep.subr.bf16.mxu0 %v18664_v47  ;;  %v15296_v1 = vld [vmem:[#allocation16 + $0x8] ss:$12 sps:$4 sm:$0xff]  }
0x1069   :  { %8534 = vst [vmem:[#allocation4 + $0x18] sm:$0x30] %v18101_v50  ;;  %v8803_v16 = vpack.c.bf16 %v18101_v50, %v18101_v50 }
0x106b   :  { %v8854_v28 = vrot.slane %v8803_v16, 2  ;;  %v9094_v16 = vrot.slane %v18038_v14, 6 }
0x106d   :  { %9017 = vmatmul.mubr.bf16.vlgmr.msra.gmra.mrb[140].mxu1 %v8854_v28  ;;  %14376 = vmatmul.mubr.bf16.vlgmr.msra.gmra.mrb[148].mxu0 %v8854_v28 }
0x106e   :  { %9321 = vmatpush1.bf16.msra.mxu1 %v17971_v2  ;;  %9352 = vmatprep.mubr.bf16.mxu1 %v18663_v59  ;;  %v15297_v2 = vld [vmem:[#allocation16 + $0x20] ss:$12 sps:$4 sm:$0xff]  }
0x106f   :  { %9322 = vmatprep.subr.bf16.mxu1 %v17975_v18  ;;  %14395 = vmatprep.mubr.msk.bf16.mxu0 %vm16124_vm12, %v18664_v47  ;;  %v15298_v18 = vld [vmem:[#allocation16 + $0x38] ss:$12 sps:$4 sm:$0xff]  }
0x1070   :  { %14380 = vmatpush3.bf16.msra.mxu0 %v15296_v1 }
0x1071   :  { %14381 = vmatprep.subr.bf16.mxu0 %v18664_v47 }
0x1072   :  { %9323 = vmatpush1.bf16.msra.mxu1 %v17978_v51  ;;  %v15299_v51 = vld [vmem:[#allocation16 + $0x50] ss:$12 sps:$4 sm:$0xff]  }
0x1073   :  { %9324 = vmatprep.subr.bf16.mxu1 %v17984_v17  ;;  %v15301_v17 = vld [vmem:[#allocation16 + $0x80] ss:$12 sps:$4 sm:$0xff]  }
0x1074   :  { %14382 = vmatpush3.bf16.msra.mxu0 %v15297_v2  ;;  %v8841_v2 = vrot.slane %v8836_v53, %v16447_v19 }
0x1075   :  { %14383 = vmatprep.subr.bf16.mxu0 %v18664_v47 }
0x1076   :  { %9325 = vmatpush1.bf16.msra.mxu1 %v17982_v60  ;;  %v15300_v60 = vld [vmem:[#allocation16 + $0x68] ss:$12 sps:$4 sm:$0xff]  }
0x1077   :  { %9326 = vmatprep.subr.bf16.mxu1 %v17990_v56  ;;  %v15302_v56 = vld [vmem:[#allocation16 + $0x98] ss:$12 sps:$4 sm:$0xff]  }
0x1078   :  { %14384 = vmatpush3.bf16.msra.mxu0 %v15298_v18  ;;  %v8537_v18 = vld [vmem:[#allocation3 + $0x70] sm:$0x30] }
0x1079   :  { %14385 = vmatprep.subr.bf16.mxu0 %v18664_v47 }
0x107a   :  { %9327 = vmatpush1.bf16.msra.mxu1 %v17992_v12  ;;  %v15303_v12 = vld [vmem:[#allocation16 + $0xb0] ss:$12 sps:$4 sm:$0xff]  }
0x107b   :  { %9328 = vmatprep.subr.bf16.mxu1 %v17996_v62  ;;  %v8574_v62 = vld [vmem:[#allocation18] ss:$2 sm:$0x7] }
0x107c   :  { %14386 = vmatpush3.bf16.msra.mxu0 %v15299_v51  ;;  %v8587_v8 = vrot.slane %v8574_v62, %v16455_v23  ;;  %v8845_v51 = vrot.slane %v8836_v53, %v16450_v20 }
0x107d   :  { %14387 = vmatprep.subr.bf16.mxu0 %v18664_v47 }
0x107e   :  { %9329 = vmatpush1.bf16.msra.mxu1 %v17999_v31  ;;  %v8579_v31 = vrot.slane %v8574_v62, %v16447_v19 }
0x107f   :  { %9330 = vmatprep.subr.bf16.mxu1 %v18003_v22  ;;  %v8583_v22 = vrot.slane %v8574_v62, %v16450_v20 }
0x1080   :  { %14388 = vmatpush3.bf16.msra.mxu0 %v15300_v60 }
0x1081   :  { %14389 = vmatprep.subr.bf16.mxu0 %v18664_v47 }
0x1082   :  { %9331 = vmatpush1.bf16.msra.mxu1 %v18006_v42 }
0x1083   :  { %9332 = vmatprep.subr.bf16.mxu1 %v18010_v35 }
0x1084   :  { %14390 = vmatpush3.bf16.msra.mxu0 %v15301_v17 }
0x1085   :  { %14391 = vmatprep.subr.bf16.mxu0 %v18664_v47 }
0x1086   :  { %9333 = vmatpush1.bf16.msra.mxu1 %v18013_v3 }
0x1087   :  { %9334 = vmatprep.subr.bf16.mxu1 %v18017_v15 }
0x1088   :  { %14392 = vmatpush3.bf16.msra.mxu0 %v15302_v56 }
0x1089   :  { %14393 = vmatprep.subr.bf16.mxu0 %v18664_v47 }
0x108a   :  { %9335 = vmatpush1.bf16.msra.mxu1 %v18020_v39 }
0x108b   :  { %9582 = vmatprep.subr.bf16.mxu1 %v18025_v5 }
0x108c   :  { %14394 = vmatpush3.bf16.msra.mxu0 %v15303_v12 }
0x108d   :  { %14399 = vmatprep.subr.bf16.mxu0 %v18664_v47 }
0x111c   :  { %v8756_v42 = vpop.f32.mrb[136].mxu1  ;;  %v8797_v35 = vpop.f32.mrb[144].mxu0 }
0x111d   :  { %v8757_v3 = vadd.f32 %v8756_v42, %v8579_v31  ;;  %v8758_v15 = vpop.f32.mrb[137].mxu1  ;;  %v14357_v39 = vpop.f32.mrb[145].mxu0  ;;  %v8798_v38 = vadd.f32 %v8797_v35, %v8587_v8 }
0x111e   :  { %v8759_v5 = vadd.f32 %v8758_v15, %v8583_v22  ;;  %v8760_v48 = vpop.f32.mrb[138].mxu1  ;;  %v8800_v37 = vpop.f32.mrb[146].mxu0 }
0x111f   :  { %v9066_v33 = vrot.slane %v8757_v3, 4  ;;  %v8761_v34 = vpop.f32.mrb[139].mxu1  ;;  %v14358_v24 = vpop.f32.mrb[147].mxu0  ;;  %v9086_v26 = vrot.slane %v8798_v38, 4  ;;  %v15305_v38 = vld [vmem:[#allocation16 + $0xe0] ss:$12 sps:$4 sm:$0xff]  }
0x1120   :  { %v9076_v49 = vrot.slane %v8759_v5, 4  ;;  %v8538_v5 = vld [vmem:[#allocation3 + $0x48] sm:$0xc] }
0x1121   :  { %v9068_v21 = vadd.f32 %v9066_v33, %v8535_v43  ;;  %v8539_v33 = vld [vmem:[#allocation3 + $0x50] sm:$0xc] }
0x1122   :  { %v9078_v9 = vadd.f32 %v9076_v49, %v8536_v27 }
0x1123   :  { %v13176_v54 = vmul.f32 -1.442695, %v9068_v21 }
0x1124   :  { %v13177_v46 = vmul.f32 -1.442695, %v9078_v9 }
0x1125   :  { %15728 = vpow2.f32 %v13176_v54 }
0x1126   :  { %15730 = vpow2.f32 %v13177_v46  ;;  %v15304_v46 = vld [vmem:[#allocation16 + $0xc8] ss:$12 sps:$4 sm:$0xff]  }
0x112f   :  { %v15729_v0 = vpop.eup %15728 }
0x1130   :  { %v15731_v55 = vpop.eup %15730  ;;  %v9072_v25 = vadd.f32 1.0, %v15729_v0 }
0x1131   :  { %v9082_v57 = vadd.f32 1.0, %v15731_v55 }
0x1132   :  { %15732 = vrcp.f32 %v9072_v25 }
0x1133   :  { %15734 = vrcp.f32 %v9082_v57 }
0x113c   :  { %v15733_v44 = vpop.eup %15732 }
0x113d   :  { %v15735_v28 = vpop.eup %15734  ;;  %v9088_v1 = vmul.f32 %v15733_v44, %v9086_v26  ;;  %v8849_v26 = vrot.slane %v8836_v53, %v16455_v23  ;;  %v15306_v44 = vld [vmem:[#allocation16 + $0xf8] ss:$12 sps:$4 sm:$0xff]  }
0x113e   :  { %v9096_v60 = vmul.f32 %v15735_v28, %v9094_v16  ;;  %v9091_v49 = vsub.f32 1.0, %v15735_v28  ;;  %v9127_v28 = vrot.slane %v18101_v50, 2 }
0x113f   :  { %v9089_v17 = vadd.f32 %v9088_v1, %v8537_v18 }
0x1140   :  { %v9018_v56 = vpop.f32.mrb[140].mxu1  ;;  %v9059_v12 = vpop.f32.mrb[148].mxu0 }
0x1141   :  { %15736 = vtanh.f32 %v9089_v17  ;;  %v9019_v62 = vadd.f32 %v9018_v56, %v8841_v2  ;;  %v9020_v31 = vpop.f32.mrb[141].mxu1  ;;  %v14377_v22 = vpop.f32.mrb[149].mxu0  ;;  %v8540_v2 = vld [vmem:[#allocation3 + $0x58] sm:$0xc]  ;;  %v18190_v17 = vld [vmem:[#allocation16 + $0x1c] ss:$12 sps:$4 sm:$0xff]  }
0x1142   :  { %v9021_v42 = vadd.f32 %v9020_v31, %v8845_v51  ;;  %v9022_v35 = vpop.f32.mrb[142].mxu1  ;;  %v9062_v3 = vpop.f32.mrb[150].mxu0  ;;  %v15315_v51 = vld [vmem:[#allocation16 + $0x8] ss:$12 sps:$4 sm:$0xff]   ;;  %v15319_v56 = vld [vmem:[#allocation16 + $0x20] ss:$12 sps:$4 sm:$0xff]  }
0x1143   :  { %v9099_v15 = vrot.slane %v9019_v62, 6  ;;  %v9023_v14 = vpop.f32.mrb[143].mxu1  ;;  %v14378_v39 = vpop.f32.mrb[151].mxu0  ;;  %v18197_v62 = vld [vmem:[#allocation16 + $0x30] ss:$12 sps:$4 sm:$0xff]  }
0x1144   :  { %v9109_v48 = vrot.slane %v9021_v42, 6  ;;  %v15323_v31 = vld [vmem:[#allocation16 + $0x38] ss:$12 sps:$4 sm:$0xff]   ;;  %v18205_v42 = vld [vmem:[#allocation16 + $0x48] ss:$12 sps:$4 sm:$0xff]  }
0x1145   :  { %v9101_v37 = vadd.f32 %v9099_v15, %v8538_v5  ;;  %v18203_v22 = vld [vmem:[#allocation16 + $0x4c] ss:$12 sps:$4 sm:$0xff]   ;;  %v15327_v35 = vld [vmem:[#allocation16 + $0x50] ss:$12 sps:$4 sm:$0xff]   ;;  %v15331_v14 = vld [vmem:[#allocation16 + $0x68] ss:$12 sps:$4 sm:$0xff]  }
0x1146   :  { %v9111_v34 = vadd.f32 %v9109_v48, %v8539_v33  ;;  %v18209_v3 = vld [vmem:[#allocation16 + $0x64] ss:$12 sps:$4 sm:$0xff]   ;;  %v18212_v15 = vld [vmem:[#allocation16 + $0x60] ss:$12 sps:$4 sm:$0xff]   ;;  %v18216_v39 = vld [vmem:[#allocation16 + $0x7c] ss:$12 sps:$4 sm:$0xff]  }
0x1147   :  { %v13178_v24 = vmul.f32 -1.442695, %v9101_v37  ;;  %v18219_v5 = vld [vmem:[#allocation16 + $0x78] ss:$12 sps:$4 sm:$0xff]   ;;  %v15335_v48 = vld [vmem:[#allocation16 + $0x80] ss:$12 sps:$4 sm:$0xff]  }
0x1148   :  { %v13179_v43 = vmul.f32 -1.442695, %v9111_v34  ;;  %v18223_v37 = vld [vmem:[#allocation16 + $0x94] ss:$12 sps:$4 sm:$0xff]   ;;  %v18226_v33 = vld [vmem:[#allocation16 + $0x90] ss:$12 sps:$4 sm:$0xff]  }
0x1149   :  { %15738 = vpow2.f32 %v13178_v24  ;;  %v15339_v34 = vld [vmem:[#allocation16 + $0x98] ss:$12 sps:$4 sm:$0xff]  }
0x114a   :  { %15740 = vpow2.f32 %v13179_v43  ;;  %v18230_v24 = vld [vmem:[#allocation16 + $0xac] ss:$12 sps:$4 sm:$0xff]   ;;  %v18233_v43 = vld [vmem:[#allocation16 + $0xa8] ss:$12 sps:$4 sm:$0xff]  }
0x114b   :  { %v15737_v21 = vpop.eup %15736 }
0x114c   :  { %v9092_v27 = vmul.f32 %v15737_v21, %v9091_v49  ;;  %v15343_v49 = vld [vmem:[#allocation16 + $0xb0] ss:$12 sps:$4 sm:$0xff]  }
0x114d   :  { %v18237_v21 = vld [vmem:[#allocation16 + $0xc4] ss:$12 sps:$4 sm:$0xff]  }
0x114e   :  { %v18141_v9 = vadd.f32 %v9096_v60, %v9092_v27  ;;  %v18188_v60 = vld [vmem:[#allocation16 + $0x18] ss:$12 sps:$4 sm:$0xff]  }
0x114f   :  { %v9172_v27 = vld [vmem:[#allocation18] ss:$2 sm:$0x7] }
0x1150   :  { %9131 = vst [vmem:[#allocation4 + $0x20] sm:$0x30] %v18141_v9  ;;  %v9139_v54 = vpack.c.bf16 %v18141_v9, %v18141_v9 }
0x1152   :  { %v9190_v0 = vrot.slane %v9139_v54, 2  ;;  %v9177_v54 = vrot.slane %v9172_v27, %v16447_v19 }
0x1153   :  { %v15739_v55 = vpop.eup %15738 }
0x1154   :  { %v15741_v25 = vpop.eup %15740  ;;  %v9105_v57 = vadd.f32 1.0, %v15739_v55  ;;  %9353 = vmatmul.mubr.bf16.vlgmr.msra.gmra.mrb[144].mxu1 %v9190_v0  ;;  %14396 = vmatmul.mubr.bf16.vlgmr.msra.gmra.mrb[152].mxu0 %v9190_v0 }
0x1155   :  { %v9115_v8 = vadd.f32 1.0, %v15741_v25  ;;  %9583 = vmatpush1.bf16.msra.mxu1 %v18043_v30  ;;  %14400 = vmatpush3.bf16.msra.mxu0 %v15304_v46  ;;  %v9060_v30 = vadd.f32 %v9059_v12, %v8849_v26  ;;  %v18193_v12 = vld [vmem:[#allocation16 + $0x34] ss:$12 sps:$4 sm:$0xff]   ;;  %v9181_v46 = vrot.slane %v9172_v27, %v16450_v20 }
0x1156   :  { %15742 = vrcp.f32 %v9105_v57  ;;  %9584 = vmatprep.subr.bf16.mxu1 %v18045_v36  ;;  %14401 = vmatprep.subr.bf16.mxu0 %v18664_v47  ;;  %v15307_v36 = vld [vmem:[#allocation16 + $0x110] ss:$12 sps:$4 sm:$0xff]  }
0x1157   :  { %15744 = vrcp.f32 %v9115_v8  ;;  %9614 = vmatprep.mubr.bf16.mxu1 %v18663_v59  ;;  %14415 = vmatprep.mubr.msk.bf16.mxu0 %vm16124_vm12, %v18664_v47  ;;  %v9119_v53 = vrot.slane %v9060_v30, 6 }
0x1159   :  { %9585 = vmatpush1.bf16.msra.mxu1 %v18048_v11  ;;  %14402 = vmatpush3.bf16.msra.mxu0 %v15305_v38 }
0x115a   :  { %9586 = vmatprep.subr.bf16.mxu1 %v18052_v13  ;;  %14403 = vmatprep.subr.bf16.mxu0 %v18664_v47  ;;  %v15308_v13 = vld [vmem:[#allocation16 + $0x128] ss:$12 sps:$4 sm:$0xff]  }
0x115d   :  { %9587 = vmatpush1.bf16.msra.mxu1 %v18060_v32  ;;  %14404 = vmatpush3.bf16.msra.mxu0 %v15306_v44 }
0x115e   :  { %9588 = vmatprep.subr.bf16.mxu1 %v18064_v7  ;;  %14405 = vmatprep.subr.bf16.mxu0 %v18664_v47  ;;  %v15309_v7 = vld [vmem:[#allocation16 + $0x140] ss:$12 sps:$4 sm:$0xff]  }
0x1160   :  { %v15743_v16 = vpop.eup %15742 }
0x1161   :  { %v15745_v11 = vpop.eup %15744  ;;  %v9121_v1 = vmul.f32 %v15743_v16, %v9119_v53  ;;  %9589 = vmatpush1.bf16.msra.mxu1 %v18067_v6  ;;  %14406 = vmatpush3.bf16.msra.mxu0 %v15307_v36  ;;  %v15310_v6 = vld [vmem:[#allocation16 + $0x158] ss:$12 sps:$4 sm:$0xff]   ;;  %v9133_v16 = vld [vmem:[#allocation3 + $0x60] sm:$0xc0] }
0x1162   :  { %9590 = vmatprep.subr.bf16.mxu1 %v18071_v61  ;;  %14407 = vmatprep.subr.bf16.mxu0 %v18664_v47  ;;  %v9129_v32 = vmul.f32 %v15745_v11, %v9127_v28  ;;  %v15311_v61 = vld [vmem:[#allocation16 + $0x170] ss:$12 sps:$4 sm:$0xff]  }
0x1163   :  { %v9122_v18 = vadd.f32 %v9121_v1, %v8540_v2  ;;  %v9134_v1 = vld [vmem:[#allocation3 + $0x68] sm:$0xc0] }
0x1165   :  { %15746 = vtanh.f32 %v9122_v18  ;;  %9591 = vmatpush1.bf16.msra.mxu1 %v18075_v45  ;;  %14408 = vmatpush3.bf16.msra.mxu0 %v15308_v13  ;;  %v9124_v45 = vsub.f32 1.0, %v15745_v11 }
0x1166   :  { %9592 = vmatprep.subr.bf16.mxu1 %v18079_v10  ;;  %14409 = vmatprep.subr.bf16.mxu0 %v18664_v47 }
0x1169   :  { %9593 = vmatpush1.bf16.msra.mxu1 %v18082_v4  ;;  %14410 = vmatpush3.bf16.msra.mxu0 %v15309_v7 }
0x116a   :  { %9594 = vmatprep.subr.bf16.mxu1 %v18086_v63  ;;  %14411 = vmatprep.subr.bf16.mxu0 %v18664_v47 }
0x116d   :  { %9595 = vmatpush1.bf16.msra.mxu1 %v18089_v52  ;;  %14412 = vmatpush3.bf16.msra.mxu0 %v15310_v6 }
0x116e   :  { %9596 = vmatprep.subr.bf16.mxu1 %v18093_v40  ;;  %14413 = vmatprep.subr.bf16.mxu0 %v18664_v47  ;;  %v18182_v40 = vld [vmem:[#allocation16 + $0x4] ss:$12 sps:$4 sm:$0xff]  }
0x116f   :  { %v15747_v10 = vpop.eup %15746 }
0x1170   :  { %v9125_v50 = vmul.f32 %v15747_v10, %v9124_v45  ;;  %v9185_v45 = vrot.slane %v9172_v27, %v16455_v23 }
0x1171   :  { %9597 = vmatpush1.bf16.msra.mxu1 %v18096_v29  ;;  %14414 = vmatpush3.bf16.msra.mxu0 %v15311_v61  ;;  %v18184_v29 = vld [vmem:[#allocation16] ss:$12 sps:$4 sm:$0xff]  }
0x1172   :  { %v18173_v4 = vadd.f32 %v9129_v32, %v9125_v50  ;;  %14419 = vmatprep.subr.bf16.mxu0 %v18664_v47  ;;  %9909 = vmatprep.subr.bf16.mxu1 %v18182_v40  ;;  %v18244_v50 = vld [vmem:[#allocation18 + $0x1] ss:$2 sm:$0x7] }
0x1174   :  { %9132 = vst [vmem:[#allocation4 + $0x18] sm:$0xc] %v18173_v4  ;;  %v9401_v63 = vpack.c.bf16 %v18173_v4, %v18173_v4 }
0x1176   :  { %v9452_v52 = vrot.slane %v9401_v63, 1 }
0x1178   :  { %9615 = vmatmul.mubr.bf16.vlgmr.msra.gmra.mrb[148].mxu1 %v9452_v52  ;;  %14416 = vmatmul.mubr.bf16.vlgmr.msra.gmra.mrb[156].mxu0 %v9452_v52 }
0x1179   :  { %9941 = vmatprep.mubr.bf16.mxu1 %v18663_v59  ;;  %14435 = vmatprep.mubr.msk.bf16.mxu0 %vm16124_vm12, %v18664_v47 }
0x117a   :  { %9910 = vmatpush1.bf16.msra.mxu1 %v18184_v29  ;;  %14420 = vmatpush3.bf16.msra.mxu0 %v15315_v51  ;;  %v9692_v51 = vrot.slane %v18141_v9, 6 }
0x117b   :  { %14421 = vmatprep.subr.bf16.mxu0 %v18664_v47  ;;  %9911 = vmatprep.subr.bf16.mxu1 %v18190_v17 }
0x117e   :  { %9912 = vmatpush1.bf16.msra.mxu1 %v18188_v60  ;;  %14422 = vmatpush3.bf16.msra.mxu0 %v15319_v56 }
0x117f   :  { %9913 = vmatprep.subr.bf16.mxu1 %v18193_v12  ;;  %14423 = vmatprep.subr.bf16.mxu0 %v18664_v47 }
0x1182   :  { %9914 = vmatpush1.bf16.msra.mxu1 %v18197_v62  ;;  %14424 = vmatpush3.bf16.msra.mxu0 %v15323_v31 }
0x1183   :  { %14425 = vmatprep.subr.bf16.mxu0 %v18664_v47  ;;  %9915 = vmatprep.subr.bf16.mxu1 %v18203_v22 }
0x1186   :  { %9916 = vmatpush1.bf16.msra.mxu1 %v18205_v42  ;;  %14426 = vmatpush3.bf16.msra.mxu0 %v15327_v35  ;;  %v9439_v35 = vrot.slane %v18244_v50, %v16447_v19 }
0x1187   :  { %14427 = vmatprep.subr.bf16.mxu0 %v18664_v47  ;;  %9917 = vmatprep.subr.bf16.mxu1 %v18209_v3 }
0x118a   :  { %9918 = vmatpush1.bf16.msra.mxu1 %v18212_v15  ;;  %14428 = vmatpush3.bf16.msra.mxu0 %v15331_v14  ;;  %v9135_v14 = vld [vmem:[#allocation3 + $0x70] sm:$0xc0] }
0x118b   :  { %14429 = vmatprep.subr.bf16.mxu0 %v18664_v47  ;;  %9919 = vmatprep.subr.bf16.mxu1 %v18216_v39 }
0x118e   :  { %9920 = vmatpush1.bf16.msra.mxu1 %v18219_v5  ;;  %14430 = vmatpush3.bf16.msra.mxu0 %v15335_v48  ;;  %v9443_v48 = vrot.slane %v18244_v50, %v16450_v20 }
0x118f   :  { %14431 = vmatprep.subr.bf16.mxu0 %v18664_v47  ;;  %9921 = vmatprep.subr.bf16.mxu1 %v18223_v37 }
0x1192   :  { %9922 = vmatpush1.bf16.msra.mxu1 %v18226_v33  ;;  %14432 = vmatpush3.bf16.msra.mxu0 %v15339_v34 }
0x1193   :  { %14433 = vmatprep.subr.bf16.mxu0 %v18664_v47  ;;  %9923 = vmatprep.subr.bf16.mxu1 %v18230_v24 }
0x1196   :  { %9924 = vmatpush1.bf16.msra.mxu1 %v18233_v43  ;;  %14434 = vmatpush3.bf16.msra.mxu0 %v15343_v49 }
0x1197   :  { %14439 = vmatprep.subr.bf16.mxu0 %v18664_v47  ;;  %10168 = vmatprep.subr.bf16.mxu1 %v18237_v21 }
0x1227   :  { %v9354_v0 = vpop.f32.mrb[144].mxu1  ;;  %v9395_v55 = vpop.f32.mrb[152].mxu0 }
0x1228   :  { %v9355_v25 = vadd.f32 %v9354_v0, %v9177_v54  ;;  %v9356_v57 = vpop.f32.mrb[145].mxu1  ;;  %v14397_v8 = vpop.f32.mrb[153].mxu0  ;;  %v9396_v10 = vadd.f32 %v9395_v55, %v9185_v45 }
0x1229   :  { %v9357_v38 = vadd.f32 %v9356_v57, %v9181_v46  ;;  %v9358_v26 = vpop.f32.mrb[146].mxu1  ;;  %v9398_v44 = vpop.f32.mrb[154].mxu0 }
0x122a   :  { %v9664_v30 = vrot.slane %v9355_v25, 2  ;;  %v9359_v36 = vpop.f32.mrb[147].mxu1  ;;  %v14398_v53 = vpop.f32.mrb[155].mxu0  ;;  %v9684_v63 = vrot.slane %v9396_v10, 2  ;;  %v9136_v25 = vld [vmem:[#allocation3 + $0x48] sm:$0x3] }
0x122b   :  { %v9674_v28 = vrot.slane %v9357_v38, 2  ;;  %v9137_v26 = vld [vmem:[#allocation3 + $0x50] sm:$0x3]  ;;  %v18258_v10 = vld [vmem:[#allocation16 + $0xdc] ss:$12 sps:$4 sm:$0xff]  }
0x122c   :  { %v9666_v11 = vadd.f32 %v9664_v30, %v9133_v16 }
0x122d   :  { %v9676_v13 = vadd.f32 %v9674_v28, %v9134_v1 }
0x122e   :  { %v13228_v2 = vmul.f32 -1.442695, %v9666_v11 }
0x122f   :  { %v13229_v32 = vmul.f32 -1.442695, %v9676_v13 }
0x1230   :  { %15748 = vpow2.f32 %v13228_v2 }
0x1231   :  { %15750 = vpow2.f32 %v13229_v32 }
0x123a   :  { %v15749_v18 = vpop.eup %15748 }
0x123b   :  { %v15751_v7 = vpop.eup %15750  ;;  %v9670_v6 = vadd.f32 1.0, %v15749_v18  ;;  %v18256_v18 = vld [vmem:[#allocation16 + $0xc0] ss:$12 sps:$4 sm:$0xff]  }
0x123c   :  { %v9680_v61 = vadd.f32 1.0, %v15751_v7  ;;  %v15347_v7 = vld [vmem:[#allocation16 + $0xc8] ss:$12 sps:$4 sm:$0xff]  }
0x123d   :  { %15752 = vrcp.f32 %v9670_v6 }
0x123e   :  { %15754 = vrcp.f32 %v9680_v61 }
0x1247   :  { %v15753_v52 = vpop.eup %15752 }
0x1248   :  { %v15755_v56 = vpop.eup %15754  ;;  %v9686_v31 = vmul.f32 %v15753_v52, %v9684_v63  ;;  %v18261_v52 = vld [vmem:[#allocation16 + $0xd8] ss:$12 sps:$4 sm:$0xff]  }
0x1249   :  { %v9694_v34 = vmul.f32 %v15755_v56, %v9692_v51  ;;  %v9689_v28 = vsub.f32 1.0, %v15755_v56  ;;  %v15351_v51 = vld [vmem:[#allocation16 + $0xe0] ss:$12 sps:$4 sm:$0xff]  }
0x124a   :  { %v9687_v49 = vadd.f32 %v9686_v31, %v9135_v14  ;;  %v18265_v56 = vld [vmem:[#allocation16 + $0xf4] ss:$12 sps:$4 sm:$0xff]   ;;  %v9447_v31 = vrot.slane %v18244_v50, %v16455_v23  ;;  %v15355_v14 = vld [vmem:[#allocation16 + $0xf8] ss:$12 sps:$4 sm:$0xff]  }
0x124b   :  { %v9616_v27 = vpop.f32.mrb[148].mxu1  ;;  %v9657_v54 = vpop.f32.mrb[156].mxu0 }
0x124c   :  { %15756 = vtanh.f32 %v9687_v49  ;;  %v9617_v46 = vadd.f32 %v9616_v27, %v9439_v35  ;;  %v9618_v0 = vpop.f32.mrb[149].mxu1  ;;  %v14417_v55 = vpop.f32.mrb[157].mxu0  ;;  %v18273_v35 = vld [vmem:[#allocation16 + $0xf0] ss:$12 sps:$4 sm:$0xff]   ;;  %v18280_v49 = vld [vmem:[#allocation16 + $0x108] ss:$12 sps:$4 sm:$0xff]  }
0x124d   :  { %v9619_v57 = vadd.f32 %v9618_v0, %v9443_v48  ;;  %v9620_v9 = vpop.f32.mrb[150].mxu1  ;;  %v9660_v8 = vpop.f32.mrb[158].mxu0  ;;  %v18277_v48 = vld [vmem:[#allocation16 + $0x10c] ss:$12 sps:$4 sm:$0xff]   ;;  %v15359_v27 = vld [vmem:[#allocation16 + $0x110] ss:$12 sps:$4 sm:$0xff]  }
0x124e   :  { %v9696_v38 = vadd.f32 %v9617_v46, %v9136_v25  ;;  %v9621_v44 = vpop.f32.mrb[151].mxu1  ;;  %v14418_v30 = vpop.f32.mrb[159].mxu0  ;;  %v18284_v46 = vld [vmem:[#allocation16 + $0x124] ss:$12 sps:$4 sm:$0xff]   ;;  %v9716_v0 = vrot.slane %v18173_v4, 2 }
0x124f   :  { %v9703_v36 = vadd.f32 %v9619_v57, %v9137_v26  ;;  %v9138_v57 = vld [vmem:[#allocation3 + $0x58] sm:$0x3]  ;;  %v18292_v26 = vld [vmem:[#allocation16 + $0x13c] ss:$12 sps:$4 sm:$0xff]   ;;  %v18295_v4 = vld [vmem:[#allocation16 + $0x138] ss:$12 sps:$4 sm:$0xff]  }
0x1250   :  { %v13230_v53 = vmul.f32 -1.442695, %v9696_v38  ;;  %v18288_v8 = vld [vmem:[#allocation16 + $0x120] ss:$12 sps:$4 sm:$0xff]   ;;  %v15363_v38 = vld [vmem:[#allocation16 + $0x128] ss:$12 sps:$4 sm:$0xff]  }
0x1251   :  { %v13231_v16 = vmul.f32 -1.442695, %v9703_v36  ;;  %v15367_v44 = vld [vmem:[#allocation16 + $0x140] ss:$12 sps:$4 sm:$0xff]   ;;  %v18302_v36 = vld [vmem:[#allocation16 + $0x150] ss:$12 sps:$4 sm:$0xff]  }
0x1252   :  { %15758 = vpow2.f32 %v13230_v53  ;;  %v18299_v30 = vld [vmem:[#allocation16 + $0x154] ss:$12 sps:$4 sm:$0xff]   ;;  %v15371_v53 = vld [vmem:[#allocation16 + $0x158] ss:$12 sps:$4 sm:$0xff]  }
0x1253   :  { %15760 = vpow2.f32 %v13231_v16  ;;  %v18306_v16 = vld [vmem:[#allocation16 + $0x16c] ss:$12 sps:$4 sm:$0xff]  }
0x1256   :  { %v15757_v11 = vpop.eup %15756 }
0x1257   :  { %v9690_v1 = vmul.f32 %v15757_v11, %v9689_v28 }
0x1259   :  { %v18251_v13 = vadd.f32 %v9694_v34, %v9690_v1  ;;  %v9658_v34 = vadd.f32 %v9657_v54, %v9447_v31  ;;  %v18309_v1 = vld [vmem:[#allocation16 + $0x168] ss:$12 sps:$4 sm:$0xff]   ;;  %v9723_v31 = vld [vmem:[#allocation3 + $0x98] sm:$0x3] }
0x125b   :  { %9720 = vst [vmem:[#allocation4 + $0x20] sm:$0xc0] %v18251_v13  ;;  %v9728_v2 = vpack.c.bf16 %v18251_v13, %v18251_v13 }
0x125c   :  { %v15759_v32 = vpop.eup %15758 }
0x125d   :  { %v15761_v6 = vpop.eup %15760  ;;  %v9700_v61 = vadd.f32 1.0, %v15759_v32  ;;  %v9779_v45 = vrot.slane %v9728_v2, 3  ;;  %v15375_v2 = vld [vmem:[#allocation16 + $0x170] ss:$12 sps:$4 sm:$0xff]  }
0x125e   :  { %v9707_v63 = vadd.f32 1.0, %v15761_v6 }
0x125f   :  { %15762 = vrcp.f32 %v9700_v61  ;;  %9942 = vmatmul.mubr.bf16.vlgmr.msra.gmra.mrb[152].mxu1 %v9779_v45  ;;  %14436 = vmatmul.mubr.bf16.vlgmr.msra.gmra.mrb[160].mxu0 %v9779_v45 }
0x1260   :  { %15764 = vrcp.f32 %v9707_v63  ;;  %10169 = vmatpush1.bf16.msra.mxu1 %v18256_v18  ;;  %14440 = vmatpush3.bf16.msra.mxu0 %v15347_v7 }
0x1261   :  { %10170 = vmatprep.subr.bf16.mxu1 %v18258_v10  ;;  %14441 = vmatprep.subr.bf16.mxu0 %v18664_v47 }
0x1262   :  { %10200 = vmatprep.mubr.bf16.mxu1 %v18663_v59  ;;  %14455 = vmatprep.mubr.msk.bf16.mxu0 %vm16124_vm12, %v18664_v47 }
0x1264   :  { %10171 = vmatpush1.bf16.msra.mxu1 %v18261_v52  ;;  %14442 = vmatpush3.bf16.msra.mxu0 %v15351_v51 }
0x1265   :  { %10172 = vmatprep.subr.bf16.mxu1 %v18265_v56  ;;  %14443 = vmatprep.subr.bf16.mxu0 %v18664_v47 }
0x1268   :  { %10173 = vmatpush1.bf16.msra.mxu1 %v18273_v35  ;;  %14444 = vmatpush3.bf16.msra.mxu0 %v15355_v14 }
0x1269   :  { %v15763_v50 = vpop.eup %15762  ;;  %10174 = vmatprep.subr.bf16.mxu1 %v18277_v48  ;;  %14445 = vmatprep.subr.bf16.mxu0 %v18664_v47 }
0x126a   :  { %v15765_v55 = vpop.eup %15764  ;;  %v9710_v25 = vmul.f32 %v15763_v50, %v9658_v34 }
0x126b   :  { %v9718_v9 = vmul.f32 %v15765_v55, %v9716_v0  ;;  %v9713_v28 = vsub.f32 1.0, %v15765_v55 }
0x126c   :  { %v9711_v54 = vadd.f32 %v9710_v25, %v9138_v57  ;;  %10175 = vmatpush1.bf16.msra.mxu1 %v18280_v49  ;;  %14446 = vmatpush3.bf16.msra.mxu0 %v15359_v27 }
0x126d   :  { %10176 = vmatprep.subr.bf16.mxu1 %v18284_v46  ;;  %14447 = vmatprep.subr.bf16.mxu0 %v18664_v47 }
0x126e   :  { %15766 = vtanh.f32 %v9711_v54 }
0x1270   :  { %10177 = vmatpush1.bf16.msra.mxu1 %v18288_v8  ;;  %14448 = vmatpush3.bf16.msra.mxu0 %v15363_v38  ;;  %v10023_v38 = vld [vmem:[#allocation18 + $0x1] ss:$2 sm:$0x7] }
0x1271   :  { %10178 = vmatprep.subr.bf16.mxu1 %v18292_v26  ;;  %14449 = vmatprep.subr.bf16.mxu0 %v18664_v47 }
0x1274   :  { %10179 = vmatpush1.bf16.msra.mxu1 %v18295_v4  ;;  %14450 = vmatpush3.bf16.msra.mxu0 %v15367_v44 }
0x1275   :  { %10180 = vmatprep.subr.bf16.mxu1 %v18299_v30  ;;  %14451 = vmatprep.subr.bf16.mxu0 %v18664_v47 }
0x1278   :  { %v15767_v11 = vpop.eup %15766  ;;  %10181 = vmatpush1.bf16.msra.mxu1 %v18302_v36  ;;  %14452 = vmatpush3.bf16.msra.mxu0 %v15371_v53  ;;  %v10028_v53 = vrot.slane %v10023_v38, %v16447_v19 }
0x1279   :  { %10182 = vmatprep.subr.bf16.mxu1 %v18306_v16  ;;  %14453 = vmatprep.subr.bf16.mxu0 %v18664_v47  ;;  %v9714_v32 = vmul.f32 %v15767_v11, %v9713_v28  ;;  %v10032_v11 = vrot.slane %v10023_v38, %v16450_v20 }
0x127b   :  { %v18313_v7 = vadd.f32 %v9718_v9, %v9714_v32 }
0x127c   :  { %10183 = vmatpush1.bf16.msra.mxu1 %v18309_v1  ;;  %14454 = vmatpush3.bf16.msra.mxu0 %v15375_v2  ;;  %v10269_v2 = vrot.slane %v18251_v13, 6 }
0x127d   :  { %9721 = vst [vmem:[#allocation4 + $0x18] sm:$0x3] %v18313_v7  ;;  %v9990_v6 = vpack.c.bf16 %v18313_v7, %v18313_v7  ;;  %10492 = vmatprep.subr.bf16.mxu1 %v18182_v40  ;;  %14459 = vmatprep.subr.bf16.mxu0 %v18664_v47  ;;  %v15376_v40 = vld [vmem:[#allocation16 + $0x8] ss:$12 sps:$4 sm:$0xff]  }
0x127f   :  { %10201 = vmatmul.mubr.bf16.vlgmr.msra.gmra.mrb[156].mxu1 %v9990_v6  ;;  %14456 = vmatmul.mubr.bf16.vlgmr.msra.gmra.mrb[164].mxu0 %v9990_v6 }
0x1280   :  { %10493 = vmatpush1.bf16.msra.mxu1 %v18184_v29  ;;  %10524 = vmatprep.mubr.bf16.mxu1 %v18663_v59  ;;  %v15377_v29 = vld [vmem:[#allocation16 + $0x20] ss:$12 sps:$4 sm:$0xff]  }
0x1281   :  { %10494 = vmatprep.subr.bf16.mxu1 %v18190_v17  ;;  %14475 = vmatprep.mubr.msk.bf16.mxu0 %vm16124_vm12, %v18664_v47  ;;  %v15379_v17 = vld [vmem:[#allocation16 + $0x50] ss:$12 sps:$4 sm:$0xff]  }
0x1282   :  { %14460 = vmatpush3.bf16.msra.mxu0 %v15376_v40  ;;  %v9724_v40 = vld [vmem:[#allocation3 + $0xa0] sm:$0x3] }
0x1283   :  { %14461 = vmatprep.subr.bf16.mxu0 %v18664_v47 }
0x1284   :  { %10495 = vmatpush1.bf16.msra.mxu1 %v18188_v60  ;;  %v15378_v60 = vld [vmem:[#allocation16 + $0x38] ss:$12 sps:$4 sm:$0xff]  }
0x1285   :  { %10496 = vmatprep.subr.bf16.mxu1 %v18193_v12  ;;  %v15380_v12 = vld [vmem:[#allocation16 + $0x68] ss:$12 sps:$4 sm:$0xff]  }
0x1286   :  { %14462 = vmatpush3.bf16.msra.mxu0 %v15377_v29 }
0x1287   :  { %14463 = vmatprep.subr.bf16.mxu0 %v18664_v47 }
0x1288   :  { %10497 = vmatpush1.bf16.msra.mxu1 %v18197_v62  ;;  %v15381_v62 = vld [vmem:[#allocation16 + $0x80] ss:$12 sps:$4 sm:$0xff]  }
0x1289   :  { %10498 = vmatprep.subr.bf16.mxu1 %v18203_v22  ;;  %v15382_v22 = vld [vmem:[#allocation16 + $0x98] ss:$12 sps:$4 sm:$0xff]  }
0x128a   :  { %14464 = vmatpush3.bf16.msra.mxu0 %v15378_v60 }
0x128b   :  { %14465 = vmatprep.subr.bf16.mxu0 %v18664_v47 }
0x128c   :  { %10499 = vmatpush1.bf16.msra.mxu1 %v18205_v42  ;;  %v15383_v42 = vld [vmem:[#allocation16 + $0xb0] ss:$12 sps:$4 sm:$0xff]  }
0x128d   :  { %10500 = vmatprep.subr.bf16.mxu1 %v18209_v3  ;;  %v9761_v3 = vld [vmem:[#allocation18] ss:$2 sm:$0x7] }
0x128e   :  { %14466 = vmatpush3.bf16.msra.mxu0 %v15379_v17  ;;  %v9774_v54 = vrot.slane %v9761_v3, %v16455_v23 }
0x128f   :  { %14467 = vmatprep.subr.bf16.mxu0 %v18664_v47 }
0x1290   :  { %10501 = vmatpush1.bf16.msra.mxu1 %v18212_v15  ;;  %v9766_v15 = vrot.slane %v9761_v3, %v16447_v19 }
0x1291   :  { %10502 = vmatprep.subr.bf16.mxu1 %v18216_v39  ;;  %v9770_v39 = vrot.slane %v9761_v3, %v16450_v20 }
0x1292   :  { %14468 = vmatpush3.bf16.msra.mxu0 %v15380_v12 }
0x1293   :  { %14469 = vmatprep.subr.bf16.mxu0 %v18664_v47 }
0x1294   :  { %10503 = vmatpush1.bf16.msra.mxu1 %v18219_v5 }
0x1295   :  { %10504 = vmatprep.subr.bf16.mxu1 %v18223_v37 }
0x1296   :  { %14470 = vmatpush3.bf16.msra.mxu0 %v15381_v62 }
0x1297   :  { %14471 = vmatprep.subr.bf16.mxu0 %v18664_v47 }
0x1298   :  { %10505 = vmatpush1.bf16.msra.mxu1 %v18226_v33 }
0x1299   :  { %10506 = vmatprep.subr.bf16.mxu1 %v18230_v24 }
0x129a   :  { %14472 = vmatpush3.bf16.msra.mxu0 %v15382_v22 }
0x129b   :  { %14473 = vmatprep.subr.bf16.mxu0 %v18664_v47 }
0x129c   :  { %10507 = vmatpush1.bf16.msra.mxu1 %v18233_v43 }
0x129d   :  { %10754 = vmatprep.subr.bf16.mxu1 %v18237_v21  ;;  %v9722_v21 = vld [vmem:[#allocation3 + $0x90] sm:$0x3] }
0x129e   :  { %14474 = vmatpush3.bf16.msra.mxu0 %v15383_v42 }
0x129f   :  { %14479 = vmatprep.subr.bf16.mxu0 %v18664_v47 }
0x1332   :  { %v9943_v5 = vpop.f32.mrb[152].mxu1  ;;  %v9984_v37 = vpop.f32.mrb[160].mxu0 }
0x1333   :  { %v9944_v33 = vadd.f32 %v9943_v5, %v9766_v15  ;;  %v9945_v24 = vpop.f32.mrb[153].mxu1  ;;  %v14437_v43 = vpop.f32.mrb[161].mxu0  ;;  %v9985_v44 = vadd.f32 %v9984_v37, %v9774_v54  ;;  %v10036_v54 = vrot.slane %v10023_v38, %v16455_v23 }
0x1334   :  { %v9946_v61 = vadd.f32 %v9945_v24, %v9770_v39  ;;  %v9947_v45 = vpop.f32.mrb[154].mxu1  ;;  %v9987_v63 = vpop.f32.mrb[162].mxu0  ;;  %v9725_v24 = vld [vmem:[#allocation3 + $0x18] sm:$0xc0] }
0x1335   :  { %v10249_v51 = vadd.f32 %v9944_v33, %v9722_v21  ;;  %v9948_v14 = vpop.f32.mrb[155].mxu1  ;;  %v14438_v34 = vpop.f32.mrb[163].mxu0  ;;  %v9726_v21 = vld [vmem:[#allocation3 + $0x20] sm:$0xc0] }
0x1336   :  { %v10256_v27 = vadd.f32 %v9946_v61, %v9723_v31 }
0x1337   :  { %v13280_v50 = vmul.f32 -1.442695, %v10249_v51 }
0x1338   :  { %v13281_v0 = vmul.f32 -1.442695, %v10256_v27  ;;  %v15384_v27 = vld [vmem:[#allocation16 + $0xc8] ss:$12 sps:$4 sm:$0xff]  }
0x1339   :  { %15768 = vpow2.f32 %v13280_v50 }
0x133a   :  { %15770 = vpow2.f32 %v13281_v0 }
0x1343   :  { %v15769_v55 = vpop.eup %15768 }
0x1344   :  { %v15771_v25 = vpop.eup %15770  ;;  %v10253_v57 = vadd.f32 1.0, %v15769_v55 }
0x1345   :  { %v10260_v9 = vadd.f32 1.0, %v15771_v25 }
0x1346   :  { %15772 = vrcp.f32 %v10253_v57 }
0x1347   :  { %15774 = vrcp.f32 %v10260_v9  ;;  %v15385_v9 = vld [vmem:[#allocation16 + $0xe0] ss:$12 sps:$4 sm:$0xff]  }
0x1350   :  { %v15773_v28 = vpop.eup %15772 }
0x1351   :  { %v15775_v32 = vpop.eup %15774  ;;  %v10263_v6 = vmul.f32 %v15773_v28, %v9985_v44  ;;  %v15386_v44 = vld [vmem:[#allocation16 + $0xf8] ss:$12 sps:$4 sm:$0xff]   ;;  %v10302_v28 = vrot.slane %v18313_v7, 2 }
0x1352   :  { %v10202_v29 = vpop.f32.mrb[156].mxu1  ;;  %v10243_v60 = vpop.f32.mrb[164].mxu0  ;;  %v10271_v17 = vmul.f32 %v15775_v32, %v10269_v2  ;;  %v10266_v51 = vsub.f32 1.0, %v15775_v32  ;;  %v9727_v2 = vld [vmem:[#allocation3 + $0x28] sm:$0xc0] }
0x1353   :  { %v10264_v12 = vadd.f32 %v10263_v6, %v9724_v40  ;;  %v10203_v62 = vadd.f32 %v10202_v29, %v10028_v53  ;;  %v10204_v22 = vpop.f32.mrb[157].mxu1  ;;  %v14457_v42 = vpop.f32.mrb[165].mxu0  ;;  %v15395_v6 = vld [vmem:[#allocation16 + $0x8] ss:$12 sps:$4 sm:$0xff]   ;;  %v15399_v29 = vld [vmem:[#allocation16 + $0x20] ss:$12 sps:$4 sm:$0xff]  }
0x1354   :  { %v10205_v3 = vadd.f32 %v10204_v22, %v10032_v11  ;;  %v10206_v15 = vpop.f32.mrb[158].mxu1  ;;  %v10246_v39 = vpop.f32.mrb[166].mxu0  ;;  %v18399_v40 = vld [vmem:[#allocation16 + $0x1c] ss:$12 sps:$4 sm:$0xff]   ;;  %v18416_v22 = vld [vmem:[#allocation16 + $0x4c] ss:$12 sps:$4 sm:$0xff]  }
0x1355   :  { %15776 = vtanh.f32 %v10264_v12  ;;  %v10274_v5 = vrot.slane %v10203_v62, 2  ;;  %v10207_v37 = vpop.f32.mrb[159].mxu1  ;;  %v14458_v33 = vpop.f32.mrb[167].mxu0  ;;  %v15403_v12 = vld [vmem:[#allocation16 + $0x38] ss:$12 sps:$4 sm:$0xff]  }
0x1356   :  { %v10284_v43 = vrot.slane %v10205_v3, 2  ;;  %v18410_v62 = vld [vmem:[#allocation16 + $0x30] ss:$12 sps:$4 sm:$0xff]   ;;  %v18418_v42 = vld [vmem:[#allocation16 + $0x48] ss:$12 sps:$4 sm:$0xff]  }
0x1357   :  { %v10276_v13 = vadd.f32 %v10274_v5, %v9725_v24  ;;  %v15407_v3 = vld [vmem:[#allocation16 + $0x50] ss:$12 sps:$4 sm:$0xff]   ;;  %v18425_v39 = vld [vmem:[#allocation16 + $0x60] ss:$12 sps:$4 sm:$0xff]   ;;  %v15411_v5 = vld [vmem:[#allocation16 + $0x68] ss:$12 sps:$4 sm:$0xff]  }
0x1358   :  { %v10286_v61 = vadd.f32 %v10284_v43, %v9726_v21  ;;  %v18422_v15 = vld [vmem:[#allocation16 + $0x64] ss:$12 sps:$4 sm:$0xff]   ;;  %v18429_v37 = vld [vmem:[#allocation16 + $0x7c] ss:$12 sps:$4 sm:$0xff]   ;;  %v15415_v24 = vld [vmem:[#allocation16 + $0x80] ss:$12 sps:$4 sm:$0xff]  }
0x1359   :  { %v13282_v45 = vmul.f32 -1.442695, %v10276_v13  ;;  %v18432_v33 = vld [vmem:[#allocation16 + $0x78] ss:$12 sps:$4 sm:$0xff]   ;;  %v18436_v43 = vld [vmem:[#allocation16 + $0x94] ss:$12 sps:$4 sm:$0xff]  }
0x135a   :  { %v13283_v63 = vmul.f32 -1.442695, %v10286_v61  ;;  %v18439_v13 = vld [vmem:[#allocation16 + $0x90] ss:$12 sps:$4 sm:$0xff]   ;;  %v15419_v21 = vld [vmem:[#allocation16 + $0x98] ss:$12 sps:$4 sm:$0xff]  }
0x135b   :  { %15778 = vpow2.f32 %v13282_v45  ;;  %v18443_v61 = vld [vmem:[#allocation16 + $0xac] ss:$12 sps:$4 sm:$0xff]   ;;  %v18446_v45 = vld [vmem:[#allocation16 + $0xa8] ss:$12 sps:$4 sm:$0xff]  }
0x135c   :  { %15780 = vpow2.f32 %v13283_v63  ;;  %v15423_v63 = vld [vmem:[#allocation16 + $0xb0] ss:$12 sps:$4 sm:$0xff]  }
0x135f   :  { %v15777_v31 = vpop.eup %15776 }
0x1360   :  { %v10267_v14 = vmul.f32 %v15777_v31, %v10266_v51  ;;  %v18451_v51 = vld [vmem:[#allocation16 + $0xc4] ss:$12 sps:$4 sm:$0xff]  }
0x1361   :  { %v10347_v31 = vld [vmem:[#allocation18] ss:$2 sm:$0x7] }
0x1362   :  { %v18354_v34 = vadd.f32 %v10271_v17, %v10267_v14  ;;  %v18407_v17 = vld [vmem:[#allocation16 + $0x34] ss:$12 sps:$4 sm:$0xff]   ;;  %v10352_v14 = vrot.slane %v10347_v31, %v16447_v19 }
0x1364   :  { %10306 = vst [vmem:[#allocation4 + $0x30] sm:$0x3] %v18354_v34  ;;  %v10314_v50 = vpack.c.bf16 %v18354_v34, %v18354_v34 }
0x1365   :  { %v15779_v0 = vpop.eup %15778 }
0x1366   :  { %v15781_v55 = vpop.eup %15780  ;;  %v10280_v25 = vadd.f32 1.0, %v15779_v0  ;;  %10525 = vmatmul.mubr.bf16.vlgmr.msra.gmra.mrb[160].mxu1 %v10314_v50  ;;  %14476 = vmatmul.mubr.bf16.vlgmr.msra.gmra.mrb[168].mxu0 %v10314_v50 }
0x1367   :  { %v10290_v57 = vadd.f32 1.0, %v15781_v55  ;;  %10755 = vmatpush1.bf16.msra.mxu1 %v18256_v18  ;;  %14480 = vmatpush3.bf16.msra.mxu0 %v15384_v27  ;;  %v10244_v18 = vadd.f32 %v10243_v60, %v10036_v54  ;;  %v18403_v60 = vld [vmem:[#allocation16 + $0x18] ss:$12 sps:$4 sm:$0xff]   ;;  %v10356_v27 = vrot.slane %v10347_v31, %v16450_v20 }
0x1368   :  { %15782 = vrcp.f32 %v10280_v25  ;;  %10756 = vmatprep.subr.bf16.mxu1 %v18258_v10  ;;  %14481 = vmatprep.subr.bf16.mxu0 %v18664_v47  ;;  %v15387_v10 = vld [vmem:[#allocation16 + $0x110] ss:$12 sps:$4 sm:$0xff]  }
0x1369   :  { %15784 = vrcp.f32 %v10290_v57  ;;  %10786 = vmatprep.mubr.bf16.mxu1 %v18663_v59  ;;  %14495 = vmatprep.mubr.msk.bf16.mxu0 %vm16124_vm12, %v18664_v47  ;;  %v10294_v38 = vrot.slane %v10244_v18, 2 }
0x136b   :  { %10757 = vmatpush1.bf16.msra.mxu1 %v18261_v52  ;;  %14482 = vmatpush3.bf16.msra.mxu0 %v15385_v9 }
0x136c   :  { %10758 = vmatprep.subr.bf16.mxu1 %v18265_v56  ;;  %14483 = vmatprep.subr.bf16.mxu0 %v18664_v47  ;;  %v15388_v56 = vld [vmem:[#allocation16 + $0x128] ss:$12 sps:$4 sm:$0xff]  }
0x136f   :  { %10759 = vmatpush1.bf16.msra.mxu1 %v18273_v35  ;;  %14484 = vmatpush3.bf16.msra.mxu0 %v15386_v44 }
0x1370   :  { %10760 = vmatprep.subr.bf16.mxu1 %v18277_v48  ;;  %14485 = vmatprep.subr.bf16.mxu0 %v18664_v47  ;;  %v15389_v48 = vld [vmem:[#allocation16 + $0x140] ss:$12 sps:$4 sm:$0xff]  }
0x1372   :  { %v15783_v53 = vpop.eup %15782 }
0x1373   :  { %v15785_v52 = vpop.eup %15784  ;;  %v10296_v11 = vmul.f32 %v15783_v53, %v10294_v38  ;;  %10761 = vmatpush1.bf16.msra.mxu1 %v18280_v49  ;;  %14486 = vmatpush3.bf16.msra.mxu0 %v15387_v10  ;;  %v15390_v49 = vld [vmem:[#allocation16 + $0x158] ss:$12 sps:$4 sm:$0xff]   ;;  %v10308_v53 = vld [vmem:[#allocation3 + $0x90] sm:$0xc] }
0x1374   :  { %10762 = vmatprep.subr.bf16.mxu1 %v18284_v46  ;;  %14487 = vmatprep.subr.bf16.mxu0 %v18664_v47  ;;  %v10304_v35 = vmul.f32 %v15785_v52, %v10302_v28  ;;  %v15391_v46 = vld [vmem:[#allocation16 + $0x170] ss:$12 sps:$4 sm:$0xff]  }
0x1375   :  { %v10297_v32 = vadd.f32 %v10296_v11, %v9727_v2  ;;  %v10309_v11 = vld [vmem:[#allocation3 + $0x98] sm:$0xc] }
0x1377   :  { %15786 = vtanh.f32 %v10297_v32  ;;  %10763 = vmatpush1.bf16.msra.mxu1 %v18288_v8  ;;  %14488 = vmatpush3.bf16.msra.mxu0 %v15388_v56  ;;  %v10299_v8 = vsub.f32 1.0, %v15785_v52 }
0x1378   :  { %10764 = vmatprep.subr.bf16.mxu1 %v18292_v26  ;;  %14489 = vmatprep.subr.bf16.mxu0 %v18664_v47 }
0x137b   :  { %10765 = vmatpush1.bf16.msra.mxu1 %v18295_v4  ;;  %14490 = vmatpush3.bf16.msra.mxu0 %v15389_v48 }
0x137c   :  { %10766 = vmatprep.subr.bf16.mxu1 %v18299_v30  ;;  %14491 = vmatprep.subr.bf16.mxu0 %v18664_v47 }
0x137f   :  { %10767 = vmatpush1.bf16.msra.mxu1 %v18302_v36  ;;  %14492 = vmatpush3.bf16.msra.mxu0 %v15390_v49 }
0x1380   :  { %10768 = vmatprep.subr.bf16.mxu1 %v18306_v16  ;;  %14493 = vmatprep.subr.bf16.mxu0 %v18664_v47  ;;  %v18395_v16 = vld [vmem:[#allocation16] ss:$12 sps:$4 sm:$0xff]  }
0x1381   :  { %v15787_v26 = vpop.eup %15786 }
0x1382   :  { %v10300_v7 = vmul.f32 %v15787_v26, %v10299_v8  ;;  %v10360_v8 = vrot.slane %v10347_v31, %v16455_v23 }
0x1383   :  { %10769 = vmatpush1.bf16.msra.mxu1 %v18309_v1  ;;  %14494 = vmatpush3.bf16.msra.mxu0 %v15391_v46  ;;  %v18397_v1 = vld [vmem:[#allocation16 + $0x4] ss:$12 sps:$4 sm:$0xff]  }
0x1384   :  { %v18386_v4 = vadd.f32 %v10304_v35, %v10300_v7  ;;  %14499 = vmatprep.subr.bf16.mxu0 %v18664_v47  ;;  %11090 = vmatprep.subr.bf16.mxu1 %v18397_v1  ;;  %v18457_v7 = vld [vmem:[#allocation18 + $0x1] ss:$2 sm:$0x7] }
0x1386   :  { %10307 = vst [vmem:[#allocation4 + $0x8] sm:$0xc0] %v18386_v4  ;;  %v10573_v30 = vpack.c.bf16 %v18386_v4, %v18386_v4 }
0x1388   :  { %v10624_v36 = vrot.slane %v10573_v30, 3 }
0x138a   :  { %10787 = vmatmul.mubr.bf16.vlgmr.msra.gmra.mrb[164].mxu1 %v10624_v36  ;;  %14496 = vmatmul.mubr.bf16.vlgmr.msra.gmra.mrb[172].mxu0 %v10624_v36 }
0x138b   :  { %11122 = vmatprep.mubr.bf16.mxu1 %v18663_v59  ;;  %14515 = vmatprep.mubr.msk.bf16.mxu0 %vm16124_vm12, %v18664_v47 }
0x138c   :  { %14500 = vmatpush3.bf16.msra.mxu0 %v15395_v6  ;;  %11091 = vmatpush1.bf16.msra.mxu1 %v18395_v16  ;;  %v10864_v6 = vrot.slane %v18354_v34, 6 }
0x138d   :  { %14501 = vmatprep.subr.bf16.mxu0 %v18664_v47  ;;  %11092 = vmatprep.subr.bf16.mxu1 %v18399_v40 }
0x1390   :  { %14502 = vmatpush3.bf16.msra.mxu0 %v15399_v29  ;;  %11093 = vmatpush1.bf16.msra.mxu1 %v18403_v60 }
0x1391   :  { %14503 = vmatprep.subr.bf16.mxu0 %v18664_v47  ;;  %11094 = vmatprep.subr.bf16.mxu1 %v18407_v17 }
0x1394   :  { %14504 = vmatpush3.bf16.msra.mxu0 %v15403_v12  ;;  %11095 = vmatpush1.bf16.msra.mxu1 %v18410_v62 }
0x1395   :  { %14505 = vmatprep.subr.bf16.mxu0 %v18664_v47  ;;  %11096 = vmatprep.subr.bf16.mxu1 %v18416_v22 }
0x1398   :  { %11097 = vmatpush1.bf16.msra.mxu1 %v18418_v42  ;;  %14506 = vmatpush3.bf16.msra.mxu0 %v15407_v3  ;;  %v10611_v3 = vrot.slane %v18457_v7, %v16447_v19 }
0x1399   :  { %14507 = vmatprep.subr.bf16.mxu0 %v18664_v47  ;;  %11098 = vmatprep.subr.bf16.mxu1 %v18422_v15 }
0x139c   :  { %11099 = vmatpush1.bf16.msra.mxu1 %v18425_v39  ;;  %14508 = vmatpush3.bf16.msra.mxu0 %v15411_v5  ;;  %v10310_v5 = vld [vmem:[#allocation3 + $0xa0] sm:$0xc] }
0x139d   :  { %14509 = vmatprep.subr.bf16.mxu0 %v18664_v47  ;;  %11100 = vmatprep.subr.bf16.mxu1 %v18429_v37 }
0x13a0   :  { %11101 = vmatpush1.bf16.msra.mxu1 %v18432_v33  ;;  %14510 = vmatpush3.bf16.msra.mxu0 %v15415_v24  ;;  %v10615_v24 = vrot.slane %v18457_v7, %v16450_v20 }
0x13a1   :  { %14511 = vmatprep.subr.bf16.mxu0 %v18664_v47  ;;  %11102 = vmatprep.subr.bf16.mxu1 %v18436_v43 }
0x13a4   :  { %11103 = vmatpush1.bf16.msra.mxu1 %v18439_v13  ;;  %14512 = vmatpush3.bf16.msra.mxu0 %v15419_v21 }
0x13a5   :  { %14513 = vmatprep.subr.bf16.mxu0 %v18664_v47  ;;  %11104 = vmatprep.subr.bf16.mxu1 %v18443_v61 }
0x13a8   :  { %11105 = vmatpush1.bf16.msra.mxu1 %v18446_v45  ;;  %14514 = vmatpush3.bf16.msra.mxu0 %v15423_v63 }
0x13a9   :  { %14519 = vmatprep.subr.bf16.mxu0 %v18664_v47  ;;  %11352 = vmatprep.subr.bf16.mxu1 %v18451_v51 }
0x1439   :  { %v10526_v50 = vpop.f32.mrb[160].mxu1  ;;  %v10567_v0 = vpop.f32.mrb[168].mxu0 }
0x143a   :  { %v10527_v55 = vadd.f32 %v10526_v50, %v10352_v14  ;;  %v10528_v25 = vpop.f32.mrb[161].mxu1  ;;  %v14477_v57 = vpop.f32.mrb[169].mxu0  ;;  %v10568_v26 = vadd.f32 %v10567_v0, %v10360_v8  ;;  %v18471_v8 = vld [vmem:[#allocation16 + $0xdc] ss:$12 sps:$4 sm:$0xff]  }
0x143b   :  { %v10529_v9 = vadd.f32 %v10528_v25, %v10356_v27  ;;  %v10530_v54 = vpop.f32.mrb[162].mxu1  ;;  %v10570_v44 = vpop.f32.mrb[170].mxu0 }
0x143c   :  { %v10836_v18 = vrot.slane %v10527_v55, 6  ;;  %v10531_v10 = vpop.f32.mrb[163].mxu1  ;;  %v14478_v38 = vpop.f32.mrb[171].mxu0  ;;  %v10856_v30 = vrot.slane %v10568_v26, 6  ;;  %v10311_v44 = vld [vmem:[#allocation3 + $0x18] sm:$0x30] }
0x143d   :  { %v10846_v28 = vrot.slane %v10529_v9, 6  ;;  %v10312_v38 = vld [vmem:[#allocation3 + $0x20] sm:$0x30] }
0x143e   :  { %v10838_v52 = vadd.f32 %v10836_v18, %v10308_v53 }
0x143f   :  { %v10848_v56 = vadd.f32 %v10846_v28, %v10309_v11 }
0x1440   :  { %v13332_v2 = vmul.f32 -1.442695, %v10838_v52 }
0x1441   :  { %v13333_v35 = vmul.f32 -1.442695, %v10848_v56 }
0x1442   :  { %15788 = vpow2.f32 %v13332_v2 }
0x1443   :  { %15790 = vpow2.f32 %v13333_v35 }
0x144c   :  { %v15789_v32 = vpop.eup %15788 }
0x144d   :  { %v15791_v48 = vpop.eup %15790  ;;  %v10842_v49 = vadd.f32 1.0, %v15789_v32 }
0x144e   :  { %v10852_v46 = vadd.f32 1.0, %v15791_v48  ;;  %v18469_v48 = vld [vmem:[#allocation16 + $0xc0] ss:$12 sps:$4 sm:$0xff]  }
0x144f   :  { %15792 = vrcp.f32 %v10842_v49  ;;  %v15427_v49 = vld [vmem:[#allocation16 + $0xc8] ss:$12 sps:$4 sm:$0xff]  }
0x1450   :  { %15794 = vrcp.f32 %v10852_v46 }
0x1459   :  { %v15793_v36 = vpop.eup %15792 }
0x145a   :  { %v15795_v29 = vpop.eup %15794  ;;  %v10858_v12 = vmul.f32 %v15793_v36, %v10856_v30 }
0x145b   :  { %v10866_v21 = vmul.f32 %v15795_v29, %v10864_v6  ;;  %v10861_v11 = vsub.f32 1.0, %v15795_v29  ;;  %v18474_v29 = vld [vmem:[#allocation16 + $0xd8] ss:$12 sps:$4 sm:$0xff]  }
0x145c   :  { %v10859_v63 = vadd.f32 %v10858_v12, %v10310_v5  ;;  %v15431_v12 = vld [vmem:[#allocation16 + $0xe0] ss:$12 sps:$4 sm:$0xff]   ;;  %v10619_v5 = vrot.slane %v18457_v7, %v16455_v23  ;;  %v18493_v7 = vld [vmem:[#allocation16 + $0x108] ss:$12 sps:$4 sm:$0xff]  }
0x145d   :  { %v10788_v31 = vpop.f32.mrb[164].mxu1  ;;  %v10829_v14 = vpop.f32.mrb[172].mxu0 }
0x145e   :  { %15796 = vtanh.f32 %v10859_v63  ;;  %v10789_v27 = vadd.f32 %v10788_v31, %v10611_v3  ;;  %v10790_v50 = vpop.f32.mrb[165].mxu1  ;;  %v14497_v0 = vpop.f32.mrb[173].mxu0  ;;  %v18478_v3 = vld [vmem:[#allocation16 + $0xf4] ss:$12 sps:$4 sm:$0xff]   ;;  %v18490_v63 = vld [vmem:[#allocation16 + $0x10c] ss:$12 sps:$4 sm:$0xff]   ;;  %v10830_v31 = vadd.f32 %v10829_v14, %v10619_v5 }
0x145f   :  { %v10791_v55 = vadd.f32 %v10790_v50, %v10615_v24  ;;  %v10792_v25 = vpop.f32.mrb[166].mxu1  ;;  %v10832_v34 = vpop.f32.mrb[174].mxu0  ;;  %v18486_v24 = vld [vmem:[#allocation16 + $0xf0] ss:$12 sps:$4 sm:$0xff]   ;;  %v18501_v14 = vld [vmem:[#allocation16 + $0x120] ss:$12 sps:$4 sm:$0xff]  }
0x1460   :  { %v10869_v57 = vrot.slane %v10789_v27, 4  ;;  %v10793_v9 = vpop.f32.mrb[167].mxu1  ;;  %v14498_v54 = vpop.f32.mrb[175].mxu0  ;;  %v15439_v27 = vld [vmem:[#allocation16 + $0x110] ss:$12 sps:$4 sm:$0xff]   ;;  %v10889_v0 = vrot.slane %v10830_v31, 4 }
0x1461   :  { %v10879_v18 = vrot.slane %v10791_v55, 4  ;;  %v18497_v50 = vld [vmem:[#allocation16 + $0x124] ss:$12 sps:$4 sm:$0xff]   ;;  %v10897_v25 = vrot.slane %v18386_v4, 2  ;;  %v15443_v9 = vld [vmem:[#allocation16 + $0x128] ss:$12 sps:$4 sm:$0xff]  }
0x1462   :  { %v10871_v10 = vadd.f32 %v10869_v57, %v10311_v44  ;;  %v10313_v54 = vld [vmem:[#allocation3 + $0x28] sm:$0x30]  ;;  %v18505_v44 = vld [vmem:[#allocation16 + $0x13c] ss:$12 sps:$4 sm:$0xff]   ;;  %v18508_v4 = vld [vmem:[#allocation16 + $0x138] ss:$12 sps:$4 sm:$0xff]  }
0x1463   :  { %v10881_v53 = vadd.f32 %v10879_v18, %v10312_v38  ;;  %v15447_v38 = vld [vmem:[#allocation16 + $0x140] ss:$12 sps:$4 sm:$0xff]  }
0x1464   :  { %v13334_v28 = vmul.f32 -1.442695, %v10871_v10 }
0x1465   :  { %v13335_v52 = vmul.f32 -1.442695, %v10881_v53  ;;  %v18512_v53 = vld [vmem:[#allocation16 + $0x154] ss:$12 sps:$4 sm:$0xff]  }
0x1466   :  { %15798 = vpow2.f32 %v13334_v28  ;;  %v18515_v28 = vld [vmem:[#allocation16 + $0x150] ss:$12 sps:$4 sm:$0xff]  }
0x1467   :  { %15800 = vpow2.f32 %v13335_v52  ;;  %v15451_v52 = vld [vmem:[#allocation16 + $0x158] ss:$12 sps:$4 sm:$0xff]  }
0x1468   :  { %v15797_v56 = vpop.eup %15796 }
0x1469   :  { %v10862_v2 = vmul.f32 %v15797_v56, %v10861_v11  ;;  %v18519_v11 = vld [vmem:[#allocation16 + $0x16c] ss:$12 sps:$4 sm:$0xff]   ;;  %v18522_v56 = vld [vmem:[#allocation16 + $0x168] ss:$12 sps:$4 sm:$0xff]  }
0x146b   :  { %v18464_v35 = vadd.f32 %v10866_v21, %v10862_v2  ;;  %v15435_v21 = vld [vmem:[#allocation16 + $0xf8] ss:$12 sps:$4 sm:$0xff]   ;;  %v15455_v2 = vld [vmem:[#allocation16 + $0x170] ss:$12 sps:$4 sm:$0xff]  }
0x146d   :  { %10901 = vst [vmem:[#allocation4 + $0x30] sm:$0xc] %v18464_v35  ;;  %v10909_v32 = vpack.c.bf16 %v18464_v35, %v18464_v35 }
0x146f   :  { %v10960_v46 = vrot.slane %v10909_v32, 1 }
0x1470   :  { %v15799_v26 = vpop.eup %15798 }
0x1471   :  { %v15801_v30 = vpop.eup %15800  ;;  %v10875_v36 = vadd.f32 1.0, %v15799_v26  ;;  %11123 = vmatmul.mubr.bf16.vlgmr.msra.gmra.mrb[168].mxu1 %v10960_v46  ;;  %14516 = vmatmul.mubr.bf16.vlgmr.msra.gmra.mrb[176].mxu0 %v10960_v46 }
0x1472   :  { %v10885_v6 = vadd.f32 1.0, %v15801_v30  ;;  %11353 = vmatpush1.bf16.msra.mxu1 %v18469_v48  ;;  %14520 = vmatpush3.bf16.msra.mxu0 %v15427_v49 }
0x1473   :  { %15802 = vrcp.f32 %v10875_v36  ;;  %11354 = vmatprep.subr.bf16.mxu1 %v18471_v8  ;;  %14521 = vmatprep.subr.bf16.mxu0 %v18664_v47 }
0x1474   :  { %15804 = vrcp.f32 %v10885_v6  ;;  %11384 = vmatprep.mubr.bf16.mxu1 %v18663_v59  ;;  %14535 = vmatprep.mubr.msk.bf16.mxu0 %vm16124_vm12, %v18664_v47 }
0x1476   :  { %11355 = vmatpush1.bf16.msra.mxu1 %v18474_v29  ;;  %14522 = vmatpush3.bf16.msra.mxu0 %v15431_v12 }
0x1477   :  { %11356 = vmatprep.subr.bf16.mxu1 %v18478_v3  ;;  %14523 = vmatprep.subr.bf16.mxu0 %v18664_v47 }
0x147a   :  { %11357 = vmatpush1.bf16.msra.mxu1 %v18486_v24  ;;  %14524 = vmatpush3.bf16.msra.mxu0 %v15435_v21 }
0x147b   :  { %11358 = vmatprep.subr.bf16.mxu1 %v18490_v63  ;;  %14525 = vmatprep.subr.bf16.mxu0 %v18664_v47 }
0x147d   :  { %v15803_v55 = vpop.eup %15802 }
0x147e   :  { %v15805_v34 = vpop.eup %15804  ;;  %v10891_v57 = vmul.f32 %v15803_v55, %v10889_v0  ;;  %11359 = vmatpush1.bf16.msra.mxu1 %v18493_v7  ;;  %14526 = vmatpush3.bf16.msra.mxu0 %v15439_v27  ;;  %v10903_v27 = vld [vmem:[#allocation3 + $0x90] sm:$0x30] }
0x147f   :  { %11360 = vmatprep.subr.bf16.mxu1 %v18497_v50  ;;  %14527 = vmatprep.subr.bf16.mxu0 %v18664_v47  ;;  %v10899_v18 = vmul.f32 %v15805_v34, %v10897_v25  ;;  %v10894_v32 = vsub.f32 1.0, %v15805_v34  ;;  %v10904_v25 = vld [vmem:[#allocation3 + $0x98] sm:$0x30] }
0x1480   :  { %v10892_v10 = vadd.f32 %v10891_v57, %v10313_v54 }
0x1482   :  { %15806 = vtanh.f32 %v10892_v10  ;;  %11361 = vmatpush1.bf16.msra.mxu1 %v18501_v14  ;;  %14528 = vmatpush3.bf16.msra.mxu0 %v15443_v9 }
0x1483   :  { %11362 = vmatprep.subr.bf16.mxu1 %v18505_v44  ;;  %14529 = vmatprep.subr.bf16.mxu0 %v18664_v47 }
0x1486   :  { %11363 = vmatpush1.bf16.msra.mxu1 %v18508_v4  ;;  %14530 = vmatpush3.bf16.msra.mxu0 %v15447_v38 }
0x1487   :  { %11364 = vmatprep.subr.bf16.mxu1 %v18512_v53  ;;  %14531 = vmatprep.subr.bf16.mxu0 %v18664_v47 }
0x148a   :  { %11365 = vmatpush1.bf16.msra.mxu1 %v18515_v28  ;;  %14532 = vmatpush3.bf16.msra.mxu0 %v15451_v52 }
0x148b   :  { %11366 = vmatprep.subr.bf16.mxu1 %v18519_v11  ;;  %14533 = vmatprep.subr.bf16.mxu0 %v18664_v47 }
0x148c   :  { %v15807_v49 = vpop.eup %15806 }
0x148d   :  { %v10895_v46 = vmul.f32 %v15807_v49, %v10894_v32  ;;  %v11204_v32 = vld [vmem:[#allocation18 + $0x1] ss:$2 sm:$0x7] }
0x148e   :  { %11367 = vmatpush1.bf16.msra.mxu1 %v18522_v56  ;;  %14534 = vmatpush3.bf16.msra.mxu0 %v15455_v2 }
0x148f   :  { %v18527_v26 = vadd.f32 %v10899_v18, %v10895_v46  ;;  %11688 = vmatprep.subr.bf16.mxu1 %v18397_v1  ;;  %14539 = vmatprep.subr.bf16.mxu0 %v18664_v47  ;;  %v15457_v1 = vld [vmem:[#allocation16 + $0x20] ss:$12 sps:$4 sm:$0xff]  }
0x1491   :  { %10902 = vst [vmem:[#allocation4 + $0x8] sm:$0x30] %v18527_v26  ;;  %v11171_v30 = vpack.c.bf16 %v18527_v26, %v18527_v26 }
0x1493   :  { %v11222_v36 = vrot.slane %v11171_v30, 2  ;;  %v11462_v30 = vrot.slane %v18464_v35, 6 }
0x1495   :  { %11385 = vmatmul.mubr.bf16.vlgmr.msra.gmra.mrb[172].mxu1 %v11222_v36  ;;  %14536 = vmatmul.mubr.bf16.vlgmr.msra.gmra.mrb[180].mxu0 %v11222_v36 }
0x1496   :  { %11689 = vmatpush1.bf16.msra.mxu1 %v18395_v16  ;;  %11720 = vmatprep.mubr.bf16.mxu1 %v18663_v59  ;;  %v15456_v16 = vld [vmem:[#allocation16 + $0x8] ss:$12 sps:$4 sm:$0xff]  }
0x1497   :  { %11690 = vmatprep.subr.bf16.mxu1 %v18399_v40  ;;  %14555 = vmatprep.mubr.msk.bf16.mxu0 %vm16124_vm12, %v18664_v47  ;;  %v15458_v40 = vld [vmem:[#allocation16 + $0x38] ss:$12 sps:$4 sm:$0xff]  }
0x1498   :  { %14540 = vmatpush3.bf16.msra.mxu0 %v15456_v16 }
0x1499   :  { %14541 = vmatprep.subr.bf16.mxu0 %v18664_v47 }
0x149a   :  { %11691 = vmatpush1.bf16.msra.mxu1 %v18403_v60  ;;  %v15459_v60 = vld [vmem:[#allocation16 + $0x50] ss:$12 sps:$4 sm:$0xff]  }
0x149b   :  { %11692 = vmatprep.subr.bf16.mxu1 %v18407_v17  ;;  %v15460_v17 = vld [vmem:[#allocation16 + $0x68] ss:$12 sps:$4 sm:$0xff]  }
0x149c   :  { %14542 = vmatpush3.bf16.msra.mxu0 %v15457_v1  ;;  %v11209_v1 = vrot.slane %v11204_v32, %v16447_v19 }
0x149d   :  { %14543 = vmatprep.subr.bf16.mxu0 %v18664_v47 }
0x149e   :  { %11693 = vmatpush1.bf16.msra.mxu1 %v18410_v62  ;;  %v15461_v62 = vld [vmem:[#allocation16 + $0x80] ss:$12 sps:$4 sm:$0xff]  }
0x149f   :  { %11694 = vmatprep.subr.bf16.mxu1 %v18416_v22  ;;  %v15462_v22 = vld [vmem:[#allocation16 + $0x98] ss:$12 sps:$4 sm:$0xff]  }
0x14a0   :  { %14544 = vmatpush3.bf16.msra.mxu0 %v15458_v40  ;;  %v10905_v40 = vld [vmem:[#allocation3 + $0xa0] sm:$0x30] }
0x14a1   :  { %14545 = vmatprep.subr.bf16.mxu0 %v18664_v47 }
0x14a2   :  { %11695 = vmatpush1.bf16.msra.mxu1 %v18418_v42  ;;  %v15463_v42 = vld [vmem:[#allocation16 + $0xb0] ss:$12 sps:$4 sm:$0xff]  }
0x14a3   :  { %11696 = vmatprep.subr.bf16.mxu1 %v18422_v15  ;;  %v10942_v15 = vld [vmem:[#allocation18] ss:$2 sm:$0x7] }
0x14a4   :  { %14546 = vmatpush3.bf16.msra.mxu0 %v15459_v60  ;;  %v10955_v52 = vrot.slane %v10942_v15, %v16455_v23  ;;  %v11213_v60 = vrot.slane %v11204_v32, %v16450_v20 }
0x14a5   :  { %14547 = vmatprep.subr.bf16.mxu0 %v18664_v47 }
0x14a6   :  { %11697 = vmatpush1.bf16.msra.mxu1 %v18425_v39  ;;  %v10947_v39 = vrot.slane %v10942_v15, %v16447_v19 }
0x14a7   :  { %11698 = vmatprep.subr.bf16.mxu1 %v18429_v37  ;;  %v10951_v37 = vrot.slane %v10942_v15, %v16450_v20 }
0x14a8   :  { %14548 = vmatpush3.bf16.msra.mxu0 %v15460_v17 }
0x14a9   :  { %14549 = vmatprep.subr.bf16.mxu0 %v18664_v47 }
0x14aa   :  { %11699 = vmatpush1.bf16.msra.mxu1 %v18432_v33 }
0x14ab   :  { %11700 = vmatprep.subr.bf16.mxu1 %v18436_v43 }
0x14ac   :  { %14550 = vmatpush3.bf16.msra.mxu0 %v15461_v62 }
0x14ad   :  { %14551 = vmatprep.subr.bf16.mxu0 %v18664_v47 }
0x14ae   :  { %11701 = vmatpush1.bf16.msra.mxu1 %v18439_v13 }
0x14af   :  { %11702 = vmatprep.subr.bf16.mxu1 %v18443_v61 }
0x14b0   :  { %14552 = vmatpush3.bf16.msra.mxu0 %v15462_v22 }
0x14b1   :  { %14553 = vmatprep.subr.bf16.mxu0 %v18664_v47 }
0x14b2   :  { %11703 = vmatpush1.bf16.msra.mxu1 %v18446_v45 }
0x14b3   :  { %11950 = vmatprep.subr.bf16.mxu1 %v18451_v51 }
0x14b4   :  { %14554 = vmatpush3.bf16.msra.mxu0 %v15463_v42 }
0x14b5   :  { %14559 = vmatprep.subr.bf16.mxu0 %v18664_v47 }
0x1544   :  { %v11124_v33 = vpop.f32.mrb[168].mxu1  ;;  %v11165_v43 = vpop.f32.mrb[176].mxu0 }
0x1545   :  { %v11125_v13 = vadd.f32 %v11124_v33, %v10947_v39  ;;  %v11126_v61 = vpop.f32.mrb[169].mxu1  ;;  %v14517_v45 = vpop.f32.mrb[177].mxu0  ;;  %v11166_v2 = vadd.f32 %v11165_v43, %v10955_v52 }
0x1546   :  { %v11127_v51 = vadd.f32 %v11126_v61, %v10951_v37  ;;  %v11128_v6 = vpop.f32.mrb[170].mxu1  ;;  %v11168_v12 = vpop.f32.mrb[178].mxu0 }
0x1547   :  { %v11434_v5 = vrot.slane %v11125_v13, 4  ;;  %v11129_v21 = vpop.f32.mrb[171].mxu1  ;;  %v14518_v31 = vpop.f32.mrb[179].mxu0  ;;  %v11454_v49 = vrot.slane %v11166_v2, 4  ;;  %v15465_v2 = vld [vmem:[#allocation16 + $0xe0] ss:$12 sps:$4 sm:$0xff]  }
0x1548   :  { %v11444_v0 = vrot.slane %v11127_v51, 4  ;;  %v10906_v51 = vld [vmem:[#allocation3 + $0x18] sm:$0xc] }
0x1549   :  { %v11436_v55 = vadd.f32 %v11434_v5, %v10903_v27  ;;  %v10907_v5 = vld [vmem:[#allocation3 + $0x20] sm:$0xc] }
0x154a   :  { %v11446_v34 = vadd.f32 %v11444_v0, %v10904_v25 }
0x154b   :  { %v13384_v57 = vmul.f32 -1.442695, %v11436_v55 }
0x154c   :  { %v13385_v9 = vmul.f32 -1.442695, %v11446_v34 }
0x154d   :  { %15808 = vpow2.f32 %v13384_v57 }
0x154e   :  { %15810 = vpow2.f32 %v13385_v9  ;;  %v15464_v9 = vld [vmem:[#allocation16 + $0xc8] ss:$12 sps:$4 sm:$0xff]  }
0x1557   :  { %v15809_v54 = vpop.eup %15808 }
0x1558   :  { %v15811_v18 = vpop.eup %15810  ;;  %v11440_v10 = vadd.f32 1.0, %v15809_v54 }
0x1559   :  { %v11450_v38 = vadd.f32 1.0, %v15811_v18 }
0x155a   :  { %15812 = vrcp.f32 %v11440_v10 }
0x155b   :  { %15814 = vrcp.f32 %v11450_v38 }
0x1564   :  { %v15813_v46 = vpop.eup %15812 }
0x1565   :  { %v15815_v36 = vpop.eup %15814  ;;  %v11456_v16 = vmul.f32 %v15813_v46, %v11454_v49  ;;  %v11217_v49 = vrot.slane %v11204_v32, %v16455_v23  ;;  %v15466_v46 = vld [vmem:[#allocation16 + $0xf8] ss:$12 sps:$4 sm:$0xff]  }
0x1566   :  { %v11464_v17 = vmul.f32 %v15815_v36, %v11462_v30  ;;  %v11459_v0 = vsub.f32 1.0, %v15815_v36  ;;  %v11495_v30 = vrot.slane %v18527_v26, 2 }
0x1567   :  { %v11457_v62 = vadd.f32 %v11456_v16, %v10905_v40  ;;  %v15468_v16 = vld [vmem:[#allocation16 + $0x128] ss:$12 sps:$4 sm:$0xff]  }
0x1568   :  { %v11386_v22 = vpop.f32.mrb[172].mxu1  ;;  %v11427_v42 = vpop.f32.mrb[180].mxu0 }
0x1569   :  { %15816 = vtanh.f32 %v11457_v62  ;;  %v11387_v15 = vadd.f32 %v11386_v22, %v11209_v1  ;;  %v11388_v39 = vpop.f32.mrb[173].mxu1  ;;  %v14537_v37 = vpop.f32.mrb[181].mxu0  ;;  %v15478_v62 = vld [vmem:[#allocation19 + $0xb0] sm:$0xff]   ;;  %v15479_v22 = vld [vmem:[#allocation19 + $0xb8] sm:$0xff]  }
0x156a   :  { %v11389_v33 = vadd.f32 %v11388_v39, %v11213_v60  ;;  %v11390_v43 = vpop.f32.mrb[174].mxu1  ;;  %v11430_v13 = vpop.f32.mrb[182].mxu0  ;;  %v15473_v60 = vld [vmem:[#allocation19 + $0x88] sm:$0xff]   ;;  %v15484_v37 = vld [vmem:[#allocation19 + $0x50] sm:$0xff]  }
0x156b   :  { %v11467_v61 = vrot.slane %v11387_v15, 6  ;;  %v11391_v35 = vpop.f32.mrb[175].mxu1  ;;  %v14538_v45 = vpop.f32.mrb[183].mxu0  ;;  %v15482_v15 = vld [vmem:[#allocation19 + $0x48] sm:$0xff]   ;;  %v15486_v43 = vld [vmem:[#allocation19 + $0x58] sm:$0xff]  }
0x156c   :  { %v11477_v6 = vrot.slane %v11389_v33, 6  ;;  %v15483_v39 = vld [vmem:[#allocation19 + $0x8] sm:$0xff]   ;;  %v15485_v33 = vld [vmem:[#allocation19 + $0x10] sm:$0xff]   ;;  %v15487_v13 = vld [vmem:[#allocation19 + $0x18] sm:$0xff]  }
0x156d   :  { %v11469_v12 = vadd.f32 %v11467_v61, %v10906_v51  ;;  %v15488_v61 = vld [vmem:[#allocation19 + $0x60] sm:$0xff]   ;;  %v15491_v45 = vld [vmem:[#allocation19 + $0x28] sm:$0xff]   ;;  %v15492_v51 = vld [vmem:[#allocation19 + $0x70] sm:$0xff]  }
0x156e   :  { %v11479_v21 = vadd.f32 %v11477_v6, %v10907_v5  ;;  %v15489_v35 = vld [vmem:[#allocation19 + $0x20] sm:$0xff]   ;;  %v15493_v6 = vld [vmem:[#allocation19 + $0x30] sm:$0xff]   ;;  %v15495_v5 = vld [vmem:[#allocation19 + $0x38] sm:$0xff]  }
0x156f   :  { %v13386_v31 = vmul.f32 -1.442695, %v11469_v12  ;;  %v15494_v12 = vld [vmem:[#allocation19 + $0x78] sm:$0xff]  }
0x1570   :  { %v13387_v27 = vmul.f32 -1.442695, %v11479_v21  ;;  %v11540_v21 = vld [vmem:[#allocation18] ss:$2 sm:$0x7] }
0x1571   :  { %15818 = vpow2.f32 %v13386_v31  ;;  %v11545_v31 = vrot.slane %v11540_v21, %v16447_v19 }
0x1572   :  { %15820 = vpow2.f32 %v13387_v27  ;;  %v11549_v27 = vrot.slane %v11540_v21, %v16450_v20 }
0x1573   :  { %v15817_v55 = vpop.eup %15816 }
0x1574   :  { %v11460_v25 = vmul.f32 %v15817_v55, %v11459_v0 }
0x1576   :  { %v18567_v34 = vadd.f32 %v11464_v17, %v11460_v25  ;;  %v15477_v17 = vld [vmem:[#allocation19 + $0xa8] sm:$0xff]  }
0x1578   :  { %11499 = vst [vmem:[#allocation4 + $0x30] sm:$0x30] %v18567_v34  ;;  %v11507_v57 = vpack.c.bf16 %v18567_v34, %v18567_v34 }
0x157a   :  { %v11558_v54 = vrot.slane %v11507_v57, 2 }
0x157b   :  { %v15819_v18 = vpop.eup %15818 }
0x157c   :  { %v15821_v10 = vpop.eup %15820  ;;  %v11473_v38 = vadd.f32 1.0, %v15819_v18  ;;  %11721 = vmatmul.mubr.bf16.vlgmr.msra.gmra.mrb[176].mxu1 %v11558_v54  ;;  %14556 = vmatmul.mubr.bf16.vlgmr.msra.gmra.mrb[184].mxu0 %v11558_v54 }
0x157d   :  { %v11483_v52 = vadd.f32 1.0, %v15821_v10  ;;  %14560 = vmatpush3.bf16.msra.mxu0 %v15464_v9  ;;  %11951 = vmatpush1.bf16.msra.mxu1 %v18469_v48  ;;  %v11428_v48 = vadd.f32 %v11427_v42, %v11217_v49  ;;  %v15481_v42 = vld [vmem:[#allocation19] sm:$0xff]  }
0x157e   :  { %15822 = vrcp.f32 %v11473_v38  ;;  %14561 = vmatprep.subr.bf16.mxu0 %v18664_v47  ;;  %11952 = vmatprep.subr.bf16.mxu1 %v18471_v8  ;;  %v15467_v8 = vld [vmem:[#allocation16 + $0x110] ss:$12 sps:$4 sm:$0xff]   ;;  %v11501_v49 = vld [vmem:[#allocation3 + $0x90] sm:$0xc0] }
0x157f   :  { %15824 = vrcp.f32 %v11483_v52  ;;  %11982 = vmatprep.mubr.bf16.mxu1 %v18663_v59  ;;  %14575 = vmatprep.mubr.msk.bf16.mxu0 %vm16124_vm12, %v18664_v47  ;;  %v11487_v59 = vrot.slane %v11428_v48, 6 }
0x1581   :  { %14562 = vmatpush3.bf16.msra.mxu0 %v15465_v2  ;;  %11953 = vmatpush1.bf16.msra.mxu1 %v18474_v29 }
0x1582   :  { %14563 = vmatprep.subr.bf16.mxu0 %v18664_v47  ;;  %11954 = vmatprep.subr.bf16.mxu1 %v18478_v3  ;;  %v10908_v3 = vld [vmem:[#allocation3 + $0x28] sm:$0xc] }
0x1585   :  { %14564 = vmatpush3.bf16.msra.mxu0 %v15466_v46  ;;  %11955 = vmatpush1.bf16.msra.mxu1 %v18486_v24 }
0x1586   :  { %14565 = vmatprep.subr.bf16.mxu0 %v18664_v47  ;;  %11956 = vmatprep.subr.bf16.mxu1 %v18490_v63  ;;  %v15469_v63 = vld [vmem:[#allocation16 + $0x140] ss:$12 sps:$4 sm:$0xff]  }
0x1588   :  { %v15823_v32 = vpop.eup %15822 }
0x1589   :  { %v15825_v36 = vpop.eup %15824  ;;  %v11489_v29 = vmul.f32 %v15823_v32, %v11487_v59  ;;  %14566 = vmatpush3.bf16.msra.mxu0 %v15467_v8  ;;  %11957 = vmatpush1.bf16.msra.mxu1 %v18493_v7  ;;  %v15470_v7 = vld [vmem:[#allocation16 + $0x158] ss:$12 sps:$4 sm:$0xff]   ;;  %v11502_v8 = vld [vmem:[#allocation3 + $0x98] sm:$0xc0] }
0x158a   :  { %14567 = vmatprep.subr.bf16.mxu0 %v18664_v47  ;;  %11958 = vmatprep.subr.bf16.mxu1 %v18497_v50  ;;  %v11497_v24 = vmul.f32 %v15825_v36, %v11495_v30  ;;  %v15471_v50 = vld [vmem:[#allocation16 + $0x170] ss:$12 sps:$4 sm:$0xff]   ;;  %v11492_v26 = vsub.f32 1.0, %v15825_v36 }
0x158b   :  { %v11490_v1 = vadd.f32 %v11489_v29, %v10908_v3 }
0x158d   :  { %15826 = vtanh.f32 %v11490_v1  ;;  %14568 = vmatpush3.bf16.msra.mxu0 %v15468_v16  ;;  %11959 = vmatpush1.bf16.msra.mxu1 %v18501_v14  ;;  %v15472_v14 = vld [vmem:[#allocation19 + $0x80] sm:$0xff]  }
0x158e   :  { %14569 = vmatprep.subr.bf16.mxu0 %v18664_v47  ;;  %11960 = vmatprep.subr.bf16.mxu1 %v18505_v44 }
0x1591   :  { %14570 = vmatpush3.bf16.msra.mxu0 %v15469_v63  ;;  %11961 = vmatpush1.bf16.msra.mxu1 %v18508_v4  ;;  %v11802_v63 = vld [vmem:[#allocation18 + $0x1] ss:$2 sm:$0x7] }
0x1592   :  { %14571 = vmatprep.subr.bf16.mxu0 %v18664_v47  ;;  %11962 = vmatprep.subr.bf16.mxu1 %v18512_v53 }
0x1595   :  { %14572 = vmatpush3.bf16.msra.mxu0 %v15470_v7  ;;  %11963 = vmatpush1.bf16.msra.mxu1 %v18515_v28 }
0x1596   :  { %14573 = vmatprep.subr.bf16.mxu0 %v18664_v47  ;;  %11964 = vmatprep.subr.bf16.mxu1 %v18519_v11  ;;  %v15474_v47 = vld [vmem:[#allocation19 + $0x90] sm:$0xff]   ;;  %v15475_v11 = vld [vmem:[#allocation19 + $0x98] sm:$0xff]  }
0x1597   :  { %v15827_v40 = vpop.eup %15826 }
0x1598   :  { %v11493_v44 = vmul.f32 %v15827_v40, %v11492_v26 }
0x1599   :  { %14574 = vmatpush3.bf16.msra.mxu0 %v15471_v50  ;;  %11965 = vmatpush1.bf16.msra.mxu1 %v18522_v56  ;;  %v15476_v56 = vld [vmem:[#allocation19 + $0xa0] sm:$0xff]  }
0x159a   :  { %14579 = vmatprep.subr.bf16.mxu0 %v15472_v14  ;;  %v18599_v4 = vadd.f32 %v11497_v24, %v11493_v44  ;;  %v11553_v24 = vrot.slane %v11540_v21, %v16455_v23  ;;  %v11807_v44 = vrot.slane %v11802_v63, %v16447_v19  ;;  %v11815_v21 = vrot.slane %v11802_v63, %v16455_v23  ;;  %v12092_v23 = vld [vmem:[#allocation4 + $0x10] sm:$0xff] }
0x159c   :  { %11500 = vst [vmem:[#allocation4 + $0x8] sm:$0xc] %v18599_v4  ;;  %v11769_v53 = vpack.c.bf16 %v18599_v4, %v18599_v4 }
0x159e   :  { %v11820_v28 = vrot.slane %v11769_v53, 1  ;;  %v11503_v53 = vld [vmem:[#allocation3 + $0xa0] sm:$0xc0] }
0x15a0   :  { %11983 = vmatmul.mubr.bf16.vlgmr.msra.gmra.mrb[180].mxu1 %v11820_v28  ;;  %14576 = vmatmul.mubr.bf16.vlgmr.msra.gmra.mrb[188].mxu0 %v11820_v28 }
0x15a1   :  { %14580 = vmatpush3.bf16.msra.mxu0 %v15472_v14  ;;  %14595 = vmatprep.mubr.bf16.mxu0 %v16898_v58  ;;  %v15480_v58 = vld [vmem:[#allocation19 + $0x40] sm:$0xff]   ;;  %v12060_v14 = vrot.slane %v18567_v34, 6 }
0x15a2   :  { %14581 = vmatprep.subr.bf16.mxu0 %v15473_v60  ;;  %13901 = vmatprep.subr.bf16.mxu1 %v15480_v58  ;;  %v11504_v58 = vld [vmem:[#allocation3 + $0x18] sm:$0x3] }
0x15a3   :  { %13902 = vmatpush3.bf16.msra.mxu1 %v15481_v42 }
0x15a4   :  { %13903 = vmatprep.subr.bf16.mxu1 %v15482_v15 }
0x15a5   :  { %14582 = vmatpush3.bf16.msra.mxu0 %v15473_v60  ;;  %v11811_v60 = vrot.slane %v11802_v63, %v16450_v20 }
0x15a6   :  { %14583 = vmatprep.subr.bf16.mxu0 %v15474_v47 }
0x15a7   :  { %13904 = vmatpush3.bf16.msra.mxu1 %v15483_v39 }
0x15a8   :  { %13905 = vmatprep.subr.bf16.mxu1 %v15484_v37  ;;  %v11505_v37 = vld [vmem:[#allocation3 + $0x20] sm:$0x3] }
0x15a9   :  { %14584 = vmatpush3.bf16.msra.mxu0 %v15474_v47 }
0x15aa   :  { %14585 = vmatprep.subr.bf16.mxu0 %v15475_v11 }
0x15ab   :  { %13906 = vmatpush3.bf16.msra.mxu1 %v15485_v33 }
0x15ac   :  { %13907 = vmatprep.subr.bf16.mxu1 %v15486_v43 }
0x15ad   :  { %14586 = vmatpush3.bf16.msra.mxu0 %v15475_v11 }
0x15ae   :  { %14587 = vmatprep.subr.bf16.mxu0 %v15476_v56 }
0x15af   :  { %13908 = vmatpush3.bf16.msra.mxu1 %v15487_v13 }
0x15b0   :  { %13909 = vmatprep.subr.bf16.mxu1 %v15488_v61 }
0x15b1   :  { %14588 = vmatpush3.bf16.msra.mxu0 %v15476_v56 }
0x15b2   :  { %14589 = vmatprep.subr.bf16.mxu0 %v15477_v17 }
0x15b3   :  { %13910 = vmatpush3.bf16.msra.mxu1 %v15489_v35 }
0x15b5   :  { %14590 = vmatpush3.bf16.msra.mxu0 %v15477_v17 }
0x15b6   :  { %14591 = vmatprep.subr.bf16.mxu0 %v15478_v62 }
0x15b9   :  { %14592 = vmatpush3.bf16.msra.mxu0 %v15478_v62 }
0x15ba   :  { %14593 = vmatprep.subr.bf16.mxu0 %v15479_v22 }
0x15bd   :  { %14594 = vmatpush3.bf16.msra.mxu0 %v15479_v22 }
0x15c0   :  { %14596 = vmatmul.mubr.bf16.vlgmr.msra.gmra.mrb[192].mxu0 %v16918_v41  ;;  %v15490_v41 = vld [vmem:[#allocation19 + $0x68] sm:$0xff]  }
0x15c1   :  { %13911 = vmatprep.subr.bf16.mxu1 %v15490_v41 }
0x15c2   :  { %13912 = vmatpush3.bf16.msra.mxu1 %v15491_v45 }
0x15c3   :  { %13913 = vmatprep.subr.bf16.mxu1 %v15492_v51 }
0x15c6   :  { %13914 = vmatpush3.bf16.msra.mxu1 %v15493_v6 }
0x15c7   :  { %13915 = vmatprep.subr.bf16.mxu1 %v15494_v12 }
0x15ca   :  { %13916 = vmatpush3.bf16.msra.mxu1 %v15495_v5 }
0x164f   :  { %v11722_v0 = vpop.f32.mrb[176].mxu1  ;;  %v11763_v55 = vpop.f32.mrb[184].mxu0 }
0x1650   :  { %v11723_v25 = vadd.f32 %v11722_v0, %v11545_v31  ;;  %v11724_v57 = vpop.f32.mrb[177].mxu1  ;;  %v14557_v9 = vpop.f32.mrb[185].mxu0  ;;  %v11764_v1 = vadd.f32 %v11763_v55, %v11553_v24  ;;  %v12084_v0 = vrot.slane %v18599_v4, 2  ;;  %v12094_v24 = vld [vmem:[#allocation4 + $0x20] sm:$0xff] }
0x1651   :  { %v11725_v54 = vadd.f32 %v11724_v57, %v11549_v27  ;;  %v11726_v18 = vpop.f32.mrb[178].mxu1  ;;  %v11766_v10 = vpop.f32.mrb[186].mxu0  ;;  %v11506_v57 = vld [vmem:[#allocation3 + $0x28] sm:$0x3] }
0x1652   :  { %v12032_v38 = vrot.slane %v11723_v25, 2  ;;  %v11727_v52 = vpop.f32.mrb[179].mxu1  ;;  %v14558_v2 = vpop.f32.mrb[187].mxu0  ;;  %v12052_v7 = vrot.slane %v11764_v1, 2 }
0x1653   :  { %v12042_v46 = vrot.slane %v11725_v54, 2 }
0x1654   :  { %v12034_v48 = vadd.f32 %v12032_v38, %v11501_v49 }
0x1655   :  { %v12044_v59 = vadd.f32 %v12042_v46, %v11502_v8 }
0x1656   :  { %v13436_v32 = vmul.f32 -1.442695, %v12034_v48 }
0x1657   :  { %v13437_v30 = vmul.f32 -1.442695, %v12044_v59  ;;  %v12093_v59 = vld [vmem:[#allocation4 + $0x18] sm:$0xff] }
0x1658   :  { %15828 = vpow2.f32 %v13436_v32  ;;  %v12095_v32 = vld [vmem:[#allocation4 + $0x28] sm:$0xff] }
0x1659   :  { %15830 = vpow2.f32 %v13437_v30  ;;  %v12090_v30 = vld [vmem:[#allocation4] sm:$0xff] }
0x1662   :  { %v15829_v36 = vpop.eup %15828 }
0x1663   :  { %v15831_v29 = vpop.eup %15830  ;;  %v12038_v16 = vadd.f32 1.0, %v15829_v36  ;;  %v12098_v36 = vpack.c.bf16 %v12092_v23, %v12090_v30 }
0x1664   :  { %v12048_v3 = vadd.f32 1.0, %v15831_v29  ;;  %v12097_v29 = vld [vmem:[#allocation4 + $0x38] sm:$0xff] }
0x1665   :  { %15832 = vrcp.f32 %v12038_v16  ;;  %v12101_v16 = vpack.c.bf16 %v12097_v29, %v12095_v32 }
0x1666   :  { %15834 = vrcp.f32 %v12048_v3 }
0x166f   :  { %v15833_v50 = vpop.eup %15832 }
0x1670   :  { %v15835_v26 = vpop.eup %15834  ;;  %v12054_v40 = vmul.f32 %v15833_v50, %v12052_v7  ;;  %v13440_v7 = vld [vmem:[#allocation21] ss:$0 sm:$0xff] }
0x1671   :  { %v12062_v28 = vmul.f32 %v15835_v26, %v12060_v14  ;;  %v12057_v20 = vsub.f32 1.0, %v15835_v26 }
0x1672   :  { %v12055_v47 = vadd.f32 %v12054_v40, %v11503_v53 }
0x1673   :  { %v11984_v11 = vpop.f32.mrb[180].mxu1  ;;  %v12025_v56 = vpop.f32.mrb[188].mxu0 }
0x1674   :  { %15836 = vtanh.f32 %v12055_v47  ;;  %v11985_v17 = vadd.f32 %v11984_v11, %v11807_v44  ;;  %v11986_v62 = vpop.f32.mrb[181].mxu1  ;;  %v14577_v22 = vpop.f32.mrb[189].mxu0  ;;  %v12026_v31 = vadd.f32 %v12025_v56, %v11815_v21 }
0x1675   :  { %v11987_v42 = vadd.f32 %v11986_v62, %v11811_v60  ;;  %v11988_v15 = vpop.f32.mrb[182].mxu1  ;;  %v12028_v39 = vpop.f32.mrb[190].mxu0 }
0x1676   :  { %v12064_v34 = vadd.f32 %v11985_v17, %v11504_v58  ;;  %v11989_v33 = vpop.f32.mrb[183].mxu1  ;;  %v14578_v43 = vpop.f32.mrb[191].mxu0 }
0x1677   :  { %v12071_v19 = vadd.f32 %v11987_v42, %v11505_v37 }
0x1678   :  { %v13438_v13 = vmul.f32 -1.442695, %v12064_v34 }
0x1679   :  { %v13439_v61 = vmul.f32 -1.442695, %v12071_v19 }
0x167a   :  { %15838 = vpow2.f32 %v13438_v13 }
0x167b   :  { %15840 = vpow2.f32 %v13439_v61 }
0x167e   :  { %v15837_v35 = vpop.eup %15836 }
0x167f   :  { %v12058_v41 = vmul.f32 %v15837_v35, %v12057_v20 }
0x1681   :  { %v12063_v45 = vadd.f32 %v12062_v28, %v12058_v41 }
0x1683   :  { %12088 = vst [vmem:[#allocation4 + $0x30] sm:$0xc0] %v12063_v45 }
0x1684   :  { %v15839_v51 = vpop.eup %15838 }
0x1685   :  { %v15841_v6 = vpop.eup %15840  ;;  %v12068_v12 = vadd.f32 1.0, %v15839_v51 }
0x1686   :  { %v12075_v5 = vadd.f32 1.0, %v15841_v6 }
0x1687   :  { %15842 = vrcp.f32 %v12068_v12 }
0x1688   :  { %15844 = vrcp.f32 %v12075_v5 }
0x168a   :  { %v12096_v3 = vld [vmem:[#allocation4 + $0x30] sm:$0xff] }
0x168b   :  { %v12100_v1 = vpack.c.bf16 %v12096_v3, %v12094_v24 }
0x1691   :  { %v15843_v27 = vpop.eup %15842 }
0x1692   :  { %v15845_v55 = vpop.eup %15844  ;;  %v12078_v25 = vmul.f32 %v15843_v27, %v12026_v31 }
0x1693   :  { %v12086_v9 = vmul.f32 %v15845_v55, %v12084_v0  ;;  %v14597_v54 = vpop.f32.mrb[192].mxu0  ;;  %v12081_v2 = vsub.f32 1.0, %v15845_v55 }
0x1694   :  { %v12079_v18 = vadd.f32 %v12078_v25, %v11506_v57  ;;  %v12384_v10 = vpop.f32.mrb[193].mxu0 }
0x1695   :  { %v14598_v38 = vpop.f32.mrb[194].mxu0 }
0x1696   :  { %15846 = vtanh.f32 %v12079_v18  ;;  %v12387_v52 = vpop.f32.mrb[195].mxu0 }
0x16a0   :  { %v15847_v49 = vpop.eup %15846 }
0x16a1   :  { %v12082_v46 = vmul.f32 %v15847_v49, %v12081_v2 }
0x16a3   :  { %v12087_v48 = vadd.f32 %v12086_v9, %v12082_v46 }
0x16a5   :  { %12089 = vst [vmem:[#allocation4 + $0x8] sm:$0x3] %v12087_v48 }
0x16ac   :  { %v12091_v8 = vld [vmem:[#allocation4 + $0x8] sm:$0xff] }
0x16ad   :  { %v12099_v4 = vpack.c.bf16 %v12093_v59, %v12091_v8 }
0x16af   :  { %12333 = vmatprep.mubr.bf16.mxu1 %v12099_v4 }
0x16b0   :  { %12334 = vmatmul.mubr.bf16.vlgmr.msra.gmra.mrb[184].mxu1 %v12098_v36 }
0x16b1   :  { %12341 = vmatprep.mubr.bf16.mxu1 %v12101_v16 }
0x16b8   :  { %12342 = vmatmul.mubr.bf16.gmra.mrb[188].mxu1 %v12100_v1 }
0x1783   :  { %v13917_v63 = vpop.f32.mrb[184].mxu1 }
0x1784   :  { %v13918_v50 = vpop.f32.mrb[185].mxu1 }
0x1785   :  { %v13919_v14 = vadd.f32 %v13918_v50, %v13917_v63  ;;  %v13920_v26 = vpop.f32.mrb[186].mxu1 }
0x1786   :  { %v13921_v40 = vpop.f32.mrb[187].mxu1 }
0x1787   :  { %v12336_v44 = vadd.f32 %v13919_v14, %v13440_v7  ;;  %v13922_v53 = vadd.f32 %v13921_v40, %v13920_v26 }
0x1789   :  { %v12385_v28 = vadd.f32 %v12384_v10, %v12336_v44  ;;  %v12339_v60 = vadd.f32 %v13922_v53, %v13440_v7 }
0x178b   :  { %12399 = vst [vmem:[%s18641_s15] sm:$0xff] %v12385_v28  ;;  %v12388_v47 = vadd.f32 %v12387_v52, %v12339_v60  ;;  %v13923_v11 = vpop.f32.mrb[188].mxu1 }
0x178c   :  { %v13924_v56 = vpop.f32.mrb[189].mxu1 }
0x178d   :  { %12400 = vst [vmem:[%s18641_s15 + $0x8] sm:$0xff] %v12388_v47  ;;  %v13925_v17 = vadd.f32 %v13924_v56, %v13923_v11  ;;  %v13926_v62 = vpop.f32.mrb[190].mxu1 }
0x178e   :  { %v13927_v22 = vpop.f32.mrb[191].mxu1 }
0x178f   :  { %v12344_v58 = vadd.f32 %v13925_v17, %v13440_v7  ;;  %v13928_v42 = vadd.f32 %v13927_v22, %v13926_v62 }
0x1791   :  { %v12393_v15 = vadd.f32 %v14597_v54, %v12344_v58  ;;  %v12347_v39 = vadd.f32 %v13928_v42, %v13440_v7 }
0x1793   :  { %12401 = vst [vmem:[%s18641_s15 + $0x10] sm:$0xff] %v12393_v15  ;;  %v12396_v34 = vadd.f32 %v14598_v38, %v12347_v39 }
0x1795   :  { %12402 = vst [vmem:[%s18641_s15 + $0x18] sm:$0xff] %v12396_v34 }
0x1796   :  { %12407 = vsyncpa [#allocation6], 1 }
0x1797   :  { %12408 = vsyncpa [#allocation8], 1 }
0x1798   :  { %12409 = vsyncpa [#allocation11], 1 }
0x1799   :  { %12410 = vsyncpa [#allocation14], 1 }
0x179a   :  { %12411 = vsyncpa [#allocation17], 1 }
0x179b   :  { %12412 = vsyncpa [#allocation20], 1 }

</bundles_post_ra>
